<compile_context>
chip_gen: v7x
topology: tpu7x:2x2x1
jax: 0.10.0
libtpu: 0.0.40
codegen_flags: <defaults>
</compile_context>

<pallas_src>
import math
import functools

import jax
import jax.numpy as jnp
from jax.experimental import pallas as pl
from jax.experimental.pallas import tpu as pltpu


# ----------------------------------------------------------------------------
# Kernel helpers
# ----------------------------------------------------------------------------
def _layernorm(v, g, b, eps=1e-5):
    mu = jnp.mean(v, axis=-1, keepdims=True)
    var = jnp.mean((v - mu) ** 2, axis=-1, keepdims=True)
    return (v - mu) * jax.lax.rsqrt(var + eps) * g + b


def _gelu_exact(x):
    # torch.nn.GELU() default (erf-based)
    return 0.5 * x * (1.0 + jax.lax.erf(x * (1.0 / math.sqrt(2.0))))


# dot_general dimension numbers (forms with native Mosaic support)
_NN = (((1,), (0,)), ((), ()))   # lhs @ rhs
_NT = (((1,), (1,)), ((), ()))   # lhs @ rhs.T
_TN = (((0,), (0,)), ((), ()))   # lhs.T @ rhs


def _bf(x):
    # bf16 MXU operands, f32 accumulation (per perf review).
    return x.astype(jnp.bfloat16)


def _dot(a, b, dims=_NN):
    return jax.lax.dot_general(a, b, dims, preferred_element_type=jnp.float32)


# ----------------------------------------------------------------------------
# Pallas kernel
# ----------------------------------------------------------------------------
def _self_attention_kernel(num_heads,
                           x_ref,      # (T, Cin, tile)   f32
                           win_ref,    # (Cin, C)         bf16
                           bias_ref,   # (8, C)           f32
                           a_ref,      # (C, H*C)         bf16
                           b_ref,      # (H*C, C)         bf16
                           sel_ref,    # (H*C, H*C)       bf16 block-diag ones
                           w1_ref,     # (C, C)           bf16
                           w2_ref,     # (C, C)           bf16
                           woutT_ref,  # (Cin, C)         bf16
                           bout_ref,   # (Cin, 1)         f32
                           o_ref):     # (T, Cin, tile)   f32
    T = x_ref.shape[0]
    tile = x_ref.shape[2]
    H = num_heads

    # Packed per-channel affine/bias vectors (all kept in f32).
    bias = bias_ref[...]
    bin_, g1, b1, bo = bias[0:1], bias[1:2], bias[2:3], bias[3:4]
    g2, b2, bf1, bf2 = bias[4:5], bias[5:6], bias[6:7], bias[7:8]

    # ---- to_input 1x1 conv: ONE dot over all T*tile tokens ------------------
    x_cat = jnp.concatenate([x_ref[t] for t in range(T)], axis=-1)  # (Cin, T*tile)
    e = _dot(_bf(x_cat), win_ref[...], _TN) + bin_                  # (T*tile, C)

    ns = _layernorm(e, g1, b1)                                      # (T*tile, C)

    # ---- L2 multi-head attention (softmax over the batch axis T) ------------
    # xa[:, h*C:(h+1)*C] = ns @ A_h   (this is also the value path's XA).
    xa = _dot(_bf(ns), a_ref[...])                                  # (T*tile, H*C)
    ns_rep = jnp.concatenate([ns] * H, axis=-1)                     # (T*tile, H*C)

    rows = lambda z, i: z[i * tile:(i + 1) * tile]
    xa_t = [rows(xa, t) for t in range(T)]
    nsr_t = [rows(ns_rep, t) for t in range(T)]

    # d[(t,s)][:, h*C + c] = q_t . q_s / sqrt(D)  (per token, head h, any c):
    # per-head rowsum of ns_t*xa_s, broadcast back over the head's C lanes with
    # ONE dot against the block-diagonal ones matrix.  Symmetric in (t,s) only
    # because A_h = Wq_h Wq_h^T / sqrt(D) is symmetric -- don't reuse this
    # shortcut if A ever stops being symmetric.
    pairs = [(t, s) for t in range(T) for s in range(t, T)]
    prod = jnp.concatenate([nsr_t[t] * xa_t[s] for (t, s) in pairs], axis=0)
    d_all = _dot(_bf(prod), sel_ref[...])                  # (npairs*tile, H*C)
    d = {}
    for idx, (t, s) in enumerate(pairs):
        blk = rows(d_all, idx)
        d[(t, s)] = blk
        d[(s, t)] = blk

    # logits_ts = -(d_tt + d_ss - 2 d_ts); the diagonal logit is exactly 0.
    if T == 2:
        # 2-way softmax == logistic of the off-diagonal logit (<= 0): one exp
        # plus one approx reciprocal per (token, head) lane-packed slab.
        l01 = 2.0 * d[(0, 1)] - d[(0, 0)] - d[(1, 1)]               # (tile, H*C)
        ew = jnp.exp(l01)                                           # in (0, ~1]
        w = ew * pl.reciprocal(1.0 + ew, approx=True)
        pxa = [xa_t[0] + w * (xa_t[1] - xa_t[0]),
               xa_t[1] + w * (xa_t[0] - xa_t[1])]
    else:
        pxa = []
        for t in range(T):
            logits = [2.0 * d[(t, s)] - d[(t, t)] - d[(s, s)] for s in range(T)]
            m = logits[0]
            for s in range(1, T):
                m = jnp.maximum(m, logits[s])
            exps = [jnp.exp(l - m) for l in logits]
            den, num = exps[0], exps[0] * xa_t[0]
            for s in range(1, T):
                den = den + exps[s]
                num = num + exps[s] * xa_t[s]
            pxa.append(num * pl.reciprocal(den, approx=True))

    # sum_h PXA_h @ (Wv_h Wo_h) as ONE (T*tile, H*C) x (H*C, C) dot.
    pxa_slab = jnp.concatenate(pxa, axis=0)                         # (T*tile, H*C)
    attn = _dot(_bf(pxa_slab), b_ref[...]) + bo                     # (T*tile, C)

    # ---- residual + LN2 + MLP (Linear/GELU/Linear) + residual ---------------
    out1 = attn + e
    n2 = _layernorm(out1, g2, b2)
    h1 = _gelu_exact(_dot(_bf(n2), w1_ref[...]) + bf1)
    out2 = _dot(_bf(h1), w2_ref[...]) + bf2
    y = out2 + out1                                                 # (T*tile, C)

    # ---- to_output 1x1 conv: ONE dot, channel-major lane-dense stores -------
    o_all = _dot(woutT_ref[...], _bf(y), _NT) + bout_ref[...]       # (Cin, T*tile)
    for t in range(T):
        o_ref[t] = o_all[:, t * tile:(t + 1) * tile]


# ----------------------------------------------------------------------------
# Wrapper (pallas_call + weight-only precompute; no activation transposes)
# ----------------------------------------------------------------------------
def _pick_tile_hw(HW):
    """One full-HW block on single-TensorCore chips (v5e/v6e); a 2-way
    'parallel' grid on v7x (2 TCs/chip), provided the half-tile stays
    lane-aligned."""
    kind = ""
    try:
        kind = jax.devices()[0].device_kind.lower()
    except Exception:
        pass
    if ("v7" in kind or "7x" in kind) and HW % 256 == 0:
        return HW // 2
    return HW


def self_attention_pallas(x_nchw, params, num_heads, tile_hw=None):
    N, Cin, Himg, Wimg = x_nchw.shape
    HW = Himg * Wimg
    if tile_hw is None:
        tile_hw = _pick_tile_hw(HW)
    assert HW % tile_hw == 0, "H*W must be divisible by the token tile"
    assert tile_hw == HW or tile_hw % 128 == 0, "token tile must be lane aligned"

    C = params['wq'].shape[0]
    H = num_heads
    D = C // H
    HC = H * C

    # channel-major tokens: free reshape of NCHW (no transpose), contiguous DMA
    x_cm = x_nchw.reshape(N, Cin, HW)

    # ---- weight-only precompute (once, outside the kernel/grid) -------------
    hi = jax.lax.Precision.HIGHEST
    wq3 = params['wq'].reshape(C, H, D)
    wv3 = params['wv'].reshape(C, H, D)
    wo3 = params['wo'].reshape(H, D, C)
    # A_h = Wq_h Wq_h^T / sqrt(D) (symmetric), heads concatenated along the
    # output axis -> a single (C, H*C) matrix for one lane-dense XA dot.
    a_heads = jnp.einsum('mhd,nhd->hmn', wq3, wq3, precision=hi) / math.sqrt(D)
    a_cat = jnp.transpose(a_heads, (1, 0, 2)).reshape(C, HC)
    # B_h = Wv_h @ Wo_h, heads stacked along the contraction axis -> (H*C, C).
    b_cat = jnp.einsum('mhd,hdn->hmn', wv3, wo3, precision=hi).reshape(HC, C)
    # Block-diagonal ones: per-head rowsum broadcast back to the head's lanes.
    head_id = jnp.arange(HC, dtype=jnp.int32) // C
    sel = (head_id[:, None] == head_id[None, :]).astype(jnp.bfloat16)

    biases = jnp.concatenate(
        [params['bin'], params['g1'], params['b1'], params['bo'],
         params['g2'], params['b2'], params['bf1'], params['bf2']],
        axis=0).astype(jnp.float32)                                  # (8, C)

    bf16 = jnp.bfloat16
    param_list = [
        params['win'].astype(bf16),                          # (Cin, C)
        biases,                                              # (8, C)   f32
        a_cat.astype(bf16),                                  # (C, H*C)
        b_cat.astype(bf16),                                  # (H*C, C)
        sel,                                                 # (H*C, H*C)
        params['w1'].astype(bf16),                           # (C, C)
        params['w2'].astype(bf16),                           # (C, C)
        params['wout'].T.astype(bf16),                       # (Cin, C)
        params['bout'].reshape(Cin, 1).astype(jnp.float32),  # (Cin, 1) f32
    ]

    def full_spec(a):
        nd = a.ndim
        return pl.BlockSpec(a.shape, lambda i, nd=nd: (0,) * nd)

    tok_spec = pl.BlockSpec((N, Cin, tile_hw), lambda i: (0, 0, i))

    kernel = functools.partial(_self_attention_kernel, num_heads)

    out_cm = pl.pallas_call(
        kernel,
        out_shape=jax.ShapeDtypeStruct((N, Cin, HW), jnp.float32),
        grid=(HW // tile_hw,),
        in_specs=[tok_spec] + [full_spec(a) for a in param_list],
        out_specs=tok_spec,
        compiler_params=pltpu.CompilerParams(
            dimension_semantics=("parallel",)),
    )(x_cm, *param_list)

    return out_cm.reshape(N, Cin, Himg, Wimg)


# ----------------------------------------------------------------------------
# Deterministic parameter initialization (synthetic; module __init__ shapes)
# ----------------------------------------------------------------------------
def init_params(key, in_channels, embed_dim, num_heads):
    assert embed_dim % num_heads == 0
    C = embed_dim
    ks = jax.random.split(key, 16)

    def rnd(k, shape, scale):
        return scale * jax.random.normal(k, shape, dtype=jnp.float32)

    # All weight matrices are stored (in_features, out_features), i.e. already
    # transposed w.r.t. torch Linear / squeezed 1x1 conv weights.
    return {
        'win':  rnd(ks[0], (in_channels, C), 0.3),   # to_input 1x1 conv
        'bin':  rnd(ks[1], (1, C), 0.1),
        'g1':   1.0 + rnd(ks[2], (1, C), 0.05),      # ln1 gamma
        'b1':   rnd(ks[3], (1, C), 0.05),            # ln1 beta
        'wq':   rnd(ks[4], (C, C), 0.2),             # q_weight (C, heads*head_dim)
        'wv':   rnd(ks[5], (C, C), 0.2),             # v_weight (C, heads*head_dim)
        'wo':   rnd(ks[6], (C, C), 0.2),             # out_proj weight^T
        'bo':   rnd(ks[7], (1, C), 0.1),             # out_proj bias
        'g2':   1.0 + rnd(ks[8], (1, C), 0.05),      # ln2 gamma
        'b2':   rnd(ks[9], (1, C), 0.05),            # ln2 beta
        'w1':   rnd(ks[10], (C, C), 0.2),            # ff linear 1
        'bf1':  rnd(ks[11], (1, C), 0.1),
        'w2':   rnd(ks[12], (C, C), 0.2),            # ff linear 2
        'bf2':  rnd(ks[13], (1, C), 0.1),
        'wout': rnd(ks[14], (C, in_channels), 0.2),  # to_output 1x1 conv
        'bout': rnd(ks[15], (1, in_channels), 0.1),
    }


# ----------------------------------------------------------------------------
# Pure-JAX reference (mirrors the PyTorch forward einsum-for-einsum, f32)
# ----------------------------------------------------------------------------
def self_attention_ref(x_nchw, params, num_heads):
    with jax.default_matmul_precision("float32"):
        N, Cin, Himg, Wimg = x_nchw.shape
        HW = Himg * Wimg
        C = params['wq'].shape[0]
        D = C // num_heads
        x_tok = jnp.transpose(x_nchw, (0, 2, 3, 1)).reshape(N, HW, Cin)
        e = x_tok @ params['win'] + params['bin']      # to_input conv (1x1)

        def ln(v, g, b, eps=1e-5):
            mu = jnp.mean(v, -1, keepdims=True)
            var = jnp.mean((v - mu) ** 2, -1, keepdims=True)
            return (v - mu) * jax.lax.rsqrt(var + eps) * g + b

        ns = ln(e, params['g1'], params['b1'])

        # L2 multihead attention; T = batch, B = tokens (as in the PyTorch code)
        wq = params['wq'].reshape(C, num_heads, D)
        wv = params['wv'].reshape(C, num_heads, D)
        q = jnp.einsum('tbm,mhd->tbhd', ns, wq)
        k = q
        sqdist = (jnp.einsum('tbhd,tbhd->tbh', q, q)[:, None]
                  + jnp.einsum('sbhd,sbhd->sbh', k, k)[None, :]
                  - 2.0 * jnp.einsum('tbhd,sbhd->tsbh', q, k))
        attn = jax.nn.softmax(-sqdist / math.sqrt(D), axis=1)
        A = jnp.einsum('mhd,nhd->hmn', wq, wq) / math.sqrt(D)
        XA = jnp.einsum('tbm,hmn->tbhn', ns, A)
        PXA = jnp.einsum('tsbh,sbhm->tbhm', attn, XA)
        PXAV = jnp.einsum('tbhm,mhd->tbhd', PXA, wv).reshape(N, HW, C)
        attn_out = PXAV @ params['wo'] + params['bo']

        out1 = attn_out + e
        n2 = ln(out1, params['g2'], params['b2'])
        h1 = n2 @ params['w1'] + params['bf1']
        h1 = 0.5 * h1 * (1.0 + jax.lax.erf(h1 / math.sqrt(2.0)))
        out2 = h1 @ params['w2'] + params['bf2']
        y = out2 + out1
        out_tok = y @ params['wout'] + params['bout']  # to_output conv (1x1)
        return jnp.transpose(out_tok.reshape(N, Himg, Wimg, Cin), (0, 3, 1, 2))


# ----------------------------------------------------------------------------
if __name__ == "__main__":
    key = jax.random.PRNGKey(0)
    kx, kp = jax.random.split(key)

    # SelfAttention(in_channels=4, embed_dim=32, num_heads=4) -> use_conv=True
    N, Cin, Himg, Wimg = 2, 4, 16, 16
    embed_dim, num_heads = 32, 4

    x = jax.random.normal(kx, (N, Cin, Himg, Wimg), dtype=jnp.float32)
    params = init_params(kp, Cin, embed_dim, num_heads)

    out = self_attention_pallas(x, params, num_heads)
    out = jax.block_until_ready(out)

    ref = self_attention_ref(x, params, num_heads)
    assert out.shape == x.shape, (out.shape, x.shape)

    # Tolerances reflect bf16 MXU operands (per the perf review) vs. an f32
    # HIGHEST-precision reference: <~1% of the output scale worst-case, and a
    # much tighter bound on the average deviation.
    max_err = float(jnp.max(jnp.abs(out - ref)))
    mean_err = float(jnp.mean(jnp.abs(out - ref)))
    assert max_err < 5e-2, f"max abs err vs reference: {max_err}"
    assert mean_err < 1.5e-2, f"mean abs err vs reference: {mean_err}"
    print("KERNEL_OK")
</pallas_src>

<mosaic_0001>
module attributes {stable_mosaic.version = 11 : i64} {
  func.func @_self_attention_kernel(%arg0: i32, %arg1: memref<2x4x256xf32, #tpu.memory_space<vmem>>, %arg2: memref<4x32xbf16, #tpu.memory_space<vmem>>, %arg3: memref<8x32xf32, #tpu.memory_space<vmem>>, %arg4: memref<32x128xbf16, #tpu.memory_space<vmem>>, %arg5: memref<128x32xbf16, #tpu.memory_space<vmem>>, %arg6: memref<128x128xbf16, #tpu.memory_space<vmem>>, %arg7: memref<32x32xbf16, #tpu.memory_space<vmem>>, %arg8: memref<32x32xbf16, #tpu.memory_space<vmem>>, %arg9: memref<4x32xbf16, #tpu.memory_space<vmem>>, %arg10: memref<4x1xf32, #tpu.memory_space<vmem>>, %arg11: memref<2x4x256xf32, #tpu.memory_space<vmem>>) attributes {dimension_semantics = [#tpu.dimension_semantics<parallel>], iteration_bounds = array<i64: 1>, scalar_prefetch = 0 : i64, scratch_operands = 0 : i64, tpu.core_type = #tpu.core_type<tc>, window_params = [{transform_indices = @transform_0, window_bounds = array<i64: 2, 4, 256>}, {pipeline_mode = #tpu.pipeline_mode<synchronous>, transform_indices = @transform_1, window_bounds = array<i64: 4, 32>}, {pipeline_mode = #tpu.pipeline_mode<synchronous>, transform_indices = @transform_2, window_bounds = array<i64: 8, 32>}, {pipeline_mode = #tpu.pipeline_mode<synchronous>, transform_indices = @transform_3, window_bounds = array<i64: 32, 128>}, {pipeline_mode = #tpu.pipeline_mode<synchronous>, transform_indices = @transform_4, window_bounds = array<i64: 128, 32>}, {pipeline_mode = #tpu.pipeline_mode<synchronous>, transform_indices = @transform_5, window_bounds = array<i64: 128, 128>}, {pipeline_mode = #tpu.pipeline_mode<synchronous>, transform_indices = @transform_6, window_bounds = array<i64: 32, 32>}, {pipeline_mode = #tpu.pipeline_mode<synchronous>, transform_indices = @transform_7, window_bounds = array<i64: 32, 32>}, {pipeline_mode = #tpu.pipeline_mode<synchronous>, transform_indices = @transform_8, window_bounds = array<i64: 4, 32>}, {pipeline_mode = #tpu.pipeline_mode<synchronous>, transform_indices = @transform_9, window_bounds = array<i64: 4, 1>}, {transform_indices = @transform_10, window_bounds = array<i64: 2, 4, 256>}]} {
    %c0 = arith.constant 0 : index
    %c0_0 = arith.constant 0 : index
    %0 = vector.load %arg3[%c0, %c0_0] : memref<8x32xf32, #tpu.memory_space<vmem>>, vector<8x32xf32>
    %1 = vector.extract_strided_slice %0 {offsets = [0, 0], sizes = [1, 32], strides = [1, 1]} : vector<8x32xf32> to vector<1x32xf32>
    %2 = vector.extract_strided_slice %0 {offsets = [1, 0], sizes = [1, 32], strides = [1, 1]} : vector<8x32xf32> to vector<1x32xf32>
    %3 = vector.extract_strided_slice %0 {offsets = [2, 0], sizes = [1, 32], strides = [1, 1]} : vector<8x32xf32> to vector<1x32xf32>
    %4 = vector.extract_strided_slice %0 {offsets = [3, 0], sizes = [1, 32], strides = [1, 1]} : vector<8x32xf32> to vector<1x32xf32>
    %5 = vector.extract_strided_slice %0 {offsets = [4, 0], sizes = [1, 32], strides = [1, 1]} : vector<8x32xf32> to vector<1x32xf32>
    %6 = vector.extract_strided_slice %0 {offsets = [5, 0], sizes = [1, 32], strides = [1, 1]} : vector<8x32xf32> to vector<1x32xf32>
    %7 = vector.extract_strided_slice %0 {offsets = [6, 0], sizes = [1, 32], strides = [1, 1]} : vector<8x32xf32> to vector<1x32xf32>
    %8 = vector.extract_strided_slice %0 {offsets = [7, 0], sizes = [1, 32], strides = [1, 1]} : vector<8x32xf32> to vector<1x32xf32>
    %c0_1 = arith.constant 0 : index
    %c0_2 = arith.constant 0 : index
    %c0_3 = arith.constant 0 : index
    %9 = vector.load %arg1[%c0_1, %c0_2, %c0_3] : memref<2x4x256xf32, #tpu.memory_space<vmem>>, vector<1x4x256xf32>
    %10 = vector.shape_cast %9 : vector<1x4x256xf32> to vector<4x256xf32>
    %c1 = arith.constant 1 : index
    %c0_4 = arith.constant 0 : index
    %c0_5 = arith.constant 0 : index
    %11 = vector.load %arg1[%c1, %c0_4, %c0_5] : memref<2x4x256xf32, #tpu.memory_space<vmem>>, vector<1x4x256xf32>
    %12 = vector.shape_cast %11 : vector<1x4x256xf32> to vector<4x256xf32>
    %13 = tpu.concatenate %10, %12 in 1 : vector<4x256xf32>, vector<4x256xf32> -> vector<4x512xf32>
    %14 = arith.truncf %13 : vector<4x512xf32> to vector<4x512xbf16>
    %c0_6 = arith.constant 0 : index
    %c0_7 = arith.constant 0 : index
    %15 = vector.load %arg2[%c0_6, %c0_7] : memref<4x32xbf16, #tpu.memory_space<vmem>>, vector<4x32xbf16>
    %cst = arith.constant dense<0.000000e+00> : vector<512x32xf32>
    %16 = tpu.matmul %14, %15, %cst {dimension_numbers = #tpu.dot_dimension_numbers<[0], [0], [1], [1], [0, 1, 1, 1], [], []>} : vector<4x512xbf16>, vector<4x32xbf16>, vector<512x32xf32> -> vector<512x32xf32>
    %17 = vector.broadcast %1 : vector<1x32xf32> to vector<512x32xf32>
    %18 = arith.addf %16, %17 : vector<512x32xf32>
    %cst_8 = arith.constant dense<0.000000e+00> : vector<512xf32>
    %19 = vector.multi_reduction <add>, %18, %cst_8 [1] : vector<512x32xf32> to vector<512xf32>
    %20 = vector.shape_cast %19 : vector<512xf32> to vector<512x1xf32>
    %cst_9 = arith.constant 3.200000e+01 : f32
    %21 = vector.broadcast %cst_9 : f32 to vector<512x1xf32>
    %22 = arith.divf %20, %21 : vector<512x1xf32>
    %23 = vector.broadcast %22 : vector<512x1xf32> to vector<512x32xf32>
    %24 = arith.subf %18, %23 : vector<512x32xf32>
    %25 = arith.mulf %24, %24 : vector<512x32xf32>
    %cst_10 = arith.constant dense<0.000000e+00> : vector<512xf32>
    %26 = vector.multi_reduction <add>, %25, %cst_10 [1] : vector<512x32xf32> to vector<512xf32>
    %27 = vector.shape_cast %26 : vector<512xf32> to vector<512x1xf32>
    %cst_11 = arith.constant 3.200000e+01 : f32
    %28 = vector.broadcast %cst_11 : f32 to vector<512x1xf32>
    %29 = arith.divf %27, %28 : vector<512x1xf32>
    %30 = vector.broadcast %22 : vector<512x1xf32> to vector<512x32xf32>
    %31 = arith.subf %18, %30 : vector<512x32xf32>
    %cst_12 = arith.constant 9.99999974E-6 : f32
    %32 = vector.broadcast %cst_12 : f32 to vector<512x1xf32>
    %33 = arith.addf %29, %32 : vector<512x1xf32>
    %34 = math.rsqrt %33 : vector<512x1xf32>
    %35 = vector.broadcast %34 : vector<512x1xf32> to vector<512x32xf32>
    %36 = arith.mulf %31, %35 : vector<512x32xf32>
    %37 = vector.broadcast %2 : vector<1x32xf32> to vector<512x32xf32>
    %38 = arith.mulf %36, %37 : vector<512x32xf32>
    %39 = vector.broadcast %3 : vector<1x32xf32> to vector<512x32xf32>
    %40 = arith.addf %38, %39 : vector<512x32xf32>
    %41 = arith.truncf %40 : vector<512x32xf32> to vector<512x32xbf16>
    %c0_13 = arith.constant 0 : index
    %c0_14 = arith.constant 0 : index
    %42 = vector.load %arg4[%c0_13, %c0_14] : memref<32x128xbf16, #tpu.memory_space<vmem>>, vector<32x128xbf16>
    %cst_15 = arith.constant dense<0.000000e+00> : vector<512x128xf32>
    %43 = tpu.matmul %41, %42, %cst_15 {dimension_numbers = #tpu.dot_dimension_numbers<[1], [0], [0], [1], [0, 0, 1, 1], [], []>} : vector<512x32xbf16>, vector<32x128xbf16>, vector<512x128xf32> -> vector<512x128xf32>
    %44 = tpu.concatenate %40, %40, %40, %40 in 1 : vector<512x32xf32>, vector<512x32xf32>, vector<512x32xf32>, vector<512x32xf32> -> vector<512x128xf32>
    %45 = vector.extract_strided_slice %43 {offsets = [0, 0], sizes = [256, 128], strides = [1, 1]} : vector<512x128xf32> to vector<256x128xf32>
    %46 = vector.extract_strided_slice %43 {offsets = [256, 0], sizes = [256, 128], strides = [1, 1]} : vector<512x128xf32> to vector<256x128xf32>
    %47 = vector.extract_strided_slice %44 {offsets = [0, 0], sizes = [256, 128], strides = [1, 1]} : vector<512x128xf32> to vector<256x128xf32>
    %48 = vector.extract_strided_slice %44 {offsets = [256, 0], sizes = [256, 128], strides = [1, 1]} : vector<512x128xf32> to vector<256x128xf32>
    %49 = arith.mulf %47, %45 : vector<256x128xf32>
    %50 = arith.mulf %47, %46 : vector<256x128xf32>
    %51 = arith.mulf %48, %46 : vector<256x128xf32>
    %52 = tpu.concatenate %49, %50, %51 in 0 : vector<256x128xf32>, vector<256x128xf32>, vector<256x128xf32> -> vector<768x128xf32>
    %53 = arith.truncf %52 : vector<768x128xf32> to vector<768x128xbf16>
    %c0_16 = arith.constant 0 : index
    %c0_17 = arith.constant 0 : index
    %54 = vector.load %arg6[%c0_16, %c0_17] : memref<128x128xbf16, #tpu.memory_space<vmem>>, vector<128x128xbf16>
    %cst_18 = arith.constant dense<0.000000e+00> : vector<768x128xf32>
    %55 = tpu.matmul %53, %54, %cst_18 {dimension_numbers = #tpu.dot_dimension_numbers<[1], [0], [0], [1], [0, 0, 1, 1], [], []>} : vector<768x128xbf16>, vector<128x128xbf16>, vector<768x128xf32> -> vector<768x128xf32>
    %56 = vector.extract_strided_slice %55 {offsets = [0, 0], sizes = [256, 128], strides = [1, 1]} : vector<768x128xf32> to vector<256x128xf32>
    %57 = vector.extract_strided_slice %55 {offsets = [256, 0], sizes = [256, 128], strides = [1, 1]} : vector<768x128xf32> to vector<256x128xf32>
    %58 = vector.extract_strided_slice %55 {offsets = [512, 0], sizes = [256, 128], strides = [1, 1]} : vector<768x128xf32> to vector<256x128xf32>
    %cst_19 = arith.constant 2.000000e+00 : f32
    %59 = vector.broadcast %cst_19 : f32 to vector<256x128xf32>
    %60 = arith.mulf %59, %57 : vector<256x128xf32>
    %61 = arith.subf %60, %56 : vector<256x128xf32>
    %62 = arith.subf %61, %58 : vector<256x128xf32>
    %63 = math.exp %62 : vector<256x128xf32>
    %cst_20 = arith.constant 1.000000e+00 : f32
    %64 = vector.broadcast %cst_20 : f32 to vector<256x128xf32>
    %65 = arith.addf %64, %63 : vector<256x128xf32>
    %66 = tpu.reciprocal %65 {approx = true} : vector<256x128xf32> -> vector<256x128xf32>
    %67 = arith.mulf %63, %66 : vector<256x128xf32>
    %68 = arith.subf %46, %45 : vector<256x128xf32>
    %69 = arith.mulf %67, %68 : vector<256x128xf32>
    %70 = arith.addf %45, %69 : vector<256x128xf32>
    %71 = arith.subf %45, %46 : vector<256x128xf32>
    %72 = arith.mulf %67, %71 : vector<256x128xf32>
    %73 = arith.addf %46, %72 : vector<256x128xf32>
    %74 = tpu.concatenate %70, %73 in 0 : vector<256x128xf32>, vector<256x128xf32> -> vector<512x128xf32>
    %75 = arith.truncf %74 : vector<512x128xf32> to vector<512x128xbf16>
    %c0_21 = arith.constant 0 : index
    %c0_22 = arith.constant 0 : index
    %76 = vector.load %arg5[%c0_21, %c0_22] : memref<128x32xbf16, #tpu.memory_space<vmem>>, vector<128x32xbf16>
    %cst_23 = arith.constant dense<0.000000e+00> : vector<512x32xf32>
    %77 = tpu.matmul %75, %76, %cst_23 {dimension_numbers = #tpu.dot_dimension_numbers<[1], [0], [0], [1], [0, 0, 1, 1], [], []>} : vector<512x128xbf16>, vector<128x32xbf16>, vector<512x32xf32> -> vector<512x32xf32>
    %78 = vector.broadcast %4 : vector<1x32xf32> to vector<512x32xf32>
    %79 = arith.addf %77, %78 : vector<512x32xf32>
    %80 = arith.addf %79, %18 : vector<512x32xf32>
    %cst_24 = arith.constant dense<0.000000e+00> : vector<512xf32>
    %81 = vector.multi_reduction <add>, %80, %cst_24 [1] : vector<512x32xf32> to vector<512xf32>
    %82 = vector.shape_cast %81 : vector<512xf32> to vector<512x1xf32>
    %cst_25 = arith.constant 3.200000e+01 : f32
    %83 = vector.broadcast %cst_25 : f32 to vector<512x1xf32>
    %84 = arith.divf %82, %83 : vector<512x1xf32>
    %85 = vector.broadcast %84 : vector<512x1xf32> to vector<512x32xf32>
    %86 = arith.subf %80, %85 : vector<512x32xf32>
    %87 = arith.mulf %86, %86 : vector<512x32xf32>
    %cst_26 = arith.constant dense<0.000000e+00> : vector<512xf32>
    %88 = vector.multi_reduction <add>, %87, %cst_26 [1] : vector<512x32xf32> to vector<512xf32>
    %89 = vector.shape_cast %88 : vector<512xf32> to vector<512x1xf32>
    %cst_27 = arith.constant 3.200000e+01 : f32
    %90 = vector.broadcast %cst_27 : f32 to vector<512x1xf32>
    %91 = arith.divf %89, %90 : vector<512x1xf32>
    %92 = vector.broadcast %84 : vector<512x1xf32> to vector<512x32xf32>
    %93 = arith.subf %80, %92 : vector<512x32xf32>
    %cst_28 = arith.constant 9.99999974E-6 : f32
    %94 = vector.broadcast %cst_28 : f32 to vector<512x1xf32>
    %95 = arith.addf %91, %94 : vector<512x1xf32>
    %96 = math.rsqrt %95 : vector<512x1xf32>
    %97 = vector.broadcast %96 : vector<512x1xf32> to vector<512x32xf32>
    %98 = arith.mulf %93, %97 : vector<512x32xf32>
    %99 = vector.broadcast %5 : vector<1x32xf32> to vector<512x32xf32>
    %100 = arith.mulf %98, %99 : vector<512x32xf32>
    %101 = vector.broadcast %6 : vector<1x32xf32> to vector<512x32xf32>
    %102 = arith.addf %100, %101 : vector<512x32xf32>
    %103 = arith.truncf %102 : vector<512x32xf32> to vector<512x32xbf16>
    %c0_29 = arith.constant 0 : index
    %c0_30 = arith.constant 0 : index
    %104 = vector.load %arg7[%c0_29, %c0_30] : memref<32x32xbf16, #tpu.memory_space<vmem>>, vector<32x32xbf16>
    %cst_31 = arith.constant dense<0.000000e+00> : vector<512x32xf32>
    %105 = tpu.matmul %103, %104, %cst_31 {dimension_numbers = #tpu.dot_dimension_numbers<[1], [0], [0], [1], [0, 0, 1, 1], [], []>} : vector<512x32xbf16>, vector<32x32xbf16>, vector<512x32xf32> -> vector<512x32xf32>
    %106 = vector.broadcast %7 : vector<1x32xf32> to vector<512x32xf32>
    %107 = arith.addf %105, %106 : vector<512x32xf32>
    %cst_32 = arith.constant 5.000000e-01 : f32
    %108 = vector.broadcast %cst_32 : f32 to vector<512x32xf32>
    %109 = arith.mulf %108, %107 : vector<512x32xf32>
    %cst_33 = arith.constant 0.707106769 : f32
    %110 = vector.broadcast %cst_33 : f32 to vector<512x32xf32>
    %111 = arith.mulf %107, %110 : vector<512x32xf32>
    %112 = math.erf %111 : vector<512x32xf32>
    %cst_34 = arith.constant 1.000000e+00 : f32
    %113 = vector.broadcast %cst_34 : f32 to vector<512x32xf32>
    %114 = arith.addf %113, %112 : vector<512x32xf32>
    %115 = arith.mulf %109, %114 : vector<512x32xf32>
    %116 = arith.truncf %115 : vector<512x32xf32> to vector<512x32xbf16>
    %c0_35 = arith.constant 0 : index
    %c0_36 = arith.constant 0 : index
    %117 = vector.load %arg8[%c0_35, %c0_36] : memref<32x32xbf16, #tpu.memory_space<vmem>>, vector<32x32xbf16>
    %cst_37 = arith.constant dense<0.000000e+00> : vector<512x32xf32>
    %118 = tpu.matmul %116, %117, %cst_37 {dimension_numbers = #tpu.dot_dimension_numbers<[1], [0], [0], [1], [0, 0, 1, 1], [], []>} : vector<512x32xbf16>, vector<32x32xbf16>, vector<512x32xf32> -> vector<512x32xf32>
    %119 = vector.broadcast %8 : vector<1x32xf32> to vector<512x32xf32>
    %120 = arith.addf %118, %119 : vector<512x32xf32>
    %121 = arith.addf %120, %80 : vector<512x32xf32>
    %c0_38 = arith.constant 0 : index
    %c0_39 = arith.constant 0 : index
    %122 = vector.load %arg9[%c0_38, %c0_39] : memref<4x32xbf16, #tpu.memory_space<vmem>>, vector<4x32xbf16>
    %123 = arith.truncf %121 : vector<512x32xf32> to vector<512x32xbf16>
    %cst_40 = arith.constant dense<0.000000e+00> : vector<4x512xf32>
    %124 = tpu.matmul %122, %123, %cst_40 {dimension_numbers = #tpu.dot_dimension_numbers<[1], [1], [0], [0], [0, 0, 1, 0], [], []>} : vector<4x32xbf16>, vector<512x32xbf16>, vector<4x512xf32> -> vector<4x512xf32>
    %c0_41 = arith.constant 0 : index
    %c0_42 = arith.constant 0 : index
    %125 = vector.load %arg10[%c0_41, %c0_42] : memref<4x1xf32, #tpu.memory_space<vmem>>, vector<4x1xf32>
    %126 = vector.broadcast %125 : vector<4x1xf32> to vector<4x512xf32>
    %127 = arith.addf %124, %126 : vector<4x512xf32>
    %128 = vector.extract_strided_slice %127 {offsets = [0, 0], sizes = [4, 256], strides = [1, 1]} : vector<4x512xf32> to vector<4x256xf32>
    %c0_43 = arith.constant 0 : index
    %c0_44 = arith.constant 0 : index
    %c0_45 = arith.constant 0 : index
    %129 = vector.load %arg11[%c0_43, %c0_44, %c0_45] : memref<2x4x256xf32, #tpu.memory_space<vmem>>, vector<1x4x256xf32>
    %130 = vector.shape_cast %129 : vector<1x4x256xf32> to vector<4x256xf32>
    %131 = vector.shape_cast %128 : vector<4x256xf32> to vector<1x4x256xf32>
    tpu.vector_store %arg11[%c0_43, %c0_44, %c0_45], %131 {strides = array<i32>} : memref<2x4x256xf32, #tpu.memory_space<vmem>>, vector<1x4x256xf32>,
    %132 = vector.extract_strided_slice %127 {offsets = [0, 256], sizes = [4, 256], strides = [1, 1]} : vector<4x512xf32> to vector<4x256xf32>
    %c1_46 = arith.constant 1 : index
    %c0_47 = arith.constant 0 : index
    %c0_48 = arith.constant 0 : index
    %133 = vector.load %arg11[%c1_46, %c0_47, %c0_48] : memref<2x4x256xf32, #tpu.memory_space<vmem>>, vector<1x4x256xf32>
    %134 = vector.shape_cast %133 : vector<1x4x256xf32> to vector<4x256xf32>
    %135 = vector.shape_cast %132 : vector<4x256xf32> to vector<1x4x256xf32>
    tpu.vector_store %arg11[%c1_46, %c0_47, %c0_48], %135 {strides = array<i32>} : memref<2x4x256xf32, #tpu.memory_space<vmem>>, vector<1x4x256xf32>,
    return
  }
  func.func @transform_0(%arg0: i32) -> (i32, i32, i32) {
    %c0_i32 = arith.constant 0 : i32
    %c0_i32_0 = arith.constant 0 : i32
    %c0_i32_1 = arith.constant 0 : i32
    return %c0_i32, %c0_i32_0, %arg0 : i32, i32, i32
  }
  func.func @transform_1(%arg0: i32) -> (i32, i32) {
    %c0_i32 = arith.constant 0 : i32
    %c0_i32_0 = arith.constant 0 : i32
    %c0_i32_1 = arith.constant 0 : i32
    return %c0_i32, %c0_i32_0 : i32, i32
  }
  func.func @transform_2(%arg0: i32) -> (i32, i32) {
    %c0_i32 = arith.constant 0 : i32
    %c0_i32_0 = arith.constant 0 : i32
    %c0_i32_1 = arith.constant 0 : i32
    return %c0_i32, %c0_i32_0 : i32, i32
  }
  func.func @transform_3(%arg0: i32) -> (i32, i32) {
    %c0_i32 = arith.constant 0 : i32
    %c0_i32_0 = arith.constant 0 : i32
    %c0_i32_1 = arith.constant 0 : i32
    return %c0_i32, %c0_i32_0 : i32, i32
  }
  func.func @transform_4(%arg0: i32) -> (i32, i32) {
    %c0_i32 = arith.constant 0 : i32
    %c0_i32_0 = arith.constant 0 : i32
    %c0_i32_1 = arith.constant 0 : i32
    return %c0_i32, %c0_i32_0 : i32, i32
  }
  func.func @transform_5(%arg0: i32) -> (i32, i32) {
    %c0_i32 = arith.constant 0 : i32
    %c0_i32_0 = arith.constant 0 : i32
    %c0_i32_1 = arith.constant 0 : i32
    return %c0_i32, %c0_i32_0 : i32, i32
  }
  func.func @transform_6(%arg0: i32) -> (i32, i32) {
    %c0_i32 = arith.constant 0 : i32
    %c0_i32_0 = arith.constant 0 : i32
    %c0_i32_1 = arith.constant 0 : i32
    return %c0_i32, %c0_i32_0 : i32, i32
  }
  func.func @transform_7(%arg0: i32) -> (i32, i32) {
    %c0_i32 = arith.constant 0 : i32
    %c0_i32_0 = arith.constant 0 : i32
    %c0_i32_1 = arith.constant 0 : i32
    return %c0_i32, %c0_i32_0 : i32, i32
  }
  func.func @transform_8(%arg0: i32) -> (i32, i32) {
    %c0_i32 = arith.constant 0 : i32
    %c0_i32_0 = arith.constant 0 : i32
    %c0_i32_1 = arith.constant 0 : i32
    return %c0_i32, %c0_i32_0 : i32, i32
  }
  func.func @transform_9(%arg0: i32) -> (i32, i32) {
    %c0_i32 = arith.constant 0 : i32
    %c0_i32_0 = arith.constant 0 : i32
    %c0_i32_1 = arith.constant 0 : i32
    return %c0_i32, %c0_i32_0 : i32, i32
  }
  func.func @transform_10(%arg0: i32) -> (i32, i32, i32) {
    %c0_i32 = arith.constant 0 : i32
    %c0_i32_0 = arith.constant 0 : i32
    %c0_i32_1 = arith.constant 0 : i32
    return %c0_i32, %c0_i32_0, %arg0 : i32, i32, i32
  }
}

</mosaic_0001>

<bundles_post_ra>
// kernel: tpu_custom_call.1
= control target key start
LH: loop header
LB: loop body
LE: loop exit
PB: predicated region body
PF: predicated region fallthrough
CT: control target
= control target key end

     0   :  { %15 = vsyncpa [#allocation3], 0  ;;  %s13804_s0 = inlined_call_operand.vmem [shape: f32[2,4,256], index: 0, kind: input, shape index: {}]   ;;  %s13805_s1 = inlined_call_operand.vmem [shape: bf16[4,32], index: 1, kind: input, shape index: {}]   ;;  %s13806_s2 = inlined_call_operand.hbm [shape: f32[8,32], index: 2, kind: input, shape index: {}]   ;;  %s13807_s3 = inlined_call_operand.vmem [shape: bf16[32,128], index: 3, kind: input, shape index: {}]   ;;  %s13808_s4 = inlined_call_operand.vmem [shape: bf16[128,32], index: 4, kind: input, shape index: {}]   ;;  %s13809_s5 = inlined_call_operand.vmem [shape: bf16[128,128], index: 5, kind: input, shape index: {}]   ;;  %s13810_s6 = inlined_call_operand.hbm [shape: bf16[32,32], index: 6, kind: input, shape index: {}]   ;;  %s13811_s7 = inlined_call_operand.hbm [shape: bf16[32,32], index: 7, kind: input, shape index: {}]   ;;  %s13812_s8 = inlined_call_operand.vmem [shape: bf16[4,32], index: 8, kind: input, shape index: {}]   ;;  %s13813_s9 = inlined_call_operand.vmem [shape: f32[4,1], index: 9, kind: input, shape index: {}]   ;;  %s13814_s10 = inlined_call_operand.hbm [shape: f32[2,4,256], index: 10, kind: output, shape index: {}]  }
   0x1   :  { %16 = vsyncpa [#allocation6], 0 }
   0x2   :  { %17 = vsyncpa [#allocation4], 0  ;;  %s8336_s13 = smov [#allocation5]   ;;  %s8242_s17 = scalar_lea.hbm %s13810_s6, 256 }
   0x3   :  { %s43_s14 = sshll.u32 %s8336_s13, 4  ;;  %p8243_p0 = scmp.ne.s32.totalorder %s13810_s6, %s8242_s17  ;;  %s44_s14 = int_to_ptr.vmem [resolvable:$true] %s43_s14 }
   0x4   :  { %p8246_p1 = scmp.lt.u32.totalorder %s8242_s17, %s13810_s6 }
   0x6   :  { %p8248_p2 = pnand %p8246_p1, %p8243_p0 }
   0x8   :  { %8251 = shalt.err (!%p8248_p2)
}
   0x9   :  { %s8252_s22 = scalar_lea.vmem %s44_s14, 256  ;;  %p8257_p4 = scmp.lt.s32.totalorder %s44_s14, %s44_s14 }
   0xa   :  { %p8253_p3 = scmp.ne.s32.totalorder %s44_s14, %s8252_s22  ;;  %p8258_p5 = scmp.lt.s32.totalorder %s8252_s22, %s8252_s22 }
   0xc   :  { %p8259_p6 = por %p8258_p5, %p8257_p4 }
   0xe   :  { %p8260_p7 = pnand %p8259_p6, %p8253_p3 }
  0x10   :  { %8263 = shalt.err (!%p8260_p7)
}
  0x11   :  { %s8337_s23 = smov 64   ;;  %s8338_s24 = smov 4  }
  0x12   :  { %49 = dma.hbm_to_vmem [thread:$0]  %s13810_s6, 256, %s44_s14, [#allocation6], %s8337_s23, %s8337_s23, %s8338_s24  }
  0x13   :  { %s8339_s27 = smov [#allocation2]   ;;  %s8340_s29 = smov [#allocation7]  }
  0x14   :  { %s28_s28 = sshll.u32 %s8339_s27, 4  ;;  %s55_s30 = sshll.u32 %s8340_s29, 4  ;;  %s29_s28 = int_to_ptr.vmem [resolvable:$true] %s28_s28  ;;  %s56_s30 = int_to_ptr.vmem [resolvable:$true] %s55_s30 }
  0x15   :  { %s8264_s13 = scalar_lea.hbm %s13806_s2, 128 }
  0x16   :  { %p8265_p8 = scmp.ne.s32.totalorder %s13806_s2, %s8264_s13  ;;  %p8268_p9 = scmp.lt.u32.totalorder %s8264_s13, %s13806_s2 }
  0x18   :  { %p8270_p10 = pnand %p8268_p9, %p8265_p8 }
  0x1a   :  { %8273 = shalt.err (!%p8270_p10)
}
  0x1b   :  { %s8274_s6 = scalar_lea.vmem %s29_s28, 128  ;;  %p8279_p12 = scmp.lt.s32.totalorder %s29_s28, %s29_s28 }
  0x1c   :  { %p8275_p11 = scmp.ne.s32.totalorder %s29_s28, %s8274_s6  ;;  %p8280_p13 = scmp.lt.s32.totalorder %s8274_s6, %s8274_s6 }
  0x1e   :  { %p8281_p0 = por %p8280_p13, %p8279_p12 }
  0x20   :  { %p8282_p1 = pnand %p8281_p0, %p8275_p11 }
  0x22   :  { %8285 = shalt.err (!%p8282_p1)
}
  0x23   :  { %31 = dma.hbm_to_vmem [thread:$0]  %s13806_s2, 128, %s29_s28, [#allocation3]  }
  0x24   :  { %s8286_s22 = scalar_lea.hbm %s13811_s7, 256 }
  0x25   :  { %p8287_p2 = scmp.ne.s32.totalorder %s13811_s7, %s8286_s22  ;;  %p8290_p3 = scmp.lt.u32.totalorder %s8286_s22, %s13811_s7 }
  0x27   :  { %p8292_p4 = pnand %p8290_p3, %p8287_p2 }
  0x29   :  { %8295 = shalt.err (!%p8292_p4)
}
  0x2a   :  { %s8296_s11 = scalar_lea.vmem %s56_s30, 256  ;;  %p8301_p6 = scmp.lt.s32.totalorder %s56_s30, %s56_s30 }
  0x2b   :  { %p8297_p5 = scmp.ne.s32.totalorder %s56_s30, %s8296_s11  ;;  %p8302_p7 = scmp.lt.s32.totalorder %s8296_s11, %s8296_s11 }
  0x2d   :  { %p8303_p8 = por %p8302_p7, %p8301_p6 }
  0x2f   :  { %p8304_p9 = pnand %p8303_p8, %p8297_p5 }
  0x31   :  { %8307 = shalt.err (!%p8304_p9)
}
  0x32   :  { %61 = dma.hbm_to_vmem [thread:$0]  %s13811_s7, 256, %s56_s30, [#allocation6], %s8337_s23, %s8337_s23, %s8338_s24  }
  0x33   :  { %8330 = dma.done.wait [#allocation3], 128  }
  0x34   :  { %8331 = vsyncadd [#allocation3], 4294967168 }
  0x35   :  { %8332 = dma.done.wait [#allocation6], 512  }
  0x36   :  { %8333 = vsyncadd [#allocation6], 4294966784  ;;  %vm256_vm0 = vcmask 1041408   ;;  %v6787_v0 = vld [vmem:[%s13804_s0 + $0x8] sm:$0xff]  ;;  %v77_v1 = vld [vmem:[%s13804_s0] sm:$0xff]  ;;  %vm159_vm1 = vcmask 31744   ;;  %v91_v42 = vlaneseq }
  0x37   :  { %v90_v2 = vld [vmem:[%s13805_s1] sm:$0x3]  ;;  %v88_v3 = vpack.c.bf16 %v6787_v0, %v6787_v0  ;;  %v86_v4 = vpack.c.bf16 %v77_v1, %v77_v1  ;;  %v84_v6 = vcombine.high %v6787_v0, %v6787_v0  ;;  %v81_v7 = vcombine.high %v77_v1, %v77_v1  ;;  %s8342_s30 = smov 96  }
  0x38   :  { %7671 = vmatprep.subr.msk.bf16.mxu0 %vm256_vm0, %v90_v2  ;;  %v258_v5 = vsel %vm256_vm0, %v90_v2, 0  ;;  %7672 = vmatprep.subr.msk.bf16.mxu1 %vm256_vm0, %v90_v2  ;;  %v8485_v43 = vshrl.u32 %v91_v42, 7  ;;  %v76_v45 = vld [vmem:[#allocation2] sm:$0xff]  ;;  %vm549_vm2 = vcmask 261120   ;;  %vm2656_vm3 = vcmask 523264  }
  0x39   :  { %127 = vxpose.xlu1.c.b16.start.end [1/1] (short) %v88_v3, 128  ;;  %95 = vxpose.xlu0.c.b16.start.end [1/1] (short) %v86_v4, 128  ;;  %v89_v8 = vpack.c.bf16 %v84_v6, %v84_v6  ;;  %v87_v9 = vpack.c.bf16 %v81_v7, %v81_v7  ;;  %vm2721_vm4 = vcmask 785408  }
  0x3a   :  { %7208 = vmatpush3.bf16.msra.mxu0 %v258_v5  ;;  %7670 = vmatpush3.bf16.msra.mxu1 %v258_v5  ;;  %14269 = vst [vmem:[#allocation12_spill] sm:$0xff] %v8485_v43  ;;  %v93_v44 = vsub.s32 0, %v8485_v43 }
  0x3c   :  { %v8488_v46 = vrot.slane %v76_v45, %v93_v44 }
  0x56   :  { %143 = vxpose.xlu1.c.b16.start.end [1/1] (short) %v89_v8, 128  ;;  %111 = vxpose.xlu0.c.b16.start.end [1/1] (short) %v87_v9, 128 }
  0x9f   :  { %v135_v10 = vpop.trf.xlu1  ;;  %v103_v11 = vpop.trf.xlu0 }
  0xa0   :  { %7209 = vmatprep.mubr.msk.bf16.mxu0 %vm159_vm1, %v103_v11 }
  0xa3   :  { %v136_v12 = vpop.trf.xlu1  ;;  %v104_v13 = vpop.trf.xlu0 }
  0xa4   :  { %7210 = vmatmul.mubr.msk.bf16.vlgmr.msra.gmra.mrb[0].mxu0 %vm159_vm1, %v104_v13 }
  0xa7   :  { %v137_v14 = vpop.trf.xlu1  ;;  %v105_v15 = vpop.trf.xlu0 }
  0xa8   :  { %7213 = vmatprep.mubr.msk.bf16.mxu0 %vm159_vm1, %v105_v15 }
  0xab   :  { %v138_v16 = vpop.trf.xlu1  ;;  %v106_v17 = vpop.trf.xlu0 }
  0xac   :  { %7214 = vmatmul.mubr.msk.bf16.gmra.mrb[4].mxu0 %vm159_vm1, %v106_v17 }
  0xaf   :  { %v139_v18 = vpop.trf.xlu1  ;;  %v107_v19 = vpop.trf.xlu0 }
  0xb0   :  { %7217 = vmatprep.mubr.msk.bf16.mxu0 %vm159_vm1, %v107_v19 }
  0xb3   :  { %v140_v20 = vpop.trf.xlu1  ;;  %v108_v21 = vpop.trf.xlu0 }
  0xb4   :  { %7218 = vmatmul.mubr.msk.bf16.gmra.mrb[8].mxu0 %vm159_vm1, %v108_v21 }
  0xb7   :  { %v141_v22 = vpop.trf.xlu1  ;;  %v109_v23 = vpop.trf.xlu0 }
  0xb8   :  { %7221 = vmatprep.mubr.msk.bf16.mxu0 %vm159_vm1, %v109_v23 }
  0xbb   :  { %v142_v24 = vpop.trf.xlu1  ;;  %v110_v25 = vpop.trf.xlu0 }
  0xbc   :  { %7222 = vmatmul.mubr.msk.bf16.gmra.mrb[12].mxu0 %vm159_vm1, %v110_v25 }
  0xbf   :  { %v151_v26 = vpop.trf.xlu1  ;;  %v119_v27 = vpop.trf.xlu0 }
  0xc0   :  { %7257 = vmatprep.mubr.msk.bf16.mxu1 %vm159_vm1, %v151_v26  ;;  %7225 = vmatprep.mubr.msk.bf16.mxu0 %vm159_vm1, %v119_v27 }
  0xc3   :  { %v152_v28 = vpop.trf.xlu1  ;;  %v120_v29 = vpop.trf.xlu0 }
  0xc4   :  { %7226 = vmatmul.mubr.msk.bf16.gmra.mrb[16].mxu0 %vm159_vm1, %v120_v29  ;;  %7258 = vmatmul.mubr.msk.bf16.vlgmr.msra.gmra.mrb[0].mxu1 %vm159_vm1, %v152_v28 }
  0xc7   :  { %v121_v30 = vpop.trf.xlu0  ;;  %v153_v31 = vpop.trf.xlu1 }
  0xc8   :  { %7229 = vmatprep.mubr.msk.bf16.mxu0 %vm159_vm1, %v121_v30  ;;  %7261 = vmatprep.mubr.msk.bf16.mxu1 %vm159_vm1, %v153_v31 }
  0xcb   :  { %v122_v32 = vpop.trf.xlu0  ;;  %v154_v33 = vpop.trf.xlu1 }
  0xcc   :  { %7230 = vmatmul.mubr.msk.bf16.gmra.mrb[20].mxu0 %vm159_vm1, %v122_v32  ;;  %7262 = vmatmul.mubr.msk.bf16.gmra.mrb[4].mxu1 %vm159_vm1, %v154_v33 }
  0xcf   :  { %v123_v34 = vpop.trf.xlu0  ;;  %v155_v35 = vpop.trf.xlu1 }
  0xd0   :  { %7233 = vmatprep.mubr.msk.bf16.mxu0 %vm159_vm1, %v123_v34  ;;  %7265 = vmatprep.mubr.msk.bf16.mxu1 %vm159_vm1, %v155_v35 }
  0xd3   :  { %v124_v36 = vpop.trf.xlu0  ;;  %v156_v37 = vpop.trf.xlu1 }
  0xd4   :  { %7234 = vmatmul.mubr.msk.bf16.gmra.mrb[24].mxu0 %vm159_vm1, %v124_v36  ;;  %7266 = vmatmul.mubr.msk.bf16.gmra.mrb[8].mxu1 %vm159_vm1, %v156_v37 }
  0xd7   :  { %v125_v38 = vpop.trf.xlu0  ;;  %v157_v39 = vpop.trf.xlu1 }
  0xd8   :  { %7237 = vmatprep.mubr.msk.bf16.mxu0 %vm159_vm1, %v125_v38  ;;  %7269 = vmatprep.mubr.msk.bf16.mxu1 %vm159_vm1, %v157_v39 }
  0xdb   :  { %v126_v40 = vpop.trf.xlu0  ;;  %v158_v41 = vpop.trf.xlu1 }
  0xdc   :  { %7238 = vmatmul.mubr.msk.bf16.gmra.mrb[28].mxu0 %vm159_vm1, %v126_v40  ;;  %7270 = vmatmul.mubr.msk.bf16.gmra.mrb[12].mxu1 %vm159_vm1, %v158_v41 }
  0xdd   :  { %7241 = vmatprep.mubr.msk.bf16.mxu0 %vm159_vm1, %v135_v10 }
  0xe4   :  { %7242 = vmatmul.mubr.msk.bf16.gmra.mrb[32].mxu0 %vm159_vm1, %v136_v12 }
  0xe5   :  { %7245 = vmatprep.mubr.msk.bf16.mxu0 %vm159_vm1, %v137_v14 }
  0xec   :  { %7246 = vmatmul.mubr.msk.bf16.gmra.mrb[36].mxu0 %vm159_vm1, %v138_v16 }
  0xed   :  { %7249 = vmatprep.mubr.msk.bf16.mxu0 %vm159_vm1, %v139_v18 }
  0xf4   :  { %7250 = vmatmul.mubr.msk.bf16.gmra.mrb[40].mxu0 %vm159_vm1, %v140_v20 }
  0xf5   :  { %7253 = vmatprep.mubr.msk.bf16.mxu0 %vm159_vm1, %v141_v22 }
  0xfc   :  { %7254 = vmatmul.mubr.msk.bf16.gmra.mrb[44].mxu0 %vm159_vm1, %v142_v24 }
 0x177   :  { %v7211_v47 = vpop.f32.mrb[0].mxu0 }
 0x178   :  { %v8491_v48 = vadd.f32 %v7211_v47, %v8488_v46  ;;  %v294_v49 = vpop.f32.mrb[1].mxu0 }
 0x179   :  { %v8494_v50 = vadd.f32 %v294_v49, %v8488_v46  ;;  %v7212_v51 = vpop.f32.mrb[2].mxu0 }
 0x17a   :  { %14270 = vst [vmem:[#allocation13_spill] sm:$0xff] %v8491_v48  ;;  %v8497_v52 = vadd.f32 %v7212_v51, %v8488_v46  ;;  %v556_v53 = vsel %vm549_vm2, %v8491_v48, 0.0  ;;  %v297_v54 = vpop.f32.mrb[3].mxu0 }
 0x17b   :  { %14271 = vst [vmem:[#allocation14_spill] sm:$0xff] %v8494_v50  ;;  %557 = vadd.xlane.f32.xlu0 %v556_v53  ;;  %v8502_v55 = vadd.f32 %v297_v54, %v8488_v46  ;;  %v550_v57 = vsel %vm549_vm2, %v8494_v50, 0.0 }
 0x17c   :  { %14272 = vst [vmem:[#allocation15_spill] sm:$0xff] %v8497_v52  ;;  %v559_v56 = vsel %vm549_vm2, %v8497_v52, 0.0 }
 0x17d   :  { %14273 = vst [vmem:[#allocation16_spill] sm:$0xff] %v8502_v55  ;;  %560 = vadd.xlane.f32.xlu1 %v559_v56  ;;  %v553_v58 = vsel %vm549_vm2, %v8502_v55, 0.0 }
 0x17f   :  { %551 = vadd.xlane.f32.xlu0 %v550_v57  ;;  %v7215_v59 = vpop.f32.mrb[4].mxu0 }
 0x180   :  { %v310_v60 = vpop.f32.mrb[5].mxu0  ;;  %v8547_v20 = vadd.f32 %v7215_v59, %v8488_v46 }
 0x181   :  { %554 = vadd.xlane.f32.xlu1 %v553_v58  ;;  %v7216_v61 = vpop.f32.mrb[6].mxu0  ;;  %v8567_v32 = vadd.f32 %v310_v60, %v8488_v46 }
 0x182   :  { %v313_v62 = vpop.f32.mrb[7].mxu0  ;;  %14278 = vst [vmem:[#allocation21_spill] sm:$0xff] %v8547_v20  ;;  %v8556_v25 = vadd.f32 %v7216_v61, %v8488_v46  ;;  %v568_v27 = vsel %vm549_vm2, %v8547_v20, 0.0 }
 0x183   :  { %14280 = vst [vmem:[#allocation23_spill] sm:$0xff] %v8567_v32  ;;  %v8572_v35 = vadd.f32 %v313_v62, %v8488_v46  ;;  %v562_v38 = vsel %vm549_vm2, %v8567_v32, 0.0 }
 0x184   :  { %14279 = vst [vmem:[#allocation22_spill] sm:$0xff] %v8556_v25  ;;  %v571_v37 = vsel %vm549_vm2, %v8556_v25, 0.0 }
 0x185   :  { %14281 = vst [vmem:[#allocation24_spill] sm:$0xff] %v8572_v35  ;;  %v565_v42 = vsel %vm549_vm2, %v8572_v35, 0.0 }
 0x187   :  { %v7219_v63 = vpop.f32.mrb[8].mxu0 }
 0x188   :  { %v8510_v0 = vpop.f32.mrb[9].mxu0  ;;  %v8600_v57 = vadd.f32 %v7219_v63, %v8488_v46 }
 0x189   :  { %v8512_v1 = vpop.f32.mrb[10].mxu0 }
 0x18a   :  { %v8514_v2 = vpop.f32.mrb[11].mxu0  ;;  %14285 = vst [vmem:[#allocation28_spill] sm:$0xff] %v8600_v57 }
 0x18f   :  { %v8516_v3 = vpop.f32.mrb[12].mxu0 }
 0x190   :  { %v8518_v4 = vpop.f32.mrb[13].mxu0 }
 0x191   :  { %v8520_v5 = vpop.f32.mrb[14].mxu0 }
 0x192   :  { %v8522_v6 = vpop.f32.mrb[15].mxu0 }
 0x197   :  { %v7259_v7 = vpop.f32.mrb[0].mxu1  ;;  %v8524_v8 = vpop.f32.mrb[16].mxu0 }
 0x198   :  { %v8527_v9 = vadd.f32 %v7259_v7, %v8488_v46  ;;  %v486_v10 = vpop.f32.mrb[1].mxu1  ;;  %v8529_v11 = vpop.f32.mrb[17].mxu0  ;;  %v8613_v7 = vadd.f32 %v8512_v1, %v8488_v46 }
 0x199   :  { %v7260_v12 = vpop.f32.mrb[2].mxu1  ;;  %v8531_v13 = vpop.f32.mrb[18].mxu0  ;;  %v8534_v14 = vadd.f32 %v486_v10, %v8488_v46  ;;  %v580_v10 = vsel %vm549_vm2, %v8600_v57, 0.0 }
 0x19a   :  { %14274 = vst [vmem:[#allocation17_spill] sm:$0xff] %v8527_v9  ;;  %v8537_v15 = vadd.f32 %v7260_v12, %v8488_v46  ;;  %v489_v16 = vpop.f32.mrb[3].mxu1  ;;  %v700_v17 = vsel %vm549_vm2, %v8527_v9, 0.0  ;;  %v8541_v18 = vpop.f32.mrb[19].mxu0  ;;  %14287 = vst [vmem:[#allocation30_spill] sm:$0xff] %v8613_v7 }
 0x19b   :  { %14275 = vst [vmem:[#allocation18_spill] sm:$0xff] %v8534_v14  ;;  %701 = vadd.xlane.f32.xlu0 %v700_v17  ;;  %v8544_v19 = vadd.f32 %v489_v16, %v8488_v46  ;;  %v694_v22 = vsel %vm549_vm2, %v8534_v14, 0.0 }
 0x19c   :  { %14276 = vst [vmem:[#allocation19_spill] sm:$0xff] %v8537_v15  ;;  %v703_v21 = vsel %vm549_vm2, %v8537_v15, 0.0 }
 0x19d   :  { %14277 = vst [vmem:[#allocation20_spill] sm:$0xff] %v8544_v19  ;;  %704 = vadd.xlane.f32.xlu1 %v703_v21  ;;  %v697_v26 = vsel %vm549_vm2, %v8544_v19, 0.0 }
 0x19f   :  { %695 = vadd.xlane.f32.xlu0 %v694_v22  ;;  %v7263_v23 = vpop.f32.mrb[4].mxu1  ;;  %v8553_v24 = vpop.f32.mrb[20].mxu0  ;;  %v8625_v22 = vadd.f32 %v8510_v0, %v8488_v46 }
 0x1a0   :  { %v502_v28 = vpop.f32.mrb[5].mxu1  ;;  %v8562_v29 = vpop.f32.mrb[21].mxu0  ;;  %v8575_v36 = vadd.f32 %v7263_v23, %v8488_v46 }
 0x1a1   :  { %698 = vadd.xlane.f32.xlu1 %v697_v26  ;;  %v7264_v30 = vpop.f32.mrb[6].mxu1  ;;  %v8564_v31 = vpop.f32.mrb[22].mxu0  ;;  %v8595_v53 = vadd.f32 %v502_v28, %v8488_v46  ;;  %14288 = vst [vmem:[#allocation31_spill] sm:$0xff] %v8625_v22  ;;  %v8631_v26 = vadd.f32 %v8514_v2, %v8488_v46  ;;  %v583_v28 = vsel %vm549_vm2, %v8613_v7, 0.0 }
 0x1a2   :  { %v505_v33 = vpop.f32.mrb[7].mxu1  ;;  %v8569_v34 = vpop.f32.mrb[23].mxu0  ;;  %14282 = vst [vmem:[#allocation25_spill] sm:$0xff] %v8575_v36  ;;  %v8584_v41 = vadd.f32 %v7264_v30, %v8488_v46  ;;  %v712_v44 = vsel %vm549_vm2, %v8575_v36, 0.0  ;;  %v574_v30 = vsel %vm549_vm2, %v8625_v22, 0.0 }
 0x1a3   :  { %569 = vadd.xlane.f32.xlu0 %v568_v27  ;;  %14284 = vst [vmem:[#allocation27_spill] sm:$0xff] %v8595_v53  ;;  %v8603_v58 = vadd.f32 %v505_v33, %v8488_v46  ;;  %v706_v60 = vsel %vm549_vm2, %v8595_v53, 0.0  ;;  %14289 = vst [vmem:[#allocation32_spill] sm:$0xff] %v8631_v26  ;;  %v577_v2 = vsel %vm549_vm2, %v8631_v26, 0.0 }
 0x1a4   :  { %14283 = vst [vmem:[#allocation26_spill] sm:$0xff] %v8584_v41  ;;  %v715_v59 = vsel %vm549_vm2, %v8584_v41, 0.0 }
 0x1a5   :  { %572 = vadd.xlane.f32.xlu1 %v571_v37  ;;  %14286 = vst [vmem:[#allocation29_spill] sm:$0xff] %v8603_v58  ;;  %v709_v63 = vsel %vm549_vm2, %v8603_v58, 0.0 }
 0x1a7   :  { %563 = vadd.xlane.f32.xlu0 %v562_v38  ;;  %v8581_v39 = vpop.f32.mrb[24].mxu0  ;;  %v7267_v40 = vpop.f32.mrb[8].mxu1 }
 0x1a8   :  { %v8590_v45 = vpop.f32.mrb[25].mxu0  ;;  %v518_v47 = vpop.f32.mrb[9].mxu1  ;;  %v8634_v27 = vadd.f32 %v7267_v40, %v8488_v46 }
 0x1a9   :  { %566 = vadd.xlane.f32.xlu1 %v565_v42  ;;  %v8592_v49 = vpop.f32.mrb[26].mxu0  ;;  %v7268_v51 = vpop.f32.mrb[10].mxu1  ;;  %v8654_v42 = vadd.f32 %v518_v47, %v8488_v46  ;;  %v8673_v47 = vadd.f32 %v8520_v5, %v8488_v46  ;;  %v8691_v5 = vadd.f32 %v8522_v6, %v8488_v46 }
 0x1aa   :  { %v8597_v54 = vpop.f32.mrb[27].mxu0  ;;  %v521_v56 = vpop.f32.mrb[11].mxu1  ;;  %14290 = vst [vmem:[#allocation33_spill] sm:$0xff] %v8634_v27  ;;  %v8643_v33 = vadd.f32 %v7268_v51, %v8488_v46  ;;  %v724_v38 = vsel %vm549_vm2, %v8634_v27, 0.0  ;;  %v8660_v51 = vadd.f32 %v8516_v3, %v8488_v46 }
 0x1ab   :  { %713 = vadd.xlane.f32.xlu0 %v712_v44  ;;  %14292 = vst [vmem:[#allocation35_spill] sm:$0xff] %v8654_v42  ;;  %14295 = vst [vmem:[#allocation38_spill] sm:$0xff] %v8673_v47  ;;  %v589_v6 = vsel %vm549_vm2, %v8691_v5, 0.0 }
 0x1ac   :  { %14291 = vst [vmem:[#allocation34_spill] sm:$0xff] %v8643_v33  ;;  %14293 = vst [vmem:[#allocation36_spill] sm:$0xff] %v8660_v51 }
 0x1ad   :  { %716 = vadd.xlane.f32.xlu1 %v715_v59  ;;  %v8663_v59 = vadd.f32 %v521_v56, %v8488_v46  ;;  %v592_v56 = vsel %vm549_vm2, %v8660_v51, 0.0  ;;  %14297 = vst [vmem:[#allocation40_spill] sm:$0xff] %v8691_v5 }
 0x1af   :  { %707 = vadd.xlane.f32.xlu0 %v706_v60  ;;  %v8609_v61 = vpop.f32.mrb[28].mxu0  ;;  %v7271_v62 = vpop.f32.mrb[12].mxu1  ;;  %14294 = vst [vmem:[#allocation37_spill] sm:$0xff] %v8663_v59  ;;  %v727_v60 = vsel %vm549_vm2, %v8643_v33, 0.0  ;;  %v721_v3 = vsel %vm549_vm2, %v8663_v59, 0.0 }
 0x1b0   :  { %v8619_v12 = vpop.f32.mrb[29].mxu0  ;;  %v534_v16 = vpop.f32.mrb[13].mxu1 }
 0x1b1   :  { %710 = vadd.xlane.f32.xlu1 %v709_v63  ;;  %v8621_v17 = vpop.f32.mrb[30].mxu0  ;;  %v7272_v21 = vpop.f32.mrb[14].mxu1  ;;  %v718_v63 = vsel %vm549_vm2, %v8654_v42, 0.0 }
 0x1b2   :  { %v8627_v23 = vpop.f32.mrb[31].mxu0  ;;  %v537_v1 = vpop.f32.mrb[15].mxu1 }
 0x1b3   :  { %581 = vadd.xlane.f32.xlu0 %v580_v10 }
 0x1b5   :  { %584 = vadd.xlane.f32.xlu1 %v583_v28 }
 0x1b7   :  { %v8640_v0 = vpop.f32.mrb[32].mxu0  ;;  %575 = vadd.xlane.f32.xlu0 %v574_v30 }
 0x1b8   :  { %v8645_v37 = vpop.f32.mrb[33].mxu0 }
 0x1b9   :  { %v8651_v40 = vpop.f32.mrb[34].mxu0  ;;  %578 = vadd.xlane.f32.xlu1 %v577_v2  ;;  %v8685_v2 = vadd.f32 %v8518_v4, %v8488_v46  ;;  %v8703_v4 = vadd.f32 %v7272_v21, %v8488_v46  ;;  %v8720_v21 = vadd.f32 %v8524_v8, %v8488_v46 }
 0x1ba   :  { %v8656_v44 = vpop.f32.mrb[35].mxu0 }
 0x1bb   :  { %725 = vadd.xlane.f32.xlu0 %v724_v38  ;;  %14296 = vst [vmem:[#allocation39_spill] sm:$0xff] %v8685_v2  ;;  %14299 = vst [vmem:[#allocation42_spill] sm:$0xff] %v8703_v4  ;;  %v739_v5 = vsel %vm549_vm2, %v8703_v4, 0.0 }
 0x1bc   :  { %14301 = vst [vmem:[#allocation44_spill] sm:$0xff] %v8720_v21 }
 0x1bd   :  { %728 = vadd.xlane.f32.xlu1 %v727_v60  ;;  %v8694_v60 = vadd.f32 %v7271_v62, %v8488_v46 }
 0x1bf   :  { %v8669_v10 = vpop.f32.mrb[36].mxu0  ;;  %719 = vadd.xlane.f32.xlu0 %v718_v63  ;;  %14298 = vst [vmem:[#allocation41_spill] sm:$0xff] %v8694_v60  ;;  %v595_v63 = vsel %vm549_vm2, %v8673_v47, 0.0  ;;  %v736_v62 = vsel %vm549_vm2, %v8694_v60, 0.0 }
 0x1c0   :  { %v8675_v28 = vpop.f32.mrb[37].mxu0 }
 0x1c1   :  { %v8681_v30 = vpop.f32.mrb[38].mxu0  ;;  %722 = vadd.xlane.f32.xlu1 %v721_v3  ;;  %v586_v3 = vsel %vm549_vm2, %v8685_v2, 0.0 }
 0x1c2   :  { %v8687_v38 = vpop.f32.mrb[39].mxu0 }
 0x1c3   :  { %593 = vadd.xlane.f32.xlu0 %v592_v56 }
 0x1c5   :  { %596 = vadd.xlane.f32.xlu1 %v595_v63  ;;  %v8714_v63 = vadd.f32 %v534_v16, %v8488_v46  ;;  %v8733_v16 = vadd.f32 %v8531_v13, %v8488_v46  ;;  %v8751_v13 = vadd.f32 %v8541_v18, %v8488_v46 }
 0x1c7   :  { %v8700_v43 = vpop.f32.mrb[40].mxu0  ;;  %587 = vadd.xlane.f32.xlu0 %v586_v3  ;;  %14300 = vst [vmem:[#allocation43_spill] sm:$0xff] %v8714_v63  ;;  %v8723_v3 = vadd.f32 %v537_v1, %v8488_v46  ;;  %14303 = vst [vmem:[#allocation46_spill] sm:$0xff] %v8733_v16  ;;  %v604_v1 = vsel %vm549_vm2, %v8720_v21, 0.0  ;;  %v607_v21 = vsel %vm549_vm2, %v8733_v16, 0.0  ;;  %v601_v18 = vsel %vm549_vm2, %v8751_v13, 0.0 }
 0x1c8   :  { %v8705_v56 = vpop.f32.mrb[41].mxu0  ;;  %14305 = vst [vmem:[#allocation48_spill] sm:$0xff] %v8751_v13 }
 0x1c9   :  { %v8711_v51 = vpop.f32.mrb[42].mxu0  ;;  %590 = vadd.xlane.f32.xlu1 %v589_v6  ;;  %14302 = vst [vmem:[#allocation45_spill] sm:$0xff] %v8723_v3  ;;  %v730_v6 = vsel %vm549_vm2, %v8714_v63, 0.0  ;;  %v733_v8 = vsel %vm549_vm2, %v8723_v3, 0.0  ;;  %v8755_v3 = vadd.f32 %v8553_v24, %v8488_v46  ;;  %v8771_v24 = vadd.f32 %v8562_v29, %v8488_v46 }
 0x1ca   :  { %v8716_v2 = vpop.f32.mrb[43].mxu0  ;;  %v8787_v29 = vadd.f32 %v8592_v49, %v8488_v46  ;;  %v8803_v49 = vadd.f32 %v8609_v61, %v8488_v46  ;;  %v8819_v61 = vadd.f32 %v8619_v12, %v8488_v46  ;;  %v8835_v12 = vadd.f32 %v8651_v40, %v8488_v46 }
 0x1cb   :  { %737 = vadd.xlane.f32.xlu0 %v736_v62  ;;  %14306 = vst [vmem:[#allocation49_spill] sm:$0xff] %v8755_v3  ;;  %14308 = vst [vmem:[#allocation51_spill] sm:$0xff] %v8771_v24 }
 0x1cc   :  { %14311 = vst [vmem:[#allocation54_spill] sm:$0xff] %v8787_v29  ;;  %14314 = vst [vmem:[#allocation57_spill] sm:$0xff] %v8803_v49  ;;  %v655_v40 = vsel %vm549_vm2, %v8835_v12, 0.0 }
 0x1cd   :  { %740 = vadd.xlane.f32.xlu1 %v739_v5  ;;  %v8745_v5 = vadd.f32 %v8529_v11, %v8488_v46  ;;  %v8763_v11 = vadd.f32 %v8564_v31, %v8488_v46  ;;  %v8779_v31 = vadd.f32 %v8581_v39, %v8488_v46  ;;  %v8795_v39 = vadd.f32 %v8590_v45, %v8488_v46 }
 0x1ce   :  { %v8811_v45 = vadd.f32 %v8621_v17, %v8488_v46  ;;  %14316 = vst [vmem:[#allocation59_spill] sm:$0xff] %v8819_v61  ;;  %14319 = vst [vmem:[#allocation62_spill] sm:$0xff] %v8835_v12 }
 0x1cf   :  { %v8729_v60 = vpop.f32.mrb[44].mxu0  ;;  %731 = vadd.xlane.f32.xlu0 %v730_v6  ;;  %14304 = vst [vmem:[#allocation47_spill] sm:$0xff] %v8745_v5  ;;  %14307 = vst [vmem:[#allocation50_spill] sm:$0xff] %v8763_v11 }
 0x1d0   :  { %v8735_v62 = vpop.f32.mrb[45].mxu0  ;;  %14310 = vst [vmem:[#allocation53_spill] sm:$0xff] %v8779_v31  ;;  %14312 = vst [vmem:[#allocation55_spill] sm:$0xff] %v8795_v39  ;;  %v643_v17 = vsel %vm549_vm2, %v8811_v45, 0.0 }
 0x1d1   :  { %v8741_v4 = vpop.f32.mrb[46].mxu0  ;;  %734 = vadd.xlane.f32.xlu1 %v733_v8  ;;  %v598_v8 = vsel %vm549_vm2, %v8745_v5, 0.0  ;;  %14315 = vst [vmem:[#allocation58_spill] sm:$0xff] %v8811_v45 }
 0x1d2   :  { %v8747_v6 = vpop.f32.mrb[47].mxu0 }
 0x1d3   :  { %605 = vadd.xlane.f32.xlu0 %v604_v1  ;;  %v616_v1 = vsel %vm549_vm2, %v8755_v3, 0.0 }
 0x1d5   :  { %608 = vadd.xlane.f32.xlu1 %v607_v21  ;;  %v8775_v21 = vadd.f32 %v8569_v34, %v8488_v46 }
 0x1d7   :  { %599 = vadd.xlane.f32.xlu0 %v598_v8  ;;  %14309 = vst [vmem:[#allocation52_spill] sm:$0xff] %v8775_v21  ;;  %v619_v8 = vsel %vm549_vm2, %v8763_v11, 0.0  ;;  %v613_v34 = vsel %vm549_vm2, %v8775_v21, 0.0 }
 0x1d9   :  { %602 = vadd.xlane.f32.xlu1 %v601_v18  ;;  %v610_v18 = vsel %vm549_vm2, %v8771_v24, 0.0 }
 0x1db   :  { %617 = vadd.xlane.f32.xlu0 %v616_v1  ;;  %v628_v1 = vsel %vm549_vm2, %v8779_v31, 0.0 }
 0x1dd   :  { %620 = vadd.xlane.f32.xlu1 %v619_v8  ;;  %v8799_v8 = vadd.f32 %v8597_v54, %v8488_v46 }
 0x1df   :  { %611 = vadd.xlane.f32.xlu0 %v610_v18  ;;  %14313 = vst [vmem:[#allocation56_spill] sm:$0xff] %v8799_v8  ;;  %v631_v18 = vsel %vm549_vm2, %v8787_v29, 0.0  ;;  %v625_v54 = vsel %vm549_vm2, %v8799_v8, 0.0 }
 0x1e1   :  { %614 = vadd.xlane.f32.xlu1 %v613_v34  ;;  %v622_v34 = vsel %vm549_vm2, %v8795_v39, 0.0 }
 0x1e3   :  { %629 = vadd.xlane.f32.xlu0 %v628_v1  ;;  %v640_v1 = vsel %vm549_vm2, %v8803_v49, 0.0 }
 0x1e5   :  { %632 = vadd.xlane.f32.xlu1 %v631_v18  ;;  %v8823_v18 = vadd.f32 %v8627_v23, %v8488_v46 }
 0x1e7   :  { %623 = vadd.xlane.f32.xlu0 %v622_v34  ;;  %14317 = vst [vmem:[#allocation60_spill] sm:$0xff] %v8823_v18  ;;  %v8829_v34 = vadd.f32 %v8640_v0, %v8488_v46  ;;  %v637_v23 = vsel %vm549_vm2, %v8823_v18, 0.0 }
 0x1e9   :  { %626 = vadd.xlane.f32.xlu1 %v625_v54  ;;  %14318 = vst [vmem:[#allocation61_spill] sm:$0xff] %v8829_v34  ;;  %v634_v54 = vsel %vm549_vm2, %v8819_v61, 0.0  ;;  %v652_v0 = vsel %vm549_vm2, %v8829_v34, 0.0 }
 0x1eb   :  { %641 = vadd.xlane.f32.xlu0 %v640_v1  ;;  %v8841_v1 = vadd.f32 %v8645_v37, %v8488_v46 }
 0x1ed   :  { %644 = vadd.xlane.f32.xlu1 %v643_v17  ;;  %14320 = vst [vmem:[#allocation63_spill] sm:$0xff] %v8841_v1  ;;  %v8847_v17 = vadd.f32 %v8656_v44, %v8488_v46  ;;  %v646_v37 = vsel %vm549_vm2, %v8841_v1, 0.0 }
 0x1ef   :  { %635 = vadd.xlane.f32.xlu0 %v634_v54  ;;  %14321 = vst [vmem:[#allocation64_spill] sm:$0xff] %v8847_v17  ;;  %v8853_v54 = vadd.f32 %v8669_v10, %v8488_v46  ;;  %v649_v44 = vsel %vm549_vm2, %v8847_v17, 0.0 }
 0x1f1   :  { %638 = vadd.xlane.f32.xlu1 %v637_v23  ;;  %14322 = vst [vmem:[#allocation65_spill] sm:$0xff] %v8853_v54  ;;  %v8859_v23 = vadd.f32 %v8681_v30, %v8488_v46  ;;  %v664_v10 = vsel %vm549_vm2, %v8853_v54, 0.0 }
 0x1f3   :  { %653 = vadd.xlane.f32.xlu0 %v652_v0  ;;  %14323 = vst [vmem:[#allocation66_spill] sm:$0xff] %v8859_v23  ;;  %v8865_v0 = vadd.f32 %v8675_v28, %v8488_v46  ;;  %v667_v30 = vsel %vm549_vm2, %v8859_v23, 0.0 }
 0x1f5   :  { %656 = vadd.xlane.f32.xlu1 %v655_v40  ;;  %14324 = vst [vmem:[#allocation67_spill] sm:$0xff] %v8865_v0  ;;  %v8871_v40 = vadd.f32 %v8687_v38, %v8488_v46  ;;  %v658_v28 = vsel %vm549_vm2, %v8865_v0, 0.0 }
 0x1f7   :  { %647 = vadd.xlane.f32.xlu0 %v646_v37  ;;  %14325 = vst [vmem:[#allocation68_spill] sm:$0xff] %v8871_v40  ;;  %v8877_v37 = vadd.f32 %v8700_v43, %v8488_v46  ;;  %v661_v38 = vsel %vm549_vm2, %v8871_v40, 0.0 }
 0x1f9   :  { %650 = vadd.xlane.f32.xlu1 %v649_v44  ;;  %14326 = vst [vmem:[#allocation69_spill] sm:$0xff] %v8877_v37  ;;  %v8883_v44 = vadd.f32 %v8711_v51, %v8488_v46  ;;  %v676_v43 = vsel %vm549_vm2, %v8877_v37, 0.0 }
 0x1fb   :  { %665 = vadd.xlane.f32.xlu0 %v664_v10  ;;  %14327 = vst [vmem:[#allocation70_spill] sm:$0xff] %v8883_v44  ;;  %v8889_v10 = vadd.f32 %v8705_v56, %v8488_v46  ;;  %v679_v51 = vsel %vm549_vm2, %v8883_v44, 0.0 }
 0x1fd   :  { %668 = vadd.xlane.f32.xlu1 %v667_v30  ;;  %14328 = vst [vmem:[#allocation71_spill] sm:$0xff] %v8889_v10  ;;  %v8895_v30 = vadd.f32 %v8716_v2, %v8488_v46  ;;  %v670_v56 = vsel %vm549_vm2, %v8889_v10, 0.0 }
 0x1ff   :  { %659 = vadd.xlane.f32.xlu0 %v658_v28  ;;  %14329 = vst [vmem:[#allocation72_spill] sm:$0xff] %v8895_v30  ;;  %v8901_v28 = vadd.f32 %v8729_v60, %v8488_v46  ;;  %v673_v2 = vsel %vm549_vm2, %v8895_v30, 0.0 }
 0x201   :  { %662 = vadd.xlane.f32.xlu1 %v661_v38  ;;  %14330 = vst [vmem:[#allocation73_spill] sm:$0xff] %v8901_v28  ;;  %v8907_v38 = vadd.f32 %v8741_v4, %v8488_v46  ;;  %v688_v44 = vsel %vm549_vm2, %v8901_v28, 0.0  ;;  %v8922_v4 = vadd.f32 %v8747_v6, %v8488_v46 }
 0x203   :  { %677 = vadd.xlane.f32.xlu0 %v676_v43  ;;  %14331 = vst [vmem:[#allocation74_spill] sm:$0xff] %v8907_v38  ;;  %14333 = vst [vmem:[#allocation76_spill] sm:$0xff] %v8922_v4  ;;  %v685_v6 = vsel %vm549_vm2, %v8922_v4, 0.0 }
 0x205   :  { %680 = vadd.xlane.f32.xlu1 %v679_v51  ;;  %v8913_v51 = vadd.f32 %v8735_v62, %v8488_v46 }
 0x207   :  { %671 = vadd.xlane.f32.xlu0 %v670_v56  ;;  %14332 = vst [vmem:[#allocation75_spill] sm:$0xff] %v8913_v51 }
 0x208   :  { %v558_v43 = vpop.xlane.xlu0 %557 }
 0x209   :  { %v745_v37 = vmul.f32 0.03125, %v558_v43  ;;  %674 = vadd.xlane.f32.xlu1 %v673_v2  ;;  %v691_v43 = vsel %vm549_vm2, %v8907_v38, 0.0 }
 0x20a   :  { %v561_v60 = vpop.xlane.xlu1 %560 }
 0x20b   :  { %v8918_v56 = vsub.f32 %v8491_v48, %v745_v37  ;;  %v746_v10 = vmul.f32 0.03125, %v561_v60  ;;  %689 = vadd.xlane.f32.xlu0 %v688_v44  ;;  %v682_v37 = vsel %vm549_vm2, %v8913_v51, 0.0 }
 0x20c   :  { %v552_v30 = vpop.xlane.xlu0 %551 }
 0x20d   :  { %v8927_v62 = vsub.f32 %v8497_v52, %v746_v10  ;;  %v743_v2 = vmul.f32 0.03125, %v552_v30  ;;  %692 = vadd.xlane.f32.xlu1 %v691_v43  ;;  %v873_v44 = vmul.f32 %v8918_v56, %v8918_v56 }
 0x20e   :  { %v555_v40 = vpop.xlane.xlu1 %554 }
 0x20f   :  { %v8934_v60 = vsub.f32 %v8494_v50, %v743_v2  ;;  %v744_v46 = vmul.f32 0.03125, %v555_v40  ;;  %683 = vadd.xlane.f32.xlu0 %v682_v37  ;;  %v874_v10 = vmul.f32 %v8927_v62, %v8927_v62  ;;  %v941_v43 = vsel %vm549_vm2, %v873_v44, 0.0 }
 0x211   :  { %14334 = vst [vmem:[#allocation77_spill] sm:$0xff] %v8934_v60  ;;  %v8941_v30 = vsub.f32 %v8502_v55, %v744_v46  ;;  %686 = vadd.xlane.f32.xlu1 %v685_v6  ;;  %v871_v52 = vmul.f32 %v8934_v60, %v8934_v60  ;;  %v944_v2 = vsel %vm549_vm2, %v874_v10, 0.0 }
 0x213   :  { %942 = vadd.xlane.f32.xlu0 %v941_v43  ;;  %v872_v40 = vmul.f32 %v8941_v30, %v8941_v30  ;;  %v935_v37 = vsel %vm549_vm2, %v871_v52, 0.0 }
 0x215   :  { %945 = vadd.xlane.f32.xlu1 %v944_v2  ;;  %v938_v50 = vsel %vm549_vm2, %v872_v40, 0.0 }
 0x217   :  { %936 = vadd.xlane.f32.xlu0 %v935_v37 }
 0x219   :  { %939 = vadd.xlane.f32.xlu1 %v938_v50 }
 0x228   :  { %v702_v46 = vpop.xlane.xlu0 %701 }
 0x229   :  { %v793_v6 = vmul.f32 0.03125, %v702_v46 }
 0x22a   :  { %v705_v55 = vpop.xlane.xlu1 %704 }
 0x22b   :  { %v8952_v44 = vsub.f32 %v8527_v9, %v793_v6  ;;  %v794_v48 = vmul.f32 0.03125, %v705_v55 }
 0x22c   :  { %v696_v43 = vpop.xlane.xlu0 %695 }
 0x22d   :  { %v8955_v10 = vsub.f32 %v8537_v15, %v794_v48  ;;  %v791_v60 = vmul.f32 0.03125, %v696_v43  ;;  %v921_v2 = vmul.f32 %v8952_v44, %v8952_v44 }
 0x22e   :  { %v699_v52 = vpop.xlane.xlu1 %698 }
 0x22f   :  { %v8960_v37 = vsub.f32 %v8534_v14, %v791_v60  ;;  %v792_v50 = vmul.f32 0.03125, %v699_v52  ;;  %v1085_v40 = vsel %vm549_vm2, %v921_v2, 0.0  ;;  %v922_v46 = vmul.f32 %v8955_v10, %v8955_v10 }
 0x230   :  { %1086 = vadd.xlane.f32.xlu0 %v1085_v40  ;;  %v570_v55 = vpop.xlane.xlu0 %569 }
 0x231   :  { %v8966_v6 = vsub.f32 %v8544_v19, %v792_v50  ;;  %v749_v48 = vmul.f32 0.03125, %v570_v55  ;;  %v1088_v43 = vsel %vm549_vm2, %v922_v46, 0.0  ;;  %v919_v15 = vmul.f32 %v8960_v37, %v8960_v37 }
 0x232   :  { %1089 = vadd.xlane.f32.xlu1 %v1088_v43  ;;  %v573_v60 = vpop.xlane.xlu1 %572 }
 0x233   :  { %v8972_v52 = vsub.f32 %v8547_v20, %v749_v48  ;;  %v750_v2 = vmul.f32 0.03125, %v573_v60  ;;  %v1079_v14 = vsel %vm549_vm2, %v919_v15, 0.0  ;;  %v920_v40 = vmul.f32 %v8966_v6, %v8966_v6  ;;  %v7703_v48 = vld [vmem:[%s13807_s3] sm:$0xff]  }
 0x234   :  { %1080 = vadd.xlane.f32.xlu0 %v1079_v14  ;;  %v564_v50 = vpop.xlane.xlu0 %563  ;;  %7273 = vmatprep.subr.bf16.mxu1 %v7703_v48 }
 0x235   :  { %v8978_v55 = vsub.f32 %v8556_v25, %v750_v2  ;;  %v747_v46 = vmul.f32 0.03125, %v564_v50  ;;  %v1082_v19 = vsel %vm549_vm2, %v920_v40, 0.0  ;;  %v877_v43 = vmul.f32 %v8972_v52, %v8972_v52  ;;  %7274 = vmatpush3.bf16.msra.mxu1 %v7703_v48 }
 0x236   :  { %1083 = vadd.xlane.f32.xlu1 %v1082_v19  ;;  %v567_v15 = vpop.xlane.xlu1 %566 }
 0x237   :  { %v8987_v60 = vsub.f32 %v8567_v32, %v747_v46  ;;  %v748_v14 = vmul.f32 0.03125, %v567_v15  ;;  %v953_v9 = vsel %vm549_vm2, %v877_v43, 0.0  ;;  %v878_v2 = vmul.f32 %v8978_v55, %v8978_v55  ;;  %v7704_v43 = vld [vmem:[%s13807_s3 + $0x8] sm:$0xff]   ;;  %s8341_s3 = smov 32  }
 0x238   :  { %954 = vadd.xlane.f32.xlu0 %v953_v9  ;;  %v714_v40 = vpop.xlane.xlu0 %713  ;;  %7275 = vmatprep.subr.bf16.mxu1 %v7704_v43 }
 0x239   :  { %v8993_v50 = vsub.f32 %v8572_v35, %v748_v14  ;;  %v797_v25 = vmul.f32 0.03125, %v714_v40  ;;  %v956_v19 = vsel %vm549_vm2, %v878_v2, 0.0  ;;  %v875_v46 = vmul.f32 %v8987_v60, %v8987_v60  ;;  %7276 = vmatpush3.bf16.msra.mxu1 %v7704_v43 }
 0x23a   :  { %957 = vadd.xlane.f32.xlu1 %v956_v19  ;;  %v717_v15 = vpop.xlane.xlu1 %716 }
 0x23b   :  { %v9002_v32 = vsub.f32 %v8575_v36, %v797_v25  ;;  %v798_v9 = vmul.f32 0.03125, %v717_v15  ;;  %v947_v48 = vsel %vm549_vm2, %v875_v46, 0.0  ;;  %v876_v14 = vmul.f32 %v8993_v50, %v8993_v50 }
 0x23c   :  { %948 = vadd.xlane.f32.xlu0 %v947_v48  ;;  %v708_v2 = vpop.xlane.xlu0 %707 }
 0x23d   :  { %v9008_v40 = vsub.f32 %v8584_v41, %v798_v9  ;;  %v795_v35 = vmul.f32 0.03125, %v708_v2  ;;  %v950_v19 = vsel %vm549_vm2, %v876_v14, 0.0  ;;  %v925_v25 = vmul.f32 %v9002_v32, %v9002_v32 }
 0x23e   :  { %951 = vadd.xlane.f32.xlu1 %v950_v19  ;;  %v711_v15 = vpop.xlane.xlu1 %710 }
 0x23f   :  { %v9014_v46 = vsub.f32 %v8595_v53, %v795_v35  ;;  %v796_v36 = vmul.f32 0.03125, %v711_v15  ;;  %v1097_v20 = vsel %vm549_vm2, %v925_v25, 0.0  ;;  %v926_v43 = vmul.f32 %v9008_v40, %v9008_v40 }
 0x240   :  { %1098 = vadd.xlane.f32.xlu0 %v1097_v20  ;;  %v582_v9 = vpop.xlane.xlu0 %581 }
 0x241   :  { %v9020_v48 = vsub.f32 %v8603_v58, %v796_v36  ;;  %v753_v14 = vmul.f32 0.03125, %v582_v9  ;;  %v1100_v2 = vsel %vm549_vm2, %v926_v43, 0.0  ;;  %v923_v19 = vmul.f32 %v9014_v46, %v9014_v46 }
 0x242   :  { %1101 = vadd.xlane.f32.xlu1 %v1100_v2  ;;  %v585_v35 = vpop.xlane.xlu1 %584 }
 0x243   :  { %14335 = vst [vmem:[#allocation78_spill] sm:$0xff] %v9020_v48  ;;  %v9026_v15 = vsub.f32 %v8600_v57, %v753_v14  ;;  %v754_v25 = vmul.f32 0.03125, %v585_v35  ;;  %v1091_v53 = vsel %vm549_vm2, %v923_v19, 0.0  ;;  %v924_v20 = vmul.f32 %v9020_v48, %v9020_v48 }
 0x244   :  { %1092 = vadd.xlane.f32.xlu0 %v1091_v53  ;;  %v576_v36 = vpop.xlane.xlu0 %575 }
 0x245   :  { %v9032_v9 = vsub.f32 %v8613_v7, %v754_v25  ;;  %v751_v43 = vmul.f32 0.03125, %v576_v36  ;;  %v1094_v58 = vsel %vm549_vm2, %v924_v20, 0.0  ;;  %v881_v2 = vmul.f32 %v9026_v15, %v9026_v15 }
 0x246   :  { %1095 = vadd.xlane.f32.xlu1 %v1094_v58  ;;  %v579_v14 = vpop.xlane.xlu1 %578 }
 0x247   :  { %v9038_v35 = vsub.f32 %v8625_v22, %v751_v43  ;;  %v752_v19 = vmul.f32 0.03125, %v579_v14  ;;  %v965_v41 = vsel %vm549_vm2, %v881_v2, 0.0  ;;  %v882_v53 = vmul.f32 %v9032_v9, %v9032_v9 }
 0x248   :  { %966 = vadd.xlane.f32.xlu0 %v965_v41  ;;  %v726_v25 = vpop.xlane.xlu0 %725 }
 0x249   :  { %v9044_v36 = vsub.f32 %v8631_v26, %v752_v19  ;;  %v801_v20 = vmul.f32 0.03125, %v726_v25  ;;  %v968_v7 = vsel %vm549_vm2, %v882_v53, 0.0  ;;  %v879_v58 = vmul.f32 %v9038_v35, %v9038_v35 }
 0x24a   :  { %969 = vadd.xlane.f32.xlu1 %v968_v7  ;;  %v729_v43 = vpop.xlane.xlu1 %728 }
 0x24b   :  { %v9050_v14 = vsub.f32 %v8634_v27, %v801_v20  ;;  %v802_v2 = vmul.f32 0.03125, %v729_v43  ;;  %v959_v22 = vsel %vm549_vm2, %v879_v58, 0.0  ;;  %v880_v41 = vmul.f32 %v9044_v36, %v9044_v36 }
 0x24c   :  { %960 = vadd.xlane.f32.xlu0 %v959_v22  ;;  %v720_v19 = vpop.xlane.xlu0 %719 }
 0x24d   :  { %14336 = vst [vmem:[#allocation79_spill] sm:$0xff] %v9050_v14  ;;  %v9056_v25 = vsub.f32 %v8643_v33, %v802_v2  ;;  %v799_v53 = vmul.f32 0.03125, %v720_v19  ;;  %v962_v26 = vsel %vm549_vm2, %v880_v41, 0.0  ;;  %v929_v7 = vmul.f32 %v9050_v14, %v9050_v14 }
 0x24e   :  { %963 = vadd.xlane.f32.xlu1 %v962_v26  ;;  %v723_v20 = vpop.xlane.xlu1 %722 }
 0x24f   :  { %14337 = vst [vmem:[#allocation80_spill] sm:$0xff] %v9056_v25  ;;  %v9062_v43 = vsub.f32 %v8654_v42, %v799_v53  ;;  %v800_v58 = vmul.f32 0.03125, %v723_v20  ;;  %v1109_v27 = vsel %vm549_vm2, %v929_v7, 0.0  ;;  %v930_v22 = vmul.f32 %v9056_v25, %v9056_v25  ;;  %v14340_v42 = vld [vmem:[#allocation36_spill] sm:$0xff] }
 0x250   :  { %1110 = vadd.xlane.f32.xlu0 %v1109_v27  ;;  %v594_v2 = vpop.xlane.xlu0 %593 }
 0x251   :  { %14338 = vst [vmem:[#allocation81_spill] sm:$0xff] %v9062_v43  ;;  %v9068_v19 = vsub.f32 %v8663_v59, %v800_v58  ;;  %v757_v41 = vmul.f32 0.03125, %v594_v2  ;;  %v1112_v33 = vsel %vm549_vm2, %v930_v22, 0.0  ;;  %v927_v26 = vmul.f32 %v9062_v43, %v9062_v43 }
 0x252   :  { %1113 = vadd.xlane.f32.xlu1 %v1112_v33  ;;  %v597_v53 = vpop.xlane.xlu1 %596 }
 0x253   :  { %14339 = vst [vmem:[#allocation82_spill] sm:$0xff] %v9068_v19  ;;  %v9074_v20 = vsub.f32 %v14340_v42, %v757_v41  ;;  %v758_v7 = vmul.f32 0.03125, %v597_v53  ;;  %v1103_v57 = vsel %vm549_vm2, %v927_v26, 0.0  ;;  %v928_v27 = vmul.f32 %v9068_v19, %v9068_v19  ;;  %v14341_v42 = vld [vmem:[#allocation39_spill] sm:$0xff] }
 0x254   :  { %1104 = vadd.xlane.f32.xlu0 %v1103_v57  ;;  %v588_v58 = vpop.xlane.xlu0 %587 }
 0x255   :  { %v9080_v2 = vsub.f32 %v8673_v47, %v758_v7  ;;  %v755_v22 = vmul.f32 0.03125, %v588_v58  ;;  %v1106_v59 = vsel %vm549_vm2, %v928_v27, 0.0  ;;  %v885_v33 = vmul.f32 %v9074_v20, %v9074_v20  ;;  %v14342_v47 = vld [vmem:[#allocation40_spill] sm:$0xff] }
 0x256   :  { %1107 = vadd.xlane.f32.xlu1 %v1106_v59  ;;  %v591_v41 = vpop.xlane.xlu1 %590 }
 0x257   :  { %v9086_v53 = vsub.f32 %v14341_v42, %v755_v22  ;;  %v756_v26 = vmul.f32 0.03125, %v591_v41  ;;  %v977_v43 = vsel %vm549_vm2, %v885_v33, 0.0  ;;  %v886_v57 = vmul.f32 %v9080_v2, %v9080_v2  ;;  %v14343_v42 = vld [vmem:[#allocation41_spill] sm:$0xff] }
 0x258   :  { %978 = vadd.xlane.f32.xlu0 %v977_v43  ;;  %v738_v7 = vpop.xlane.xlu0 %737 }
 0x259   :  { %v9092_v58 = vsub.f32 %v14342_v47, %v756_v26  ;;  %v805_v27 = vmul.f32 0.03125, %v738_v7  ;;  %v980_v19 = vsel %vm549_vm2, %v886_v57, 0.0  ;;  %v883_v59 = vmul.f32 %v9086_v53, %v9086_v53  ;;  %v14345_v47 = vld [vmem:[#allocation42_spill] sm:$0xff] }
 0x25a   :  { %981 = vadd.xlane.f32.xlu1 %v980_v19  ;;  %v741_v22 = vpop.xlane.xlu1 %740 }
 0x25b   :  { %v9098_v41 = vsub.f32 %v14343_v42, %v805_v27  ;;  %v806_v33 = vmul.f32 0.03125, %v741_v22  ;;  %v971_v25 = vsel %vm549_vm2, %v883_v59, 0.0  ;;  %v884_v43 = vmul.f32 %v9092_v58, %v9092_v58 }
 0x25c   :  { %972 = vadd.xlane.f32.xlu0 %v971_v25  ;;  %v732_v26 = vpop.xlane.xlu0 %731 }
 0x25d   :  { %14344 = vst [vmem:[#allocation83_spill] sm:$0xff] %v9098_v41  ;;  %v9104_v7 = vsub.f32 %v14345_v47, %v806_v33  ;;  %v803_v57 = vmul.f32 0.03125, %v732_v26  ;;  %v974_v14 = vsel %vm549_vm2, %v884_v43, 0.0  ;;  %v933_v19 = vmul.f32 %v9098_v41, %v9098_v41  ;;  %v14348_v47 = vld [vmem:[#allocation45_spill] sm:$0xff] }
 0x25e   :  { %975 = vadd.xlane.f32.xlu1 %v974_v14  ;;  %v735_v27 = vpop.xlane.xlu1 %734 }
 0x25f   :  { %14346 = vst [vmem:[#allocation84_spill] sm:$0xff] %v9104_v7  ;;  %v9110_v22 = vsub.f32 %v8714_v63, %v803_v57  ;;  %v804_v59 = vmul.f32 0.03125, %v735_v27  ;;  %v1121_v42 = vsel %vm549_vm2, %v933_v19, 0.0  ;;  %v934_v25 = vmul.f32 %v9104_v7, %v9104_v7  ;;  %v14350_v63 = vld [vmem:[#allocation44_spill] sm:$0xff] }
 0x260   :  { %1122 = vadd.xlane.f32.xlu0 %v1121_v42  ;;  %v606_v33 = vpop.xlane.xlu0 %605 }
 0x261   :  { %14347 = vst [vmem:[#allocation85_spill] sm:$0xff] %v9110_v22  ;;  %v9116_v26 = vsub.f32 %v14348_v47, %v804_v59  ;;  %v761_v43 = vmul.f32 0.03125, %v606_v33  ;;  %v1124_v48 = vsel %vm549_vm2, %v934_v25, 0.0  ;;  %v931_v14 = vmul.f32 %v9110_v22, %v9110_v22 }
 0x262   :  { %1125 = vadd.xlane.f32.xlu1 %v1124_v48  ;;  %v609_v57 = vpop.xlane.xlu1 %608 }
 0x263   :  { %14349 = vst [vmem:[#allocation86_spill] sm:$0xff] %v9116_v26  ;;  %v9122_v27 = vsub.f32 %v14350_v63, %v761_v43  ;;  %v762_v19 = vmul.f32 0.03125, %v609_v57  ;;  %v1115_v41 = vsel %vm549_vm2, %v931_v14, 0.0  ;;  %v932_v42 = vmul.f32 %v9116_v26, %v9116_v26 }
 0x264   :  { %1116 = vadd.xlane.f32.xlu0 %v1115_v41  ;;  %v600_v59 = vpop.xlane.xlu0 %599 }
 0x265   :  { %v9128_v33 = vsub.f32 %v8733_v16, %v762_v19  ;;  %v759_v25 = vmul.f32 0.03125, %v600_v59  ;;  %v1118_v47 = vsel %vm549_vm2, %v932_v42, 0.0  ;;  %v889_v48 = vmul.f32 %v9122_v27, %v9122_v27 }
 0x266   :  { %1119 = vadd.xlane.f32.xlu1 %v1118_v47  ;;  %v603_v43 = vpop.xlane.xlu1 %602 }
 0x267   :  { %v9134_v57 = vsub.f32 %v8745_v5, %v759_v25  ;;  %v760_v14 = vmul.f32 0.03125, %v603_v43  ;;  %v989_v63 = vsel %vm549_vm2, %v889_v48, 0.0  ;;  %v890_v41 = vmul.f32 %v9128_v33, %v9128_v33 }
 0x268   :  { %990 = vadd.xlane.f32.xlu0 %v989_v63  ;;  %v618_v19 = vpop.xlane.xlu0 %617 }
 0x269   :  { %v9140_v59 = vsub.f32 %v8751_v13, %v760_v14  ;;  %v765_v42 = vmul.f32 0.03125, %v618_v19  ;;  %v992_v16 = vsel %vm549_vm2, %v890_v41, 0.0  ;;  %v887_v47 = vmul.f32 %v9134_v57, %v9134_v57 }
 0x26a   :  { %993 = vadd.xlane.f32.xlu1 %v992_v16  ;;  %v621_v25 = vpop.xlane.xlu1 %620 }
 0x26b   :  { %v9146_v43 = vsub.f32 %v8755_v3, %v765_v42  ;;  %v766_v48 = vmul.f32 0.03125, %v621_v25  ;;  %v983_v5 = vsel %vm549_vm2, %v887_v47, 0.0  ;;  %v888_v63 = vmul.f32 %v9140_v59, %v9140_v59 }
 0x26c   :  { %984 = vadd.xlane.f32.xlu0 %v983_v5  ;;  %v612_v14 = vpop.xlane.xlu0 %611 }
 0x26d   :  { %v9152_v19 = vsub.f32 %v8763_v11, %v766_v48  ;;  %v763_v41 = vmul.f32 0.03125, %v612_v14  ;;  %v986_v13 = vsel %vm549_vm2, %v888_v63, 0.0  ;;  %v893_v16 = vmul.f32 %v9146_v43, %v9146_v43 }
 0x26e   :  { %987 = vadd.xlane.f32.xlu1 %v986_v13  ;;  %v615_v42 = vpop.xlane.xlu1 %614 }
 0x26f   :  { %v9158_v25 = vsub.f32 %v8771_v24, %v763_v41  ;;  %v764_v47 = vmul.f32 0.03125, %v615_v42  ;;  %v1001_v3 = vsel %vm549_vm2, %v893_v16, 0.0  ;;  %v894_v5 = vmul.f32 %v9152_v19, %v9152_v19 }
 0x270   :  { %1002 = vadd.xlane.f32.xlu0 %v1001_v3  ;;  %v630_v48 = vpop.xlane.xlu0 %629 }
 0x271   :  { %v9164_v14 = vsub.f32 %v8775_v21, %v764_v47  ;;  %v769_v63 = vmul.f32 0.03125, %v630_v48  ;;  %v1004_v11 = vsel %vm549_vm2, %v894_v5, 0.0  ;;  %v891_v13 = vmul.f32 %v9158_v25, %v9158_v25 }
 0x272   :  { %1005 = vadd.xlane.f32.xlu1 %v1004_v11  ;;  %v633_v41 = vpop.xlane.xlu1 %632 }
 0x273   :  { %v9170_v42 = vsub.f32 %v8779_v31, %v769_v63  ;;  %v770_v16 = vmul.f32 0.03125, %v633_v41  ;;  %v995_v24 = vsel %vm549_vm2, %v891_v13, 0.0  ;;  %v892_v3 = vmul.f32 %v9164_v14, %v9164_v14 }
 0x274   :  { %996 = vadd.xlane.f32.xlu0 %v995_v24  ;;  %v624_v47 = vpop.xlane.xlu0 %623 }
 0x275   :  { %v9176_v48 = vsub.f32 %v8787_v29, %v770_v16  ;;  %v767_v5 = vmul.f32 0.03125, %v624_v47  ;;  %v998_v21 = vsel %vm549_vm2, %v892_v3, 0.0  ;;  %v897_v11 = vmul.f32 %v9170_v42, %v9170_v42 }
 0x276   :  { %999 = vadd.xlane.f32.xlu1 %v998_v21  ;;  %v627_v63 = vpop.xlane.xlu1 %626 }
 0x277   :  { %v9182_v41 = vsub.f32 %v8795_v39, %v767_v5  ;;  %v768_v13 = vmul.f32 0.03125, %v627_v63  ;;  %v1013_v31 = vsel %vm549_vm2, %v897_v11, 0.0  ;;  %v898_v24 = vmul.f32 %v9176_v48, %v9176_v48 }
 0x278   :  { %1014 = vadd.xlane.f32.xlu0 %v1013_v31  ;;  %v642_v16 = vpop.xlane.xlu0 %641 }
 0x279   :  { %v9188_v47 = vsub.f32 %v8799_v8, %v768_v13  ;;  %v773_v3 = vmul.f32 0.03125, %v642_v16  ;;  %v1016_v29 = vsel %vm549_vm2, %v898_v24, 0.0  ;;  %v895_v21 = vmul.f32 %v9182_v41, %v9182_v41 }
 0x27a   :  { %1017 = vadd.xlane.f32.xlu1 %v1016_v29  ;;  %v645_v5 = vpop.xlane.xlu1 %644 }
 0x27b   :  { %v9194_v63 = vsub.f32 %v8803_v49, %v773_v3  ;;  %v774_v11 = vmul.f32 0.03125, %v645_v5  ;;  %v1007_v39 = vsel %vm549_vm2, %v895_v21, 0.0  ;;  %v896_v31 = vmul.f32 %v9188_v47, %v9188_v47 }
 0x27c   :  { %1008 = vadd.xlane.f32.xlu0 %v1007_v39  ;;  %v636_v13 = vpop.xlane.xlu0 %635 }
 0x27d   :  { %v9200_v16 = vsub.f32 %v8811_v45, %v774_v11  ;;  %v771_v24 = vmul.f32 0.03125, %v636_v13  ;;  %v1010_v8 = vsel %vm549_vm2, %v896_v31, 0.0  ;;  %v901_v29 = vmul.f32 %v9194_v63, %v9194_v63 }
 0x27e   :  { %1011 = vadd.xlane.f32.xlu1 %v1010_v8  ;;  %v639_v3 = vpop.xlane.xlu1 %638 }
 0x27f   :  { %v9206_v5 = vsub.f32 %v8819_v61, %v771_v24  ;;  %v772_v21 = vmul.f32 0.03125, %v639_v3  ;;  %v1025_v49 = vsel %vm549_vm2, %v901_v29, 0.0  ;;  %v902_v39 = vmul.f32 %v9200_v16, %v9200_v16 }
 0x280   :  { %1026 = vadd.xlane.f32.xlu0 %v1025_v49  ;;  %v654_v11 = vpop.xlane.xlu0 %653 }
 0x281   :  { %v9212_v13 = vsub.f32 %v8823_v18, %v772_v21  ;;  %v777_v31 = vmul.f32 0.03125, %v654_v11  ;;  %v1028_v45 = vsel %vm549_vm2, %v902_v39, 0.0  ;;  %v899_v8 = vmul.f32 %v9206_v5, %v9206_v5 }
 0x282   :  { %1029 = vadd.xlane.f32.xlu1 %v1028_v45  ;;  %v657_v24 = vpop.xlane.xlu1 %656 }
 0x283   :  { %v9218_v3 = vsub.f32 %v8829_v34, %v777_v31  ;;  %v778_v29 = vmul.f32 0.03125, %v657_v24  ;;  %v1019_v61 = vsel %vm549_vm2, %v899_v8, 0.0  ;;  %v900_v49 = vmul.f32 %v9212_v13, %v9212_v13 }
 0x284   :  { %1020 = vadd.xlane.f32.xlu0 %v1019_v61  ;;  %v648_v21 = vpop.xlane.xlu0 %647 }
 0x285   :  { %v9224_v11 = vsub.f32 %v8835_v12, %v778_v29  ;;  %v775_v39 = vmul.f32 0.03125, %v648_v21  ;;  %v1022_v18 = vsel %vm549_vm2, %v900_v49, 0.0  ;;  %v905_v45 = vmul.f32 %v9218_v3, %v9218_v3 }
 0x286   :  { %1023 = vadd.xlane.f32.xlu1 %v1022_v18  ;;  %v651_v31 = vpop.xlane.xlu1 %650 }
 0x287   :  { %v9230_v24 = vsub.f32 %v8841_v1, %v775_v39  ;;  %v776_v8 = vmul.f32 0.03125, %v651_v31  ;;  %v1037_v34 = vsel %vm549_vm2, %v905_v45, 0.0  ;;  %v906_v61 = vmul.f32 %v9224_v11, %v9224_v11 }
 0x288   :  { %1038 = vadd.xlane.f32.xlu0 %v1037_v34  ;;  %v666_v29 = vpop.xlane.xlu0 %665 }
 0x289   :  { %v9236_v21 = vsub.f32 %v8847_v17, %v776_v8  ;;  %v781_v49 = vmul.f32 0.03125, %v666_v29  ;;  %v1040_v12 = vsel %vm549_vm2, %v906_v61, 0.0  ;;  %v903_v18 = vmul.f32 %v9230_v24, %v9230_v24 }
 0x28a   :  { %1041 = vadd.xlane.f32.xlu1 %v1040_v12  ;;  %v669_v39 = vpop.xlane.xlu1 %668 }
 0x28b   :  { %v9242_v31 = vsub.f32 %v8853_v54, %v781_v49  ;;  %v782_v45 = vmul.f32 0.03125, %v669_v39  ;;  %v1031_v1 = vsel %vm549_vm2, %v903_v18, 0.0  ;;  %v904_v34 = vmul.f32 %v9236_v21, %v9236_v21 }
 0x28c   :  { %1032 = vadd.xlane.f32.xlu0 %v1031_v1  ;;  %v660_v8 = vpop.xlane.xlu0 %659 }
 0x28d   :  { %v9248_v29 = vsub.f32 %v8859_v23, %v782_v45  ;;  %v779_v61 = vmul.f32 0.03125, %v660_v8  ;;  %v1034_v17 = vsel %vm549_vm2, %v904_v34, 0.0  ;;  %v909_v12 = vmul.f32 %v9242_v31, %v9242_v31  ;;  %v14352_v23 = vld [vmem:[#allocation68_spill] sm:$0xff] }
 0x28e   :  { %1035 = vadd.xlane.f32.xlu1 %v1034_v17  ;;  %v663_v49 = vpop.xlane.xlu1 %662 }
 0x28f   :  { %v9254_v39 = vsub.f32 %v8865_v0, %v779_v61  ;;  %v780_v18 = vmul.f32 0.03125, %v663_v49  ;;  %v1049_v54 = vsel %vm549_vm2, %v909_v12, 0.0  ;;  %v910_v1 = vmul.f32 %v9248_v29, %v9248_v29  ;;  %v14354_v0 = vld [vmem:[#allocation69_spill] sm:$0xff] }
 0x290   :  { %1050 = vadd.xlane.f32.xlu0 %v1049_v54  ;;  %v678_v45 = vpop.xlane.xlu0 %677 }
 0x291   :  { %14351 = vst [vmem:[#allocation87_spill] sm:$0xff] %v9254_v39  ;;  %v9260_v8 = vsub.f32 %v14352_v23, %v780_v18  ;;  %v785_v34 = vmul.f32 0.03125, %v678_v45  ;;  %v1052_v7 = vsel %vm549_vm2, %v910_v1, 0.0  ;;  %v907_v17 = vmul.f32 %v9254_v39, %v9254_v39  ;;  %v14356_v23 = vld [vmem:[#allocation70_spill] sm:$0xff] }
 0x292   :  { %1053 = vadd.xlane.f32.xlu1 %v1052_v7  ;;  %v681_v61 = vpop.xlane.xlu1 %680 }
 0x293   :  { %14353 = vst [vmem:[#allocation88_spill] sm:$0xff] %v9260_v8  ;;  %v9266_v49 = vsub.f32 %v14354_v0, %v785_v34  ;;  %v786_v12 = vmul.f32 0.03125, %v681_v61  ;;  %v1043_v22 = vsel %vm549_vm2, %v907_v17, 0.0  ;;  %v908_v54 = vmul.f32 %v9260_v8, %v9260_v8  ;;  %v14358_v0 = vld [vmem:[#allocation71_spill] sm:$0xff] }
 0x294   :  { %1044 = vadd.xlane.f32.xlu0 %v1043_v22  ;;  %v672_v18 = vpop.xlane.xlu0 %671 }
 0x295   :  { %14355 = vst [vmem:[#allocation89_spill] sm:$0xff] %v9266_v49  ;;  %v9272_v45 = vsub.f32 %v14356_v23, %v786_v12  ;;  %v783_v1 = vmul.f32 0.03125, %v672_v18  ;;  %v1046_v26 = vsel %vm549_vm2, %v908_v54, 0.0  ;;  %v913_v7 = vmul.f32 %v9266_v49, %v9266_v49  ;;  %v14360_v23 = vld [vmem:[#allocation72_spill] sm:$0xff] }
 0x296   :  { %1047 = vadd.xlane.f32.xlu1 %v1046_v26  ;;  %v675_v34 = vpop.xlane.xlu1 %674 }
 0x297   :  { %14357 = vst [vmem:[#allocation90_spill] sm:$0xff] %v9272_v45  ;;  %v9278_v61 = vsub.f32 %v14358_v0, %v783_v1  ;;  %v784_v17 = vmul.f32 0.03125, %v675_v34  ;;  %v1061_v39 = vsel %vm549_vm2, %v913_v7, 0.0  ;;  %v914_v22 = vmul.f32 %v9272_v45, %v9272_v45 }
 0x298   :  { %1062 = vadd.xlane.f32.xlu0 %v1061_v39  ;;  %v690_v12 = vpop.xlane.xlu0 %689 }
 0x299   :  { %14359 = vst [vmem:[#allocation91_spill] sm:$0xff] %v9278_v61  ;;  %v9284_v18 = vsub.f32 %v14360_v23, %v784_v17  ;;  %v789_v54 = vmul.f32 0.03125, %v690_v12  ;;  %v1064_v8 = vsel %vm549_vm2, %v914_v22, 0.0  ;;  %v911_v26 = vmul.f32 %v9278_v61, %v9278_v61 }
 0x29a   :  { %1065 = vadd.xlane.f32.xlu1 %v1064_v8  ;;  %v693_v1 = vpop.xlane.xlu1 %692 }
 0x29b   :  { %14361 = vst [vmem:[#allocation92_spill] sm:$0xff] %v9284_v18  ;;  %v9290_v34 = vsub.f32 %v8901_v28, %v789_v54  ;;  %v790_v7 = vmul.f32 0.03125, %v693_v1  ;;  %v1055_v0 = vsel %vm549_vm2, %v911_v26, 0.0  ;;  %v912_v39 = vmul.f32 %v9284_v18, %v9284_v18 }
 0x29c   :  { %1056 = vadd.xlane.f32.xlu0 %v1055_v0  ;;  %v684_v17 = vpop.xlane.xlu0 %683 }
 0x29d   :  { %14362 = vst [vmem:[#allocation93_spill] sm:$0xff] %v9290_v34  ;;  %v9296_v12 = vsub.f32 %v8907_v38, %v790_v7  ;;  %v787_v22 = vmul.f32 0.03125, %v684_v17  ;;  %v1058_v23 = vsel %vm549_vm2, %v912_v39, 0.0  ;;  %v917_v8 = vmul.f32 %v9290_v34, %v9290_v34 }
 0x29e   :  { %1059 = vadd.xlane.f32.xlu1 %v1058_v23  ;;  %v687_v54 = vpop.xlane.xlu1 %686 }
 0x29f   :  { %14363 = vst [vmem:[#allocation94_spill] sm:$0xff] %v9296_v12  ;;  %v9302_v1 = vsub.f32 %v8913_v51, %v787_v22  ;;  %v788_v26 = vmul.f32 0.03125, %v687_v54  ;;  %v1073_v28 = vsel %vm549_vm2, %v917_v8, 0.0  ;;  %v918_v0 = vmul.f32 %v9296_v12, %v9296_v12 }
 0x2a0   :  { %1074 = vadd.xlane.f32.xlu0 %v1073_v28  ;;  %v943_v7 = vpop.xlane.xlu0 %942 }
 0x2a1   :  { %14364 = vst [vmem:[#allocation95_spill] sm:$0xff] %v9302_v1  ;;  %v9308_v17 = vsub.f32 %v8922_v4, %v788_v26  ;;  %v1129_v39 = vmul.f32 0.03125, %v943_v7  ;;  %v1076_v38 = vsel %vm549_vm2, %v918_v0, 0.0  ;;  %v915_v23 = vmul.f32 %v9302_v1, %v9302_v1 }
 0x2a2   :  { %1077 = vadd.xlane.f32.xlu1 %v1076_v38  ;;  %v946_v22 = vpop.xlane.xlu1 %945 }
 0x2a3   :  { %14365 = vst [vmem:[#allocation96_spill] sm:$0xff] %v9308_v17  ;;  %v1193_v51 = vadd.f32 1e-05, %v1129_v39  ;;  %v1130_v54 = vmul.f32 0.03125, %v946_v22  ;;  %v1067_v8 = vsel %vm549_vm2, %v915_v23, 0.0  ;;  %v916_v34 = vmul.f32 %v9308_v17, %v9308_v17  ;;  %v14366_v22 = vld [vmem:[#allocation12_spill] sm:$0xff] }
 0x2a4   :  { %1068 = vadd.xlane.f32.xlu0 %v1067_v8  ;;  %v937_v28 = vpop.xlane.xlu0 %936  ;;  %v1385_v12 = vsub.s32 1, %v14366_v22  ;;  %v1453_v23 = vsub.s32 2, %v14366_v22  ;;  %v8237_v17 = vld [vmem:[#allocation2] sm:$0xff] }
 0x2a5   :  { %7725 = vrsqrt.f32 %v1193_v51  ;;  %v1194_v26 = vadd.f32 1e-05, %v1130_v54  ;;  %v1127_v4 = vmul.f32 0.03125, %v937_v28  ;;  %v1070_v7 = vsel %vm549_vm2, %v916_v34, 0.0 }
 0x2a6   :  { %1071 = vadd.xlane.f32.xlu1 %v1070_v7  ;;  %v940_v0 = vpop.xlane.xlu1 %939  ;;  %v9319_v8 = vrot.slane %v8237_v17, %v1385_v12  ;;  %v9322_v28 = vrot.slane %v8237_v17, %v1453_v23  ;;  %v14367_v7 = vld [vmem:[#allocation77_spill] sm:$0xff] }
 0x2a7   :  { %7727 = vrsqrt.f32 %v1194_v26  ;;  %v1191_v1 = vadd.f32 1e-05, %v1127_v4  ;;  %v1128_v38 = vmul.f32 0.03125, %v940_v0 }
 0x2a9   :  { %7729 = vrsqrt.f32 %v1191_v1  ;;  %v1192_v39 = vadd.f32 1e-05, %v1128_v38 }
 0x2ab   :  { %7731 = vrsqrt.f32 %v1192_v39 }
 0x2af   :  { %v7726_v51 = vpop.eup %7725 }
 0x2b0   :  { %v1321_v54 = vmul.f32 %v7726_v51, %v8918_v56 }
 0x2b1   :  { %v7728_v34 = vpop.eup %7727 }
 0x2b2   :  { %v1322_v26 = vmul.f32 %v7728_v34, %v8927_v62  ;;  %v1389_v4 = vmul.f32 %v9319_v8, %v1321_v54 }
 0x2b3   :  { %v7730_v1 = vpop.eup %7729 }
 0x2b4   :  { %v1319_v0 = vmul.f32 %v7730_v1, %v14367_v7  ;;  %v9328_v38 = vadd.f32 %v9322_v28, %v1389_v4  ;;  %v1390_v12 = vmul.f32 %v9319_v8, %v1322_v26 }
 0x2b5   :  { %v7732_v39 = vpop.eup %7731 }
 0x2b6   :  { %14368 = vst [vmem:[#allocation77_spill] sm:$0xff] %v9328_v38  ;;  %v1387_v22 = vmul.f32 %v9319_v8, %v1319_v0  ;;  %v1320_v56 = vmul.f32 %v7732_v39, %v8941_v30  ;;  %v9337_v17 = vadd.f32 %v9322_v28, %v1390_v12 }
 0x2b7   :  { %2020 = vrot.lane.b32.xlu1 %v9328_v38, %s8341_s3 }
 0x2b8   :  { %v1388_v62 = vmul.f32 %v9319_v8, %v1320_v56  ;;  %14369 = vst [vmem:[#allocation97_spill] sm:$0xff] %v9337_v17  ;;  %v9340_v23 = vadd.f32 %v9322_v28, %v1387_v22  ;;  %v1520_v34 = vpack.c.bf16 %v9337_v17, %v9328_v38 }
 0x2ba   :  { %14370 = vst [vmem:[#allocation98_spill] sm:$0xff] %v9340_v23  ;;  %v9343_v51 = vadd.f32 %v9322_v28, %v1388_v62  ;;  %2212 = vrot.lane.b32.xlu0 %v9328_v38, %s8337_s23 }
 0x2bb   :  { %2022 = vrot.lane.b32.xlu1 %v9337_v17, %s8341_s3 }
 0x2bc   :  { %14371 = vst [vmem:[#allocation99_spill] sm:$0xff] %v9343_v51  ;;  %v1519_v30 = vpack.c.bf16 %v9343_v51, %v9340_v23 }
 0x2bd   :  { %v1087_v54 = vpop.xlane.xlu0 %1086 }
 0x2be   :  { %v1177_v26 = vmul.f32 0.03125, %v1087_v54  ;;  %2404 = vrot.lane.b32.xlu0 %v9328_v38, %s8342_s30  ;;  %7277 = vmatprep.mubr.msk.bf16.mxu1 %vm549_vm2, %v1519_v30 }
 0x2bf   :  { %v1090_v22 = vpop.xlane.xlu1 %1089  ;;  %2214 = vrot.lane.b32.xlu1 %v9337_v17, %s8337_s23  ;;  %7278 = vmatmul.mubr.msk.bf16.vlgmr.msra.gmra.mrb[16].mxu1 %vm549_vm2, %v1520_v34 }
 0x2c0   :  { %v1241_v4 = vadd.f32 1e-05, %v1177_v26  ;;  %v1178_v1 = vmul.f32 0.03125, %v1090_v22 }
 0x2c1   :  { %v1081_v7 = vpop.xlane.xlu0 %1080 }
 0x2c2   :  { %7733 = vrsqrt.f32 %v1241_v4  ;;  %v1242_v0 = vadd.f32 1e-05, %v1178_v1  ;;  %v1175_v39 = vmul.f32 0.03125, %v1081_v7  ;;  %2016 = vrot.lane.b32.xlu0 %v9340_v23, %s8341_s3 }
 0x2c3   :  { %v1084_v12 = vpop.xlane.xlu1 %1083  ;;  %2406 = vrot.lane.b32.xlu1 %v9337_v17, %s8342_s30 }
 0x2c4   :  { %7735 = vrsqrt.f32 %v1242_v0  ;;  %v1239_v56 = vadd.f32 1e-05, %v1175_v39  ;;  %v1176_v62 = vmul.f32 0.03125, %v1084_v12 }
 0x2c5   :  { %v955_v30 = vpop.xlane.xlu0 %954 }
 0x2c6   :  { %v1240_v54 = vadd.f32 1e-05, %v1176_v62  ;;  %v1133_v38 = vmul.f32 0.03125, %v955_v30  ;;  %2208 = vrot.lane.b32.xlu0 %v9340_v23, %s8337_s23  ;;  %7737 = vrsqrt.f32 %v1239_v56 }
 0x2c7   :  { %v958_v34 = vpop.xlane.xlu1 %957  ;;  %2018 = vrot.lane.b32.xlu1 %v9343_v51, %s8341_s3 }
 0x2c8   :  { %v1197_v26 = vadd.f32 1e-05, %v1133_v38  ;;  %v1134_v22 = vmul.f32 0.03125, %v958_v34  ;;  %7739 = vrsqrt.f32 %v1240_v54 }
 0x2c9   :  { %v949_v4 = vpop.xlane.xlu0 %948 }
 0x2ca   :  { %v1198_v1 = vadd.f32 1e-05, %v1134_v22  ;;  %v1131_v7 = vmul.f32 0.03125, %v949_v4  ;;  %2400 = vrot.lane.b32.xlu0 %v9340_v23, %s8342_s30  ;;  %7741 = vrsqrt.f32 %v1197_v26 }
 0x2cb   :  { %v952_v0 = vpop.xlane.xlu1 %951  ;;  %2210 = vrot.lane.b32.xlu1 %v9343_v51, %s8337_s23 }
 0x2cc   :  { %v7734_v39 = vpop.eup %7733  ;;  %7743 = vrsqrt.f32 %v1198_v1  ;;  %v1195_v12 = vadd.f32 1e-05, %v1131_v7  ;;  %v1132_v62 = vmul.f32 0.03125, %v952_v0 }
 0x2cd   :  { %v1369_v56 = vmul.f32 %v7734_v39, %v8952_v44  ;;  %v9372_v38 = vpop.xlane.xlu0 %1098 }
 0x2ce   :  { %v7736_v30 = vpop.eup %7735  ;;  %7745 = vrsqrt.f32 %v1195_v12  ;;  %v1196_v54 = vadd.f32 1e-05, %v1132_v62 }
 0x2cf   :  { %v1370_v34 = vmul.f32 %v7736_v30, %v8955_v10  ;;  %v9375_v22 = vpop.xlane.xlu1 %1101  ;;  %2402 = vrot.lane.b32.xlu1 %v9343_v51, %s8342_s30  ;;  %v1437_v26 = vmul.f32 %v9319_v8, %v1369_v56 }
 0x2d0   :  { %7747 = vrsqrt.f32 %v1196_v54  ;;  %v7738_v7 = vpop.eup %7737 }
 0x2d1   :  { %v9380_v4 = vpop.xlane.xlu0 %1092  ;;  %v9383_v1 = vadd.f32 %v9322_v28, %v1437_v26  ;;  %v1438_v44 = vmul.f32 %v9319_v8, %v1370_v34  ;;  %v1367_v62 = vmul.f32 %v7738_v7, %v8960_v37 }
 0x2d2   :  { %v7740_v39 = vpop.eup %7739 }
 0x2d3   :  { %14372 = vst [vmem:[#allocation100_spill] sm:$0xff] %v9383_v1  ;;  %v9386_v0 = vpop.xlane.xlu1 %1095  ;;  %2116 = vrot.lane.b32.xlu0 %v9383_v1, %s8341_s3  ;;  %v9391_v10 = vadd.f32 %v9322_v28, %v1438_v44  ;;  %v1368_v34 = vmul.f32 %v7740_v39, %v8966_v6 }
 0x2d4   :  { %v7742_v12 = vpop.eup %7741 }
 0x2d5   :  { %14373 = vst [vmem:[#allocation101_spill] sm:$0xff] %v9391_v10  ;;  %2118 = vrot.lane.b32.xlu1 %v9391_v10, %s8341_s3  ;;  %v967_v56 = vpop.xlane.xlu0 %966  ;;  %v1325_v23 = vmul.f32 %v7742_v12, %v8972_v52 }
 0x2d6   :  { %v7744_v30 = vpop.eup %7743  ;;  %v1137_v54 = vmul.f32 0.03125, %v967_v56  ;;  %v1435_v56 = vmul.f32 %v9319_v8, %v1367_v62 }
 0x2d7   :  { %v1326_v26 = vmul.f32 %v7744_v30, %v8978_v55  ;;  %v970_v51 = vpop.xlane.xlu1 %969  ;;  %2308 = vrot.lane.b32.xlu0 %v9383_v1, %s8337_s23 }
 0x2d8   :  { %v7746_v44 = vpop.eup %7745  ;;  %v1201_v17 = vadd.f32 1e-05, %v1137_v54  ;;  %v1138_v18 = vmul.f32 0.03125, %v970_v51  ;;  %v1393_v51 = vmul.f32 %v9319_v8, %v1325_v23 }
 0x2d9   :  { %v1323_v37 = vmul.f32 %v7746_v44, %v8987_v60  ;;  %2310 = vrot.lane.b32.xlu1 %v9391_v10, %s8337_s23  ;;  %v961_v7 = vpop.xlane.xlu0 %960  ;;  %v1394_v55 = vmul.f32 %v9319_v8, %v1326_v26  ;;  %v1436_v60 = vmul.f32 %v9319_v8, %v1368_v34 }
 0x2da   :  { %v7748_v6 = vpop.eup %7747  ;;  %v1202_v39 = vadd.f32 1e-05, %v1138_v18  ;;  %v1135_v30 = vmul.f32 0.03125, %v961_v7  ;;  %7749 = vrsqrt.f32 %v1201_v17 }
 0x2db   :  { %v1391_v61 = vmul.f32 %v9319_v8, %v1323_v37  ;;  %v1324_v49 = vmul.f32 %v7748_v6, %v8993_v50  ;;  %v964_v52 = vpop.xlane.xlu1 %963  ;;  %2500 = vrot.lane.b32.xlu0 %v9383_v1, %s8342_s30  ;;  %v9418_v50 = vadd.f32 %v9322_v28, %v1435_v56  ;;  %v9421_v17 = vadd.f32 %v9322_v28, %v1394_v55 }
 0x2dc   :  { %7751 = vrsqrt.f32 %v1202_v39  ;;  %v1199_v12 = vadd.f32 1e-05, %v1135_v30  ;;  %v1136_v62 = vmul.f32 0.03125, %v964_v52  ;;  %v9434_v44 = vadd.f32 %v9322_v28, %v1436_v60 }
 0x2dd   :  { %v1392_v54 = vmul.f32 %v9319_v8, %v1324_v49  ;;  %2502 = vrot.lane.b32.xlu1 %v9391_v10, %s8342_s30  ;;  %v9415_v18 = vpop.xlane.xlu0 %1110  ;;  %14374 = vst [vmem:[#allocation102_spill] sm:$0xff] %v9418_v50  ;;  %14375 = vst [vmem:[#allocation103_spill] sm:$0xff] %v9421_v17  ;;  %v9424_v23 = vadd.f32 %v9322_v28, %v1391_v61  ;;  %v9437_v37 = vadd.f32 %v9322_v28, %v1393_v51 }
 0x2de   :  { %7753 = vrsqrt.f32 %v1199_v12  ;;  %v1200_v34 = vadd.f32 1e-05, %v1136_v62  ;;  %14377 = vst [vmem:[#allocation105_spill] sm:$0xff] %v9434_v44  ;;  %v1181_v56 = vmul.f32 0.03125, %v9372_v38  ;;  %v1182_v30 = vmul.f32 0.03125, %v9375_v22 }
 0x2df   :  { %v9427_v26 = vadd.f32 %v9322_v28, %v1392_v54  ;;  %v9429_v49 = vpop.xlane.xlu1 %1113  ;;  %2112 = vrot.lane.b32.xlu0 %v9418_v50, %s8341_s3  ;;  %v1522_v6 = vpack.c.bf16 %v9421_v17, %v9437_v37 }
 0x2e0   :  { %7755 = vrsqrt.f32 %v1200_v34  ;;  %v1245_v60 = vadd.f32 1e-05, %v1181_v56  ;;  %v1246_v10 = vadd.f32 1e-05, %v1182_v30 }
 0x2e1   :  { %14376 = vst [vmem:[#allocation104_spill] sm:$0xff] %v9427_v26  ;;  %2114 = vrot.lane.b32.xlu1 %v9434_v44, %s8341_s3  ;;  %v9441_v61 = vpop.xlane.xlu0 %1104  ;;  %v1521_v7 = vpack.c.bf16 %v9427_v26, %v9424_v23 }
 0x2e2   :  { %7757 = vrsqrt.f32 %v1245_v60 }
 0x2e3   :  { %v9448_v55 = vpop.xlane.xlu1 %1107  ;;  %2304 = vrot.lane.b32.xlu0 %v9418_v50, %s8337_s23  ;;  %7281 = vmatprep.mubr.msk.bf16.mxu1 %vm549_vm2, %v1521_v7 }
 0x2e4   :  { %7282 = vmatmul.mubr.msk.bf16.gmra.mrb[20].mxu1 %vm549_vm2, %v1522_v6  ;;  %v7750_v39 = vpop.eup %7749 }
 0x2e5   :  { %2306 = vrot.lane.b32.xlu1 %v9434_v44, %s8337_s23  ;;  %v979_v52 = vpop.xlane.xlu0 %978  ;;  %v1329_v34 = vmul.f32 %v7750_v39, %v9026_v15 }
 0x2e6   :  { %v7752_v38 = vpop.eup %7751  ;;  %v1141_v51 = vmul.f32 0.03125, %v979_v52 }
 0x2e7   :  { %v1330_v12 = vmul.f32 %v7752_v38, %v9032_v9  ;;  %v982_v62 = vpop.xlane.xlu1 %981  ;;  %2496 = vrot.lane.b32.xlu0 %v9418_v50, %s8342_s30 }
 0x2e8   :  { %v7754_v54 = vpop.eup %7753  ;;  %v1205_v7 = vadd.f32 1e-05, %v1141_v51  ;;  %v1142_v6 = vmul.f32 0.03125, %v982_v62 }
 0x2e9   :  { %v1327_v22 = vmul.f32 %v7754_v54, %v9038_v35  ;;  %2498 = vrot.lane.b32.xlu1 %v9434_v44, %s8342_s30  ;;  %v973_v1 = vpop.xlane.xlu0 %972  ;;  %v1398_v9 = vmul.f32 %v9319_v8, %v1330_v12  ;;  %v1397_v35 = vmul.f32 %v9319_v8, %v1329_v34  ;;  %v1179_v12 = vmul.f32 0.03125, %v9380_v4 }
 0x2ea   :  { %v7756_v56 = vpop.eup %7755  ;;  %v1206_v52 = vadd.f32 1e-05, %v1142_v6  ;;  %v1139_v38 = vmul.f32 0.03125, %v973_v1  ;;  %7759 = vrsqrt.f32 %v1205_v7 }
 0x2eb   :  { %v1395_v50 = vmul.f32 %v9319_v8, %v1327_v22  ;;  %v1328_v45 = vmul.f32 %v7756_v56, %v9044_v36  ;;  %v976_v15 = vpop.xlane.xlu1 %975  ;;  %2028 = vrot.lane.b32.xlu0 %v9437_v37, %s8341_s3  ;;  %v9476_v36 = vadd.f32 %v9322_v28, %v1398_v9  ;;  %v9491_v34 = vadd.f32 %v9322_v28, %v1397_v35 }
 0x2ec   :  { %7761 = vrsqrt.f32 %v1206_v52  ;;  %v1203_v39 = vadd.f32 1e-05, %v1139_v38  ;;  %v1140_v30 = vmul.f32 0.03125, %v976_v15  ;;  %v1243_v6 = vadd.f32 1e-05, %v1179_v12 }
 0x2ed   :  { %7763 = vrsqrt.f32 %v1246_v10  ;;  %v1396_v60 = vmul.f32 %v9319_v8, %v1328_v45  ;;  %2030 = vrot.lane.b32.xlu1 %v9421_v17, %s8341_s3  ;;  %v9473_v1 = vpop.xlane.xlu0 %1122  ;;  %14378 = vst [vmem:[#allocation106_spill] sm:$0xff] %v9476_v36  ;;  %v9480_v62 = vadd.f32 %v9322_v28, %v1395_v50  ;;  %v1180_v45 = vmul.f32 0.03125, %v9386_v0  ;;  %14381 = vst [vmem:[#allocation109_spill] sm:$0xff] %v9491_v34  ;;  %v7758_v0 = vpop.eup %7757 }
 0x2ee   :  { %7765 = vrsqrt.f32 %v1203_v39  ;;  %v1204_v51 = vadd.f32 1e-05, %v1140_v30  ;;  %v1524_v7 = vpack.c.bf16 %v9476_v36, %v9491_v34 }
 0x2ef   :  { %14379 = vst [vmem:[#allocation107_spill] sm:$0xff] %v9480_v62  ;;  %v9483_v54 = vadd.f32 %v9322_v28, %v1396_v60  ;;  %v9485_v10 = vpop.xlane.xlu1 %1125  ;;  %2220 = vrot.lane.b32.xlu0 %v9437_v37, %s8337_s23  ;;  %v1244_v56 = vadd.f32 1e-05, %v1180_v45 }
 0x2f0   :  { %7767 = vrsqrt.f32 %v1204_v51 }
 0x2f1   :  { %14380 = vst [vmem:[#allocation108_spill] sm:$0xff] %v9483_v54  ;;  %2222 = vrot.lane.b32.xlu1 %v9421_v17, %s8337_s23  ;;  %v9495_v4 = vpop.xlane.xlu0 %1116  ;;  %v1523_v50 = vpack.c.bf16 %v9483_v54, %v9480_v62  ;;  %7769 = vrsqrt.f32 %v1243_v6 }
 0x2f2   :  { %7771 = vrsqrt.f32 %v1244_v56 }
 0x2f3   :  { %v9501_v22 = vpop.xlane.xlu1 %1119  ;;  %2412 = vrot.lane.b32.xlu0 %v9437_v37, %s8342_s30  ;;  %7285 = vmatprep.mubr.msk.bf16.mxu1 %vm549_vm2, %v1523_v50  ;;  %v1373_v50 = vmul.f32 %v7758_v0, %v9002_v32 }
 0x2f4   :  { %7286 = vmatmul.mubr.msk.bf16.gmra.mrb[24].mxu1 %vm549_vm2, %v1524_v7  ;;  %v7760_v9 = vpop.eup %7759 }
 0x2f5   :  { %2414 = vrot.lane.b32.xlu1 %v9421_v17, %s8342_s30  ;;  %v991_v52 = vpop.xlane.xlu0 %990  ;;  %v1333_v51 = vmul.f32 %v7760_v9, %v9074_v20  ;;  %v7705_v20 = vld [vmem:[%s13809_s5] sm:$0xff]  }
 0x2f6   :  { %v7762_v38 = vpop.eup %7761  ;;  %v1145_v15 = vmul.f32 0.03125, %v991_v52  ;;  %7341 = vmatprep.subr.bf16.mxu0 %v7705_v20 }
 0x2f7   :  { %v7764_v35 = vpop.eup %7763  ;;  %v1334_v39 = vmul.f32 %v7762_v38, %v9080_v2  ;;  %v994_v30 = vpop.xlane.xlu1 %993  ;;  %2024 = vrot.lane.b32.xlu0 %v9424_v23, %s8341_s3  ;;  %v1401_v9 = vmul.f32 %v9319_v8, %v1333_v51  ;;  %7342 = vmatpush3.bf16.msra.mxu0 %v7705_v20 }
 0x2f8   :  { %v7766_v60 = vpop.eup %7765  ;;  %v1209_v12 = vadd.f32 1e-05, %v1145_v15  ;;  %v1146_v45 = vmul.f32 0.03125, %v994_v30  ;;  %v1374_v56 = vmul.f32 %v7764_v35, %v9008_v40  ;;  %v1441_v35 = vmul.f32 %v9319_v8, %v1373_v50 }
 0x2f9   :  { %v1331_v7 = vmul.f32 %v7766_v60, %v9086_v53  ;;  %2026 = vrot.lane.b32.xlu1 %v9427_v26, %s8341_s3  ;;  %v985_v6 = vpop.xlane.xlu0 %984  ;;  %v1402_v2 = vmul.f32 %v9319_v8, %v1334_v39 }
 0x2fa   :  { %v7768_v52 = vpop.eup %7767  ;;  %7773 = vrsqrt.f32 %v1209_v12  ;;  %v1210_v38 = vadd.f32 1e-05, %v1146_v45  ;;  %v1143_v17 = vmul.f32 0.03125, %v985_v6  ;;  %v1442_v50 = vmul.f32 %v9319_v8, %v1374_v56 }
 0x2fb   :  { %v1399_v32 = vmul.f32 %v9319_v8, %v1331_v7  ;;  %v1332_v53 = vmul.f32 %v7768_v52, %v9092_v58  ;;  %v988_v0 = vpop.xlane.xlu1 %987  ;;  %2216 = vrot.lane.b32.xlu0 %v9424_v23, %s8337_s23  ;;  %v9532_v58 = vadd.f32 %v9322_v28, %v1402_v2  ;;  %v9547_v6 = vadd.f32 %v9322_v28, %v1401_v9 }
 0x2fc   :  { %7775 = vrsqrt.f32 %v1210_v38  ;;  %v1207_v15 = vadd.f32 1e-05, %v1143_v17  ;;  %v1144_v39 = vmul.f32 0.03125, %v988_v0  ;;  %v7706_v17 = vld [vmem:[%s13809_s5 + $0x8] sm:$0xff]   ;;  %v7770_v38 = vpop.eup %7769 }
 0x2fd   :  { %v1400_v30 = vmul.f32 %v9319_v8, %v1332_v53  ;;  %2218 = vrot.lane.b32.xlu1 %v9427_v26, %s8337_s23  ;;  %v1003_v40 = vpop.xlane.xlu0 %1002  ;;  %v9538_v51 = vadd.f32 %v9322_v28, %v1399_v32  ;;  %7343 = vmatprep.subr.bf16.mxu0 %v7706_v17  ;;  %v9552_v32 = vadd.f32 %v9322_v28, %v1441_v35  ;;  %v7772_v0 = vpop.eup %7771 }
 0x2fe   :  { %7777 = vrsqrt.f32 %v1207_v15  ;;  %v1208_v60 = vadd.f32 1e-05, %v1144_v39  ;;  %v1149_v12 = vmul.f32 0.03125, %v1003_v40  ;;  %v1526_v15 = vpack.c.bf16 %v9532_v58, %v9547_v6  ;;  %7344 = vmatpush3.bf16.msra.mxu0 %v7706_v17  ;;  %v7707_v39 = vld [vmem:[%s13809_s5 + $0x10] sm:$0xff]  }
 0x2ff   :  { %v9541_v45 = vadd.f32 %v9322_v28, %v1400_v30  ;;  %v1006_v7 = vpop.xlane.xlu1 %1005  ;;  %2408 = vrot.lane.b32.xlu0 %v9424_v23, %s8342_s30  ;;  %14382 = vst [vmem:[#allocation110_spill] sm:$0xff] %v9552_v32  ;;  %v9565_v40 = vadd.f32 %v9322_v28, %v1442_v50  ;;  %7345 = vmatprep.subr.bf16.mxu0 %v7707_v39 }
 0x300   :  { %7779 = vrsqrt.f32 %v1208_v60  ;;  %v1213_v52 = vadd.f32 1e-05, %v1149_v12  ;;  %v1150_v2 = vmul.f32 0.03125, %v1006_v7  ;;  %v1371_v17 = vmul.f32 %v7770_v38, %v9014_v46  ;;  %v14384_v7 = vld [vmem:[#allocation78_spill] sm:$0xff] }
 0x301   :  { %2410 = vrot.lane.b32.xlu1 %v9427_v26, %s8342_s30  ;;  %v997_v20 = vpop.xlane.xlu0 %996  ;;  %v1525_v53 = vpack.c.bf16 %v9541_v45, %v9538_v51  ;;  %14383 = vst [vmem:[#allocation111_spill] sm:$0xff] %v9565_v40 }
 0x302   :  { %7781 = vrsqrt.f32 %v1213_v52  ;;  %v1214_v56 = vadd.f32 1e-05, %v1150_v2  ;;  %v1147_v9 = vmul.f32 0.03125, %v997_v20  ;;  %v1372_v52 = vmul.f32 %v7772_v0, %v14384_v7  ;;  %7346 = vmatpush3.bf16.msra.mxu0 %v7707_v39 }
 0x303   :  { %v1000_v30 = vpop.xlane.xlu1 %999  ;;  %2124 = vrot.lane.b32.xlu0 %v9552_v32, %s8341_s3  ;;  %7289 = vmatprep.mubr.msk.bf16.mxu1 %vm549_vm2, %v1525_v53 }
 0x304   :  { %v7774_v35 = vpop.eup %7773  ;;  %7783 = vrsqrt.f32 %v1214_v56  ;;  %v1211_v60 = vadd.f32 1e-05, %v1147_v9  ;;  %v1148_v12 = vmul.f32 0.03125, %v1000_v30  ;;  %7290 = vmatmul.mubr.msk.bf16.gmra.mrb[28].mxu1 %vm549_vm2, %v1526_v15  ;;  %v7708_v56 = vld [vmem:[%s13809_s5 + $0x18] sm:$0xff]   ;;  %v1185_v9 = vmul.f32 0.03125, %v9415_v18 }
 0x305   :  { %2126 = vrot.lane.b32.xlu1 %v9565_v40, %s8341_s3  ;;  %v1015_v2 = vpop.xlane.xlu0 %1014  ;;  %v1337_v53 = vmul.f32 %v7774_v35, %v9122_v27  ;;  %7347 = vmatprep.subr.bf16.mxu0 %v7708_v56  ;;  %v1439_v18 = vmul.f32 %v9319_v8, %v1371_v17 }
 0x306   :  { %v7776_v20 = vpop.eup %7775  ;;  %7785 = vrsqrt.f32 %v1211_v60  ;;  %v1212_v50 = vadd.f32 1e-05, %v1148_v12  ;;  %v1153_v26 = vmul.f32 0.03125, %v1015_v2  ;;  %7348 = vmatpush3.bf16.msra.mxu0 %v7708_v56 }
 0x307   :  { %v1338_v46 = vmul.f32 %v7776_v20, %v9128_v33  ;;  %v1018_v38 = vpop.xlane.xlu1 %1017  ;;  %2316 = vrot.lane.b32.xlu0 %v9552_v32, %s8337_s23  ;;  %v1440_v33 = vmul.f32 %v9319_v8, %v1372_v52  ;;  %v1405_v12 = vmul.f32 %v9319_v8, %v1337_v53  ;;  %v1249_v20 = vadd.f32 1e-05, %v1185_v9 }
 0x308   :  { %v7778_v0 = vpop.eup %7777  ;;  %7787 = vrsqrt.f32 %v1212_v50  ;;  %v1217_v15 = vadd.f32 1e-05, %v1153_v26  ;;  %v1154_v27 = vmul.f32 0.03125, %v1018_v38  ;;  %v7709_v26 = vld [vmem:[%s13809_s5 + $0x20] sm:$0xff]   ;;  %v1186_v52 = vmul.f32 0.03125, %v9429_v49 }
 0x309   :  { %v1406_v30 = vmul.f32 %v9319_v8, %v1338_v46  ;;  %v1335_v39 = vmul.f32 %v7778_v0, %v9134_v57  ;;  %2318 = vrot.lane.b32.xlu1 %v9565_v40, %s8337_s23  ;;  %v1009_v35 = vpop.xlane.xlu0 %1008  ;;  %7349 = vmatprep.subr.bf16.mxu0 %v7709_v26  ;;  %v9602_v0 = vadd.f32 %v9322_v28, %v1439_v18 }
 0x30a   :  { %v7780_v60 = vpop.eup %7779  ;;  %v1218_v7 = vadd.f32 1e-05, %v1154_v27  ;;  %v1151_v2 = vmul.f32 0.03125, %v1009_v35  ;;  %7789 = vrsqrt.f32 %v1217_v15  ;;  %v9605_v15 = vadd.f32 %v9322_v28, %v1440_v33  ;;  %7350 = vmatpush3.bf16.msra.mxu0 %v7709_v26  ;;  %v7710_v35 = vld [vmem:[%s13809_s5 + $0x28] sm:$0xff]  }
 0x30b   :  { %v1403_v57 = vmul.f32 %v9319_v8, %v1335_v39  ;;  %v1336_v50 = vmul.f32 %v7780_v60, %v9140_v59  ;;  %v1012_v46 = vpop.xlane.xlu1 %1011  ;;  %2508 = vrot.lane.b32.xlu0 %v9552_v32, %s8342_s30  ;;  %v9596_v38 = vadd.f32 %v9322_v28, %v1406_v30  ;;  %14385 = vst [vmem:[#allocation78_spill] sm:$0xff] %v9602_v0 }
 0x30c   :  { %v7782_v17 = vpop.eup %7781  ;;  %7791 = vrsqrt.f32 %v1218_v7  ;;  %v1215_v53 = vadd.f32 1e-05, %v1151_v2  ;;  %v1152_v56 = vmul.f32 0.03125, %v1012_v46  ;;  %14386 = vst [vmem:[#allocation112_spill] sm:$0xff] %v9605_v15  ;;  %v9608_v27 = vadd.f32 %v9322_v28, %v1405_v12  ;;  %7351 = vmatprep.subr.bf16.mxu0 %v7710_v35 }
 0x30d   :  { %v1404_v9 = vmul.f32 %v9319_v8, %v1336_v50  ;;  %2510 = vrot.lane.b32.xlu1 %v9565_v40, %s8342_s30  ;;  %v1027_v59 = vpop.xlane.xlu0 %1026  ;;  %v9614_v60 = vadd.f32 %v9322_v28, %v1403_v57  ;;  %v1341_v33 = vmul.f32 %v7782_v17, %v9146_v43  ;;  %v1250_v46 = vadd.f32 1e-05, %v1186_v52 }
 0x30e   :  { %v7784_v49 = vpop.eup %7783  ;;  %7793 = vrsqrt.f32 %v1215_v53  ;;  %v1216_v39 = vadd.f32 1e-05, %v1152_v56  ;;  %v1157_v30 = vmul.f32 0.03125, %v1027_v59  ;;  %7352 = vmatpush3.bf16.msra.mxu0 %v7710_v35 }
 0x30f   :  { %v9617_v18 = vadd.f32 %v9322_v28, %v1404_v9  ;;  %v1342_v7 = vmul.f32 %v7784_v49, %v9152_v19  ;;  %v1030_v12 = vpop.xlane.xlu1 %1029  ;;  %2120 = vrot.lane.b32.xlu0 %v9602_v0, %s8341_s3  ;;  %v1528_v19 = vpack.c.bf16 %v9596_v38, %v9608_v27  ;;  %v1409_v52 = vmul.f32 %v9319_v8, %v1341_v33 }
 0x310   :  { %v7786_v2 = vpop.eup %7785  ;;  %7795 = vrsqrt.f32 %v1216_v39  ;;  %v1221_v26 = vadd.f32 1e-05, %v1157_v30  ;;  %v1158_v50 = vmul.f32 0.03125, %v1030_v12 }
 0x311   :  { %v1339_v57 = vmul.f32 %v7786_v2, %v9158_v25  ;;  %2122 = vrot.lane.b32.xlu1 %v9605_v15, %s8341_s3  ;;  %v1021_v53 = vpop.xlane.xlu0 %1020  ;;  %v1527_v43 = vpack.c.bf16 %v9617_v18, %v9614_v60  ;;  %v1410_v56 = vmul.f32 %v9319_v8, %v1342_v7  ;;  %v7711_v25 = vld [vmem:[%s13809_s5 + $0x30] sm:$0xff]  }
 0x312   :  { %v7788_v17 = vpop.eup %7787  ;;  %7797 = vrsqrt.f32 %v1221_v26  ;;  %v1222_v9 = vadd.f32 1e-05, %v1158_v50  ;;  %v1155_v59 = vmul.f32 0.03125, %v1021_v53  ;;  %7353 = vmatprep.subr.bf16.mxu0 %v7711_v25 }
 0x313   :  { %7799 = vrsqrt.f32 %v1249_v20  ;;  %v1407_v49 = vmul.f32 %v9319_v8, %v1339_v57  ;;  %v1340_v39 = vmul.f32 %v7788_v17, %v9164_v14  ;;  %v1024_v30 = vpop.xlane.xlu1 %1023  ;;  %2312 = vrot.lane.b32.xlu0 %v9602_v0, %s8337_s23  ;;  %7293 = vmatprep.mubr.msk.bf16.mxu1 %vm549_vm2, %v1527_v43  ;;  %v1183_v20 = vmul.f32 0.03125, %v9441_v61 }
 0x314   :  { %7801 = vrsqrt.f32 %v1222_v9  ;;  %v1219_v7 = vadd.f32 1e-05, %v1155_v59  ;;  %v1156_v35 = vmul.f32 0.03125, %v1024_v30  ;;  %7294 = vmatmul.mubr.msk.bf16.gmra.mrb[32].mxu1 %vm549_vm2, %v1528_v19  ;;  %v7790_v12 = vpop.eup %7789  ;;  %v9646_v26 = vadd.f32 %v9322_v28, %v1410_v56  ;;  %7354 = vmatpush3.bf16.msra.mxu0 %v7711_v25 }
 0x315   :  { %7803 = vrsqrt.f32 %v1250_v46  ;;  %v1408_v33 = vmul.f32 %v9319_v8, %v1340_v39  ;;  %2314 = vrot.lane.b32.xlu1 %v9605_v15, %s8337_s23  ;;  %v1039_v14 = vpop.xlane.xlu0 %1038  ;;  %v7712_v46 = vld [vmem:[%s13809_s5 + $0x38] sm:$0xff]   ;;  %v9652_v61 = vadd.f32 %v9322_v28, %v1409_v52  ;;  %v9655_v53 = vadd.f32 %v9322_v28, %v1407_v49 }
 0x316   :  { %v7792_v2 = vpop.eup %7791  ;;  %7805 = vrsqrt.f32 %v1219_v7  ;;  %v1220_v50 = vadd.f32 1e-05, %v1156_v35  ;;  %v1161_v57 = vmul.f32 0.03125, %v1039_v14  ;;  %v1345_v9 = vmul.f32 %v7790_v12, %v9170_v42  ;;  %7355 = vmatprep.subr.bf16.mxu0 %v7712_v46 }
 0x317   :  { %v9658_v43 = vadd.f32 %v9322_v28, %v1408_v33  ;;  %v1346_v19 = vmul.f32 %v7792_v2, %v9176_v48  ;;  %v1042_v17 = vpop.xlane.xlu1 %1041  ;;  %2504 = vrot.lane.b32.xlu0 %v9602_v0, %s8342_s30  ;;  %v1247_v52 = vadd.f32 1e-05, %v1183_v20  ;;  %v1184_v49 = vmul.f32 0.03125, %v9448_v55 }
 0x318   :  { %v7794_v56 = vpop.eup %7793  ;;  %7807 = vrsqrt.f32 %v1220_v50  ;;  %v1225_v59 = vadd.f32 1e-05, %v1161_v57  ;;  %v1162_v25 = vmul.f32 0.03125, %v1042_v17  ;;  %v1530_v33 = vpack.c.bf16 %v9646_v26, %v9652_v61  ;;  %7356 = vmatpush3.bf16.msra.mxu0 %v7712_v46 }
 0x319   :  { %v1343_v39 = vmul.f32 %v7794_v56, %v9182_v41  ;;  %2506 = vrot.lane.b32.xlu1 %v9605_v15, %s8342_s30  ;;  %v1033_v48 = vpop.xlane.xlu0 %1032  ;;  %v1529_v30 = vpack.c.bf16 %v9658_v43, %v9655_v53  ;;  %v1414_v35 = vmul.f32 %v9319_v8, %v1346_v19  ;;  %v1413_v2 = vmul.f32 %v9319_v8, %v1345_v9 }
 0x31a   :  { %v7796_v7 = vpop.eup %7795  ;;  %v1226_v42 = vadd.f32 1e-05, %v1162_v25  ;;  %v1159_v12 = vmul.f32 0.03125, %v1033_v48  ;;  %7809 = vrsqrt.f32 %v1225_v59  ;;  %v1248_v19 = vadd.f32 1e-05, %v1184_v49 }
 0x31b   :  { %v1411_v55 = vmul.f32 %v9319_v8, %v1343_v39  ;;  %v1344_v41 = vmul.f32 %v7796_v7, %v9188_v47  ;;  %v1036_v20 = vpop.xlane.xlu1 %1035  ;;  %2036 = vrot.lane.b32.xlu0 %v9491_v34, %s8341_s3  ;;  %7297 = vmatprep.mubr.msk.bf16.mxu1 %vm549_vm2, %v1529_v30  ;;  %v9684_v59 = vadd.f32 %v9322_v28, %v1414_v35 }
 0x31c   :  { %v7798_v14 = vpop.eup %7797  ;;  %7811 = vrsqrt.f32 %v1226_v42  ;;  %v1223_v50 = vadd.f32 1e-05, %v1159_v12  ;;  %v1160_v57 = vmul.f32 0.03125, %v1036_v20  ;;  %7298 = vmatmul.mubr.msk.bf16.gmra.mrb[36].mxu1 %vm549_vm2, %v1530_v33  ;;  %v9697_v42 = vadd.f32 %v9322_v28, %v1413_v2 }
 0x31d   :  { %v7800_v46 = vpop.eup %7799  ;;  %7813 = vrsqrt.f32 %v1247_v52  ;;  %v1412_v47 = vmul.f32 %v9319_v8, %v1344_v41  ;;  %2038 = vrot.lane.b32.xlu1 %v9476_v36, %s8341_s3  ;;  %v1051_v17 = vpop.xlane.xlu0 %1050  ;;  %14387 = vst [vmem:[#allocation113_spill] sm:$0xff] %v9684_v59  ;;  %v9687_v48 = vadd.f32 %v9322_v28, %v1411_v55  ;;  %v1349_v49 = vmul.f32 %v7798_v14, %v9194_v63 }
 0x31e   :  { %v7802_v56 = vpop.eup %7801  ;;  %7815 = vrsqrt.f32 %v1223_v50  ;;  %v1224_v9 = vadd.f32 1e-05, %v1160_v57  ;;  %v1165_v25 = vmul.f32 0.03125, %v1051_v17  ;;  %v1532_v2 = vpack.c.bf16 %v9684_v59, %v9697_v42 }
 0x31f   :  { %v7804_v39 = vpop.eup %7803  ;;  %14388 = vst [vmem:[#allocation114_spill] sm:$0xff] %v9687_v48  ;;  %v9690_v52 = vadd.f32 %v9322_v28, %v1412_v47  ;;  %v1350_v30 = vmul.f32 %v7802_v56, %v9200_v16  ;;  %v1054_v7 = vpop.xlane.xlu1 %1053  ;;  %2228 = vrot.lane.b32.xlu0 %v9491_v34, %s8337_s23  ;;  %v1417_v57 = vmul.f32 %v9319_v8, %v1349_v49 }
 0x320   :  { %v7806_v35 = vpop.eup %7805  ;;  %7817 = vrsqrt.f32 %v1224_v9  ;;  %v1229_v12 = vadd.f32 1e-05, %v1165_v25  ;;  %v1166_v33 = vmul.f32 0.03125, %v1054_v7  ;;  %v14390_v25 = vld [vmem:[#allocation79_spill] sm:$0xff] }
 0x321   :  { %14389 = vst [vmem:[#allocation115_spill] sm:$0xff] %v9690_v52  ;;  %7819 = vrsqrt.f32 %v1248_v19  ;;  %v1347_v55 = vmul.f32 %v7806_v35, %v9206_v5  ;;  %2230 = vrot.lane.b32.xlu1 %v9476_v36, %s8337_s23  ;;  %v1045_v63 = vpop.xlane.xlu0 %1044  ;;  %v1531_v16 = vpack.c.bf16 %v9690_v52, %v9687_v48  ;;  %v1418_v20 = vmul.f32 %v9319_v8, %v1350_v30 }
 0x322   :  { %v7808_v41 = vpop.eup %7807  ;;  %v1230_v14 = vadd.f32 1e-05, %v1166_v33  ;;  %v1163_v50 = vmul.f32 0.03125, %v1045_v63  ;;  %7821 = vrsqrt.f32 %v1229_v12  ;;  %v1377_v30 = vmul.f32 %v7800_v46, %v14390_v25 }
 0x323   :  { %v1415_v19 = vmul.f32 %v9319_v8, %v1347_v55  ;;  %v1348_v5 = vmul.f32 %v7808_v41, %v9212_v13  ;;  %v1048_v47 = vpop.xlane.xlu1 %1047  ;;  %2420 = vrot.lane.b32.xlu0 %v9491_v34, %s8342_s30  ;;  %7301 = vmatprep.mubr.msk.bf16.mxu1 %vm549_vm2, %v1531_v16  ;;  %v9719_v35 = vadd.f32 %v9322_v28, %v1418_v20  ;;  %v1188_v34 = vmul.f32 0.03125, %v9501_v22 }
 0x324   :  { %7823 = vrsqrt.f32 %v1230_v14  ;;  %v1227_v17 = vadd.f32 1e-05, %v1163_v50  ;;  %v1164_v56 = vmul.f32 0.03125, %v1048_v47  ;;  %7302 = vmatmul.mubr.msk.bf16.gmra.mrb[40].mxu1 %vm549_vm2, %v1532_v2  ;;  %v7810_v9 = vpop.eup %7809  ;;  %v9722_v63 = vadd.f32 %v9322_v28, %v1417_v57  ;;  %v14395_v57 = vld [vmem:[#allocation80_spill] sm:$0xff] }
 0x325   :  { %v1416_v49 = vmul.f32 %v9319_v8, %v1348_v5  ;;  %2422 = vrot.lane.b32.xlu1 %v9476_v36, %s8342_s30  ;;  %v1063_v13 = vpop.xlane.xlu0 %1062  ;;  %14391 = vst [vmem:[#allocation79_spill] sm:$0xff] %v9719_v35  ;;  %v9725_v16 = vadd.f32 %v9322_v28, %v1415_v19  ;;  %v1353_v50 = vmul.f32 %v7810_v9, %v9218_v3  ;;  %v1252_v22 = vadd.f32 1e-05, %v1188_v34 }
 0x326   :  { %v7812_v7 = vpop.eup %7811  ;;  %7825 = vrsqrt.f32 %v1227_v17  ;;  %v1228_v12 = vadd.f32 1e-05, %v1164_v56  ;;  %v1169_v33 = vmul.f32 0.03125, %v1063_v13  ;;  %14392 = vst [vmem:[#allocation116_spill] sm:$0xff] %v9722_v63  ;;  %v1378_v47 = vmul.f32 %v7804_v39, %v14395_v57 }
 0x327   :  { %v7814_v55 = vpop.eup %7813  ;;  %14393 = vst [vmem:[#allocation117_spill] sm:$0xff] %v9725_v16  ;;  %v9728_v46 = vadd.f32 %v9322_v28, %v1416_v49  ;;  %v1354_v41 = vmul.f32 %v7812_v7, %v9224_v11  ;;  %v1066_v14 = vpop.xlane.xlu1 %1065  ;;  %2032 = vrot.lane.b32.xlu0 %v9480_v62, %s8341_s3  ;;  %v1445_v56 = vmul.f32 %v9319_v8, %v1377_v30 }
 0x328   :  { %v7816_v20 = vpop.eup %7815  ;;  %7827 = vrsqrt.f32 %v1228_v12  ;;  %v1233_v2 = vadd.f32 1e-05, %v1169_v33  ;;  %v1170_v5 = vmul.f32 0.03125, %v1066_v14  ;;  %v1534_v13 = vpack.c.bf16 %v9719_v35, %v9722_v63 }
 0x329   :  { %14394 = vst [vmem:[#allocation118_spill] sm:$0xff] %v9728_v46  ;;  %v1351_v19 = vmul.f32 %v7816_v20, %v9230_v24  ;;  %2034 = vrot.lane.b32.xlu1 %v9483_v54, %s8341_s3  ;;  %v1057_v17 = vpop.xlane.xlu0 %1056  ;;  %v1533_v11 = vpack.c.bf16 %v9728_v46, %v9725_v16  ;;  %v1422_v49 = vmul.f32 %v9319_v8, %v1354_v41  ;;  %v14396_v20 = vld [vmem:[#allocation81_spill] sm:$0xff] }
 0x32a   :  { %v7818_v25 = vpop.eup %7817  ;;  %v1234_v3 = vadd.f32 1e-05, %v1170_v5  ;;  %v1167_v9 = vmul.f32 0.03125, %v1057_v17  ;;  %7829 = vrsqrt.f32 %v1233_v2  ;;  %v1421_v30 = vmul.f32 %v9319_v8, %v1353_v50 }
 0x32b   :  { %v7820_v39 = vpop.eup %7819  ;;  %v1419_v24 = vmul.f32 %v9319_v8, %v1351_v19  ;;  %v1352_v7 = vmul.f32 %v7818_v25, %v9236_v21  ;;  %v1060_v12 = vpop.xlane.xlu1 %1059  ;;  %2224 = vrot.lane.b32.xlu0 %v9480_v62, %s8337_s23  ;;  %7305 = vmatprep.mubr.msk.bf16.mxu1 %vm549_vm2, %v1533_v11  ;;  %v1375_v5 = vmul.f32 %v7814_v55, %v14396_v20 }
 0x32c   :  { %7831 = vrsqrt.f32 %v1234_v3  ;;  %v1231_v33 = vadd.f32 1e-05, %v1167_v9  ;;  %v1168_v41 = vmul.f32 0.03125, %v1060_v12  ;;  %7306 = vmatmul.mubr.msk.bf16.gmra.mrb[44].mxu1 %vm549_vm2, %v1534_v13  ;;  %v7822_v14 = vpop.eup %7821  ;;  %v9756_v2 = vadd.f32 %v9322_v28, %v1445_v56  ;;  %v14399_v3 = vld [vmem:[#allocation82_spill] sm:$0xff] }
 0x32d   :  { %v1420_v57 = vmul.f32 %v9319_v8, %v1352_v7  ;;  %2226 = vrot.lane.b32.xlu1 %v9483_v54, %s8337_s23  ;;  %v1075_v21 = vpop.xlane.xlu0 %1074  ;;  %v1446_v19 = vmul.f32 %v9319_v8, %v1378_v47  ;;  %v9760_v17 = vadd.f32 %v9322_v28, %v1422_v49  ;;  %v1376_v55 = vmul.f32 %v7820_v39, %v14399_v3 }
 0x32e   :  { %14397 = vst [vmem:[#allocation80_spill] sm:$0xff] %v9756_v2  ;;  %v7824_v50 = vpop.eup %7823  ;;  %7833 = vrsqrt.f32 %v1231_v33  ;;  %v1232_v11 = vadd.f32 1e-05, %v1168_v41  ;;  %v1173_v25 = vmul.f32 0.03125, %v1075_v21  ;;  %v9764_v9 = vadd.f32 %v9322_v28, %v1419_v24  ;;  %v14403_v24 = vld [vmem:[#allocation87_spill] sm:$0xff] }
 0x32f   :  { %14398 = vst [vmem:[#allocation81_spill] sm:$0xff] %v9760_v17  ;;  %v9767_v13 = vadd.f32 %v9322_v28, %v1420_v57  ;;  %v1358_v56 = vmul.f32 %v7824_v50, %v9248_v29  ;;  %v1078_v7 = vpop.xlane.xlu1 %1077  ;;  %2416 = vrot.lane.b32.xlu0 %v9480_v62, %s8342_s30  ;;  %v9773_v49 = vadd.f32 %v9322_v28, %v1421_v30  ;;  %v14422_v62 = vld [vmem:[#allocation95_spill] sm:$0xff] }
 0x330   :  { %14400 = vst [vmem:[#allocation82_spill] sm:$0xff] %v9764_v9  ;;  %v7826_v47 = vpop.eup %7825  ;;  %7835 = vrsqrt.f32 %v1232_v11  ;;  %v1237_v12 = vadd.f32 1e-05, %v1173_v25  ;;  %v1174_v33 = vmul.f32 0.03125, %v1078_v7  ;;  %v1357_v39 = vmul.f32 %v7822_v14, %v9242_v31  ;;  %v14405_v14 = vld [vmem:[#allocation88_spill] sm:$0xff] }
 0x331   :  { %14401 = vst [vmem:[#allocation119_spill] sm:$0xff] %v9767_v13  ;;  %14402 = vst [vmem:[#allocation120_spill] sm:$0xff] %v9773_v49  ;;  %v1355_v41 = vmul.f32 %v7826_v47, %v14403_v24  ;;  %2418 = vrot.lane.b32.xlu1 %v9483_v54, %s8342_s30  ;;  %v1069_v20 = vpop.xlane.xlu0 %1068  ;;  %v1535_v29 = vpack.c.bf16 %v9767_v13, %v9764_v9  ;;  %v1443_v57 = vmul.f32 %v9319_v8, %v1375_v5 }
 0x332   :  { %v7828_v21 = vpop.eup %7827  ;;  %v1238_v50 = vadd.f32 1e-05, %v1174_v33  ;;  %v1171_v30 = vmul.f32 0.03125, %v1069_v20  ;;  %v1536_v11 = vpack.c.bf16 %v9760_v17, %v9773_v49  ;;  %v9785_v25 = vadd.f32 %v9322_v28, %v1446_v19 }
 0x333   :  { %v1426_v31 = vmul.f32 %v9319_v8, %v1358_v56  ;;  %v1356_v3 = vmul.f32 %v7828_v21, %v14405_v14  ;;  %7837 = vrsqrt.f32 %v1237_v12  ;;  %v1072_v7 = vpop.xlane.xlu1 %1071  ;;  %2132 = vrot.lane.b32.xlu0 %v9756_v2, %s8341_s3  ;;  %7309 = vmatprep.mubr.msk.bf16.mxu1 %vm549_vm2, %v1535_v29  ;;  %v1444_v5 = vmul.f32 %v9319_v8, %v1376_v55 }
 0x334   :  { %14404 = vst [vmem:[#allocation87_spill] sm:$0xff] %v9785_v25  ;;  %v1423_v47 = vmul.f32 %v9319_v8, %v1355_v41  ;;  %7839 = vrsqrt.f32 %v1238_v50  ;;  %v1235_v33 = vadd.f32 1e-05, %v1171_v30  ;;  %v1172_v24 = vmul.f32 0.03125, %v1072_v7  ;;  %7310 = vmatmul.mubr.msk.bf16.gmra.mrb[48].mxu1 %vm549_vm2, %v1536_v11  ;;  %v7830_v19 = vpop.eup %7829  ;;  %v14412_v7 = vld [vmem:[#allocation89_spill] sm:$0xff] }
 0x335   :  { %v1425_v56 = vmul.f32 %v9319_v8, %v1357_v39  ;;  %v1424_v12 = vmul.f32 %v9319_v8, %v1356_v3  ;;  %2134 = vrot.lane.b32.xlu1 %v9785_v25, %s8341_s3  ;;  %v9799_v20 = vpop.permute.xlu0 %2212  ;;  %v9802_v29 = vadd.f32 %v9322_v28, %v1443_v57  ;;  %v9805_v21 = vadd.f32 %v9322_v28, %v1426_v31  ;;  %v14409_v39 = vld [vmem:[#allocation90_spill] sm:$0xff] }
 0x336   :  { %v7832_v55 = vpop.eup %7831  ;;  %7841 = vrsqrt.f32 %v1235_v33  ;;  %v1236_v41 = vadd.f32 1e-05, %v1172_v24  ;;  %v9816_v14 = vadd.f32 %v9322_v28, %v1444_v5  ;;  %v9819_v3 = vadd.f32 %v9322_v28, %v1423_v47  ;;  %v14414_v24 = vld [vmem:[#allocation91_spill] sm:$0xff] }
 0x337   :  { %14406 = vst [vmem:[#allocation88_spill] sm:$0xff] %v9802_v29  ;;  %14407 = vst [vmem:[#allocation121_spill] sm:$0xff] %v9805_v21  ;;  %v9808_v50 = vadd.f32 %v9322_v28, %v1424_v12  ;;  %v1362_v30 = vmul.f32 %v7832_v55, %v14409_v39  ;;  %v9811_v11 = vpop.permute.xlu1 %2020  ;;  %2128 = vrot.lane.b32.xlu0 %v9802_v29, %s8341_s3  ;;  %v1361_v31 = vmul.f32 %v7830_v19, %v14412_v7  ;;  %v14415_v19 = vld [vmem:[#allocation92_spill] sm:$0xff] }
 0x338   :  { %14410 = vst [vmem:[#allocation90_spill] sm:$0xff] %v9816_v14  ;;  %v7834_v57 = vpop.eup %7833  ;;  %14411 = vst [vmem:[#allocation123_spill] sm:$0xff] %v9819_v3  ;;  %7843 = vrsqrt.f32 %v1236_v41  ;;  %v9823_v33 = vadd.f32 %v9322_v28, %v1425_v56 }
 0x339   :  { %14408 = vst [vmem:[#allocation122_spill] sm:$0xff] %v9808_v50  ;;  %v1359_v12 = vmul.f32 %v7834_v57, %v14414_v24  ;;  %2130 = vrot.lane.b32.xlu1 %v9816_v14, %s8341_s3  ;;  %v9828_v55 = vpop.permute.xlu0 %2404  ;;  %v1430_v5 = vmul.f32 %v9319_v8, %v1362_v30  ;;  %v1537_v47 = vpack.c.bf16 %v9808_v50, %v9819_v3  ;;  %7845 = vrsqrt.f32 %v1252_v22 }
 0x33a   :  { %14413 = vst [vmem:[#allocation89_spill] sm:$0xff] %v9823_v33  ;;  %v7836_v39 = vpop.eup %7835  ;;  %v1538_v56 = vpack.c.bf16 %v9805_v21, %v9823_v33  ;;  %v1429_v57 = vmul.f32 %v9319_v8, %v1361_v31  ;;  %v14421_v33 = vld [vmem:[#allocation93_spill] sm:$0xff] }
 0x33b   :  { %v1427_v54 = vmul.f32 %v9319_v8, %v1359_v12  ;;  %v1360_v41 = vmul.f32 %v7836_v39, %v14415_v19  ;;  %v9835_v7 = vpop.permute.xlu1 %2022  ;;  %2320 = vrot.lane.b32.xlu0 %v9802_v29, %s8337_s23  ;;  %7313 = vmatprep.mubr.msk.bf16.mxu1 %vm549_vm2, %v1537_v47  ;;  %v9850_v19 = vadd.f32 %v9322_v28, %v1430_v5  ;;  %v14419_v47 = vld [vmem:[#allocation94_spill] sm:$0xff] }
 0x33c   :  { %7314 = vmatmul.mubr.msk.bf16.gmra.mrb[52].mxu1 %vm549_vm2, %v1538_v56  ;;  %v9864_v21 = vadd.f32 %v9322_v28, %v1429_v57 }
 0x33d   :  { %v7838_v30 = vpop.eup %7837  ;;  %v1428_v24 = vmul.f32 %v9319_v8, %v1360_v41  ;;  %2322 = vrot.lane.b32.xlu1 %v9816_v14, %s8337_s23  ;;  %v9847_v12 = vpop.permute.xlu0 %2016  ;;  %14416 = vst [vmem:[#allocation91_spill] sm:$0xff] %v9850_v19  ;;  %v9853_v50 = vadd.f32 %v9322_v28, %v1427_v54 }
 0x33e   :  { %v7840_v39 = vpop.eup %7839  ;;  %14420 = vst [vmem:[#allocation94_spill] sm:$0xff] %v9864_v21  ;;  %v1365_v5 = vmul.f32 %v7838_v30, %v14421_v33  ;;  %v14423_v30 = vld [vmem:[#allocation96_spill] sm:$0xff] }
 0x33f   :  { %14417 = vst [vmem:[#allocation92_spill] sm:$0xff] %v9853_v50  ;;  %v9856_v31 = vadd.f32 %v9322_v28, %v1428_v24  ;;  %v1366_v3 = vmul.f32 %v7840_v39, %v14419_v47  ;;  %v9859_v41 = vpop.permute.xlu1 %2214  ;;  %2044 = vrot.lane.b32.xlu0 %v9547_v6, %s8341_s3  ;;  %v1540_v47 = vpack.c.bf16 %v9850_v19, %v9864_v21 }
 0x340   :  { %v7842_v56 = vpop.eup %7841 }
 0x341   :  { %14418 = vst [vmem:[#allocation124_spill] sm:$0xff] %v9856_v31  ;;  %v1363_v36 = vmul.f32 %v7842_v56, %v14422_v62  ;;  %2046 = vrot.lane.b32.xlu1 %v9532_v58, %s8341_s3  ;;  %v9870_v54 = vpop.permute.xlu0 %2208  ;;  %v1539_v24 = vpack.c.bf16 %v9856_v31, %v9853_v50  ;;  %v1434_v57 = vmul.f32 %v9319_v8, %v1366_v3  ;;  %v1187_v31 = vmul.f32 0.03125, %v9495_v4 }
 0x342   :  { %v7844_v39 = vpop.eup %7843  ;;  %v1433_v50 = vmul.f32 %v9319_v8, %v1365_v5 }
 0x343   :  { %v1431_v33 = vmul.f32 %v9319_v8, %v1363_v36  ;;  %v1364_v62 = vmul.f32 %v7844_v39, %v14423_v30  ;;  %v9880_v56 = vpop.permute.xlu1 %2406  ;;  %2236 = vrot.lane.b32.xlu0 %v9547_v6, %s8337_s23  ;;  %7317 = vmatprep.mubr.msk.bf16.mxu1 %vm549_vm2, %v1539_v24  ;;  %v9894_v3 = vadd.f32 %v9322_v28, %v1434_v57  ;;  %v1251_v24 = vadd.f32 1e-05, %v1187_v31  ;;  %v14429_v30 = vld [vmem:[#allocation102_spill] sm:$0xff] }
 0x344   :  { %7318 = vmatmul.mubr.msk.bf16.gmra.mrb[56].mxu1 %vm549_vm2, %v1540_v47  ;;  %v9907_v47 = vadd.f32 %v9322_v28, %v1433_v50  ;;  %v1189_v31 = vmul.f32 0.03125, %v9473_v1 }
 0x345   :  { %v1432_v19 = vmul.f32 %v9319_v8, %v1364_v62  ;;  %2238 = vrot.lane.b32.xlu1 %v9532_v58, %s8337_s23  ;;  %v9891_v36 = vpop.permute.xlu0 %2400  ;;  %14424 = vst [vmem:[#allocation93_spill] sm:$0xff] %v9894_v3  ;;  %v9897_v39 = vadd.f32 %v9322_v28, %v1431_v33  ;;  %v1543_v62 = vpack.c.bf16 %v9434_v44, %v14429_v30  ;;  %7847 = vrsqrt.f32 %v1251_v24  ;;  %v14434_v44 = vld [vmem:[#allocation101_spill] sm:$0xff]  ;;  %v7846_v30 = vpop.eup %7845 }
 0x346   :  { %14427 = vst [vmem:[#allocation125_spill] sm:$0xff] %v9907_v47  ;;  %v1542_v50 = vpack.c.bf16 %v9894_v3, %v9907_v47  ;;  %v1253_v1 = vadd.f32 1e-05, %v1189_v31 }
 0x347   :  { %14425 = vst [vmem:[#allocation95_spill] sm:$0xff] %v9897_v39  ;;  %v9900_v4 = vadd.f32 %v9322_v28, %v1432_v19  ;;  %v9902_v5 = vpop.permute.xlu1 %2018  ;;  %2428 = vrot.lane.b32.xlu0 %v9547_v6, %s8342_s30  ;;  %v1190_v19 = vmul.f32 0.03125, %v9485_v10 }
 0x349   :  { %14426 = vst [vmem:[#allocation96_spill] sm:$0xff] %v9900_v4  ;;  %2430 = vrot.lane.b32.xlu1 %v9532_v58, %s8342_s30  ;;  %v9911_v34 = vpop.permute.xlu0 %2116  ;;  %v1541_v57 = vpack.c.bf16 %v9900_v4, %v9897_v39  ;;  %v1254_v22 = vadd.f32 1e-05, %v1190_v19  ;;  %v14433_v19 = vld [vmem:[#allocation100_spill] sm:$0xff] }
 0x34a   :  { %14428 = vst [vmem:[#allocation126_spill] sm:$0xff] %v9911_v34 }
 0x34b   :  { %v9916_v33 = vpop.permute.xlu1 %2210  ;;  %2040 = vrot.lane.b32.xlu0 %v9538_v51, %s8341_s3  ;;  %7321 = vmatprep.mubr.msk.bf16.mxu1 %vm549_vm2, %v1541_v57  ;;  %7849 = vrsqrt.f32 %v1254_v22 }
 0x34c   :  { %7322 = vmatmul.mubr.msk.bf16.gmra.mrb[60].mxu1 %vm549_vm2, %v1542_v50  ;;  %7851 = vrsqrt.f32 %v1253_v1  ;;  %v14437_v1 = vld [vmem:[#allocation86_spill] sm:$0xff] }
 0x34d   :  { %2042 = vrot.lane.b32.xlu1 %v9541_v45, %s8341_s3  ;;  %v9929_v10 = vpop.permute.xlu0 %2308  ;;  %7325 = vmatprep.mubr.msk.bf16.mxu1 %vm549_vm2, %v1543_v62  ;;  %v1544_v62 = vpack.c.bf16 %v14434_v44, %v14433_v19  ;;  %v1380_v44 = vmul.f32 %v7846_v30, %v14437_v1  ;;  %v1547_v30 = vpack.c.bf16 %v9816_v14, %v9802_v29 }
 0x34e   :  { %14430 = vst [vmem:[#allocation127_spill] sm:$0xff] %v9929_v10  ;;  %v1545_v10 = vpack.c.bf16 %v9605_v15, %v9602_v0 }
 0x34f   :  { %v9932_v57 = vpop.permute.xlu1 %2402  ;;  %2232 = vrot.lane.b32.xlu0 %v9538_v51, %s8337_s23  ;;  %v7848_v22 = vpop.eup %7847 }
 0x351   :  { %2234 = vrot.lane.b32.xlu1 %v9541_v45, %s8337_s23  ;;  %v9938_v24 = vpop.permute.xlu0 %2500 }
 0x352   :  { %14431 = vst [vmem:[#allocation128_spill] sm:$0xff] %v9938_v24 }
 0x353   :  { %v9940_v50 = vpop.permute.xlu1 %2118  ;;  %2424 = vrot.lane.b32.xlu0 %v9538_v51, %s8342_s30 }
 0x354   :  { %14432 = vst [vmem:[#allocation129_spill] sm:$0xff] %v9940_v50  ;;  %7326 = vmatmul.mubr.msk.bf16.gmra.mrb[64].mxu1 %vm549_vm2, %v1544_v62  ;;  %v14439_v62 = vld [vmem:[#allocation85_spill] sm:$0xff] }
 0x355   :  { %2426 = vrot.lane.b32.xlu1 %v9541_v45, %s8342_s30  ;;  %v9951_v31 = vpop.permute.xlu0 %2112  ;;  %7329 = vmatprep.mubr.msk.bf16.mxu1 %vm549_vm2, %v1545_v10  ;;  %v1379_v0 = vmul.f32 %v7848_v22, %v14439_v62  ;;  %v1546_v10 = vpack.c.bf16 %v9565_v40, %v9552_v32 }
 0x356   :  { %14435 = vst [vmem:[#allocation130_spill] sm:$0xff] %v9951_v31  ;;  %v1448_v31 = vmul.f32 %v9319_v8, %v1380_v44 }
 0x357   :  { %v9954_v24 = vpop.permute.xlu1 %2310  ;;  %2052 = vrot.lane.b32.xlu0 %v9608_v27, %s8341_s3  ;;  %v1447_v62 = vmul.f32 %v9319_v8, %v1379_v0 }
 0x358   :  { %14436 = vst [vmem:[#allocation131_spill] sm:$0xff] %v9954_v24  ;;  %v7850_v24 = vpop.eup %7849  ;;  %v9986_v44 = vadd.f32 %v9322_v28, %v1448_v31  ;;  %v1548_v31 = vpack.c.bf16 %v9785_v25, %v9756_v2 }
 0x359   :  { %2054 = vrot.lane.b32.xlu1 %v9596_v38, %s8341_s3  ;;  %v9961_v15 = vpop.permute.xlu0 %2304  ;;  %v7852_v1 = vpop.eup %7851  ;;  %v9994_v0 = vadd.f32 %v9322_v28, %v1447_v62 }
 0x35a   :  { %14438 = vst [vmem:[#allocation86_spill] sm:$0xff] %v9961_v15  ;;  %14444 = vst [vmem:[#allocation133_spill] sm:$0xff] %v9986_v44 }
 0x35b   :  { %v9964_v50 = vpop.permute.xlu1 %2502  ;;  %2244 = vrot.lane.b32.xlu0 %v9608_v27, %s8337_s23 }
 0x35c   :  { %14440 = vst [vmem:[#allocation85_spill] sm:$0xff] %v9964_v50  ;;  %7330 = vmatmul.mubr.msk.bf16.gmra.mrb[68].mxu1 %vm549_vm2, %v1546_v10  ;;  %v14442_v50 = vld [vmem:[#allocation84_spill] sm:$0xff]  ;;  %v14445_v10 = vld [vmem:[#allocation83_spill] sm:$0xff] }
 0x35d   :  { %2246 = vrot.lane.b32.xlu1 %v9596_v38, %s8337_s23  ;;  %v9976_v22 = vpop.permute.xlu0 %2496  ;;  %7333 = vmatprep.mubr.msk.bf16.mxu1 %vm549_vm2, %v1547_v30  ;;  %v1382_v40 = vmul.f32 %v7850_v24, %v14442_v50  ;;  %v1381_v15 = vmul.f32 %v7852_v1, %v14445_v10  ;;  %14446 = vst [vmem:[#allocation83_spill] sm:$0xff] %v9994_v0 }
 0x35e   :  { %14441 = vst [vmem:[#allocation132_spill] sm:$0xff] %v9976_v22  ;;  %v1549_v30 = vpack.c.bf16 %v9986_v44, %v9994_v0 }
 0x35f   :  { %v9981_v32 = vpop.permute.xlu1 %2114  ;;  %2436 = vrot.lane.b32.xlu0 %v9608_v27, %s8342_s30  ;;  %v1450_v24 = vmul.f32 %v9319_v8, %v1382_v40  ;;  %v1449_v1 = vmul.f32 %v9319_v8, %v1381_v15 }
 0x360   :  { %14443 = vst [vmem:[#allocation84_spill] sm:$0xff] %v9981_v32 }
 0x361   :  { %2438 = vrot.lane.b32.xlu1 %v9596_v38, %s8342_s30  ;;  %v9991_v22 = vpop.permute.xlu0 %2028  ;;  %v10013_v40 = vadd.f32 %v9322_v28, %v1450_v24  ;;  %v10020_v44 = vadd.f32 %v9322_v28, %v1449_v1 }
 0x363   :  { %v9997_v50 = vpop.permute.xlu1 %2306  ;;  %2048 = vrot.lane.b32.xlu0 %v9614_v60, %s8341_s3  ;;  %14448 = vst [vmem:[#allocation135_spill] sm:$0xff] %v10013_v40  ;;  %14450 = vst [vmem:[#allocation137_spill] sm:$0xff] %v10020_v44  ;;  %v1550_v24 = vpack.c.bf16 %v10013_v40, %v10020_v44 }
 0x364   :  { %14447 = vst [vmem:[#allocation134_spill] sm:$0xff] %v9997_v50  ;;  %7334 = vmatmul.mubr.msk.bf16.gmra.mrb[72].mxu1 %vm549_vm2, %v1548_v31 }
 0x365   :  { %2050 = vrot.lane.b32.xlu1 %v9617_v18, %s8341_s3  ;;  %v10009_v62 = vpop.permute.xlu0 %2220  ;;  %7337 = vmatprep.mubr.msk.bf16.mxu1 %vm549_vm2, %v1549_v30 }
 0x367   :  { %v10015_v10 = vpop.permute.xlu1 %2498  ;;  %2240 = vrot.lane.b32.xlu0 %v9614_v60, %s8337_s23 }
 0x368   :  { %14449 = vst [vmem:[#allocation136_spill] sm:$0xff] %v10015_v10 }
 0x369   :  { %2242 = vrot.lane.b32.xlu1 %v9617_v18, %s8337_s23  ;;  %v10024_v8 = vpop.permute.xlu0 %2412 }
 0x36b   :  { %v10026_v15 = vpop.permute.xlu1 %2030  ;;  %2432 = vrot.lane.b32.xlu0 %v9614_v60, %s8342_s30 }
 0x36c   :  { %7338 = vmatmul.mubr.msk.bf16.gmra.mrb[76].mxu1 %vm549_vm2, %v1550_v24 }
 0x36d   :  { %2434 = vrot.lane.b32.xlu1 %v9617_v18, %s8342_s30  ;;  %v10035_v28 = vpop.permute.xlu0 %2024 }
 0x36f   :  { %v10037_v31 = vpop.permute.xlu1 %2222  ;;  %2060 = vrot.lane.b32.xlu0 %v9652_v61, %s8341_s3 }
 0x371   :  { %2062 = vrot.lane.b32.xlu1 %v9646_v26, %s8341_s3  ;;  %v10043_v30 = vpop.permute.xlu0 %2216 }
 0x373   :  { %v10045_v1 = vpop.permute.xlu1 %2414  ;;  %2252 = vrot.lane.b32.xlu0 %v9652_v61, %s8337_s23 }
 0x375   :  { %2254 = vrot.lane.b32.xlu1 %v9646_v26, %s8337_s23  ;;  %v10051_v24 = vpop.permute.xlu0 %2408 }
 0x377   :  { %v10053_v40 = vpop.permute.xlu1 %2026  ;;  %2444 = vrot.lane.b32.xlu0 %v9652_v61, %s8342_s30 }
 0x379   :  { %2446 = vrot.lane.b32.xlu1 %v9646_v26, %s8342_s30  ;;  %v10059_v44 = vpop.permute.xlu0 %2124 }
 0x37a   :  { %14451 = vst [vmem:[#allocation138_spill] sm:$0xff] %v10059_v44 }
 0x37b   :  { %v10061_v10 = vpop.permute.xlu1 %2218  ;;  %2056 = vrot.lane.b32.xlu0 %v9655_v53, %s8341_s3 }
 0x37d   :  { %2058 = vrot.lane.b32.xlu1 %v9658_v43, %s8341_s3  ;;  %v10067_v50 = vpop.permute.xlu0 %2316 }
 0x37e   :  { %14452 = vst [vmem:[#allocation139_spill] sm:$0xff] %v10067_v50 }
 0x37f   :  { %v10069_v0 = vpop.permute.xlu1 %2410  ;;  %2248 = vrot.lane.b32.xlu0 %v9655_v53, %s8337_s23 }
 0x381   :  { %2250 = vrot.lane.b32.xlu1 %v9658_v43, %s8337_s23  ;;  %v10075_v32 = vpop.permute.xlu0 %2508 }
 0x382   :  { %14453 = vst [vmem:[#allocation140_spill] sm:$0xff] %v10075_v32 }
 0x383   :  { %v10077_v44 = vpop.permute.xlu1 %2126  ;;  %2440 = vrot.lane.b32.xlu0 %v9655_v53, %s8342_s30 }
 0x384   :  { %14454 = vst [vmem:[#allocation141_spill] sm:$0xff] %v10077_v44 }
 0x385   :  { %2442 = vrot.lane.b32.xlu1 %v9658_v43, %s8342_s30  ;;  %v10083_v19 = vpop.permute.xlu0 %2120 }
 0x386   :  { %14455 = vst [vmem:[#allocation142_spill] sm:$0xff] %v10083_v19 }
 0x387   :  { %v10085_v50 = vpop.permute.xlu1 %2318  ;;  %2068 = vrot.lane.b32.xlu0 %v9697_v42, %s8341_s3 }
 0x388   :  { %14456 = vst [vmem:[#allocation143_spill] sm:$0xff] %v10085_v50  ;;  %v14460_v50 = vld [vmem:[#allocation77_spill] sm:$0xff] }
 0x389   :  { %2070 = vrot.lane.b32.xlu1 %v9684_v59, %s8341_s3  ;;  %v10091_v34 = vpop.permute.xlu0 %2312  ;;  %v2594_v19 = vsel %vm549_vm2, %v14460_v50, %v9811_v11  ;;  %v14464_v50 = vld [vmem:[#allocation98_spill] sm:$0xff] }
 0x38a   :  { %14457 = vst [vmem:[#allocation144_spill] sm:$0xff] %v10091_v34 }
 0x38b   :  { %v10093_v32 = vpop.permute.xlu1 %2510  ;;  %2260 = vrot.lane.b32.xlu0 %v9697_v42, %s8337_s23 }
 0x38c   :  { %14458 = vst [vmem:[#allocation145_spill] sm:$0xff] %v10093_v32  ;;  %v2659_v32 = vsel %vm2656_vm3, %v2594_v19, %v9799_v20  ;;  %v14465_v20 = vld [vmem:[#allocation99_spill] sm:$0xff] }
 0x38d   :  { %2262 = vrot.lane.b32.xlu1 %v9684_v59, %s8337_s23  ;;  %v10099_v44 = vpop.permute.xlu0 %2504  ;;  %v2593_v19 = vsel %vm549_vm2, %v14465_v20, %v9902_v5 }
 0x38e   :  { %14459 = vst [vmem:[#allocation146_spill] sm:$0xff] %v10099_v44  ;;  %v14462_v44 = vld [vmem:[#allocation97_spill] sm:$0xff] }
 0x38f   :  { %v10104_v14 = vpop.permute.xlu1 %2122  ;;  %2452 = vrot.lane.b32.xlu0 %v9697_v42, %s8342_s30  ;;  %v2595_v29 = vsel %vm549_vm2, %v14462_v44, %v9835_v7  ;;  %v10135_v7 = vsel %vm2721_vm4, %v2659_v32, %v9828_v55 }
 0x390   :  { %14461 = vst [vmem:[#allocation77_spill] sm:$0xff] %v10104_v14  ;;  %v2592_v14 = vsel %vm549_vm2, %v14464_v50, %v9847_v12  ;;  %v2660_v25 = vsel %vm2656_vm3, %v2595_v29, %v9859_v41  ;;  %v2658_v41 = vsel %vm2656_vm3, %v2593_v19, %v9916_v33 }
 0x391   :  { %2454 = vrot.lane.b32.xlu1 %v9684_v59, %s8342_s30  ;;  %v10112_v34 = vpop.permute.xlu0 %2036  ;;  %v2657_v12 = vsel %vm2656_vm3, %v2592_v14, %v9870_v54  ;;  %v10141_v29 = vsel %vm2721_vm4, %v2660_v25, %v9880_v56  ;;  %v10153_v32 = vsel %vm2721_vm4, %v2658_v41, %v9932_v57 }
 0x392   :  { %v10117_v11 = vpop.f32.mrb[16].mxu1  ;;  %v10149_v44 = vsel %vm2721_vm4, %v2657_v12, %v9891_v36 }
 0x393   :  { %14463 = vst [vmem:[#allocation97_spill] sm:$0xff] %v10117_v11  ;;  %v10127_v2 = vpop.permute.xlu1 %2314  ;;  %v10129_v59 = vpop.f32.mrb[17].mxu1  ;;  %2064 = vrot.lane.b32.xlu0 %v9687_v48, %s8341_s3  ;;  %v2788_v14 = vmul.f32 %v10117_v11, %v10135_v7 }
 0x394   :  { %14466 = vst [vmem:[#allocation98_spill] sm:$0xff] %v10127_v2  ;;  %14467 = vst [vmem:[#allocation99_spill] sm:$0xff] %v10129_v59  ;;  %v10145_v5 = vpop.f32.mrb[18].mxu1  ;;  %v2786_v56 = vmul.f32 %v10149_v44, %v10129_v59 }
 0x395   :  { %14468 = vst [vmem:[#allocation147_spill] sm:$0xff] %v10145_v5  ;;  %v2789_v25 = vmul.f32 %v10145_v5, %v10141_v29  ;;  %2066 = vrot.lane.b32.xlu1 %v9690_v52, %s8341_s3  ;;  %v10161_v55 = vpop.f32.mrb[19].mxu1  ;;  %v10163_v54 = vpop.permute.xlu0 %2228 }
 0x396   :  { %14469 = vst [vmem:[#allocation148_spill] sm:$0xff] %v10161_v55  ;;  %v2787_v36 = vmul.f32 %v10153_v32, %v10161_v55 }
 0x397   :  { %v2883_v33 = vpack.c.bf16 %v2789_v25, %v2788_v14  ;;  %v10169_v57 = vpop.permute.xlu1 %2506  ;;  %2256 = vrot.lane.b32.xlu0 %v9687_v48, %s8337_s23 }
 0x398   :  { %14470 = vst [vmem:[#allocation149_spill] sm:$0xff] %v10169_v57  ;;  %v2882_v50 = vpack.c.bf16 %v2787_v36, %v2786_v56 }
 0x399   :  { %2258 = vrot.lane.b32.xlu1 %v9690_v52, %s8337_s23  ;;  %v10175_v20 = vpop.permute.xlu0 %2420 }
 0x39a   :  { %7357 = vmatprep.mubr.bf16.mxu0 %v2882_v50 }
 0x39b   :  { %v10177_v19 = vpop.permute.xlu1 %2038  ;;  %7358 = vmatmul.mubr.bf16.vlgmr.msra.gmra.mrb[48].mxu0 %v2883_v33  ;;  %2448 = vrot.lane.b32.xlu0 %v9687_v48, %s8342_s30 }
 0x39d   :  { %2450 = vrot.lane.b32.xlu1 %v9690_v52, %s8342_s30  ;;  %v10183_v12 = vpop.permute.xlu0 %2032  ;;  %v14475_v52 = vld [vmem:[#allocation103_spill] sm:$0xff] }
 0x39e   :  { %v2599_v48 = vsel %vm549_vm2, %v14475_v52, %v10026_v15 }
 0x39f   :  { %v10185_v41 = vpop.permute.xlu1 %2230  ;;  %2076 = vrot.lane.b32.xlu0 %v9722_v63, %s8341_s3 }
 0x3a1   :  { %2078 = vrot.lane.b32.xlu1 %v9719_v35, %s8341_s3  ;;  %v10191_v14 = vpop.permute.xlu0 %2224 }
 0x3a3   :  { %v10193_v25 = vpop.permute.xlu1 %2422  ;;  %2268 = vrot.lane.b32.xlu0 %v9722_v63, %s8337_s23 }
 0x3a5   :  { %2270 = vrot.lane.b32.xlu1 %v9719_v35, %s8337_s23  ;;  %v10199_v56 = vpop.permute.xlu0 %2416 }
 0x3a7   :  { %v10201_v36 = vpop.permute.xlu1 %2034  ;;  %2460 = vrot.lane.b32.xlu0 %v9722_v63, %s8342_s30 }
 0x3a9   :  { %2462 = vrot.lane.b32.xlu1 %v9719_v35, %s8342_s30  ;;  %v10207_v33 = vpop.permute.xlu0 %2132 }
 0x3aa   :  { %14471 = vst [vmem:[#allocation150_spill] sm:$0xff] %v10207_v33 }
 0x3ab   :  { %v10209_v50 = vpop.permute.xlu1 %2226  ;;  %2072 = vrot.lane.b32.xlu0 %v9725_v16, %s8341_s3 }
 0x3ad   :  { %2074 = vrot.lane.b32.xlu1 %v9728_v46, %s8341_s3  ;;  %v10215_v57 = vpop.permute.xlu0 %2128 }
 0x3ae   :  { %14472 = vst [vmem:[#allocation151_spill] sm:$0xff] %v10215_v57  ;;  %v2598_v57 = vsel %vm549_vm2, %v9437_v37, %v9991_v22  ;;  %v2664_v37 = vsel %vm2656_vm3, %v2599_v48, %v10037_v31  ;;  %v14478_v22 = vld [vmem:[#allocation104_spill] sm:$0xff] }
 0x3af   :  { %v10217_v2 = vpop.permute.xlu1 %2418  ;;  %2264 = vrot.lane.b32.xlu0 %v9725_v16, %s8337_s23  ;;  %v2597_v52 = vsel %vm549_vm2, %v14478_v22, %v10053_v40 }
 0x3b1   :  { %2266 = vrot.lane.b32.xlu1 %v9728_v46, %s8337_s23  ;;  %v10223_v35 = vpop.permute.xlu0 %2320 }
 0x3b2   :  { %14473 = vst [vmem:[#allocation152_spill] sm:$0xff] %v10223_v35 }
 0x3b3   :  { %v10225_v33 = vpop.permute.xlu1 %2134  ;;  %2456 = vrot.lane.b32.xlu0 %v9725_v16, %s8342_s30 }
 0x3b4   :  { %14474 = vst [vmem:[#allocation153_spill] sm:$0xff] %v10225_v33  ;;  %v2663_v33 = vsel %vm2656_vm3, %v2598_v57, %v10009_v62  ;;  %v10265_v57 = vsel %vm2721_vm4, %v2664_v37, %v10045_v1 }
 0x3b5   :  { %2458 = vrot.lane.b32.xlu1 %v9728_v46, %s8342_s30  ;;  %v10231_v63 = vpop.permute.xlu0 %2044  ;;  %v2596_v46 = vsel %vm549_vm2, %v9424_v23, %v10035_v28  ;;  %v2662_v23 = vsel %vm2656_vm3, %v2597_v52, %v10061_v10 }
 0x3b6   :  { %v2661_v62 = vsel %vm2656_vm3, %v2596_v46, %v10043_v30  ;;  %v10281_v46 = vsel %vm2721_vm4, %v2662_v23, %v10069_v0 }
 0x3b7   :  { %v10239_v4 = vpop.permute.xlu1 %2130  ;;  %v10241_v35 = vpop.f32.mrb[20].mxu1  ;;  %2084 = vrot.lane.b32.xlu0 %v9773_v49, %s8341_s3 }
 0x3b8   :  { %14476 = vst [vmem:[#allocation103_spill] sm:$0xff] %v10239_v4  ;;  %14477 = vst [vmem:[#allocation154_spill] sm:$0xff] %v10241_v35  ;;  %v10255_v15 = vpop.f32.mrb[21].mxu1  ;;  %v10259_v4 = vsel %vm2721_vm4, %v2663_v33, %v10024_v8  ;;  %v10277_v8 = vsel %vm2721_vm4, %v2661_v62, %v10051_v24 }
 0x3b9   :  { %14479 = vst [vmem:[#allocation104_spill] sm:$0xff] %v10255_v15  ;;  %2086 = vrot.lane.b32.xlu1 %v9760_v17, %s8341_s3  ;;  %v10271_v48 = vpop.f32.mrb[22].mxu1  ;;  %v10273_v40 = vpop.permute.xlu0 %2236  ;;  %v2792_v28 = vmul.f32 %v10241_v35, %v10259_v4  ;;  %v2790_v30 = vmul.f32 %v10277_v8, %v10255_v15  ;;  %v14534_v15 = vld [vmem:[#allocation114_spill] sm:$0xff] }
 0x3ba   :  { %14480 = vst [vmem:[#allocation155_spill] sm:$0xff] %v10271_v48  ;;  %v2793_v10 = vmul.f32 %v10271_v48, %v10265_v57  ;;  %v10287_v31 = vpop.f32.mrb[23].mxu1 }
 0x3bb   :  { %14481 = vst [vmem:[#allocation156_spill] sm:$0xff] %v10287_v31  ;;  %v2791_v1 = vmul.f32 %v10281_v46, %v10287_v31  ;;  %v10293_v24 = vpop.permute.xlu1 %2322  ;;  %2276 = vrot.lane.b32.xlu0 %v9773_v49, %s8337_s23 }
 0x3bc   :  { %14482 = vst [vmem:[#allocation157_spill] sm:$0xff] %v10293_v24  ;;  %v2885_v0 = vpack.c.bf16 %v2793_v10, %v2792_v28  ;;  %v14483_v28 = vld [vmem:[#allocation109_spill] sm:$0xff] }
 0x3bd   :  { %2278 = vrot.lane.b32.xlu1 %v9760_v17, %s8337_s23  ;;  %v10299_v33 = vpop.permute.xlu0 %2428  ;;  %v2884_v37 = vpack.c.bf16 %v2791_v1, %v2790_v30  ;;  %v2602_v10 = vsel %vm549_vm2, %v14483_v28, %v10112_v34  ;;  %v14484_v30 = vld [vmem:[#allocation106_spill] sm:$0xff]  ;;  %v14487_v28 = vld [vmem:[#allocation108_spill] sm:$0xff] }
 0x3be   :  { %v2603_v1 = vsel %vm549_vm2, %v14484_v30, %v10177_v19  ;;  %v2667_v24 = vsel %vm2656_vm3, %v2602_v10, %v10163_v54  ;;  %v2601_v19 = vsel %vm549_vm2, %v14487_v28, %v10201_v36 }
 0x3bf   :  { %v2047_v22 = vpop.permute.xlu1 %2046  ;;  %2468 = vrot.lane.b32.xlu0 %v9773_v49, %s8342_s30  ;;  %7361 = vmatprep.mubr.bf16.mxu0 %v2884_v37  ;;  %v2668_v34 = vsel %vm2656_vm3, %v2603_v1, %v10185_v41  ;;  %v10333_v16 = vsel %vm2721_vm4, %v2667_v24, %v10175_v20 }
 0x3c0   :  { %7362 = vmatmul.mubr.bf16.gmra.mrb[52].mxu0 %v2885_v0  ;;  %v10339_v10 = vsel %vm2721_vm4, %v2668_v34, %v10193_v25 }
 0x3c1   :  { %2470 = vrot.lane.b32.xlu1 %v9760_v17, %s8342_s30  ;;  %v2041_v52 = vpop.permute.xlu0 %2040  ;;  %v14486_v17 = vld [vmem:[#allocation107_spill] sm:$0xff] }
 0x3c2   :  { %v2600_v49 = vsel %vm549_vm2, %v14486_v17, %v10183_v12  ;;  %v2666_v17 = vsel %vm2656_vm3, %v2601_v19, %v10209_v50  ;;  %v14492_v19 = vld [vmem:[#allocation89_spill] sm:$0xff] }
 0x3c3   :  { %v2239_v62 = vpop.permute.xlu1 %2238  ;;  %2080 = vrot.lane.b32.xlu0 %v9764_v9, %s8341_s3  ;;  %v2665_v54 = vsel %vm2656_vm3, %v2600_v49, %v10191_v14  ;;  %v10353_v49 = vsel %vm2721_vm4, %v2666_v17, %v10217_v2 }
 0x3c4   :  { %v10349_v20 = vsel %vm2721_vm4, %v2665_v54, %v10199_v56  ;;  %14490 = vst [vmem:[#allocation108_spill] sm:$0xff] %v10353_v49  ;;  %v14493_v54 = vld [vmem:[#allocation121_spill] sm:$0xff] }
 0x3c5   :  { %2082 = vrot.lane.b32.xlu1 %v9767_v13, %s8341_s3  ;;  %v2233_v23 = vpop.permute.xlu0 %2232 }
 0x3c7   :  { %v2431_v0 = vpop.permute.xlu1 %2430  ;;  %v10315_v37 = vpop.f32.mrb[24].mxu1  ;;  %2272 = vrot.lane.b32.xlu0 %v9764_v9, %s8337_s23 }
 0x3c8   :  { %14485 = vst [vmem:[#allocation109_spill] sm:$0xff] %v10315_v37  ;;  %v10329_v30 = vpop.f32.mrb[25].mxu1  ;;  %v2796_v14 = vmul.f32 %v10315_v37, %v10333_v16 }
 0x3c9   :  { %14488 = vst [vmem:[#allocation106_spill] sm:$0xff] %v10329_v30  ;;  %2274 = vrot.lane.b32.xlu1 %v9767_v13, %s8337_s23  ;;  %v10345_v12 = vpop.f32.mrb[26].mxu1  ;;  %v2425_v41 = vpop.permute.xlu0 %2424  ;;  %v2794_v50 = vmul.f32 %v10349_v20, %v10329_v30 }
 0x3ca   :  { %14489 = vst [vmem:[#allocation107_spill] sm:$0xff] %v10345_v12  ;;  %v2797_v25 = vmul.f32 %v10345_v12, %v10339_v10  ;;  %v10359_v36 = vpop.f32.mrb[27].mxu1 }
 0x3cb   :  { %14491 = vst [vmem:[#allocation158_spill] sm:$0xff] %v10359_v36  ;;  %v2795_v24 = vmul.f32 %v10353_v49, %v10359_v36  ;;  %v2043_v56 = vpop.permute.xlu1 %2042  ;;  %2464 = vrot.lane.b32.xlu0 %v9764_v9, %s8342_s30  ;;  %v14544_v12 = vld [vmem:[#allocation108_spill] sm:$0xff]  ;;  %v14546_v36 = vld [vmem:[#allocation126_spill] sm:$0xff] }
 0x3cc   :  { %v2887_v2 = vpack.c.bf16 %v2797_v25, %v2796_v14  ;;  %v2606_v25 = vsel %vm549_vm2, %v9547_v6, %v10231_v63  ;;  %v2605_v6 = vsel %vm549_vm2, %v9541_v45, %v2043_v56 }
 0x3cd   :  { %2466 = vrot.lane.b32.xlu1 %v9767_v13, %s8342_s30  ;;  %v2053_v1 = vpop.permute.xlu0 %2052  ;;  %v2886_v34 = vpack.c.bf16 %v2795_v24, %v2794_v50  ;;  %v2607_v50 = vsel %vm549_vm2, %v9532_v58, %v2047_v22  ;;  %v2604_v13 = vsel %vm549_vm2, %v9538_v51, %v2041_v52 }
 0x3ce   :  { %v2672_v9 = vsel %vm2656_vm3, %v2607_v50, %v2239_v62  ;;  %v2669_v22 = vsel %vm2656_vm3, %v2604_v13, %v2233_v23 }
 0x3cf   :  { %v2235_v28 = vpop.permute.xlu1 %2234  ;;  %2092 = vrot.lane.b32.xlu0 %v14492_v19, %s8341_s3  ;;  %7365 = vmatprep.mubr.bf16.mxu0 %v2886_v34  ;;  %v2671_v34 = vsel %vm2656_vm3, %v2606_v25, %v10273_v40  ;;  %v10409_v45 = vsel %vm2721_vm4, %v2669_v22, %v2425_v41  ;;  %v14498_v41 = vld [vmem:[#allocation123_spill] sm:$0xff] }
 0x3d0   :  { %7366 = vmatmul.mubr.bf16.gmra.mrb[56].mxu0 %v2887_v2  ;;  %v10397_v58 = vsel %vm2721_vm4, %v2671_v34, %v10299_v33  ;;  %v2670_v40 = vsel %vm2656_vm3, %v2605_v6, %v2235_v28  ;;  %v14499_v28 = vld [vmem:[#allocation122_spill] sm:$0xff] }
 0x3d1   :  { %2094 = vrot.lane.b32.xlu1 %v14493_v54, %s8341_s3  ;;  %v2245_v17 = vpop.permute.xlu0 %2244 }
 0x3d3   :  { %v2427_v49 = vpop.permute.xlu1 %2426  ;;  %2284 = vrot.lane.b32.xlu0 %v14492_v19, %s8337_s23 }
 0x3d4   :  { %v10412_v62 = vsel %vm2721_vm4, %v2670_v40, %v2427_v49 }
 0x3d5   :  { %2286 = vrot.lane.b32.xlu1 %v14493_v54, %s8337_s23  ;;  %v2437_v14 = vpop.permute.xlu0 %2436 }
 0x3d7   :  { %v2055_v24 = vpop.permute.xlu1 %2054  ;;  %v10382_v2 = vpop.f32.mrb[28].mxu1  ;;  %2476 = vrot.lane.b32.xlu0 %v14492_v19, %s8342_s30  ;;  %v10401_v19 = vsel %vm2721_vm4, %v2672_v9, %v2431_v0 }
 0x3d8   :  { %14494 = vst [vmem:[#allocation159_spill] sm:$0xff] %v10382_v2  ;;  %v10393_v63 = vpop.f32.mrb[29].mxu1  ;;  %v2800_v13 = vmul.f32 %v10382_v2, %v10397_v58  ;;  %v14573_v2 = vld [vmem:[#allocation136_spill] sm:$0xff] }
 0x3d9   :  { %14495 = vst [vmem:[#allocation160_spill] sm:$0xff] %v10393_v63  ;;  %2478 = vrot.lane.b32.xlu1 %v14493_v54, %s8342_s30  ;;  %v10406_v51 = vpop.f32.mrb[30].mxu1  ;;  %v2049_v52 = vpop.permute.xlu0 %2048  ;;  %v2798_v23 = vmul.f32 %v10409_v45, %v10393_v63  ;;  %v14574_v63 = vld [vmem:[#allocation139_spill] sm:$0xff] }
 0x3da   :  { %14496 = vst [vmem:[#allocation161_spill] sm:$0xff] %v10406_v51  ;;  %v2801_v9 = vmul.f32 %v10406_v51, %v10401_v19  ;;  %v10418_v33 = vpop.f32.mrb[31].mxu1  ;;  %v2608_v54 = vsel %vm549_vm2, %v9614_v60, %v2049_v52 }
 0x3db   :  { %14497 = vst [vmem:[#allocation162_spill] sm:$0xff] %v10418_v33  ;;  %v2799_v0 = vmul.f32 %v10412_v62, %v10418_v33  ;;  %v2247_v56 = vpop.permute.xlu1 %2246  ;;  %2088 = vrot.lane.b32.xlu0 %v14498_v41, %s8341_s3 }
 0x3dc   :  { %v2889_v49 = vpack.c.bf16 %v2801_v9, %v2800_v13  ;;  %v2610_v13 = vsel %vm549_vm2, %v9608_v27, %v2053_v1  ;;  %v2611_v9 = vsel %vm549_vm2, %v9596_v38, %v2055_v24  ;;  %v14503_v38 = vld [vmem:[#allocation91_spill] sm:$0xff] }
 0x3dd   :  { %2090 = vrot.lane.b32.xlu1 %v14499_v28, %s8341_s3  ;;  %v2241_v25 = vpop.permute.xlu0 %2240  ;;  %v2888_v50 = vpack.c.bf16 %v2799_v0, %v2798_v23 }
 0x3df   :  { %v2439_v34 = vpop.permute.xlu1 %2438  ;;  %2280 = vrot.lane.b32.xlu0 %v14498_v41, %s8337_s23  ;;  %7369 = vmatprep.mubr.bf16.mxu0 %v2888_v50  ;;  %v2676_v50 = vsel %vm2656_vm3, %v2611_v9, %v2247_v56 }
 0x3e0   :  { %7370 = vmatmul.mubr.bf16.gmra.mrb[60].mxu0 %v2889_v49  ;;  %v2675_v49 = vsel %vm2656_vm3, %v2610_v13, %v2245_v17  ;;  %v10452_v27 = vsel %vm2721_vm4, %v2676_v50, %v2439_v34  ;;  %v2673_v13 = vsel %vm2656_vm3, %v2608_v54, %v2241_v25 }
 0x3e1   :  { %2282 = vrot.lane.b32.xlu1 %v14499_v28, %s8337_s23  ;;  %v2433_v6 = vpop.permute.xlu0 %2432  ;;  %14502 = vst [vmem:[#allocation165_spill] sm:$0xff] %v10452_v27 }
 0x3e2   :  { %v10473_v60 = vsel %vm2721_vm4, %v2673_v13, %v2433_v6 }
 0x3e3   :  { %v2051_v22 = vpop.permute.xlu1 %2050  ;;  %2472 = vrot.lane.b32.xlu0 %v14498_v41, %s8342_s30  ;;  %14506 = vst [vmem:[#allocation168_spill] sm:$0xff] %v10473_v60 }
 0x3e4   :  { %v2609_v17 = vsel %vm549_vm2, %v9617_v18, %v2051_v22 }
 0x3e5   :  { %2474 = vrot.lane.b32.xlu1 %v14499_v28, %s8342_s30  ;;  %v2061_v40 = vpop.permute.xlu0 %2060  ;;  %v10449_v28 = vsel %vm2721_vm4, %v2675_v49, %v2437_v14 }
 0x3e7   :  { %v2243_v23 = vpop.permute.xlu1 %2242  ;;  %v10440_v0 = vpop.f32.mrb[32].mxu1  ;;  %2100 = vrot.lane.b32.xlu0 %v9864_v21, %s8341_s3 }
 0x3e8   :  { %14500 = vst [vmem:[#allocation163_spill] sm:$0xff] %v10440_v0  ;;  %v10446_v41 = vpop.f32.mrb[33].mxu1  ;;  %v2804_v56 = vmul.f32 %v10440_v0, %v10449_v28  ;;  %v2674_v9 = vsel %vm2656_vm3, %v2609_v17, %v2243_v23 }
 0x3e9   :  { %14501 = vst [vmem:[#allocation164_spill] sm:$0xff] %v10446_v41  ;;  %2102 = vrot.lane.b32.xlu1 %v14503_v38, %s8341_s3  ;;  %v10456_v1 = vpop.f32.mrb[34].mxu1  ;;  %v2253_v24 = vpop.permute.xlu0 %2252  ;;  %v2802_v22 = vmul.f32 %v10473_v60, %v10446_v41 }
 0x3ea   :  { %14504 = vst [vmem:[#allocation166_spill] sm:$0xff] %v10456_v1  ;;  %v2805_v14 = vmul.f32 %v10456_v1, %v10452_v27  ;;  %v10466_v34 = vpop.f32.mrb[35].mxu1  ;;  %v14591_v0 = vld [vmem:[#allocation168_spill] sm:$0xff] }
 0x3eb   :  { %14505 = vst [vmem:[#allocation167_spill] sm:$0xff] %v10466_v34  ;;  %v2435_v49 = vpop.permute.xlu1 %2434  ;;  %2292 = vrot.lane.b32.xlu0 %v9864_v21, %s8337_s23 }
 0x3ec   :  { %v10476_v18 = vsel %vm2721_vm4, %v2674_v9, %v2435_v49  ;;  %v2891_v52 = vpack.c.bf16 %v2805_v14, %v2804_v56  ;;  %v14512_v49 = vld [vmem:[#allocation92_spill] sm:$0xff] }
 0x3ed   :  { %14507 = vst [vmem:[#allocation169_spill] sm:$0xff] %v10476_v18  ;;  %v2803_v50 = vmul.f32 %v10476_v18, %v10466_v34  ;;  %2294 = vrot.lane.b32.xlu1 %v14503_v38, %s8337_s23  ;;  %v2445_v54 = vpop.permute.xlu0 %2444  ;;  %v14596_v34 = vld [vmem:[#allocation112_spill] sm:$0xff] }
 0x3ef   :  { %v2063_v25 = vpop.permute.xlu1 %2062  ;;  %v10484_v23 = vpop.f32.mrb[36].mxu1  ;;  %2484 = vrot.lane.b32.xlu0 %v9864_v21, %s8342_s30  ;;  %v2890_v6 = vpack.c.bf16 %v2803_v50, %v2802_v22  ;;  %v2614_v21 = vsel %vm549_vm2, %v9652_v61, %v2061_v40  ;;  %v14513_v50 = vld [vmem:[#allocation124_spill] sm:$0xff] }
 0x3f0   :  { %14508 = vst [vmem:[#allocation170_spill] sm:$0xff] %v10484_v23  ;;  %v10488_v17 = vpop.f32.mrb[37].mxu1  ;;  %v2679_v22 = vsel %vm2656_vm3, %v2614_v21, %v2253_v24 }
 0x3f1   :  { %14509 = vst [vmem:[#allocation171_spill] sm:$0xff] %v10488_v17  ;;  %2486 = vrot.lane.b32.xlu1 %v14503_v38, %s8342_s30  ;;  %v10492_v56 = vpop.f32.mrb[38].mxu1  ;;  %7373 = vmatprep.mubr.bf16.mxu0 %v2890_v6  ;;  %v2057_v14 = vpop.permute.xlu0 %2056  ;;  %v10504_v27 = vsel %vm2721_vm4, %v2679_v22, %v2445_v54  ;;  %v2615_v6 = vsel %vm549_vm2, %v9646_v26, %v2063_v25 }
 0x3f2   :  { %14510 = vst [vmem:[#allocation172_spill] sm:$0xff] %v10492_v56  ;;  %v10494_v13 = vpop.f32.mrb[39].mxu1  ;;  %7374 = vmatmul.mubr.bf16.gmra.mrb[64].mxu0 %v2891_v52  ;;  %14514 = vst [vmem:[#allocation174_spill] sm:$0xff] %v10504_v27  ;;  %v2808_v40 = vmul.f32 %v10484_v23, %v10504_v27 }
 0x3f3   :  { %14511 = vst [vmem:[#allocation173_spill] sm:$0xff] %v10494_v13  ;;  %v2255_v9 = vpop.permute.xlu1 %2254  ;;  %2096 = vrot.lane.b32.xlu0 %v14512_v49, %s8341_s3 }
 0x3f4   :  { %v2680_v52 = vsel %vm2656_vm3, %v2615_v6, %v2255_v9 }
 0x3f5   :  { %2098 = vrot.lane.b32.xlu1 %v14513_v50, %s8341_s3  ;;  %v2249_v38 = vpop.permute.xlu0 %2248 }
 0x3f7   :  { %v2447_v18 = vpop.permute.xlu1 %2446  ;;  %v10509_v60 = vpop.f32.mrb[40].mxu1  ;;  %2288 = vrot.lane.b32.xlu0 %v14512_v49, %s8337_s23 }
 0x3f8   :  { %14515 = vst [vmem:[#allocation175_spill] sm:$0xff] %v10509_v60  ;;  %v10514_v61 = vsel %vm2721_vm4, %v2680_v52, %v2447_v18  ;;  %v10516_v21 = vpop.f32.mrb[41].mxu1 }
 0x3f9   :  { %14516 = vst [vmem:[#allocation176_spill] sm:$0xff] %v10514_v61  ;;  %14517 = vst [vmem:[#allocation177_spill] sm:$0xff] %v10516_v21  ;;  %v2809_v24 = vmul.f32 %v10492_v56, %v10514_v61  ;;  %2290 = vrot.lane.b32.xlu1 %v14513_v50, %s8337_s23  ;;  %v10524_v26 = vpop.f32.mrb[42].mxu1  ;;  %v2441_v54 = vpop.permute.xlu0 %2440  ;;  %v2612_v61 = vsel %vm549_vm2, %v9655_v53, %v2057_v14 }
 0x3fa   :  { %14518 = vst [vmem:[#allocation178_spill] sm:$0xff] %v10524_v26  ;;  %v10526_v25 = vpop.f32.mrb[43].mxu1  ;;  %v2677_v27 = vsel %vm2656_vm3, %v2612_v61, %v2249_v38 }
 0x3fb   :  { %14519 = vst [vmem:[#allocation179_spill] sm:$0xff] %v10526_v25  ;;  %v2059_v9 = vpop.permute.xlu1 %2058  ;;  %2480 = vrot.lane.b32.xlu0 %v14512_v49, %s8342_s30  ;;  %v2893_v18 = vpack.c.bf16 %v2809_v24, %v2808_v40 }
 0x3fc   :  { %v2613_v49 = vsel %vm549_vm2, %v9658_v43, %v2059_v9 }
 0x3fd   :  { %2482 = vrot.lane.b32.xlu1 %v14513_v50, %s8342_s30  ;;  %v2069_v22 = vpop.permute.xlu0 %2068  ;;  %v10546_v50 = vsel %vm2721_vm4, %v2677_v27, %v2441_v54 }
 0x3fe   :  { %v2806_v61 = vmul.f32 %v10546_v50, %v10488_v17 }
 0x3ff   :  { %v2251_v6 = vpop.permute.xlu1 %2250  ;;  %v10532_v52 = vpop.f32.mrb[44].mxu1  ;;  %2108 = vrot.lane.b32.xlu0 %v9907_v47, %s8341_s3 }
 0x400   :  { %14520 = vst [vmem:[#allocation180_spill] sm:$0xff] %v10532_v52  ;;  %v10538_v56 = vpop.f32.mrb[45].mxu1  ;;  %v2678_v53 = vsel %vm2656_vm3, %v2613_v49, %v2251_v6 }
 0x401   :  { %14521 = vst [vmem:[#allocation181_spill] sm:$0xff] %v10538_v56  ;;  %2110 = vrot.lane.b32.xlu1 %v9894_v3, %s8341_s3  ;;  %v10543_v40 = vpop.f32.mrb[46].mxu1  ;;  %v2261_v24 = vpop.permute.xlu0 %2260 }
 0x402   :  { %14522 = vst [vmem:[#allocation182_spill] sm:$0xff] %v10543_v40  ;;  %v10550_v23 = vpop.f32.mrb[47].mxu1 }
 0x403   :  { %14523 = vst [vmem:[#allocation183_spill] sm:$0xff] %v10550_v23  ;;  %v2443_v14 = vpop.permute.xlu1 %2442  ;;  %2300 = vrot.lane.b32.xlu0 %v9907_v47, %s8337_s23 }
 0x404   :  { %v10556_v38 = vsel %vm2721_vm4, %v2678_v53, %v2443_v14 }
 0x405   :  { %14524 = vst [vmem:[#allocation184_spill] sm:$0xff] %v10556_v38  ;;  %v2807_v27 = vmul.f32 %v10556_v38, %v10494_v13  ;;  %2302 = vrot.lane.b32.xlu1 %v9894_v3, %s8337_s23  ;;  %v2453_v43 = vpop.permute.xlu0 %2452 }
 0x407   :  { %v2071_v54 = vpop.permute.xlu1 %2070  ;;  %v10564_v9 = vpop.f32.mrb[48].mxu1  ;;  %2492 = vrot.lane.b32.xlu0 %v9907_v47, %s8342_s30  ;;  %v2892_v49 = vpack.c.bf16 %v2807_v27, %v2806_v61  ;;  %v14537_v47 = vld [vmem:[#allocation115_spill] sm:$0xff] }
 0x408   :  { %v10572_v14 = vpop.f32.mrb[49].mxu1  ;;  %v10590_v23 = vmul.f32 %v10564_v9, %v10135_v7 }
 0x409   :  { %14525 = vst [vmem:[#allocation185_spill] sm:$0xff] %v10572_v14  ;;  %2494 = vrot.lane.b32.xlu1 %v9894_v3, %s8342_s30  ;;  %v10580_v13 = vpop.f32.mrb[50].mxu1  ;;  %7377 = vmatprep.mubr.bf16.mxu0 %v2892_v49  ;;  %v2065_v61 = vpop.permute.xlu0 %2064  ;;  %v14528_v49 = vld [vmem:[#allocation96_spill] sm:$0xff] }
 0x40a   :  { %14526 = vst [vmem:[#allocation186_spill] sm:$0xff] %v10580_v13  ;;  %v10586_v6 = vpop.f32.mrb[51].mxu1  ;;  %7378 = vmatmul.mubr.bf16.gmra.mrb[68].mxu0 %v2893_v18  ;;  %v10594_v38 = vmul.f32 %v10580_v13, %v10141_v29  ;;  %v10604_v18 = vmul.f32 %v10149_v44, %v10572_v14  ;;  %v2618_v29 = vsel %vm549_vm2, %v9697_v42, %v2069_v22 }
 0x40b   :  { %14527 = vst [vmem:[#allocation187_spill] sm:$0xff] %v10586_v6  ;;  %v2263_v59 = vpop.permute.xlu1 %2262  ;;  %2104 = vrot.lane.b32.xlu0 %v9897_v39, %s8341_s3  ;;  %v10608_v7 = vmul.f32 %v10153_v32, %v10586_v6  ;;  %v2683_v27 = vsel %vm2656_vm3, %v2618_v29, %v2261_v24  ;;  %v14529_v32 = vld [vmem:[#allocation113_spill] sm:$0xff]  ;;  %v2616_v31 = vsel %vm549_vm2, %v14534_v15, %v2065_v61  ;;  %v14553_v6 = vld [vmem:[#allocation131_spill] sm:$0xff] }
 0x40c   :  { %v10620_v5 = vsel %vm2721_vm4, %v2683_v27, %v2453_v43  ;;  %v2619_v11 = vsel %vm549_vm2, %v14529_v32, %v2071_v54 }
 0x40d   :  { %2106 = vrot.lane.b32.xlu1 %v14528_v49, %s8341_s3  ;;  %v2257_v55 = vpop.permute.xlu0 %2256  ;;  %v2684_v42 = vsel %vm2656_vm3, %v2619_v11, %v2263_v59  ;;  %v10634_v53 = vmul.f32 %v10509_v60, %v10620_v5 }
 0x40f   :  { %v2455_v22 = vpop.permute.xlu1 %2454  ;;  %2296 = vrot.lane.b32.xlu0 %v9897_v39, %s8337_s23  ;;  %v10630_v29 = vpop.f32.mrb[52].mxu1 }
 0x410   :  { %v10628_v24 = vsel %vm2721_vm4, %v2684_v42, %v2455_v22  ;;  %14530 = vst [vmem:[#allocation113_spill] sm:$0xff] %v10630_v29  ;;  %v10644_v54 = vpop.f32.mrb[53].mxu1  ;;  %v10680_v32 = vmul.f32 %v10630_v29, %v10259_v4  ;;  %v2681_v4 = vsel %vm2656_vm3, %v2616_v31, %v2257_v55 }
 0x411   :  { %v10638_v43 = vmul.f32 %v10524_v26, %v10628_v24  ;;  %14531 = vst [vmem:[#allocation188_spill] sm:$0xff] %v10644_v54  ;;  %2298 = vrot.lane.b32.xlu1 %v14528_v49, %s8337_s23  ;;  %v2449_v27 = vpop.permute.xlu0 %2448  ;;  %v10652_v22 = vpop.f32.mrb[54].mxu1  ;;  %v10670_v59 = vmul.f32 %v10277_v8, %v10644_v54 }
 0x412   :  { %14532 = vst [vmem:[#allocation189_spill] sm:$0xff] %v10652_v22  ;;  %v10658_v44 = vpop.f32.mrb[55].mxu1  ;;  %v10684_v42 = vmul.f32 %v10652_v22, %v10265_v57  ;;  %v10698_v57 = vsel %vm2721_vm4, %v2681_v4, %v2449_v27 }
 0x413   :  { %14533 = vst [vmem:[#allocation190_spill] sm:$0xff] %v10658_v44  ;;  %v2067_v35 = vpop.permute.xlu1 %2066  ;;  %2488 = vrot.lane.b32.xlu0 %v9897_v39, %s8342_s30  ;;  %v10674_v11 = vmul.f32 %v10281_v46, %v10658_v44  ;;  %v14535_v39 = vld [vmem:[#allocation80_spill] sm:$0xff] }
 0x414   :  { %v2617_v8 = vsel %vm549_vm2, %v14537_v47, %v2067_v35 }
 0x415   :  { %2490 = vrot.lane.b32.xlu1 %v14528_v49, %s8342_s30  ;;  %v2077_v48 = vpop.permute.xlu0 %2076  ;;  %v14539_v49 = vld [vmem:[#allocation87_spill] sm:$0xff] }
 0x417   :  { %v2259_v46 = vpop.permute.xlu1 %2258  ;;  %2324 = vrot.lane.b32.xlu0 %v14535_v39, %s8337_s23  ;;  %v10695_v3 = vpop.f32.mrb[56].mxu1 }
 0x418   :  { %14536 = vst [vmem:[#allocation114_spill] sm:$0xff] %v10695_v3  ;;  %v10706_v44 = vpop.f32.mrb[57].mxu1  ;;  %v2682_v31 = vsel %vm2656_vm3, %v2617_v8, %v2259_v46  ;;  %v10719_v4 = vmul.f32 %v10695_v3, %v10333_v16  ;;  %v14543_v46 = vld [vmem:[#allocation88_spill] sm:$0xff]  ;;  %v14551_v3 = vld [vmem:[#allocation102_spill] sm:$0xff] }
 0x419   :  { %14538 = vst [vmem:[#allocation115_spill] sm:$0xff] %v10706_v44  ;;  %2326 = vrot.lane.b32.xlu1 %v14539_v49, %s8337_s23  ;;  %v2269_v55 = vpop.permute.xlu0 %2268  ;;  %v10715_v47 = vpop.f32.mrb[58].mxu1  ;;  %v10731_v35 = vmul.f32 %v10349_v20, %v10706_v44  ;;  %v2810_v20 = vmul.f32 %v10698_v57, %v10516_v21  ;;  %v14548_v44 = vld [vmem:[#allocation129_spill] sm:$0xff] }
 0x41a   :  { %14540 = vst [vmem:[#allocation191_spill] sm:$0xff] %v10715_v47  ;;  %14541 = vst [vmem:[#allocation192_spill] sm:$0xff] %v10719_v4  ;;  %v10725_v37 = vpop.f32.mrb[59].mxu1  ;;  %v10735_v16 = vmul.f32 %v10715_v47, %v10339_v10  ;;  %v14550_v47 = vld [vmem:[#allocation130_spill] sm:$0xff] }
 0x41b   :  { %14542 = vst [vmem:[#allocation193_spill] sm:$0xff] %v10725_v37  ;;  %v2451_v8 = vpop.permute.xlu1 %2450  ;;  %2512 = vrot.lane.b32.xlu0 %v14543_v46, %s8342_s30  ;;  %v10746_v30 = vmul.f32 %v14544_v12, %v10725_v37  ;;  %v14545_v46 = vld [vmem:[#allocation90_spill] sm:$0xff]  ;;  %v14549_v12 = vld [vmem:[#allocation101_spill] sm:$0xff]  ;;  %v2640_v54 = vsel %vm549_vm2, %v14551_v3, %v14550_v47 }
 0x41c   :  { %v10742_v27 = vsel %vm2721_vm4, %v2682_v31, %v2451_v8  ;;  %v14547_v31 = vld [vmem:[#allocation100_spill] sm:$0xff]  ;;  %v2643_v37 = vsel %vm549_vm2, %v14549_v12, %v14548_v44  ;;  %v14554_v4 = vld [vmem:[#allocation86_spill] sm:$0xff]  ;;  %v14556_v47 = vld [vmem:[#allocation85_spill] sm:$0xff] }
 0x41d   :  { %v2811_v10 = vmul.f32 %v10742_v27, %v10526_v25  ;;  %2514 = vrot.lane.b32.xlu1 %v14545_v46, %s8342_s30  ;;  %v2461_v61 = vpop.permute.xlu0 %2460  ;;  %v2642_v8 = vsel %vm549_vm2, %v14547_v31, %v14546_v36  ;;  %v14552_v46 = vld [vmem:[#allocation127_spill] sm:$0xff]  ;;  %v2708_v15 = vsel %vm2656_vm3, %v2643_v37, %v14553_v6  ;;  %v2705_v36 = vsel %vm2656_vm3, %v2640_v54, %v14554_v4  ;;  %v14555_v12 = vld [vmem:[#allocation128_spill] sm:$0xff] }
 0x41e   :  { %v2707_v29 = vsel %vm2656_vm3, %v2642_v8, %v14552_v46  ;;  %v10781_v22 = vsel %vm2721_vm4, %v2708_v15, %v14556_v47  ;;  %v14557_v46 = vld [vmem:[#allocation132_spill] sm:$0xff] }
 0x41f   :  { %v2079_v31 = vpop.permute.xlu1 %2078  ;;  %2516 = vrot.lane.b32.xlu0 %v14535_v39, %s8342_s30  ;;  %v2894_v44 = vpack.c.bf16 %v2811_v10, %v2810_v20  ;;  %v10777_v3 = vsel %vm2721_vm4, %v2707_v29, %v14555_v12  ;;  %v10785_v8 = vsel %vm2721_vm4, %v2705_v36, %v14557_v46  ;;  %v10787_v37 = vpop.f32.mrb[60].mxu1  ;;  %v14559_v6 = vld [vmem:[#allocation116_spill] sm:$0xff]  ;;  %v14562_v36 = vld [vmem:[#allocation105_spill] sm:$0xff]  ;;  %v14564_v29 = vpack.c.bf16 %v10638_v43, %v10634_v53  ;;  %v14578_v39 = vld [vmem:[#allocation111_spill] sm:$0xff] }
 0x420   :  { %14558 = vst [vmem:[#allocation108_spill] sm:$0xff] %v10787_v37  ;;  %v2622_v54 = vsel %vm549_vm2, %v14559_v6, %v2077_v48  ;;  %v10795_v20 = vpop.f32.mrb[61].mxu1  ;;  %v14561_v10 = vld [vmem:[#allocation84_spill] sm:$0xff]  ;;  %v10822_v46 = vmul.f32 %v10787_v37, %v10397_v58  ;;  %v14569_v58 = vld [vmem:[#allocation134_spill] sm:$0xff] }
 0x421   :  { %14560 = vst [vmem:[#allocation126_spill] sm:$0xff] %v10795_v20  ;;  %2518 = vrot.lane.b32.xlu1 %v14539_v49, %s8342_s30  ;;  %7381 = vmatprep.mubr.bf16.mxu0 %v2894_v44  ;;  %v2073_v15 = vpop.permute.xlu0 %2072  ;;  %v2641_v12 = vsel %vm549_vm2, %v14562_v36, %v14561_v10  ;;  %v2687_v47 = vsel %vm2656_vm3, %v2622_v54, %v2269_v55  ;;  %v10807_v6 = vpop.f32.mrb[62].mxu1  ;;  %v14566_v54 = vld [vmem:[#allocation83_spill] sm:$0xff]  ;;  %v14570_v48 = vld [vmem:[#allocation138_spill] sm:$0xff] }
 0x422   :  { %14563 = vst [vmem:[#allocation100_spill] sm:$0xff] %v10807_v6  ;;  %7382 = vmatmul.mubr.bf16.gmra.mrb[72].mxu0 %v14564_v29  ;;  %v10816_v36 = vpop.f32.mrb[63].mxu1  ;;  %14567 = vst [vmem:[#allocation101_spill] sm:$0xff] %v10822_v46  ;;  %v10826_v53 = vmul.f32 %v10807_v6, %v10401_v19  ;;  %v10834_v10 = vmul.f32 %v10409_v45, %v10795_v20  ;;  %v2706_v4 = vsel %vm2656_vm3, %v2641_v12, %v14569_v58  ;;  %v14571_v19 = vld [vmem:[#allocation110_spill] sm:$0xff]  ;;  %v14572_v29 = vld [vmem:[#allocation133_spill] sm:$0xff] }
 0x423   :  { %14565 = vst [vmem:[#allocation129_spill] sm:$0xff] %v10816_v36  ;;  %v2271_v55 = vpop.permute.xlu1 %2270  ;;  %2136 = vrot.lane.b32.xlu0 %v14566_v54, %s8341_s3  ;;  %v10838_v44 = vmul.f32 %v10412_v62, %v10816_v36  ;;  %v2646_v51 = vsel %vm549_vm2, %v14571_v19, %v14570_v48  ;;  %v10846_v43 = vsel %vm2721_vm4, %v2687_v47, %v2461_v61  ;;  %v14575_v58 = vld [vmem:[#allocation79_spill] sm:$0xff]  ;;  %v14576_v47 = vld [vmem:[#allocation140_spill] sm:$0xff]  ;;  %v14577_v19 = vld [vmem:[#allocation141_spill] sm:$0xff] }
 0x424   :  { %14568 = vst [vmem:[#allocation130_spill] sm:$0xff] %v10826_v53  ;;  %v2771_v62 = vsel %vm2721_vm4, %v2706_v4, %v14573_v2  ;;  %v2711_v12 = vsel %vm2656_vm3, %v2646_v51, %v14574_v63  ;;  %v2623_v49 = vsel %vm549_vm2, %v14575_v58, %v2079_v31  ;;  %v2647_v45 = vsel %vm549_vm2, %v14578_v39, %v14577_v19  ;;  %v14579_v36 = vld [vmem:[#allocation142_spill] sm:$0xff]  ;;  %v14581_v31 = vld [vmem:[#allocation137_spill] sm:$0xff]  ;;  %v14582_v4 = vld [vmem:[#allocation143_spill] sm:$0xff] }
 0x425   :  { %2138 = vrot.lane.b32.xlu1 %v14572_v29, %s8341_s3  ;;  %v2265_v33 = vpop.permute.xlu0 %2264  ;;  %v10862_v48 = vsel %vm2721_vm4, %v2711_v12, %v14576_v47  ;;  %v14580_v20 = vld [vmem:[#allocation78_spill] sm:$0xff]  ;;  %v2688_v63 = vsel %vm2656_vm3, %v2623_v49, %v2271_v55  ;;  %v2712_v58 = vsel %vm2656_vm3, %v2647_v45, %v14582_v4  ;;  %v14583_v61 = vld [vmem:[#allocation144_spill] sm:$0xff]  ;;  %v10879_v47 = vmul.f32 %v10532_v52, %v10846_v43  ;;  %v14585_v49 = vld [vmem:[#allocation117_spill] sm:$0xff] }
 0x426   :  { %v2644_v2 = vsel %vm549_vm2, %v14580_v20, %v14579_v36  ;;  %v2620_v36 = vsel %vm549_vm2, %v14585_v49, %v2073_v15  ;;  %v14592_v49 = vld [vmem:[#allocation169_spill] sm:$0xff] }
 0x427   :  { %v2463_v51 = vpop.permute.xlu1 %2462  ;;  %2140 = vrot.lane.b32.xlu0 %v14581_v31, %s8341_s3  ;;  %v2709_v12 = vsel %vm2656_vm3, %v2644_v2, %v14583_v61  ;;  %v10884_v20 = vpop.f32.mrb[64].mxu1  ;;  %v14587_v2 = vld [vmem:[#allocation135_spill] sm:$0xff]  ;;  %v2685_v15 = vsel %vm2656_vm3, %v2620_v36, %v2265_v33 }
 0x428   :  { %v10882_v39 = vsel %vm2721_vm4, %v2688_v63, %v2463_v51  ;;  %14584 = vst [vmem:[#allocation102_spill] sm:$0xff] %v10884_v20  ;;  %v10896_v19 = vpop.f32.mrb[65].mxu1  ;;  %v14588_v51 = vld [vmem:[#allocation145_spill] sm:$0xff]  ;;  %v10923_v36 = vmul.f32 %v10884_v20, %v10449_v28  ;;  %v10962_v46 = vmul.f32 %v10884_v20, %v10777_v3 }
 0x429   :  { %v10890_v55 = vmul.f32 %v10543_v40, %v10882_v39  ;;  %14586 = vst [vmem:[#allocation127_spill] sm:$0xff] %v10896_v19  ;;  %2142 = vrot.lane.b32.xlu1 %v14587_v2, %s8341_s3  ;;  %v2457_v63 = vpop.permute.xlu0 %2456  ;;  %v10902_v4 = vsel %vm2721_vm4, %v2712_v58, %v14588_v51  ;;  %v10909_v6 = vpop.f32.mrb[66].mxu1  ;;  %v10931_v61 = vmul.f32 %v14591_v0, %v10896_v19  ;;  %v14593_v51 = vld [vmem:[#allocation165_spill] sm:$0xff] }
 0x42a   :  { %14589 = vst [vmem:[#allocation131_spill] sm:$0xff] %v10909_v6  ;;  %v10915_v37 = vpop.f32.mrb[67].mxu1  ;;  %v10938_v33 = vsel %vm2721_vm4, %v2685_v15, %v2457_v63  ;;  %v10946_v41 = vmul.f32 %v10909_v6, %v14593_v51  ;;  %v10950_v0 = vmul.f32 %v10785_v8, %v10896_v19  ;;  %14597 = vst [vmem:[#allocation85_spill] sm:$0xff] %v10962_v46  ;;  %v14599_v8 = vld [vmem:[#allocation146_spill] sm:$0xff] }
 0x42b   :  { %14590 = vst [vmem:[#allocation86_spill] sm:$0xff] %v10915_v37  ;;  %v2075_v58 = vpop.permute.xlu1 %2074  ;;  %2328 = vrot.lane.b32.xlu0 %v14566_v54, %s8337_s23  ;;  %v10935_v1 = vmul.f32 %v14592_v49, %v10915_v37  ;;  %v10953_v45 = vmul.f32 %v2771_v62, %v10915_v37  ;;  %v14595_v49 = vld [vmem:[#allocation77_spill] sm:$0xff]  ;;  %v10966_v51 = vmul.f32 %v10909_v6, %v10781_v22  ;;  %v14600_v62 = vld [vmem:[#allocation98_spill] sm:$0xff] }
 0x42c   :  { %14594 = vst [vmem:[#allocation128_spill] sm:$0xff] %v10950_v0  ;;  %v2645_v63 = vsel %vm549_vm2, %v14596_v34, %v14595_v49  ;;  %v2774_v19 = vsel %vm2721_vm4, %v2709_v12, %v14599_v8  ;;  %v14601_v49 = vld [vmem:[#allocation149_spill] sm:$0xff]  ;;  %v2814_v15 = vmul.f32 %v10938_v33, %v10538_v56  ;;  %v14602_v12 = vld [vmem:[#allocation118_spill] sm:$0xff]  ;;  %v14612_v34 = vld [vmem:[#allocation184_spill] sm:$0xff] }
 0x42d   :  { %2330 = vrot.lane.b32.xlu1 %v14572_v29, %s8337_s23  ;;  %v10942_v28 = vpop.permute.xlu0 %2084  ;;  %14598 = vst [vmem:[#allocation132_spill] sm:$0xff] %v10966_v51  ;;  %v2710_v37 = vsel %vm2656_vm3, %v2645_v63, %v14600_v62  ;;  %v2621_v8 = vsel %vm549_vm2, %v14602_v12, %v2075_v58  ;;  %v14606_v58 = vld [vmem:[#allocation174_spill] sm:$0xff] }
 0x42e   :  { %v2775_v22 = vsel %vm2721_vm4, %v2710_v37, %v14601_v49 }
 0x42f   :  { %v2267_v53 = vpop.permute.xlu1 %2266  ;;  %2332 = vrot.lane.b32.xlu0 %v14581_v31, %s8337_s23  ;;  %v10984_v63 = vpop.f32.mrb[68].mxu1 }
 0x430   :  { %14603 = vst [vmem:[#allocation116_spill] sm:$0xff] %v10984_v63  ;;  %v2686_v6 = vsel %vm2656_vm3, %v2621_v8, %v2267_v53  ;;  %v10993_v37 = vpop.f32.mrb[69].mxu1  ;;  %v10999_v12 = vmul.f32 %v10984_v63, %v14606_v58  ;;  %v11013_v20 = vmul.f32 %v10984_v63, %v10862_v48  ;;  %v14610_v53 = vld [vmem:[#allocation176_spill] sm:$0xff] }
 0x431   :  { %14605 = vst [vmem:[#allocation84_spill] sm:$0xff] %v10993_v37  ;;  %2334 = vrot.lane.b32.xlu1 %v14587_v2, %s8337_s23  ;;  %v2277_v49 = vpop.permute.xlu0 %2276  ;;  %v11005_v8 = vpop.f32.mrb[70].mxu1  ;;  %v11009_v3 = vmul.f32 %v10546_v50, %v10993_v37  ;;  %v11028_v17 = vmul.f32 %v2774_v19, %v10993_v37 }
 0x432   :  { %14607 = vst [vmem:[#allocation105_spill] sm:$0xff] %v11005_v8  ;;  %v11019_v62 = vpop.f32.mrb[71].mxu1  ;;  %v11025_v50 = vmul.f32 %v11005_v8, %v14610_v53 }
 0x433   :  { %14609 = vst [vmem:[#allocation134_spill] sm:$0xff] %v11019_v62  ;;  %v2459_v51 = vpop.permute.xlu1 %2458  ;;  %2520 = vrot.lane.b32.xlu0 %v14566_v54, %s8342_s30  ;;  %v11039_v0 = vmul.f32 %v14612_v34, %v11019_v62  ;;  %v14613_v54 = vld [vmem:[#allocation183_spill] sm:$0xff]  ;;  %v11048_v37 = vmul.f32 %v2775_v22, %v11019_v62  ;;  %v14617_v62 = vpack.c.bf16 %v10890_v55, %v10879_v47 }
 0x434   :  { %v11035_v46 = vsel %vm2721_vm4, %v2686_v6, %v2459_v51  ;;  %v11052_v6 = vmul.f32 %v11005_v8, %v10902_v4  ;;  %v14619_v4 = vpack.c.bf16 %v10608_v7, %v10604_v18  ;;  %v14620_v18 = vld [vmem:[#allocation120_spill] sm:$0xff] }
 0x435   :  { %v2815_v53 = vmul.f32 %v11035_v46, %v14613_v54  ;;  %2522 = vrot.lane.b32.xlu1 %v14572_v29, %s8342_s30  ;;  %v2469_v19 = vpop.permute.xlu0 %2468  ;;  %v2626_v7 = vsel %vm549_vm2, %v14620_v18, %v10942_v28 }
 0x436   :  { %v2691_v55 = vsel %vm2656_vm3, %v2626_v7, %v2277_v49 }
 0x437   :  { %v2087_v34 = vpop.permute.xlu1 %2086  ;;  %2524 = vrot.lane.b32.xlu0 %v14581_v31, %s8342_s30  ;;  %v2896_v58 = vpack.c.bf16 %v2815_v53, %v2814_v15  ;;  %v11062_v22 = vpop.f32.mrb[72].mxu1  ;;  %v2756_v26 = vsel %vm2721_vm4, %v2691_v55, %v2469_v19  ;;  %v14625_v55 = vpack.c.bf16 %v10594_v38, %v10590_v23  ;;  %v14628_v38 = vld [vmem:[#allocation82_spill] sm:$0xff] }
 0x438   :  { %14614 = vst [vmem:[#allocation138_spill] sm:$0xff] %v11062_v22  ;;  %v11068_v51 = vpop.f32.mrb[73].mxu1  ;;  %v11074_v53 = vmul.f32 %v11062_v22, %v10620_v5  ;;  %v11148_v7 = vmul.f32 %v10564_v9, %v2756_v26 }
 0x439   :  { %14615 = vst [vmem:[#allocation110_spill] sm:$0xff] %v11068_v51  ;;  %2526 = vrot.lane.b32.xlu1 %v14587_v2, %s8342_s30  ;;  %7385 = vmatprep.mubr.bf16.mxu0 %v2896_v58  ;;  %v2081_v15 = vpop.permute.xlu0 %2080  ;;  %v11080_v48 = vpop.f32.mrb[74].mxu1  ;;  %v11087_v58 = vmul.f32 %v10698_v57, %v11068_v51 }
 0x43a   :  { %14616 = vst [vmem:[#allocation133_spill] sm:$0xff] %v11080_v48  ;;  %7386 = vmatmul.mubr.bf16.gmra.mrb[76].mxu0 %v14617_v62  ;;  %v11093_v63 = vpop.f32.mrb[75].mxu1  ;;  %v11100_v47 = vmul.f32 %v11080_v48, %v10628_v24  ;;  %v14621_v24 = vld [vmem:[#allocation81_spill] sm:$0xff]  ;;  %v2624_v26 = vsel %vm549_vm2, %v14628_v38, %v2081_v15 }
 0x43b   :  { %14618 = vst [vmem:[#allocation136_spill] sm:$0xff] %v11093_v63  ;;  %v2279_v8 = vpop.permute.xlu1 %2278  ;;  %7389 = vmatprep.mubr.bf16.mxu0 %v14619_v4  ;;  %v11108_v62 = vmul.f32 %v10742_v27, %v11093_v63  ;;  %v2627_v4 = vsel %vm549_vm2, %v14621_v24, %v2087_v34  ;;  %v14627_v34 = vpack.c.bf16 %v10674_v11, %v10670_v59 }
 0x43c   :  { %v2692_v25 = vsel %vm2656_vm3, %v2627_v4, %v2279_v8  ;;  %v14630_v11 = vpack.c.bf16 %v10684_v42, %v10680_v32 }
 0x43d   :  { %v2273_v60 = vpop.permute.xlu0 %2272 }
 0x43f   :  { %v2471_v27 = vpop.permute.xlu1 %2470  ;;  %v11123_v5 = vpop.f32.mrb[76].mxu1 }
 0x440   :  { %v2757_v21 = vsel %vm2721_vm4, %v2692_v25, %v2471_v27  ;;  %14622 = vst [vmem:[#allocation139_spill] sm:$0xff] %v11123_v5  ;;  %v11132_v18 = vpop.f32.mrb[77].mxu1  ;;  %v11136_v8 = vmul.f32 %v11123_v5, %v10846_v43  ;;  %v14629_v25 = vld [vmem:[#allocation119_spill] sm:$0xff] }
 0x441   :  { %v11126_v2 = vmul.f32 %v10580_v13, %v2757_v21  ;;  %14623 = vst [vmem:[#allocation79_spill] sm:$0xff] %v11132_v18  ;;  %v2465_v49 = vpop.permute.xlu0 %2464  ;;  %v11142_v19 = vpop.f32.mrb[78].mxu1 }
 0x442   :  { %14624 = vst [vmem:[#allocation140_spill] sm:$0xff] %v11142_v19  ;;  %7390 = vmatmul.mubr.bf16.gmra.mrb[80].mxu0 %v14625_v55  ;;  %v11154_v4 = vpop.f32.mrb[79].mxu1  ;;  %v11161_v23 = vmul.f32 %v11142_v19, %v10882_v39  ;;  %v11169_v55 = vmul.f32 %v10938_v33, %v11132_v18  ;;  %v2689_v33 = vsel %vm2656_vm3, %v2624_v26, %v2273_v60 }
 0x443   :  { %14626 = vst [vmem:[#allocation141_spill] sm:$0xff] %v11154_v4  ;;  %v2083_v27 = vpop.permute.xlu1 %2082  ;;  %7393 = vmatprep.mubr.bf16.mxu0 %v14627_v34  ;;  %v11173_v43 = vmul.f32 %v11035_v46, %v11154_v4  ;;  %v2754_v46 = vsel %vm2721_vm4, %v2689_v33, %v2465_v49  ;;  %v14631_v34 = vpack.c.bf16 %v10746_v30, %v10731_v35  ;;  %v14632_v49 = vld [vmem:[#allocation187_spill] sm:$0xff]  ;;  %v14637_v33 = vld [vmem:[#allocation121_spill] sm:$0xff] }
 0x444   :  { %v2625_v28 = vsel %vm549_vm2, %v14629_v25, %v2083_v27  ;;  %v11196_v60 = vmul.f32 %v2754_v46, %v10572_v14  ;;  %v14635_v35 = vpack.c.bf16 %v10838_v44, %v10834_v10  ;;  %v14639_v44 = vld [vmem:[#allocation189_spill] sm:$0xff] }
 0x445   :  { %v2093_v59 = vpop.permute.xlu0 %2092 }
 0x447   :  { %v2275_v21 = vpop.permute.xlu1 %2274 }
 0x448   :  { %v2690_v39 = vsel %vm2656_vm3, %v2625_v28, %v2275_v21  ;;  %v14633_v28 = vld [vmem:[#allocation192_spill] sm:$0xff] }
 0x449   :  { %v2285_v24 = vpop.permute.xlu0 %2284  ;;  %v14634_v21 = vpack.c.bf16 %v10735_v16, %v14633_v28 }
 0x44a   :  { %7394 = vmatmul.mubr.bf16.gmra.mrb[84].mxu0 %v14630_v11 }
 0x44b   :  { %v2467_v57 = vpop.permute.xlu1 %2466  ;;  %7397 = vmatprep.mubr.bf16.mxu0 %v14631_v34 }
 0x44c   :  { %v2755_v15 = vsel %vm2721_vm4, %v2690_v39, %v2467_v57  ;;  %v14636_v57 = vld [vmem:[#allocation89_spill] sm:$0xff] }
 0x44d   :  { %v11199_v26 = vmul.f32 %v2755_v15, %v14632_v49  ;;  %v2477_v25 = vpop.permute.xlu0 %2476  ;;  %v2630_v38 = vsel %vm549_vm2, %v14636_v57, %v2093_v59 }
 0x44e   :  { %v2695_v11 = vsel %vm2656_vm3, %v2630_v38, %v2285_v24  ;;  %v14641_v24 = vld [vmem:[#allocation101_spill] sm:$0xff] }
 0x44f   :  { %v2095_v27 = vpop.permute.xlu1 %2094  ;;  %v2760_v34 = vsel %vm2721_vm4, %v2695_v11, %v2477_v25 }
 0x450   :  { %v2631_v46 = vsel %vm549_vm2, %v14637_v33, %v2095_v27  ;;  %v14643_v27 = vpack.c.bf16 %v10935_v1, %v10931_v61  ;;  %v14646_v1 = vpack.c.bf16 %v10946_v41, %v10923_v36  ;;  %v14650_v41 = vpack.c.bf16 %v11025_v50, %v10999_v12 }
 0x451   :  { %v2089_v42 = vpop.permute.xlu0 %2088 }
 0x452   :  { %7398 = vmatmul.mubr.bf16.gmra.mrb[88].mxu0 %v14634_v21  ;;  %v14638_v21 = vld [vmem:[#allocation113_spill] sm:$0xff] }
 0x453   :  { %v2287_v30 = vpop.permute.xlu1 %2286  ;;  %7401 = vmatprep.mubr.bf16.mxu0 %v14635_v35  ;;  %v11218_v32 = vmul.f32 %v14638_v21, %v2760_v34  ;;  %v14640_v35 = vld [vmem:[#allocation130_spill] sm:$0xff]  ;;  %v14644_v34 = vld [vmem:[#allocation123_spill] sm:$0xff] }
 0x454   :  { %v2696_v15 = vsel %vm2656_vm3, %v2631_v46, %v2287_v30  ;;  %v14642_v57 = vpack.c.bf16 %v14640_v35, %v14641_v24  ;;  %v2628_v33 = vsel %vm549_vm2, %v14644_v34, %v2089_v42  ;;  %v14649_v34 = vld [vmem:[#allocation190_spill] sm:$0xff] }
 0x455   :  { %v2281_v39 = vpop.permute.xlu0 %2280 }
 0x456   :  { %v2693_v46 = vsel %vm2656_vm3, %v2628_v33, %v2281_v39  ;;  %v14648_v39 = vld [vmem:[#allocation188_spill] sm:$0xff] }
 0x457   :  { %v2479_v16 = vpop.permute.xlu1 %2478 }
 0x458   :  { %v2761_v28 = vsel %vm2721_vm4, %v2696_v15, %v2479_v16 }
 0x459   :  { %v11221_v10 = vmul.f32 %v14639_v44, %v2761_v28  ;;  %v2473_v59 = vpop.permute.xlu0 %2472  ;;  %v14645_v28 = vld [vmem:[#allocation122_spill] sm:$0xff] }
 0x45a   :  { %7402 = vmatmul.mubr.bf16.gmra.mrb[92].mxu0 %v14642_v57  ;;  %v2758_v16 = vsel %vm2721_vm4, %v2693_v46, %v2473_v59  ;;  %v14647_v57 = vpack.c.bf16 %v11039_v0, %v11009_v3  ;;  %v14652_v0 = vld [vmem:[#allocation94_spill] sm:$0xff] }
 0x45b   :  { %v2091_v25 = vpop.permute.xlu1 %2090  ;;  %7405 = vmatprep.mubr.bf16.mxu0 %v14643_v27  ;;  %v2917_v30 = vpack.c.bf16 %v11221_v10, %v11218_v32  ;;  %v2854_v27 = vmul.f32 %v2758_v16, %v14648_v39  ;;  %v14670_v10 = vld [vmem:[#allocation96_spill] sm:$0xff] }
 0x45c   :  { %v2629_v35 = vsel %vm549_vm2, %v14645_v28, %v2091_v25 }
 0x45d   :  { %v2101_v38 = vpop.permute.xlu0 %2100 }
 0x45e   :  { %v2634_v3 = vsel %vm549_vm2, %v14652_v0, %v2101_v38  ;;  %v14654_v38 = vld [vmem:[#allocation114_spill] sm:$0xff] }
 0x45f   :  { %v2283_v11 = vpop.permute.xlu1 %2282 }
 0x460   :  { %v2694_v61 = vsel %vm2656_vm3, %v2629_v35, %v2283_v11  ;;  %v14651_v11 = vpack.c.bf16 %v11108_v62, %v11087_v58 }
 0x461   :  { %v2293_v15 = vpop.permute.xlu0 %2292 }
 0x462   :  { %7406 = vmatmul.mubr.bf16.gmra.mrb[96].mxu0 %v14646_v1  ;;  %v2699_v16 = vsel %vm2656_vm3, %v2634_v3, %v2293_v15  ;;  %v14655_v15 = vld [vmem:[#allocation191_spill] sm:$0xff] }
 0x463   :  { %v2475_v24 = vpop.permute.xlu1 %2474  ;;  %7409 = vmatprep.mubr.bf16.mxu0 %v14647_v57 }
 0x464   :  { %v2759_v42 = vsel %vm2721_vm4, %v2694_v61, %v2475_v24  ;;  %v14653_v61 = vld [vmem:[#allocation91_spill] sm:$0xff] }
 0x465   :  { %v2855_v59 = vmul.f32 %v2759_v42, %v14649_v34  ;;  %v2485_v33 = vpop.permute.xlu0 %2484 }
 0x466   :  { %v2764_v1 = vsel %vm2721_vm4, %v2699_v16, %v2485_v33 }
 0x467   :  { %v2103_v46 = vpop.permute.xlu1 %2102  ;;  %v2916_v25 = vpack.c.bf16 %v2855_v59, %v2854_v27  ;;  %v2860_v27 = vmul.f32 %v14654_v38, %v2764_v1 }
 0x468   :  { %v2635_v24 = vsel %vm549_vm2, %v14653_v61, %v2103_v46  ;;  %v14656_v46 = vpack.c.bf16 %v11100_v47, %v11074_v53  ;;  %v14658_v61 = vld [vmem:[#allocation92_spill] sm:$0xff]  ;;  %v14660_v47 = vpack.c.bf16 %v11161_v23, %v11136_v8  ;;  %v14664_v8 = vpack.c.bf16 %v11126_v2, %v11148_v7 }
 0x469   :  { %v2097_v28 = vpop.permute.xlu0 %2096  ;;  %v14667_v2 = vld [vmem:[#allocation108_spill] sm:$0xff] }
 0x46a   :  { %7410 = vmatmul.mubr.bf16.gmra.mrb[100].mxu0 %v14650_v41  ;;  %v2632_v1 = vsel %vm549_vm2, %v14658_v61, %v2097_v28 }
 0x46b   :  { %v2295_v36 = vpop.permute.xlu1 %2294  ;;  %7413 = vmatprep.mubr.bf16.mxu0 %v14651_v11 }
 0x46c   :  { %v2700_v12 = vsel %vm2656_vm3, %v2635_v24, %v2295_v36  ;;  %v14657_v36 = vpack.c.bf16 %v11173_v43, %v11169_v55 }
 0x46d   :  { %v2289_v35 = vpop.permute.xlu0 %2288 }
 0x46e   :  { %v11259_v57 = vpop.f32.mrb[48].mxu0  ;;  %v2697_v24 = vsel %vm2656_vm3, %v2632_v1, %v2289_v35  ;;  %v14662_v35 = vld [vmem:[#allocation115_spill] sm:$0xff] }
 0x46f   :  { %v2487_v50 = vpop.permute.xlu1 %2486  ;;  %v11262_v42 = vpop.f32.mrb[49].mxu0 }
 0x470   :  { %v2765_v58 = vsel %vm2721_vm4, %v2700_v12, %v2487_v50  ;;  %v11265_v62 = vpop.f32.mrb[50].mxu0 }
 0x471   :  { %v2861_v59 = vmul.f32 %v14655_v15, %v2765_v58  ;;  %v11269_v41 = vpop.f32.mrb[51].mxu0  ;;  %v2481_v33 = vpop.permute.xlu0 %2480  ;;  %v14659_v58 = vld [vmem:[#allocation124_spill] sm:$0xff] }
 0x472   :  { %7414 = vmatmul.mubr.bf16.gmra.mrb[104].mxu0 %v14656_v46  ;;  %v2762_v50 = vsel %vm2721_vm4, %v2697_v24, %v2481_v33  ;;  %v14663_v46 = vld [vmem:[#allocation193_spill] sm:$0xff] }
 0x473   :  { %v2099_v11 = vpop.permute.xlu1 %2098  ;;  %7417 = vmatprep.mubr.bf16.mxu0 %v14657_v36  ;;  %v2919_v0 = vpack.c.bf16 %v2861_v59, %v2860_v27  ;;  %v14661_v27 = vpack.c.bf16 %v11199_v26, %v11196_v60  ;;  %v2858_v59 = vmul.f32 %v2762_v50, %v14662_v35 }
 0x474   :  { %v2633_v53 = vsel %vm549_vm2, %v14659_v58, %v2099_v11  ;;  %v14666_v58 = vld [vmem:[#allocation93_spill] sm:$0xff] }
 0x475   :  { %v2109_v3 = vpop.permute.xlu0 %2108 }
 0x477   :  { %v2291_v16 = vpop.permute.xlu1 %2290 }
 0x478   :  { %v2698_v43 = vsel %vm2656_vm3, %v2633_v53, %v2291_v16  ;;  %v14665_v16 = vld [vmem:[#allocation125_spill] sm:$0xff] }
 0x479   :  { %v2301_v12 = vpop.permute.xlu0 %2300  ;;  %v2638_v60 = vsel %vm549_vm2, %v14665_v16, %v2109_v3 }
 0x47a   :  { %7418 = vmatmul.mubr.bf16.gmra.mrb[108].mxu0 %v14660_v47  ;;  %v2703_v26 = vsel %vm2656_vm3, %v2638_v60, %v2301_v12 }
 0x47b   :  { %v2483_v55 = vpop.permute.xlu1 %2482  ;;  %7421 = vmatprep.mubr.bf16.mxu0 %v14661_v27  ;;  %v14668_v27 = vld [vmem:[#allocation100_spill] sm:$0xff] }
 0x47c   :  { %v2763_v28 = vsel %vm2721_vm4, %v2698_v43, %v2483_v55 }
 0x47d   :  { %v2859_v33 = vmul.f32 %v2763_v28, %v14663_v46  ;;  %v2493_v36 = vpop.permute.xlu0 %2492 }
 0x47e   :  { %v2768_v50 = vsel %vm2721_vm4, %v2703_v26, %v2493_v36 }
 0x47f   :  { %v2111_v61 = vpop.permute.xlu1 %2110  ;;  %v2918_v11 = vpack.c.bf16 %v2859_v33, %v2858_v59  ;;  %v2864_v7 = vmul.f32 %v14667_v2, %v2768_v50  ;;  %v7713_v33 = vld [vmem:[%s13808_s4] sm:$0xff]  }
 0x480   :  { %v2639_v53 = vsel %vm549_vm2, %v14666_v58, %v2111_v61  ;;  %v14669_v61 = vld [vmem:[#allocation95_spill] sm:$0xff]  ;;  %7453 = vmatprep.subr.bf16.mxu1 %v7713_v33 }
 0x481   :  { %v2105_v1 = vpop.permute.xlu0 %2104  ;;  %7454 = vmatpush3.bf16.msra.mxu1 %v7713_v33 }
 0x482   :  { %7422 = vmatmul.mubr.bf16.gmra.mrb[112].mxu0 %v14664_v8  ;;  %v2636_v8 = vsel %vm549_vm2, %v14669_v61, %v2105_v1  ;;  %v14671_v1 = vld [vmem:[#allocation126_spill] sm:$0xff] }
 0x483   :  { %v2303_v23 = vpop.permute.xlu1 %2302  ;;  %7425 = vmatprep.mubr.bf16.mxu0 %v2916_v25 }
 0x484   :  { %v2704_v47 = vsel %vm2656_vm3, %v2639_v53, %v2303_v23 }
 0x485   :  { %v2297_v24 = vpop.permute.xlu0 %2296 }
 0x486   :  { %v2701_v23 = vsel %vm2656_vm3, %v2636_v8, %v2297_v24  ;;  %v14672_v24 = vld [vmem:[#allocation129_spill] sm:$0xff] }
 0x487   :  { %v2495_v43 = vpop.permute.xlu1 %2494 }
 0x488   :  { %v2769_v55 = vsel %vm2721_vm4, %v2704_v47, %v2495_v43 }
 0x489   :  { %v2865_v25 = vmul.f32 %v14668_v27, %v2769_v55  ;;  %v2489_v28 = vpop.permute.xlu0 %2488 }
 0x48a   :  { %7426 = vmatmul.mubr.bf16.gmra.mrb[116].mxu0 %v2917_v30  ;;  %v2766_v32 = vsel %vm2721_vm4, %v2701_v23, %v2489_v28  ;;  %v14673_v28 = vld [vmem:[#allocation151_spill] sm:$0xff] }
 0x48b   :  { %v2107_v3 = vpop.permute.xlu1 %2106  ;;  %7429 = vmatprep.mubr.bf16.mxu0 %v2918_v11  ;;  %v2921_v12 = vpack.c.bf16 %v2865_v25, %v2864_v7  ;;  %v2862_v53 = vmul.f32 %v2766_v32, %v14671_v1  ;;  %v14676_v23 = vld [vmem:[#allocation103_spill] sm:$0xff]  ;;  %v14677_v32 = vld [vmem:[#allocation90_spill] sm:$0xff] }
 0x48c   :  { %v2637_v30 = vsel %vm549_vm2, %v14670_v10, %v2107_v3  ;;  %v14674_v3 = vld [vmem:[#allocation88_spill] sm:$0xff]  ;;  %v2649_v10 = vsel %vm549_vm2, %v14677_v32, %v14676_v23  ;;  %v14684_v32 = vld [vmem:[#allocation87_spill] sm:$0xff] }
 0x48d   :  { %v2325_v59 = vpop.permute.xlu0 %2324  ;;  %v2648_v33 = vsel %vm549_vm2, %v14674_v3, %v14673_v28  ;;  %v14681_v28 = vld [vmem:[#allocation150_spill] sm:$0xff]  ;;  %v14682_v3 = vld [vmem:[#allocation80_spill] sm:$0xff] }
 0x48f   :  { %v2299_v36 = vpop.permute.xlu1 %2298 }
 0x490   :  { %v2702_v11 = vsel %vm2656_vm3, %v2637_v30, %v2299_v36  ;;  %v14675_v36 = vld [vmem:[#allocation152_spill] sm:$0xff] }
 0x491   :  { %v2513_v16 = vpop.permute.xlu0 %2512  ;;  %v2713_v61 = vsel %vm2656_vm3, %v2648_v33, %v14675_v36 }
 0x492   :  { %7430 = vmatmul.mubr.bf16.gmra.mrb[120].mxu0 %v2919_v0  ;;  %v2778_v30 = vsel %vm2721_vm4, %v2713_v61, %v2513_v16  ;;  %v14683_v61 = vld [vmem:[#allocation153_spill] sm:$0xff] }
 0x493   :  { %v2491_v60 = vpop.permute.xlu1 %2490  ;;  %v11319_v26 = vpop.f32.mrb[52].mxu0  ;;  %v2874_v23 = vmul.f32 %v2778_v30, %v11068_v51 }
 0x494   :  { %v2767_v50 = vsel %vm2721_vm4, %v2702_v11, %v2491_v60  ;;  %v11322_v58 = vpop.f32.mrb[53].mxu0  ;;  %v14678_v11 = vld [vmem:[#allocation157_spill] sm:$0xff] }
 0x495   :  { %v2863_v47 = vmul.f32 %v2767_v50, %v14672_v24  ;;  %v11326_v43 = vpop.f32.mrb[54].mxu0  ;;  %v2517_v55 = vpop.permute.xlu0 %2516  ;;  %v2714_v60 = vsel %vm2656_vm3, %v2649_v10, %v14678_v11  ;;  %v2651_v10 = vsel %vm549_vm2, %v14684_v32, %v14683_v61 }
 0x496   :  { %v11328_v7 = vpop.f32.mrb[55].mxu0 }
 0x497   :  { %v2327_v25 = vpop.permute.xlu1 %2326  ;;  %v2920_v0 = vpack.c.bf16 %v2863_v47, %v2862_v53  ;;  %v14679_v53 = vld [vmem:[#allocation128_spill] sm:$0xff] }
 0x498   :  { %v14680_v47 = vpack.c.bf16 %v10953_v45, %v14679_v53  ;;  %v2716_v11 = vsel %vm2656_vm3, %v2651_v10, %v2327_v25 }
 0x499   :  { %7433 = vmatprep.mubr.bf16.mxu0 %v2920_v0  ;;  %v2137_v8 = vpop.permute.xlu0 %2136  ;;  %v2650_v0 = vsel %vm549_vm2, %v14682_v3, %v14681_v28  ;;  %v14685_v3 = vld [vmem:[#allocation132_spill] sm:$0xff] }
 0x49a   :  { %7434 = vmatmul.mubr.bf16.gmra.mrb[124].mxu0 %v2921_v12  ;;  %v2715_v36 = vsel %vm2656_vm3, %v2650_v0, %v2325_v59  ;;  %v14686_v0 = vld [vmem:[#allocation85_spill] sm:$0xff] }
 0x49b   :  { %v2515_v50 = vpop.permute.xlu1 %2514  ;;  %7437 = vmatprep.mubr.bf16.mxu0 %v14680_v47  ;;  %v2780_v45 = vsel %vm2721_vm4, %v2715_v36, %v2517_v55  ;;  %v14688_v36 = vpack.c.bf16 %v11048_v37, %v11028_v17  ;;  %v7715_v17 = vld [vmem:[%s13808_s4 + $0x10] sm:$0xff]  }
 0x49c   :  { %v2779_v33 = vsel %vm2721_vm4, %v2714_v60, %v2515_v50  ;;  %v7714_v60 = vld [vmem:[%s13808_s4 + $0x8] sm:$0xff]   ;;  %v2876_v30 = vmul.f32 %v11062_v22, %v2780_v45  ;;  %v14690_v37 = vld [vmem:[#allocation83_spill] sm:$0xff] }
 0x49d   :  { %v2875_v12 = vmul.f32 %v2779_v33, %v11093_v63  ;;  %v2141_v16 = vpop.permute.xlu0 %2140  ;;  %7455 = vmatprep.subr.bf16.mxu1 %v7714_v60  ;;  %v14687_v33 = vpack.c.bf16 %v14685_v3, %v14686_v0 }
 0x49e   :  { %7456 = vmatpush3.bf16.msra.mxu1 %v7714_v60 }
 0x49f   :  { %v2519_v53 = vpop.permute.xlu1 %2518  ;;  %v2926_v47 = vpack.c.bf16 %v2875_v12, %v2874_v23  ;;  %7457 = vmatprep.subr.bf16.mxu1 %v7715_v17 }
 0x4a0   :  { %v2781_v59 = vsel %vm2721_vm4, %v2716_v11, %v2519_v53  ;;  %v14689_v11 = vpack.c.bf16 %v11052_v6, %v11013_v20 }
 0x4a1   :  { %v2877_v50 = vmul.f32 %v11080_v48, %v2781_v59  ;;  %v2329_v28 = vpop.permute.xlu0 %2328 }
 0x4a2   :  { %7438 = vmatmul.mubr.bf16.gmra.mrb[128].mxu0 %v14687_v33  ;;  %7458 = vmatpush3.bf16.msra.mxu1 %v7715_v17 }
 0x4a3   :  { %v2139_v55 = vpop.permute.xlu1 %2138  ;;  %v11365_v25 = vpop.f32.mrb[56].mxu0  ;;  %7441 = vmatprep.mubr.bf16.mxu0 %v14688_v36  ;;  %v2927_v23 = vpack.c.bf16 %v2877_v50, %v2876_v30  ;;  %v2652_v30 = vsel %vm549_vm2, %v14690_v37, %v2137_v8  ;;  %v2654_v36 = vsel %vm549_vm2, %v14581_v31, %v2141_v16 }
 0x4a4   :  { %v11370_v12 = vpop.f32.mrb[57].mxu0  ;;  %v2717_v50 = vsel %vm2656_vm3, %v2652_v30, %v2329_v28  ;;  %v2653_v3 = vsel %vm549_vm2, %v14572_v29, %v2139_v55 }
 0x4a5   :  { %v11372_v61 = vpop.f32.mrb[58].mxu0  ;;  %v2333_v32 = vpop.permute.xlu0 %2332 }
 0x4a6   :  { %v11374_v10 = vpop.f32.mrb[59].mxu0 }
 0x4a7   :  { %v2143_v45 = vpop.permute.xlu1 %2142 }
 0x4a9   :  { %v2521_v60 = vpop.permute.xlu0 %2520 }
 0x4aa   :  { %7442 = vmatmul.mubr.bf16.gmra.mrb[132].mxu0 %v14689_v11  ;;  %v2782_v20 = vsel %vm2721_vm4, %v2717_v50, %v2521_v60  ;;  %v2719_v11 = vsel %vm2656_vm3, %v2654_v36, %v2333_v32  ;;  %v14691_v60 = vld [vmem:[#allocation135_spill] sm:$0xff]  ;;  %v7717_v36 = vld [vmem:[%s13808_s4 + $0x20] sm:$0xff]  }
 0x4ab   :  { %v2331_v53 = vpop.permute.xlu1 %2330  ;;  %7445 = vmatprep.mubr.bf16.mxu0 %v2926_v47  ;;  %v2878_v29 = vmul.f32 %v2782_v20, %v11132_v18 }
 0x4ac   :  { %v2718_v47 = vsel %vm2656_vm3, %v2653_v3, %v2331_v53  ;;  %v2655_v53 = vsel %vm549_vm2, %v14691_v60, %v2143_v45  ;;  %v7716_v45 = vld [vmem:[%s13808_s4 + $0x18] sm:$0xff]  }
 0x4ad   :  { %v2525_v6 = vpop.permute.xlu0 %2524  ;;  %7459 = vmatprep.subr.bf16.mxu1 %v7716_v45 }
 0x4ae   :  { %v2784_v17 = vsel %vm2721_vm4, %v2719_v11, %v2525_v6  ;;  %7460 = vmatpush3.bf16.msra.mxu1 %v7716_v45 }
 0x4af   :  { %v2335_v59 = vpop.permute.xlu1 %2334  ;;  %v2880_v32 = vmul.f32 %v11123_v5, %v2784_v17  ;;  %7461 = vmatprep.subr.bf16.mxu1 %v7717_v36 }
 0x4b0   :  { %v2720_v31 = vsel %vm2656_vm3, %v2655_v53, %v2335_v59  ;;  %v7718_v53 = vld [vmem:[%s13808_s4 + $0x28] sm:$0xff]  }
 0x4b2   :  { %7446 = vmatmul.mubr.bf16.gmra.mrb[136].mxu0 %v2927_v23  ;;  %7462 = vmatpush3.bf16.msra.mxu1 %v7717_v36 }
 0x4b3   :  { %v2523_v0 = vpop.permute.xlu1 %2522  ;;  %v11389_v33 = vpop.f32.mrb[60].mxu0  ;;  %7463 = vmatprep.subr.bf16.mxu1 %v7718_v53 }
 0x4b4   :  { %v2783_v8 = vsel %vm2721_vm4, %v2718_v47, %v2523_v0  ;;  %v11394_v28 = vpop.f32.mrb[61].mxu0 }
 0x4b5   :  { %v2879_v55 = vmul.f32 %v2783_v8, %v11154_v4  ;;  %v11399_v23 = vpop.f32.mrb[62].mxu0 }
 0x4b6   :  { %v11404_v37 = vpop.f32.mrb[63].mxu0  ;;  %7464 = vmatpush3.bf16.msra.mxu1 %v7718_v53 }
 0x4b7   :  { %v2527_v16 = vpop.permute.xlu1 %2526  ;;  %v2928_v30 = vpack.c.bf16 %v2879_v55, %v2878_v29 }
 0x4b8   :  { %v2785_v50 = vsel %vm2721_vm4, %v2720_v31, %v2527_v16 }
 0x4b9   :  { %v2881_v3 = vmul.f32 %v11142_v19, %v2785_v50  ;;  %7449 = vmatprep.mubr.bf16.mxu0 %v2928_v30  ;;  %v7719_v30 = vld [vmem:[%s13808_s4 + $0x30] sm:$0xff]   ;;  %v7720_v50 = vld [vmem:[%s13808_s4 + $0x38] sm:$0xff]  }
 0x4ba   :  { %7465 = vmatprep.subr.bf16.mxu1 %v7719_v30 }
 0x4bb   :  { %v2929_v20 = vpack.c.bf16 %v2881_v3, %v2880_v32  ;;  %7466 = vmatpush3.bf16.msra.mxu1 %v7719_v30 }
 0x4bc   :  { %7467 = vmatprep.subr.bf16.mxu1 %v7720_v50 }
 0x4bd   :  { %7450 = vmatmul.mubr.bf16.gmra.mrb[140].mxu0 %v2929_v20 }
 0x4bf   :  { %7468 = vmatpush3.bf16.msra.mxu1 %v7720_v50 }
 0x4c5   :  { %v11413_v6 = vpop.f32.mrb[64].mxu0 }
 0x4c6   :  { %v11415_v59 = vpop.f32.mrb[65].mxu0 }
 0x4c7   :  { %v11417_v47 = vpop.f32.mrb[66].mxu0 }
 0x4c8   :  { %14692 = vst [vmem:[#allocation111_spill] sm:$0xff] %v11417_v47  ;;  %v11419_v0 = vpop.f32.mrb[67].mxu0 }
 0x4c9   :  { %14693 = vst [vmem:[#allocation142_spill] sm:$0xff] %v11419_v0 }
 0x4dd   :  { %v11424_v8 = vpop.f32.mrb[68].mxu0 }
 0x4de   :  { %v11426_v11 = vpop.f32.mrb[69].mxu0 }
 0x4df   :  { %v11428_v29 = vpop.f32.mrb[70].mxu0 }
 0x4e0   :  { %14694 = vst [vmem:[#allocation78_spill] sm:$0xff] %v11428_v29  ;;  %v11430_v55 = vpop.f32.mrb[71].mxu0 }
 0x4e1   :  { %14695 = vst [vmem:[#allocation137_spill] sm:$0xff] %v11430_v55 }
 0x4f5   :  { %v11432_v60 = vpop.f32.mrb[72].mxu0 }
 0x4f6   :  { %v11437_v17 = vpop.f32.mrb[73].mxu0 }
 0x4f7   :  { %v11439_v31 = vpop.f32.mrb[74].mxu0 }
 0x4f8   :  { %v11441_v16 = vpop.f32.mrb[75].mxu0 }
 0x4f9   :  { %14696 = vst [vmem:[#allocation143_spill] sm:$0xff] %v11441_v16 }
 0x50d   :  { %v11449_v32 = vpop.f32.mrb[76].mxu0 }
 0x50e   :  { %14697 = vst [vmem:[#allocation144_spill] sm:$0xff] %v11449_v32  ;;  %v11451_v3 = vpop.f32.mrb[77].mxu0 }
 0x50f   :  { %14698 = vst [vmem:[#allocation117_spill] sm:$0xff] %v11451_v3  ;;  %v11453_v20 = vpop.f32.mrb[78].mxu0 }
 0x510   :  { %14699 = vst [vmem:[#allocation145_spill] sm:$0xff] %v11453_v20  ;;  %v11455_v45 = vpop.f32.mrb[79].mxu0 }
 0x511   :  { %14700 = vst [vmem:[#allocation168_spill] sm:$0xff] %v11455_v45 }
 0x515   :  { %v7391_v36 = vpop.f32.mrb[80].mxu0 }
 0x516   :  { %v11457_v53 = vmul.f32 2.0, %v7391_v36  ;;  %v3156_v54 = vpop.f32.mrb[81].mxu0 }
 0x517   :  { %v11459_v4 = vmul.f32 2.0, %v3156_v54  ;;  %v7392_v30 = vpop.f32.mrb[82].mxu0 }
 0x518   :  { %v11461_v40 = vmul.f32 2.0, %v7392_v30  ;;  %v3159_v19 = vpop.f32.mrb[83].mxu0 }
 0x519   :  { %v11465_v56 = vmul.f32 2.0, %v3159_v19  ;;  %v14708_v50 = vsub.f32 %v11459_v4, %v11262_v42 }
 0x51d   :  { %v7395_v54 = vpop.f32.mrb[84].mxu0 }
 0x51e   :  { %v11473_v5 = vmul.f32 2.0, %v7395_v54  ;;  %v3172_v30 = vpop.f32.mrb[85].mxu0 }
 0x51f   :  { %v11475_v63 = vmul.f32 2.0, %v3172_v30  ;;  %v7396_v48 = vpop.f32.mrb[86].mxu0 }
 0x520   :  { %v11477_v51 = vmul.f32 2.0, %v7396_v48  ;;  %v3175_v19 = vpop.f32.mrb[87].mxu0  ;;  %v14711_v42 = vsub.f32 %v11473_v5, %v11319_v26 }
 0x521   :  { %v11481_v18 = vmul.f32 2.0, %v3175_v19 }
 0x525   :  { %v7399_v30 = vpop.f32.mrb[88].mxu0 }
 0x526   :  { %v11489_v22 = vmul.f32 2.0, %v7399_v30  ;;  %v3188_v48 = vpop.f32.mrb[89].mxu0 }
 0x527   :  { %v11491_v24 = vmul.f32 2.0, %v3188_v48  ;;  %v7400_v27 = vpop.f32.mrb[90].mxu0 }
 0x528   :  { %v11493_v2 = vmul.f32 2.0, %v7400_v27  ;;  %v3191_v19 = vpop.f32.mrb[91].mxu0 }
 0x529   :  { %v11497_v52 = vmul.f32 2.0, %v3191_v19 }
 0x52d   :  { %v7403_v48 = vpop.f32.mrb[92].mxu0 }
 0x52e   :  { %v11505_v1 = vmul.f32 2.0, %v7403_v48  ;;  %v3204_v27 = vpop.f32.mrb[93].mxu0 }
 0x52f   :  { %v11507_v15 = vmul.f32 2.0, %v3204_v27  ;;  %v7404_v38 = vpop.f32.mrb[94].mxu0 }
 0x530   :  { %v11509_v46 = vmul.f32 2.0, %v7404_v38  ;;  %v3207_v19 = vpop.f32.mrb[95].mxu0 }
 0x531   :  { %v11513_v36 = vmul.f32 2.0, %v3207_v19 }
 0x535   :  { %v7407_v27 = vpop.f32.mrb[96].mxu0 }
 0x536   :  { %v11521_v35 = vmul.f32 2.0, %v7407_v27  ;;  %v3220_v38 = vpop.f32.mrb[97].mxu0 }
 0x537   :  { %v11523_v44 = vmul.f32 2.0, %v3220_v38  ;;  %v7408_v34 = vpop.f32.mrb[98].mxu0 }
 0x538   :  { %v11525_v21 = vmul.f32 2.0, %v7408_v34  ;;  %v3223_v19 = vpop.f32.mrb[99].mxu0 }
 0x539   :  { %v11529_v54 = vmul.f32 2.0, %v3223_v19 }
 0x53a   :  { %14701 = vst [vmem:[#allocation169_spill] sm:$0xff] %v11525_v21 }
 0x53b   :  { %14702 = vst [vmem:[#allocation165_spill] sm:$0xff] %v11529_v54 }
 0x53d   :  { %v7411_v38 = vpop.f32.mrb[100].mxu0 }
 0x53e   :  { %v11537_v39 = vmul.f32 2.0, %v7411_v38  ;;  %v3236_v34 = vpop.f32.mrb[101].mxu0  ;;  %v14709_v38 = vsub.f32 %v11461_v40, %v11265_v62  ;;  %v14712_v40 = vsub.f32 %v11475_v63, %v11322_v58 }
 0x53f   :  { %v11539_v49 = vmul.f32 2.0, %v3236_v34  ;;  %v7412_v13 = vpop.f32.mrb[102].mxu0 }
 0x540   :  { %v11541_v14 = vmul.f32 2.0, %v7412_v13  ;;  %v3239_v19 = vpop.f32.mrb[103].mxu0 }
 0x541   :  { %v11545_v30 = vmul.f32 2.0, %v3239_v19 }
 0x542   :  { %14703 = vst [vmem:[#allocation77_spill] sm:$0xff] %v11541_v14 }
 0x543   :  { %14704 = vst [vmem:[#allocation112_spill] sm:$0xff] %v11545_v30 }
 0x545   :  { %v7415_v34 = vpop.f32.mrb[104].mxu0 }
 0x546   :  { %v11553_v0 = vmul.f32 2.0, %v7415_v34  ;;  %v3252_v13 = vpop.f32.mrb[105].mxu0 }
 0x547   :  { %v11555_v54 = vmul.f32 2.0, %v3252_v13  ;;  %v7416_v47 = vpop.f32.mrb[106].mxu0 }
 0x548   :  { %v11557_v21 = vmul.f32 2.0, %v7416_v47  ;;  %v3255_v19 = vpop.f32.mrb[107].mxu0 }
 0x549   :  { %v11561_v48 = vmul.f32 2.0, %v3255_v19 }
 0x54b   :  { %14705 = vst [vmem:[#allocation146_spill] sm:$0xff] %v11561_v48 }
 0x54d   :  { %v7419_v13 = vpop.f32.mrb[108].mxu0 }
 0x54e   :  { %v11569_v55 = vmul.f32 2.0, %v7419_v13  ;;  %v3268_v47 = vpop.f32.mrb[109].mxu0  ;;  %v14710_v13 = vsub.f32 %v11465_v56, %v11269_v41  ;;  %v14713_v56 = vsub.f32 %v11477_v51, %v11326_v43  ;;  %v14715_v51 = vsub.f32 %v11489_v22, %v11365_v25 }
 0x54f   :  { %v11571_v30 = vmul.f32 2.0, %v3268_v47  ;;  %v7420_v29 = vpop.f32.mrb[110].mxu0  ;;  %v14718_v25 = vsub.f32 %v11497_v52, %v11374_v10  ;;  %v14719_v52 = vsub.f32 %v11505_v1, %v11389_v33 }
 0x550   :  { %14706 = vst [vmem:[#allocation98_spill] sm:$0xff] %v11569_v55  ;;  %v11573_v14 = vmul.f32 2.0, %v7420_v29  ;;  %v3271_v19 = vpop.f32.mrb[111].mxu0  ;;  %v14707_v29 = vsub.f32 %v11457_v53, %v11259_v57 }
 0x551   :  { %v11577_v27 = vmul.f32 2.0, %v3271_v19 }
 0x555   :  { %v7423_v47 = vpop.f32.mrb[112].mxu0 }
 0x556   :  { %v3477_v16 = vsub.f32 %v14707_v29, %v7423_v47  ;;  %v3284_v48 = vpop.f32.mrb[113].mxu0 }
 0x557   :  { %v3475_v19 = vsub.f32 %v14708_v50, %v3284_v48  ;;  %v7424_v32 = vpop.f32.mrb[114].mxu0 }
 0x558   :  { %v3511_v55 = vmul.f32 1.442695, %v3477_v16  ;;  %v3478_v3 = vsub.f32 %v14709_v38, %v7424_v32  ;;  %v3287_v34 = vpop.f32.mrb[115].mxu0 }
 0x559   :  { %v3507_v20 = vmul.f32 1.442695, %v3475_v19  ;;  %v3476_v45 = vsub.f32 %v14710_v13, %v3287_v34 }
 0x55a   :  { %7853 = vpow2.f32 %v3511_v55  ;;  %v3513_v57 = vmul.f32 1.442695, %v3478_v3 }
 0x55b   :  { %7855 = vpow2.f32 %v3507_v20  ;;  %v3509_v53 = vmul.f32 1.442695, %v3476_v45  ;;  %v14714_v20 = vsub.f32 %v11481_v18, %v11328_v7  ;;  %v14716_v7 = vsub.f32 %v11491_v24, %v11370_v12 }
 0x55c   :  { %7857 = vpow2.f32 %v3513_v57 }
 0x55d   :  { %7859 = vpow2.f32 %v3509_v53  ;;  %v7427_v4 = vpop.f32.mrb[116].mxu0 }
 0x55e   :  { %v3481_v16 = vsub.f32 %v14711_v42, %v7427_v4  ;;  %v3300_v50 = vpop.f32.mrb[117].mxu0 }
 0x55f   :  { %v3479_v62 = vsub.f32 %v14712_v40, %v3300_v50  ;;  %v7428_v32 = vpop.f32.mrb[118].mxu0 }
 0x560   :  { %v3519_v48 = vmul.f32 1.442695, %v3481_v16  ;;  %v3482_v41 = vsub.f32 %v14713_v56, %v7428_v32  ;;  %v3303_v55 = vpop.f32.mrb[119].mxu0  ;;  %v14717_v16 = vsub.f32 %v11493_v2, %v11372_v61 }
 0x561   :  { %v3515_v3 = vmul.f32 1.442695, %v3479_v62  ;;  %v3480_v45 = vsub.f32 %v14714_v20, %v3303_v55 }
 0x562   :  { %7861 = vpow2.f32 %v3519_v48  ;;  %v3521_v5 = vmul.f32 1.442695, %v3482_v41 }
 0x563   :  { %7863 = vpow2.f32 %v3515_v3  ;;  %v3517_v26 = vmul.f32 1.442695, %v3480_v45  ;;  %v14720_v45 = vsub.f32 %v11507_v15, %v11394_v28 }
 0x564   :  { %v7854_v38 = vpop.eup %7853  ;;  %7865 = vpow2.f32 %v3521_v5 }
 0x565   :  { %v7856_v63 = vpop.eup %7855  ;;  %v3573_v58 = vadd.f32 1.0, %v7854_v38  ;;  %7867 = vpow2.f32 %v3517_v26  ;;  %v7431_v34 = vpop.f32.mrb[120].mxu0 }
 0x566   :  { %v7858_v13 = vpop.eup %7857  ;;  %v3571_v47 = vadd.f32 1.0, %v7856_v63  ;;  %v3485_v43 = vsub.f32 %v14715_v51, %v7431_v34  ;;  %v3316_v29 = vpop.f32.mrb[121].mxu0 }
 0x567   :  { %v7860_v19 = vpop.eup %7859  ;;  %7869 = vrcp.f32 %v3573_v58  ;;  %v3574_v18 = vadd.f32 1.0, %v7858_v13  ;;  %v3483_v57 = vsub.f32 %v14716_v7, %v3316_v29  ;;  %v7432_v53 = vpop.f32.mrb[122].mxu0  ;;  %v14722_v29 = vsub.f32 %v11513_v36, %v11404_v37 }
 0x568   :  { %7871 = vrcp.f32 %v3571_v47  ;;  %v3572_v4 = vadd.f32 1.0, %v7860_v19  ;;  %v3527_v42 = vmul.f32 1.442695, %v3485_v43  ;;  %v3486_v50 = vsub.f32 %v14717_v16, %v7432_v53  ;;  %v3319_v40 = vpop.f32.mrb[123].mxu0 }
 0x569   :  { %7873 = vrcp.f32 %v3574_v18  ;;  %v3523_v22 = vmul.f32 1.442695, %v3483_v57  ;;  %v3484_v62 = vsub.f32 %v14718_v25, %v3319_v40  ;;  %v14721_v47 = vsub.f32 %v11509_v46, %v11399_v23  ;;  %v14723_v46 = vld [vmem:[#allocation97_spill] sm:$0xff]  ;;  %v14727_v25 = vld [vmem:[#allocation99_spill] sm:$0xff] }
 0x56a   :  { %7875 = vrcp.f32 %v3572_v4  ;;  %v3529_v32 = vmul.f32 1.442695, %v3486_v50  ;;  %v14724_v23 = vsub.f32 %v10564_v9, %v14723_v46  ;;  %v14725_v37 = vsub.f32 %v14723_v46, %v10564_v9 }
 0x56b   :  { %7877 = vpow2.f32 %v3527_v42  ;;  %v3525_v24 = vmul.f32 1.442695, %v3484_v62 }
 0x56c   :  { %v11621_v12 = vpop.eup %7861  ;;  %7879 = vpow2.f32 %v3523_v22 }
 0x56d   :  { %v11623_v48 = vpop.eup %7863  ;;  %v3577_v56 = vadd.f32 1.0, %v11621_v12  ;;  %7881 = vpow2.f32 %v3529_v32  ;;  %v7435_v2 = vpop.f32.mrb[124].mxu0 }
 0x56e   :  { %v11626_v61 = vpop.eup %7865  ;;  %v3575_v41 = vadd.f32 1.0, %v11623_v48  ;;  %7883 = vpow2.f32 %v3525_v24  ;;  %v3489_v10 = vsub.f32 %v14719_v52, %v7435_v2  ;;  %v3332_v55 = vpop.f32.mrb[125].mxu0  ;;  %v14730_v2 = vld [vmem:[#allocation186_spill] sm:$0xff] }
 0x56f   :  { %v11632_v3 = vpop.eup %7867  ;;  %7885 = vrcp.f32 %v3577_v56  ;;  %v3578_v20 = vadd.f32 1.0, %v11626_v61  ;;  %v3487_v5 = vsub.f32 %v14720_v45, %v3332_v55  ;;  %v7436_v26 = vpop.f32.mrb[126].mxu0 }
 0x570   :  { %7887 = vrcp.f32 %v3575_v41  ;;  %v3576_v58 = vadd.f32 1.0, %v11632_v3  ;;  %v3535_v34 = vmul.f32 1.442695, %v3489_v10  ;;  %v3490_v1 = vsub.f32 %v14721_v47, %v7436_v26  ;;  %v3335_v33 = vpop.f32.mrb[127].mxu0  ;;  %v14731_v41 = vld [vmem:[#allocation147_spill] sm:$0xff] }
 0x571   :  { %v7870_v51 = vpop.eup %7869  ;;  %7889 = vrcp.f32 %v3578_v20  ;;  %v3531_v43 = vmul.f32 1.442695, %v3487_v5  ;;  %v3488_v18 = vsub.f32 %v14722_v29, %v3335_v33  ;;  %v14732_v52 = vsub.f32 %v14730_v2, %v14731_v41  ;;  %v14736_v33 = vld [vmem:[#allocation148_spill] sm:$0xff] }
 0x572   :  { %v7872_v7 = vpop.eup %7871  ;;  %v3637_v15 = vmul.f32 %v7870_v51, %v7854_v38  ;;  %7891 = vrcp.f32 %v3576_v58  ;;  %v3537_v28 = vmul.f32 1.442695, %v3490_v1  ;;  %v14734_v58 = vsub.f32 %v11523_v44, %v11415_v59  ;;  %v14735_v1 = vld [vmem:[#allocation187_spill] sm:$0xff] }
 0x573   :  { %v7874_v57 = vpop.eup %7873  ;;  %7893 = vpow2.f32 %v3535_v34  ;;  %v3533_v53 = vmul.f32 1.442695, %v3488_v18  ;;  %v3635_v4 = vmul.f32 %v7872_v7, %v7856_v63  ;;  %v14726_v63 = vld [vmem:[#allocation185_spill] sm:$0xff]  ;;  %v14737_v51 = vsub.f32 %v14735_v1, %v14736_v33 }
 0x574   :  { %v7876_v42 = vpop.eup %7875  ;;  %v3701_v16 = vmul.f32 %v14724_v23, %v3637_v15  ;;  %v11648_v50 = vmul.f32 %v7874_v57, %v7858_v13  ;;  %7895 = vpow2.f32 %v3531_v43  ;;  %v11653_v36 = vmul.f32 %v14725_v37, %v3637_v15  ;;  %v14738_v7 = vld [vmem:[#allocation169_spill] sm:$0xff]  ;;  %v14739_v15 = vld [vmem:[#allocation111_spill] sm:$0xff]  ;;  %v14742_v23 = vld [vmem:[#allocation142_spill] sm:$0xff] }
 0x575   :  { %v11655_v38 = vpop.eup %7877  ;;  %7897 = vpow2.f32 %v3537_v28  ;;  %v7439_v40 = vpop.f32.mrb[128].mxu0  ;;  %v11657_v22 = vmul.f32 %v7876_v42, %v7860_v19  ;;  %v14728_v62 = vsub.f32 %v14726_v63, %v14727_v25  ;;  %v14729_v13 = vsub.f32 %v14727_v25, %v14726_v63  ;;  %v14741_v42 = vld [vmem:[#allocation165_spill] sm:$0xff] }
 0x576   :  { %v11667_v56 = vpop.eup %7879  ;;  %v3702_v10 = vmul.f32 %v14732_v52, %v11648_v50  ;;  %v3581_v55 = vadd.f32 1.0, %v11655_v38  ;;  %7899 = vpow2.f32 %v3533_v53  ;;  %v14733_v19 = vsub.f32 %v11521_v35, %v11413_v6  ;;  %v3348_v45 = vpop.f32.mrb[129].mxu0 }
 0x577   :  { %v3699_v32 = vmul.f32 %v14728_v62, %v3635_v4  ;;  %v11665_v24 = vmul.f32 %v14729_v13, %v3635_v4  ;;  %v11677_v5 = vpop.eup %7881  ;;  %v3579_v26 = vadd.f32 1.0, %v11667_v56  ;;  %v3491_v34 = vsub.f32 %v14734_v58, %v3348_v45  ;;  %v7440_v47 = vpop.f32.mrb[130].mxu0 }
 0x578   :  { %v3493_v20 = vsub.f32 %v14733_v19, %v7439_v40  ;;  %v3700_v43 = vmul.f32 %v14737_v51, %v11657_v22  ;;  %v11688_v18 = vpop.eup %7883  ;;  %7901 = vrcp.f32 %v3581_v55  ;;  %v3582_v35 = vadd.f32 1.0, %v11677_v5  ;;  %v3351_v44 = vpop.f32.mrb[131].mxu0 }
 0x579   :  { %v3731_v29 = vadd.f32 %v3699_v32, %v14727_v25  ;;  %v14740_v28 = vsub.f32 %v14738_v7, %v14739_v15  ;;  %v7886_v59 = vpop.eup %7885  ;;  %7903 = vrcp.f32 %v3579_v26  ;;  %v3580_v53 = vadd.f32 1.0, %v11688_v18  ;;  %v14748_v15 = vld [vmem:[#allocation113_spill] sm:$0xff] }
 0x57a   :  { %v3543_v6 = vmul.f32 1.442695, %v3493_v20  ;;  %v3539_v4 = vmul.f32 1.442695, %v3491_v34  ;;  %v14743_v37 = vsub.f32 %v14741_v42, %v14742_v23  ;;  %v7888_v25 = vpop.eup %7887  ;;  %7905 = vrcp.f32 %v3582_v35 }
 0x57b   :  { %v3494_v57 = vsub.f32 %v14740_v28, %v7440_v47  ;;  %v3732_v32 = vadd.f32 %v3700_v43, %v14736_v33  ;;  %v3733_v13 = vadd.f32 %v14723_v46, %v3701_v16  ;;  %v7890_v52 = vpop.eup %7889  ;;  %7907 = vrcp.f32 %v3580_v53 }
 0x57c   :  { %v3492_v40 = vsub.f32 %v14743_v37, %v3351_v44  ;;  %v3734_v19 = vadd.f32 %v14731_v41, %v3702_v10  ;;  %v11702_v20 = vmul.f32 %v7888_v25, %v11623_v48  ;;  %v7892_v45 = vpop.eup %7891  ;;  %7909 = vpow2.f32 %v3543_v6  ;;  %v14744_v48 = vld [vmem:[#allocation188_spill] sm:$0xff] }
 0x57d   :  { %v3545_v62 = vmul.f32 1.442695, %v3494_v57  ;;  %v3859_v26 = vpack.c.bf16 %v3732_v32, %v3731_v29  ;;  %v11705_v58 = vmul.f32 %v7886_v59, %v11621_v12  ;;  %v11708_v34 = vmul.f32 %v7890_v52, %v11626_v61  ;;  %v11710_v47 = vpop.eup %7893  ;;  %v7443_v46 = vpop.f32.mrb[132].mxu0  ;;  %v14745_v10 = vld [vmem:[#allocation104_spill] sm:$0xff]  ;;  %v14755_v32 = vld [vmem:[#allocation77_spill] sm:$0xff] }
 0x57e   :  { %v3541_v55 = vmul.f32 1.442695, %v3492_v40  ;;  %7911 = vpow2.f32 %v3539_v4  ;;  %v3860_v16 = vpack.c.bf16 %v3734_v19, %v3733_v13  ;;  %v11713_v51 = vmul.f32 %v7892_v45, %v11632_v3  ;;  %v11719_v29 = vpop.eup %7895  ;;  %v3364_v7 = vpop.f32.mrb[133].mxu0  ;;  %v14749_v3 = vld [vmem:[#allocation154_spill] sm:$0xff]  ;;  %v14758_v45 = vld [vmem:[#allocation112_spill] sm:$0xff] }
 0x57f   :  { %v14746_v43 = vsub.f32 %v14744_v48, %v14745_v10  ;;  %v3585_v12 = vadd.f32 1.0, %v11710_v47  ;;  %7913 = vpow2.f32 %v3545_v62  ;;  %v14747_v61 = vsub.f32 %v11537_v39, %v11424_v8  ;;  %7469 = vmatprep.mubr.bf16.mxu1 %v3859_v26  ;;  %v11729_v44 = vpop.eup %7897  ;;  %v7444_v42 = vpop.f32.mrb[134].mxu0  ;;  %v14752_v39 = vld [vmem:[#allocation190_spill] sm:$0xff]  ;;  %v14753_v8 = vld [vmem:[#allocation156_spill] sm:$0xff]  ;;  %v14759_v26 = vld [vmem:[#allocation137_spill] sm:$0xff] }
 0x580   :  { %v14750_v28 = vsub.f32 %v14748_v15, %v14749_v3  ;;  %v3583_v59 = vadd.f32 1.0, %v11719_v29  ;;  %7915 = vpow2.f32 %v3541_v55  ;;  %v14751_v53 = vsub.f32 %v11539_v49, %v11426_v11  ;;  %7470 = vmatmul.mubr.bf16.vlgmr.msra.gmra.mrb[80].mxu1 %v3860_v16  ;;  %v11739_v40 = vpop.eup %7899  ;;  %v14756_v13 = vld [vmem:[#allocation78_spill] sm:$0xff]  ;;  %v3367_v19 = vpop.f32.mrb[135].mxu0 }
 0x581   :  { %v3703_v35 = vmul.f32 %v14746_v43, %v11702_v20  ;;  %v3497_v6 = vsub.f32 %v14747_v61, %v7443_v46  ;;  %v14754_v23 = vsub.f32 %v14752_v39, %v14753_v8  ;;  %7917 = vrcp.f32 %v3585_v12 }
 0x582   :  { %v3705_v57 = vmul.f32 %v14750_v28, %v11705_v58  ;;  %v3495_v4 = vsub.f32 %v14751_v53, %v3364_v7  ;;  %v3586_v25 = vadd.f32 1.0, %v11729_v44  ;;  %v14757_v52 = vsub.f32 %v14755_v32, %v14756_v13  ;;  %v7902_v43 = vpop.eup %7901  ;;  %v14761_v53 = vld [vmem:[#allocation189_spill] sm:$0xff] }
 0x583   :  { %v3704_v37 = vmul.f32 %v14754_v23, %v11713_v51  ;;  %v3551_v62 = vmul.f32 1.442695, %v3497_v6  ;;  %7919 = vrcp.f32 %v3583_v59  ;;  %v3584_v49 = vadd.f32 1.0, %v11739_v40  ;;  %v7904_v7 = vpop.eup %7903  ;;  %v14762_v59 = vld [vmem:[#allocation155_spill] sm:$0xff] }
 0x584   :  { %v3498_v55 = vsub.f32 %v14757_v52, %v7444_v42  ;;  %v3547_v11 = vmul.f32 1.442695, %v3495_v4  ;;  %v14760_v46 = vsub.f32 %v14758_v45, %v14759_v26  ;;  %7921 = vrcp.f32 %v3586_v25  ;;  %v7906_v32 = vpop.eup %7905  ;;  %v14769_v26 = vld [vmem:[#allocation106_spill] sm:$0xff] }
 0x585   :  { %v3735_v12 = vadd.f32 %v3703_v35, %v14745_v10  ;;  %v3736_v6 = vadd.f32 %v3704_v37, %v14753_v8  ;;  %7923 = vrcp.f32 %v3584_v49  ;;  %v14763_v42 = vsub.f32 %v14761_v53, %v14762_v59  ;;  %v7908_v37 = vpop.eup %7907  ;;  %v7447_v52 = vpop.f32.mrb[136].mxu0 }
 0x586   :  { %v3496_v16 = vsub.f32 %v14760_v46, %v3367_v19  ;;  %v3553_v61 = vmul.f32 1.442695, %v3498_v55  ;;  %v3737_v4 = vadd.f32 %v14749_v3, %v3705_v57  ;;  %7925 = vpow2.f32 %v3551_v62  ;;  %v11772_v49 = vpop.eup %7909 }
 0x587   :  { %v3706_v23 = vmul.f32 %v14763_v42, %v11708_v34  ;;  %v3861_v13 = vpack.c.bf16 %v3736_v6, %v3735_v12  ;;  %v11757_v25 = vmul.f32 %v7904_v7, %v11667_v56  ;;  %v11760_v35 = vmul.f32 %v7902_v43, %v11655_v38 }
 0x588   :  { %v3549_v28 = vmul.f32 1.442695, %v3496_v16  ;;  %7927 = vpow2.f32 %v3547_v11  ;;  %v11764_v19 = vmul.f32 %v7906_v32, %v11677_v5  ;;  %v14766_v57 = vsub.f32 %v14736_v33, %v14735_v1  ;;  %v3380_v11 = vpop.f32.mrb[137].mxu0  ;;  %v14768_v5 = vld [vmem:[#allocation115_spill] sm:$0xff]  ;;  %v11784_v33 = vpop.eup %7911  ;;  %v14773_v32 = vld [vmem:[#allocation193_spill] sm:$0xff] }
 0x589   :  { %14764 = vst [vmem:[#allocation149_spill] sm:$0xff] %v11760_v35  ;;  %v3738_v55 = vadd.f32 %v14762_v59, %v3706_v23  ;;  %7929 = vpow2.f32 %v3553_v61  ;;  %v14767_v38 = vsub.f32 %v11553_v0, %v11432_v60  ;;  %7473 = vmatprep.mubr.bf16.mxu1 %v3861_v13  ;;  %v11778_v45 = vmul.f32 %v7908_v37, %v11688_v18  ;;  %v7448_v61 = vpop.f32.mrb[138].mxu0  ;;  %v11790_v12 = vpop.eup %7913  ;;  %v14774_v13 = vld [vmem:[#allocation158_spill] sm:$0xff] }
 0x58a   :  { %14765 = vst [vmem:[#allocation118_spill] sm:$0xff] %v11764_v19  ;;  %v11770_v62 = vmul.f32 %v14766_v57, %v11657_v22  ;;  %v14770_v46 = vsub.f32 %v14768_v5, %v14769_v26  ;;  %v3589_v22 = vadd.f32 1.0, %v11772_v49  ;;  %7931 = vpow2.f32 %v3549_v28  ;;  %v3383_v23 = vpop.f32.mrb[139].mxu0 }
 0x58b   :  { %v3501_v56 = vsub.f32 %v14767_v38, %v7447_v52  ;;  %v14771_v43 = vsub.f32 %v11555_v54, %v11437_v17  ;;  %v3862_v60 = vpack.c.bf16 %v3738_v55, %v3737_v4  ;;  %v3587_v18 = vadd.f32 1.0, %v11784_v33  ;;  %v11800_v52 = vpop.eup %7915  ;;  %v14776_v4 = vld [vmem:[#allocation146_spill] sm:$0xff]  ;;  %v14777_v55 = vld [vmem:[#allocation143_spill] sm:$0xff] }
 0x58c   :  { %v3707_v16 = vmul.f32 %v14770_v46, %v11757_v25  ;;  %v14772_v7 = vsub.f32 %v11557_v21, %v11439_v31  ;;  %v14775_v28 = vsub.f32 %v14773_v32, %v14774_v13  ;;  %7933 = vrcp.f32 %v3589_v22 }
 0x58d   :  { %v3499_v0 = vsub.f32 %v14771_v43, %v3380_v11  ;;  %v3559_v6 = vmul.f32 1.442695, %v3501_v56  ;;  %v3590_v17 = vadd.f32 1.0, %v11790_v12  ;;  %7474 = vmatmul.mubr.bf16.gmra.mrb[84].mxu1 %v3862_v60  ;;  %v14778_v57 = vsub.f32 %v14776_v4, %v14777_v55  ;;  %v7918_v56 = vpop.eup %7917 }
 0x58e   :  { %v3502_v42 = vsub.f32 %v14772_v7, %v7448_v61  ;;  %v3708_v37 = vmul.f32 %v14775_v28, %v11778_v45  ;;  %7935 = vrcp.f32 %v3587_v18  ;;  %v3588_v21 = vadd.f32 1.0, %v11800_v52  ;;  %v7920_v46 = vpop.eup %7919  ;;  %v14779_v61 = vld [vmem:[#allocation114_spill] sm:$0xff]  ;;  %v14783_v18 = vld [vmem:[#allocation107_spill] sm:$0xff] }
 0x58f   :  { %v3555_v54 = vmul.f32 1.442695, %v3499_v0  ;;  %v3500_v38 = vsub.f32 %v14778_v57, %v3383_v23  ;;  %v3739_v11 = vadd.f32 %v3707_v16, %v14769_v26  ;;  %7937 = vrcp.f32 %v3590_v17  ;;  %v14780_v0 = vld [vmem:[#allocation109_spill] sm:$0xff]  ;;  %v7922_v28 = vpop.eup %7921  ;;  %v14782_v23 = vld [vmem:[#allocation191_spill] sm:$0xff] }
 0x590   :  { %v3561_v31 = vmul.f32 1.442695, %v3502_v42  ;;  %v3740_v22 = vadd.f32 %v3708_v37, %v14774_v13  ;;  %v14781_v60 = vsub.f32 %v14779_v61, %v14780_v0  ;;  %7939 = vrcp.f32 %v3588_v21  ;;  %v7924_v17 = vpop.eup %7923 }
 0x591   :  { %v3557_v43 = vmul.f32 1.442695, %v3500_v38  ;;  %v14784_v4 = vsub.f32 %v14782_v23, %v14783_v18  ;;  %v11818_v42 = vmul.f32 %v7920_v46, %v11719_v29  ;;  %v11821_v16 = vmul.f32 %v7918_v56, %v11710_v47  ;;  %v11827_v21 = vpop.eup %7925  ;;  %v14789_v29 = vld [vmem:[#allocation126_spill] sm:$0xff]  ;;  %v14790_v47 = vld [vmem:[#allocation160_spill] sm:$0xff] }
 0x592   :  { %v3709_v7 = vmul.f32 %v14781_v60, %v11760_v35  ;;  %7941 = vpow2.f32 %v3559_v6  ;;  %v3863_v37 = vpack.c.bf16 %v3740_v22, %v3739_v11  ;;  %v11825_v38 = vmul.f32 %v7922_v28, %v11729_v44  ;;  %v11837_v6 = vpop.eup %7927  ;;  %v14792_v44 = vld [vmem:[#allocation108_spill] sm:$0xff]  ;;  %v14793_v22 = vld [vmem:[#allocation159_spill] sm:$0xff] }
 0x593   :  { %v3710_v55 = vmul.f32 %v14784_v4, %v11764_v19  ;;  %14785 = vst [vmem:[#allocation174_spill] sm:$0xff] %v11818_v42  ;;  %14786 = vst [vmem:[#allocation176_spill] sm:$0xff] %v11821_v16  ;;  %7943 = vpow2.f32 %v3555_v54  ;;  %v11831_v4 = vmul.f32 %v7924_v17, %v11739_v40  ;;  %v14791_v56 = vsub.f32 %v14789_v29, %v14790_v47  ;;  %v14795_v28 = vld [vmem:[#allocation100_spill] sm:$0xff]  ;;  %v14796_v40 = vld [vmem:[#allocation161_spill] sm:$0xff]  ;;  %v11848_v23 = vpop.eup %7929 }
 0x594   :  { %v3741_v57 = vadd.f32 %v14780_v0, %v3709_v7  ;;  %14787 = vst [vmem:[#allocation184_spill] sm:$0xff] %v11825_v38  ;;  %v3593_v11 = vadd.f32 1.0, %v11827_v21  ;;  %7945 = vpow2.f32 %v3561_v31  ;;  %7477 = vmatprep.mubr.bf16.mxu1 %v3863_v37  ;;  %v14794_v54 = vsub.f32 %v14792_v44, %v14793_v22  ;;  %v14798_v31 = vld [vmem:[#allocation129_spill] sm:$0xff]  ;;  %v14799_v37 = vld [vmem:[#allocation162_spill] sm:$0xff]  ;;  %v11855_v61 = vpop.eup %7931 }
 0x595   :  { %v3742_v60 = vadd.f32 %v14783_v18, %v3710_v55  ;;  %14788 = vst [vmem:[#allocation120_spill] sm:$0xff] %v11831_v4  ;;  %v3711_v46 = vmul.f32 %v14791_v56, %v11818_v42  ;;  %v14797_v55 = vsub.f32 %v14795_v28, %v14796_v40  ;;  %v3591_v56 = vadd.f32 1.0, %v11837_v6  ;;  %v7451_v42 = vpop.f32.mrb[140].mxu0  ;;  %v14801_v44 = vld [vmem:[#allocation98_spill] sm:$0xff]  ;;  %v14802_v28 = vld [vmem:[#allocation144_spill] sm:$0xff] }
 0x596   :  { %v3713_v7 = vmul.f32 %v14794_v54, %v11821_v16  ;;  %7947 = vpow2.f32 %v3557_v43  ;;  %v14800_v18 = vsub.f32 %v14798_v31, %v14799_v37  ;;  %v3594_v54 = vadd.f32 1.0, %v11848_v23  ;;  %v3396_v16 = vpop.f32.mrb[141].mxu0 }
 0x597   :  { %v3714_v17 = vmul.f32 %v14797_v55, %v11825_v38  ;;  %v3864_v29 = vpack.c.bf16 %v3742_v60, %v3741_v57  ;;  %7949 = vrcp.f32 %v3593_v11  ;;  %v14803_v55 = vsub.f32 %v14801_v44, %v14802_v28  ;;  %v14804_v57 = vld [vmem:[#allocation117_spill] sm:$0xff]  ;;  %v7452_v31 = vpop.f32.mrb[142].mxu0 }
 0x598   :  { %v3712_v19 = vmul.f32 %v14800_v18, %v11831_v4  ;;  %v3743_v0 = vadd.f32 %v3711_v46, %v14790_v47  ;;  %7951 = vrcp.f32 %v3591_v56  ;;  %v3592_v43 = vadd.f32 1.0, %v11855_v61  ;;  %v7934_v4 = vpop.eup %7933  ;;  %v14806_v44 = vld [vmem:[#allocation145_spill] sm:$0xff]  ;;  %v14808_v47 = vld [vmem:[#allocation168_spill] sm:$0xff] }
 0x599   :  { %v3505_v38 = vsub.f32 %v14803_v55, %v7451_v42  ;;  %7478 = vmatmul.mubr.bf16.gmra.mrb[88].mxu1 %v3864_v29  ;;  %v14805_v60 = vsub.f32 %v11571_v30, %v14804_v57  ;;  %7953 = vrcp.f32 %v3594_v54  ;;  %v14807_v42 = vsub.f32 %v11573_v14, %v14806_v44  ;;  %v3399_v55 = vpop.f32.mrb[143].mxu0  ;;  %v7936_v56 = vpop.eup %7935 }
 0x59a   :  { %v3744_v11 = vadd.f32 %v3712_v19, %v14799_v37  ;;  %v3745_v46 = vadd.f32 %v14793_v22, %v3713_v7  ;;  %7955 = vrcp.f32 %v3592_v43  ;;  %v14809_v30 = vsub.f32 %v11577_v27, %v14808_v47  ;;  %v14811_v47 = vld [vmem:[#allocation164_spill] sm:$0xff] }
 0x59b   :  { %v3503_v18 = vsub.f32 %v14805_v60, %v3396_v16  ;;  %v3567_v35 = vmul.f32 1.442695, %v3505_v38  ;;  %v3506_v28 = vsub.f32 %v14807_v42, %v7452_v31  ;;  %v7938_v60 = vpop.eup %7937  ;;  %v3746_v38 = vadd.f32 %v14796_v40, %v3714_v17 }
 0x59c   :  { %v3504_v16 = vsub.f32 %v14809_v30, %v3399_v55  ;;  %v3865_v57 = vpack.c.bf16 %v3744_v11, %v3743_v0  ;;  %v11876_v54 = vmul.f32 %v7936_v56, %v11784_v33  ;;  %v7940_v14 = vpop.eup %7939  ;;  %v11879_v7 = vmul.f32 %v7934_v4, %v11772_v49  ;;  %v14810_v33 = vld [vmem:[#allocation127_spill] sm:$0xff]  ;;  %v14817_v55 = vld [vmem:[#allocation166_spill] sm:$0xff] }
 0x59d   :  { %v3563_v29 = vmul.f32 1.442695, %v3503_v18  ;;  %7957 = vpow2.f32 %v3567_v35  ;;  %v3569_v19 = vmul.f32 1.442695, %v3506_v28  ;;  %v11882_v43 = vmul.f32 %v7938_v60, %v11790_v12  ;;  %v11884_v27 = vpop.eup %7941  ;;  %v14813_v12 = vld [vmem:[#allocation102_spill] sm:$0xff]  ;;  %v14814_v4 = vld [vmem:[#allocation163_spill] sm:$0xff] }
 0x59e   :  { %v3565_v31 = vmul.f32 1.442695, %v3504_v16  ;;  %7481 = vmatprep.mubr.bf16.mxu1 %v3865_v57  ;;  %v3866_v35 = vpack.c.bf16 %v3746_v38, %v3745_v46  ;;  %v11887_v0 = vmul.f32 %v7940_v14, %v11800_v52  ;;  %v14812_v17 = vsub.f32 %v14810_v33, %v14811_v47  ;;  %v11893_v11 = vpop.eup %7943  ;;  %v14816_v28 = vld [vmem:[#allocation131_spill] sm:$0xff]  ;;  %v14819_v30 = vld [vmem:[#allocation86_spill] sm:$0xff] }
 0x59f   :  { %7959 = vpow2.f32 %v3563_v29  ;;  %v3597_v49 = vadd.f32 1.0, %v11884_v27  ;;  %v14815_v44 = vsub.f32 %v14813_v12, %v14814_v4  ;;  %v14818_v52 = vsub.f32 %v14816_v28, %v14817_v55  ;;  %v11904_v56 = vpop.eup %7945  ;;  %v14820_v16 = vld [vmem:[#allocation167_spill] sm:$0xff] }
 0x5a0   :  { %7961 = vpow2.f32 %v3569_v19  ;;  %v3715_v18 = vmul.f32 %v14812_v17, %v11876_v54  ;;  %v3595_v29 = vadd.f32 1.0, %v11893_v11  ;;  %v14821_v57 = vsub.f32 %v14819_v30, %v14820_v16  ;;  %v11916_v14 = vpop.eup %7947 }
 0x5a1   :  { %7963 = vpow2.f32 %v3565_v31  ;;  %v3717_v42 = vmul.f32 %v14815_v44, %v11879_v7  ;;  %v3718_v46 = vmul.f32 %v14818_v52, %v11882_v43  ;;  %v11914_v38 = vadd.f32 %v11665_v24, %v14726_v63  ;;  %7482 = vmatmul.mubr.bf16.gmra.mrb[92].mxu1 %v3866_v35  ;;  %v7950_v52 = vpop.eup %7949 }
 0x5a2   :  { %v3716_v60 = vmul.f32 %v14821_v57, %v11887_v0  ;;  %v3747_v19 = vadd.f32 %v3715_v18, %v14811_v47  ;;  %7965 = vrcp.f32 %v3597_v49  ;;  %v3598_v31 = vadd.f32 1.0, %v11904_v56  ;;  %v7952_v24 = vpop.eup %7951 }
 0x5a3   :  { %14822 = vst [vmem:[#allocation81_spill] sm:$0xff] %v11914_v38  ;;  %v3749_v17 = vadd.f32 %v14814_v4, %v3717_v42  ;;  %v3750_v44 = vadd.f32 %v14817_v55, %v3718_v46  ;;  %7967 = vrcp.f32 %v3595_v29  ;;  %v3596_v57 = vadd.f32 1.0, %v11916_v14  ;;  %v7954_v46 = vpop.eup %7953 }
 0x5a4   :  { %v3748_v18 = vadd.f32 %v3716_v60, %v14820_v16  ;;  %v11925_v63 = vadd.f32 %v11770_v62, %v14735_v1  ;;  %7969 = vrcp.f32 %v3598_v31  ;;  %v11928_v28 = vmul.f32 %v7950_v52, %v11827_v21  ;;  %v7956_v62 = vpop.eup %7955  ;;  %v14825_v21 = vld [vmem:[#allocation116_spill] sm:$0xff] }
 0x5a5   :  { %v3868_v49 = vpack.c.bf16 %v3750_v44, %v3749_v17  ;;  %v14824_v35 = vsub.f32 %v14731_v41, %v14730_v2  ;;  %7971 = vrcp.f32 %v3596_v57  ;;  %v11935_v60 = vmul.f32 %v7952_v24, %v11837_v6  ;;  %v14826_v17 = vld [vmem:[#allocation170_spill] sm:$0xff]  ;;  %v14831_v57 = vld [vmem:[#allocation171_spill] sm:$0xff] }
 0x5a6   :  { %14823 = vst [vmem:[#allocation82_spill] sm:$0xff] %v11925_v63  ;;  %v3867_v29 = vpack.c.bf16 %v3748_v18, %v3747_v19  ;;  %v11940_v31 = vmul.f32 %v7954_v46, %v11848_v23  ;;  %v14827_v44 = vsub.f32 %v14825_v21, %v14826_v17  ;;  %v11956_v19 = vmul.f32 %v7956_v62, %v11855_v61  ;;  %v14830_v23 = vld [vmem:[#allocation84_spill] sm:$0xff]  ;;  %v14835_v46 = vld [vmem:[#allocation105_spill] sm:$0xff] }
 0x5a7   :  { %v3798_v42 = vmul.f32 %v14824_v35, %v11648_v50  ;;  %v11948_v50 = vadd.f32 %v10564_v9, %v11653_v36  ;;  %v11953_v6 = vpop.eup %7957  ;;  %v14832_v18 = vsub.f32 %v14830_v23, %v14831_v57  ;;  %v14833_v35 = vsub.f32 %v14745_v10, %v14744_v48 }
 0x5a8   :  { %v3721_v52 = vmul.f32 %v14827_v44, %v11928_v28  ;;  %7485 = vmatprep.mubr.bf16.mxu1 %v3867_v29  ;;  %v14834_v36 = vsub.f32 %v14753_v8, %v14752_v39  ;;  %v3601_v61 = vadd.f32 1.0, %v11953_v6  ;;  %v14836_v29 = vld [vmem:[#allocation172_spill] sm:$0xff]  ;;  %v14839_v8 = vld [vmem:[#allocation173_spill] sm:$0xff] }
 0x5a9   :  { %14828 = vst [vmem:[#allocation119_spill] sm:$0xff] %v11948_v50  ;;  %v11951_v41 = vadd.f32 %v14730_v2, %v3798_v42  ;;  %v3719_v24 = vmul.f32 %v14832_v18, %v11935_v60  ;;  %v3799_v9 = vmul.f32 %v14833_v35, %v11702_v20  ;;  %v11970_v42 = vpop.eup %7959  ;;  %v14837_v62 = vsub.f32 %v14835_v46, %v14836_v29 }
 0x5aa   :  { %v3800_v2 = vmul.f32 %v14834_v36, %v11713_v51  ;;  %v3753_v18 = vadd.f32 %v14826_v17, %v3721_v52  ;;  %v11980_v20 = vpop.eup %7961  ;;  %v3599_v35 = vadd.f32 1.0, %v11970_v42  ;;  %v14838_v51 = vld [vmem:[#allocation134_spill] sm:$0xff]  ;;  %7973 = vrcp.f32 %v3601_v61  ;;  %7486 = vmatmul.mubr.bf16.gmra.mrb[96].mxu1 %v3868_v49 }
 0x5ab   :  { %14829 = vst [vmem:[#allocation192_spill] sm:$0xff] %v11951_v41  ;;  %v3722_v44 = vmul.f32 %v14837_v62, %v11940_v31  ;;  %v14840_v36 = vsub.f32 %v14838_v51, %v14839_v8  ;;  %v3751_v38 = vadd.f32 %v3719_v24, %v14831_v57  ;;  %v11989_v63 = vadd.f32 %v3799_v9, %v14744_v48  ;;  %v11991_v62 = vpop.eup %7963 }
 0x5ac   :  { %v3602_v52 = vadd.f32 1.0, %v11980_v20  ;;  %v11996_v50 = vadd.f32 %v3800_v2, %v14752_v39  ;;  %7975 = vrcp.f32 %v3599_v35  ;;  %v3600_v41 = vadd.f32 1.0, %v11991_v62  ;;  %v7966_v9 = vpop.eup %7965 }
 0x5ad   :  { %v3720_v1 = vmul.f32 %v14840_v36, %v11956_v19  ;;  %14841 = vst [vmem:[#allocation89_spill] sm:$0xff] %v11989_v63  ;;  %v3754_v10 = vadd.f32 %v14836_v29, %v3722_v44  ;;  %v14843_v48 = vsub.f32 %v14749_v3, %v14748_v15  ;;  %v14844_v39 = vsub.f32 %v14762_v59, %v14761_v53  ;;  %v7968_v44 = vpop.eup %7967 }
 0x5ae   :  { %14842 = vst [vmem:[#allocation121_spill] sm:$0xff] %v11996_v50  ;;  %7977 = vrcp.f32 %v3602_v52  ;;  %v14851_v52 = vld [vmem:[#allocation175_spill] sm:$0xff] }
 0x5af   :  { %v3752_v36 = vadd.f32 %v3720_v1, %v14839_v8  ;;  %v3801_v24 = vmul.f32 %v14843_v48, %v11705_v58  ;;  %v3870_v61 = vpack.c.bf16 %v3754_v10, %v3753_v18  ;;  %v3802_v2 = vmul.f32 %v14844_v39, %v11708_v34  ;;  %v7970_v58 = vpop.eup %7969  ;;  %v14853_v48 = vld [vmem:[#allocation149_spill] sm:$0xff]  ;;  %v14857_v39 = vld [vmem:[#allocation118_spill] sm:$0xff] }
 0x5b0   :  { %7979 = vrcp.f32 %v3600_v41  ;;  %v12011_v1 = vmul.f32 %v7966_v9, %v11884_v27  ;;  %v12017_v18 = vmul.f32 %v7968_v44, %v11893_v11  ;;  %v14847_v34 = vsub.f32 %v14769_v26, %v14768_v5  ;;  %v7972_v41 = vpop.eup %7971  ;;  %v14850_v11 = vld [vmem:[#allocation138_spill] sm:$0xff]  ;;  %v14859_v44 = vld [vmem:[#allocation191_spill] sm:$0xff] }
 0x5b1   :  { %v3869_v35 = vpack.c.bf16 %v3752_v36, %v3751_v38  ;;  %v12014_v3 = vadd.f32 %v14748_v15, %v3801_v24  ;;  %v12020_v10 = vadd.f32 %v14761_v53, %v3802_v2  ;;  %v14848_v27 = vsub.f32 %v14774_v13, %v14773_v32  ;;  %v14854_v24 = vld [vmem:[#allocation109_spill] sm:$0xff]  ;;  %v14855_v9 = vld [vmem:[#allocation114_spill] sm:$0xff]  ;;  %v14858_v2 = vld [vmem:[#allocation107_spill] sm:$0xff] }
 0x5b2   :  { %v3803_v59 = vmul.f32 %v14847_v34, %v11757_v25  ;;  %v12031_v15 = vmul.f32 %v7970_v58, %v11904_v56  ;;  %v14852_v53 = vsub.f32 %v14850_v11, %v14851_v52  ;;  %v14856_v26 = vsub.f32 %v14854_v24, %v14855_v9  ;;  %v14861_v56 = vld [vmem:[#allocation110_spill] sm:$0xff]  ;;  %v14862_v58 = vld [vmem:[#allocation177_spill] sm:$0xff] }
 0x5b3   :  { %14845 = vst [vmem:[#allocation130_spill] sm:$0xff] %v12014_v3  ;;  %14846 = vst [vmem:[#allocation101_spill] sm:$0xff] %v12020_v10  ;;  %v3804_v38 = vmul.f32 %v14848_v27, %v11778_v45  ;;  %7489 = vmatprep.mubr.bf16.mxu1 %v3869_v35  ;;  %v14860_v13 = vsub.f32 %v14858_v2, %v14859_v44  ;;  %v12046_v35 = vmul.f32 %v7972_v41, %v11916_v14  ;;  %v14866_v24 = vld [vmem:[#allocation178_spill] sm:$0xff]  ;;  %v14872_v10 = vld [vmem:[#allocation160_spill] sm:$0xff] }
 0x5b4   :  { %14849 = vst [vmem:[#allocation123_spill] sm:$0xff] %v12031_v15  ;;  %v3725_v36 = vmul.f32 %v14852_v53, %v12011_v1  ;;  %v3805_v25 = vmul.f32 %v14856_v26, %v14853_v48  ;;  %v14863_v34 = vsub.f32 %v14861_v56, %v14862_v58  ;;  %v12055_v49 = vadd.f32 %v3803_v59, %v14768_v5  ;;  %v14865_v48 = vld [vmem:[#allocation133_spill] sm:$0xff] }
 0x5b5   :  { %v3806_v45 = vmul.f32 %v14860_v13, %v14857_v39  ;;  %v14867_v26 = vsub.f32 %v14865_v48, %v14866_v24  ;;  %v12063_v14 = vadd.f32 %v3804_v38, %v14773_v32  ;;  %7490 = vmatmul.mubr.bf16.gmra.mrb[100].mxu1 %v3870_v61  ;;  %v14868_v13 = vld [vmem:[#allocation136_spill] sm:$0xff] }
 0x5b6   :  { %v3723_v27 = vmul.f32 %v14863_v34, %v12017_v18  ;;  %14864 = vst [vmem:[#allocation122_spill] sm:$0xff] %v12055_v49  ;;  %v3757_v39 = vadd.f32 %v14851_v52, %v3725_v36  ;;  %v12066_v41 = vadd.f32 %v14855_v9, %v3805_v25  ;;  %v14869_v34 = vld [vmem:[#allocation179_spill] sm:$0xff]  ;;  %v14873_v36 = vld [vmem:[#allocation126_spill] sm:$0xff]  ;;  %v14875_v9 = vld [vmem:[#allocation120_spill] sm:$0xff] }
 0x5b7   :  { %v3726_v2 = vmul.f32 %v14867_v26, %v12031_v15  ;;  %v14870_v53 = vsub.f32 %v14868_v13, %v14869_v34  ;;  %v12074_v3 = vadd.f32 %v14859_v44, %v3806_v45  ;;  %v14871_v26 = vld [vmem:[#allocation174_spill] sm:$0xff]  ;;  %v14874_v63 = vsub.f32 %v14872_v10, %v14873_v36  ;;  %v14876_v25 = vld [vmem:[#allocation129_spill] sm:$0xff]  ;;  %v14878_v48 = vld [vmem:[#allocation176_spill] sm:$0xff]  ;;  %v7974_v15 = vpop.eup %7973 }
 0x5b8   :  { %v3755_v59 = vadd.f32 %v3723_v27, %v14862_v58  ;;  %v14877_v50 = vsub.f32 %v14799_v37, %v14876_v25  ;;  %v14879_v27 = vld [vmem:[#allocation108_spill] sm:$0xff]  ;;  %v3665_v49 = vmul.f32 %v7974_v15, %v11953_v6  ;;  %v14885_v15 = vld [vmem:[#allocation139_spill] sm:$0xff] }
 0x5b9   :  { %v3724_v5 = vmul.f32 %v14870_v53, %v12046_v35  ;;  %v3807_v32 = vmul.f32 %v14874_v63, %v14871_v26  ;;  %v3758_v38 = vadd.f32 %v14866_v24, %v3726_v2  ;;  %v14880_v44 = vsub.f32 %v14793_v22, %v14879_v27  ;;  %v14881_v2 = vld [vmem:[#allocation184_spill] sm:$0xff] }
 0x5ba   :  { %v3808_v53 = vmul.f32 %v14877_v50, %v14875_v9  ;;  %v3880_v63 = vpack.c.bf16 %v12074_v3, %v12066_v41  ;;  %v14882_v26 = vld [vmem:[#allocation100_spill] sm:$0xff]  ;;  %v7976_v50 = vpop.eup %7975 }
 0x5bb   :  { %v3809_v45 = vmul.f32 %v14880_v44, %v14878_v48  ;;  %v3756_v11 = vadd.f32 %v3724_v5, %v14869_v34  ;;  %v12095_v10 = vadd.f32 %v3807_v32, %v14873_v36  ;;  %v14883_v61 = vsub.f32 %v14796_v40, %v14882_v26  ;;  %v7978_v5 = vpop.eup %7977 }
 0x5bc   :  { %v3872_v9 = vpack.c.bf16 %v3758_v38, %v3757_v39  ;;  %v12103_v22 = vadd.f32 %v3808_v53, %v14876_v25  ;;  %v3663_v36 = vmul.f32 %v7976_v50, %v11970_v42  ;;  %v14884_v40 = vsub.f32 %v14811_v47, %v14810_v33  ;;  %v7980_v38 = vpop.eup %7979  ;;  %v14889_v47 = vld [vmem:[#allocation79_spill] sm:$0xff]  ;;  %v14893_v50 = vld [vmem:[#allocation182_spill] sm:$0xff] }
 0x5bd   :  { %v3810_v37 = vmul.f32 %v14883_v61, %v14881_v2  ;;  %v12106_v48 = vadd.f32 %v14879_v27, %v3809_v45  ;;  %v3871_v44 = vpack.c.bf16 %v3756_v11, %v3755_v59  ;;  %v3666_v6 = vmul.f32 %v7978_v5, %v11980_v20  ;;  %v14886_v61 = vld [vmem:[#allocation180_spill] sm:$0xff] }
 0x5be   :  { %v3811_v39 = vmul.f32 %v14884_v40, %v11876_v54  ;;  %v14887_v25 = vsub.f32 %v14885_v15, %v14886_v61  ;;  %v3881_v11 = vpack.c.bf16 %v12103_v22, %v12095_v10  ;;  %v14888_v42 = vsub.f32 %v14820_v16, %v14819_v30  ;;  %v14890_v54 = vld [vmem:[#allocation181_spill] sm:$0xff]  ;;  %v14897_v40 = vld [vmem:[#allocation183_spill] sm:$0xff] }
 0x5bf   :  { %v12110_v32 = vadd.f32 %v14882_v26, %v3810_v37  ;;  %7493 = vmatprep.mubr.bf16.mxu1 %v3871_v44  ;;  %v3664_v27 = vmul.f32 %v7980_v38, %v11991_v62  ;;  %v14891_v45 = vsub.f32 %v14889_v47, %v14890_v54  ;;  %v14892_v37 = vld [vmem:[#allocation140_spill] sm:$0xff]  ;;  %v14895_v16 = vsub.f32 %v14814_v4, %v14813_v12  ;;  %v14896_v44 = vld [vmem:[#allocation141_spill] sm:$0xff] }
 0x5c0   :  { %v3729_v53 = vmul.f32 %v14887_v25, %v3665_v49  ;;  %v3812_v59 = vmul.f32 %v14888_v42, %v11887_v0  ;;  %v3843_v26 = vadd.f32 %v3811_v39, %v14810_v33  ;;  %v14894_v10 = vsub.f32 %v14892_v37, %v14893_v50  ;;  %7494 = vmatmul.mubr.bf16.gmra.mrb[104].mxu1 %v3872_v9 }
 0x5c1   :  { %v3727_v2 = vmul.f32 %v14891_v45, %v3663_v36  ;;  %v3882_v20 = vpack.c.bf16 %v12110_v32, %v12106_v48  ;;  %v3813_v62 = vmul.f32 %v14895_v16, %v11879_v7  ;;  %v14898_v38 = vsub.f32 %v14896_v44, %v14897_v40  ;;  %v14899_v32 = vld [vmem:[#allocation131_spill] sm:$0xff] }
 0x5c2   :  { %v3730_v22 = vmul.f32 %v14894_v10, %v3666_v6  ;;  %v3761_v5 = vadd.f32 %v14886_v61, %v3729_v53  ;;  %v3844_v0 = vadd.f32 %v3812_v59, %v14819_v30  ;;  %v14900_v39 = vsub.f32 %v14817_v55, %v14899_v32 }
 0x5c3   :  { %v3728_v48 = vmul.f32 %v14898_v38, %v3664_v27  ;;  %v3759_v33 = vadd.f32 %v3727_v2, %v14890_v54  ;;  %v14901_v30 = vsub.f32 %v14831_v57, %v14830_v23  ;;  %v3845_v9 = vadd.f32 %v14813_v12, %v3813_v62  ;;  %v14909_v62 = vld [vmem:[#allocation123_spill] sm:$0xff] }
 0x5c4   :  { %v3814_v25 = vmul.f32 %v14900_v39, %v11882_v43  ;;  %v3762_v4 = vadd.f32 %v14893_v50, %v3730_v22  ;;  %v3883_v7 = vpack.c.bf16 %v3844_v0, %v3843_v26  ;;  %v14902_v42 = vsub.f32 %v14839_v8, %v14838_v51 }
 0x5c5   :  { %v3815_v53 = vmul.f32 %v14901_v30, %v11935_v60  ;;  %v3760_v45 = vadd.f32 %v3728_v48, %v14897_v40  ;;  %v14903_v60 = vsub.f32 %v14826_v17, %v14825_v21  ;;  %v14904_v12 = vsub.f32 %v14836_v29, %v14835_v46 }
 0x5c6   :  { %v3816_v59 = vmul.f32 %v14902_v42, %v11956_v19  ;;  %v3846_v55 = vadd.f32 %v14899_v32, %v3814_v25  ;;  %v3874_v2 = vpack.c.bf16 %v3762_v4, %v3761_v5  ;;  %v14905_v19 = vsub.f32 %v14862_v58, %v14861_v56  ;;  %v14917_v25 = vld [vmem:[#allocation81_spill] sm:$0xff] }
 0x5c7   :  { %v3847_v43 = vadd.f32 %v3815_v53, %v14830_v23  ;;  %v3817_v57 = vmul.f32 %v14903_v60, %v11928_v28  ;;  %v3818_v8 = vmul.f32 %v14904_v12, %v11940_v31  ;;  %v3873_v22 = vpack.c.bf16 %v3760_v45, %v3759_v33  ;;  %v14907_v31 = vld [vmem:[#allocation138_spill] sm:$0xff]  ;;  %v14923_v45 = vld [vmem:[#allocation89_spill] sm:$0xff] }
 0x5c8   :  { %v3848_v26 = vadd.f32 %v3816_v59, %v14838_v51  ;;  %v3819_v10 = vmul.f32 %v14905_v19, %v12017_v18  ;;  %v3884_v23 = vpack.c.bf16 %v3846_v55, %v3845_v9  ;;  %v14906_v28 = vsub.f32 %v14869_v34, %v14868_v13  ;;  %v14920_v9 = vld [vmem:[#allocation119_spill] sm:$0xff]  ;;  %v14922_v59 = vld [vmem:[#allocation121_spill] sm:$0xff]  ;;  %v14926_v55 = vld [vmem:[#allocation130_spill] sm:$0xff] }
 0x5c9   :  { %v3849_v0 = vadd.f32 %v14825_v21, %v3817_v57  ;;  %v3850_v5 = vadd.f32 %v14835_v46, %v3818_v8  ;;  %v14908_v16 = vsub.f32 %v14851_v52, %v14907_v31  ;;  %7497 = vmatprep.mubr.bf16.mxu1 %v3873_v22  ;;  %v14910_v21 = vld [vmem:[#allocation133_spill] sm:$0xff]  ;;  %v14913_v46 = vsub.f32 %v14897_v40, %v14896_v44  ;;  %v14928_v60 = vld [vmem:[#allocation122_spill] sm:$0xff] }
 0x5ca   :  { %v3820_v17 = vmul.f32 %v14906_v28, %v12046_v35  ;;  %v3885_v51 = vpack.c.bf16 %v3848_v26, %v3847_v43  ;;  %v3851_v29 = vadd.f32 %v3819_v10, %v14861_v56  ;;  %v14911_v38 = vsub.f32 %v14866_v24, %v14910_v21  ;;  %7498 = vmatmul.mubr.bf16.gmra.mrb[108].mxu1 %v3874_v2  ;;  %v8238_v2 = vld [vmem:[#allocation2] sm:$0xff]  ;;  %v14933_v19 = vld [vmem:[#allocation14_spill] sm:$0xff] }
 0x5cb   :  { %v3821_v58 = vmul.f32 %v14908_v16, %v12011_v1  ;;  %v14912_v35 = vsub.f32 %v14890_v54, %v14889_v47  ;;  %v3824_v56 = vmul.f32 %v14913_v46, %v3664_v27  ;;  %v3886_v33 = vpack.c.bf16 %v3850_v5, %v3849_v0  ;;  %v14916_v27 = vld [vmem:[#allocation82_spill] sm:$0xff]  ;;  %v14935_v0 = vld [vmem:[#allocation16_spill] sm:$0xff] }
 0x5cc   :  { %v3852_v18 = vadd.f32 %v3820_v17, %v14868_v13  ;;  %v3822_v48 = vmul.f32 %v14911_v38, %v14909_v62  ;;  %v14914_v1 = vsub.f32 %v14886_v61, %v14885_v15  ;;  %v14915_v32 = vsub.f32 %v14893_v50, %v14892_v37  ;;  %v14939_v62 = vld [vmem:[#allocation21_spill] sm:$0xff] }
 0x5cd   :  { %v3823_v34 = vmul.f32 %v14912_v35, %v3663_v36  ;;  %v3853_v52 = vadd.f32 %v14907_v31, %v3821_v58  ;;  %v3856_v40 = vadd.f32 %v3824_v56, %v14896_v44  ;;  %v14918_v30 = vpack.c.bf16 %v14916_v27, %v14917_v25  ;;  %v14925_v44 = vld [vmem:[#allocation101_spill] sm:$0xff]  ;;  %v14941_v56 = vld [vmem:[#allocation22_spill] sm:$0xff] }
 0x5ce   :  { %v3825_v13 = vmul.f32 %v14914_v1, %v3665_v49  ;;  %v3826_v24 = vmul.f32 %v14915_v32, %v3666_v6  ;;  %v3887_v39 = vpack.c.bf16 %v3852_v18, %v3851_v29  ;;  %v3854_v54 = vadd.f32 %v14910_v21, %v3822_v48  ;;  %v14919_v6 = vld [vmem:[#allocation192_spill] sm:$0xff] }
 0x5cf   :  { %v3855_v36 = vadd.f32 %v3823_v34, %v14889_v47  ;;  %7501 = vmatprep.mubr.bf16.mxu1 %v14918_v30  ;;  %v14921_v42 = vpack.c.bf16 %v14919_v6, %v14920_v9  ;;  %v14924_v47 = vpack.c.bf16 %v14922_v59, %v14923_v45  ;;  %v14927_v43 = vpack.c.bf16 %v14925_v44, %v14926_v55  ;;  %v14949_v9 = vld [vmem:[#allocation30_spill] sm:$0xff]  ;;  %v14951_v59 = vld [vmem:[#allocation31_spill] sm:$0xff]  ;;  %v14953_v44 = vld [vmem:[#allocation32_spill] sm:$0xff] }
 0x5d0   :  { %v3857_v53 = vadd.f32 %v14885_v15, %v3825_v13  ;;  %v3858_v49 = vadd.f32 %v14892_v37, %v3826_v24  ;;  %v3888_v61 = vpack.c.bf16 %v3854_v54, %v3853_v52  ;;  %v14929_v15 = vpack.c.bf16 %v12063_v14, %v14928_v60  ;;  %v14930_v37 = vld [vmem:[#allocation12_spill] sm:$0xff]  ;;  %v14943_v52 = vld [vmem:[#allocation23_spill] sm:$0xff] }
 0x5d1   :  { %v3889_v4 = vpack.c.bf16 %v3856_v40, %v3855_v36  ;;  %v3909_v57 = vsub.s32 3, %v14930_v37  ;;  %v14945_v13 = vld [vmem:[#allocation24_spill] sm:$0xff] }
 0x5d2   :  { %v3890_v50 = vpack.c.bf16 %v3858_v49, %v3857_v53  ;;  %7502 = vmatmul.mubr.bf16.gmra.mrb[112].mxu1 %v14921_v42  ;;  %v14947_v49 = vld [vmem:[#allocation28_spill] sm:$0xff] }
 0x5d3   :  { %7505 = vmatprep.mubr.bf16.mxu1 %v14924_v47  ;;  %v12229_v26 = vrot.slane %v8238_v2, %v3909_v57 }
 0x5da   :  { %7506 = vmatmul.mubr.bf16.gmra.mrb[116].mxu1 %v14927_v43 }
 0x5db   :  { %7509 = vmatprep.mubr.bf16.mxu1 %v14929_v15 }
 0x5e2   :  { %7510 = vmatmul.mubr.bf16.gmra.mrb[120].mxu1 %v3880_v63 }
 0x5e3   :  { %7513 = vmatprep.mubr.bf16.mxu1 %v3881_v11  ;;  %v14931_v11 = vld [vmem:[#allocation13_spill] sm:$0xff] }
 0x5ea   :  { %7514 = vmatmul.mubr.bf16.gmra.mrb[124].mxu1 %v3882_v20 }
 0x5eb   :  { %7517 = vmatprep.mubr.bf16.mxu1 %v3883_v7 }
 0x5f2   :  { %7518 = vmatmul.mubr.bf16.gmra.mrb[128].mxu1 %v3884_v23 }
 0x5f3   :  { %7521 = vmatprep.mubr.bf16.mxu1 %v3885_v51  ;;  %v14937_v51 = vld [vmem:[#allocation15_spill] sm:$0xff] }
 0x5fa   :  { %7522 = vmatmul.mubr.bf16.gmra.mrb[132].mxu1 %v3886_v33 }
 0x5fb   :  { %7525 = vmatprep.mubr.bf16.mxu1 %v3887_v39 }
 0x602   :  { %7526 = vmatmul.mubr.bf16.gmra.mrb[136].mxu1 %v3888_v61 }
 0x603   :  { %7529 = vmatprep.mubr.bf16.mxu1 %v3889_v4 }
 0x60a   :  { %7530 = vmatmul.mubr.bf16.gmra.mrb[140].mxu1 %v3890_v50 }
 0x653   :  { %v7471_v14 = vpop.f32.mrb[80].mxu1 }
 0x654   :  { %v4002_v12 = vadd.f32 %v7471_v14, %v12229_v26  ;;  %v3993_v3 = vpop.f32.mrb[81].mxu1 }
 0x655   :  { %v3994_v41 = vadd.f32 %v3993_v3, %v12229_v26  ;;  %v7472_v63 = vpop.f32.mrb[82].mxu1  ;;  %v14955_v3 = vld [vmem:[#allocation36_spill] sm:$0xff] }
 0x656   :  { %v12234_v20 = vadd.f32 %v4002_v12, %v14931_v11  ;;  %v3996_v7 = vpop.f32.mrb[83].mxu1  ;;  %v4005_v22 = vadd.f32 %v7472_v63, %v12229_v26 }
 0x657   :  { %v3997_v8 = vadd.f32 %v3996_v7, %v12229_v26  ;;  %v12238_v10 = vadd.f32 %v3994_v41, %v14933_v19  ;;  %v14957_v19 = vld [vmem:[#allocation38_spill] sm:$0xff] }
 0x658   :  { %14932 = vst [vmem:[#allocation94_spill] sm:$0xff] %v12234_v20  ;;  %v4318_v23 = vsel %vm549_vm2, %v12234_v20, 0.0  ;;  %v12249_v5 = vadd.f32 %v4005_v22, %v14937_v51  ;;  %v14961_v51 = vld [vmem:[#allocation40_spill] sm:$0xff] }
 0x659   :  { %14934 = vst [vmem:[#allocation91_spill] sm:$0xff] %v12238_v10  ;;  %v12244_v28 = vadd.f32 %v3997_v8, %v14935_v0  ;;  %4319 = vadd.xlane.f32.xlu0 %v4318_v23  ;;  %v4312_v29 = vsel %vm549_vm2, %v12238_v10, 0.0  ;;  %v14959_v23 = vld [vmem:[#allocation39_spill] sm:$0xff] }
 0x65a   :  { %14938 = vst [vmem:[#allocation124_spill] sm:$0xff] %v12249_v5  ;;  %v4321_v34 = vsel %vm549_vm2, %v12249_v5, 0.0 }
 0x65b   :  { %14936 = vst [vmem:[#allocation92_spill] sm:$0xff] %v12244_v28  ;;  %v4315_v17 = vsel %vm549_vm2, %v12244_v28, 0.0 }
 0x65c   :  { %4316 = vadd.xlane.f32.xlu1 %v4315_v17 }
 0x65d   :  { %4313 = vadd.xlane.f32.xlu0 %v4312_v29 }
 0x660   :  { %v7475_v31 = vpop.f32.mrb[84].mxu1 }
 0x661   :  { %v4018_v16 = vadd.f32 %v7475_v31, %v12229_v26  ;;  %v4009_v58 = vpop.f32.mrb[85].mxu1  ;;  %4322 = vadd.xlane.f32.xlu0 %v4321_v34 }
 0x662   :  { %v7476_v18 = vpop.f32.mrb[86].mxu1  ;;  %v4010_v38 = vadd.f32 %v4009_v58, %v12229_v26 }
 0x663   :  { %v12255_v21 = vadd.f32 %v4018_v16, %v14939_v62  ;;  %v4021_v48 = vadd.f32 %v7476_v18, %v12229_v26  ;;  %v4012_v35 = vpop.f32.mrb[87].mxu1 }
 0x664   :  { %v4013_v46 = vadd.f32 %v4012_v35, %v12229_v26  ;;  %v12266_v1 = vadd.f32 %v4010_v38, %v14943_v52  ;;  %v14963_v35 = vld [vmem:[#allocation44_spill] sm:$0xff] }
 0x665   :  { %14940 = vst [vmem:[#allocation125_spill] sm:$0xff] %v12255_v21  ;;  %v12263_v33 = vadd.f32 %v4021_v48, %v14941_v56  ;;  %v4330_v39 = vsel %vm549_vm2, %v12255_v21, 0.0 }
 0x666   :  { %14944 = vst [vmem:[#allocation95_spill] sm:$0xff] %v12266_v1  ;;  %v12269_v32 = vadd.f32 %v4013_v46, %v14945_v13  ;;  %4331 = vadd.xlane.f32.xlu0 %v4330_v39  ;;  %v4324_v53 = vsel %vm549_vm2, %v12266_v1, 0.0 }
 0x667   :  { %14942 = vst [vmem:[#allocation93_spill] sm:$0xff] %v12263_v33  ;;  %v4333_v24 = vsel %vm549_vm2, %v12263_v33, 0.0 }
 0x668   :  { %14946 = vst [vmem:[#allocation96_spill] sm:$0xff] %v12269_v32  ;;  %4334 = vadd.xlane.f32.xlu1 %v4333_v24  ;;  %v4327_v30 = vsel %vm549_vm2, %v12269_v32, 0.0  ;;  %v14965_v24 = vld [vmem:[#allocation46_spill] sm:$0xff] }
 0x66a   :  { %4325 = vadd.xlane.f32.xlu0 %v4324_v53 }
 0x66c   :  { %v7479_v54 = vpop.f32.mrb[88].mxu1  ;;  %4328 = vadd.xlane.f32.xlu1 %v4327_v30 }
 0x66d   :  { %v4034_v36 = vadd.f32 %v7479_v54, %v12229_v26  ;;  %v4025_v40 = vpop.f32.mrb[89].mxu1  ;;  %v14967_v54 = vld [vmem:[#allocation47_spill] sm:$0xff] }
 0x66e   :  { %v4026_v27 = vadd.f32 %v4025_v40, %v12229_v26  ;;  %v7480_v25 = vpop.f32.mrb[90].mxu1 }
 0x66f   :  { %v12282_v61 = vadd.f32 %v4034_v36, %v14947_v49  ;;  %v4037_v4 = vadd.f32 %v7480_v25, %v12229_v26  ;;  %v4028_v50 = vpop.f32.mrb[91].mxu1 }
 0x670   :  { %v4029_v6 = vadd.f32 %v4028_v50, %v12229_v26  ;;  %v12290_v45 = vadd.f32 %v4026_v27, %v14951_v59  ;;  %v14969_v27 = vld [vmem:[#allocation48_spill] sm:$0xff]  ;;  %v14971_v59 = vld [vmem:[#allocation49_spill] sm:$0xff] }
 0x671   :  { %14948 = vst [vmem:[#allocation151_spill] sm:$0xff] %v12282_v61  ;;  %v12287_v42 = vadd.f32 %v4037_v4, %v14949_v9  ;;  %v4342_v47 = vsel %vm549_vm2, %v12282_v61, 0.0 }
 0x672   :  { %14952 = vst [vmem:[#allocation152_spill] sm:$0xff] %v12290_v45  ;;  %v12295_v55 = vadd.f32 %v4029_v6, %v14953_v44  ;;  %4343 = vadd.xlane.f32.xlu0 %v4342_v47  ;;  %v4336_v12 = vsel %vm549_vm2, %v12290_v45, 0.0 }
 0x673   :  { %14950 = vst [vmem:[#allocation88_spill] sm:$0xff] %v12287_v42  ;;  %v4345_v43 = vsel %vm549_vm2, %v12287_v42, 0.0 }
 0x674   :  { %14954 = vst [vmem:[#allocation103_spill] sm:$0xff] %v12295_v55  ;;  %4346 = vadd.xlane.f32.xlu1 %v4345_v43  ;;  %v7483_v60 = vpop.f32.mrb[92].mxu1  ;;  %v4339_v7 = vsel %vm549_vm2, %v12295_v55, 0.0 }
 0x675   :  { %v4050_v15 = vadd.f32 %v7483_v60, %v12229_v26  ;;  %v4041_v57 = vpop.f32.mrb[93].mxu1 }
 0x676   :  { %v4042_v2 = vadd.f32 %v4041_v57, %v12229_v26  ;;  %v7484_v14 = vpop.f32.mrb[94].mxu1  ;;  %4337 = vadd.xlane.f32.xlu0 %v4336_v12  ;;  %v14973_v57 = vld [vmem:[#allocation50_spill] sm:$0xff] }
 0x677   :  { %v12304_v41 = vadd.f32 %v4050_v15, %v14955_v3  ;;  %v4053_v63 = vadd.f32 %v7484_v14, %v12229_v26  ;;  %v4044_v11 = vpop.f32.mrb[95].mxu1  ;;  %v14975_v14 = vld [vmem:[#allocation51_spill] sm:$0xff] }
 0x678   :  { %v4045_v8 = vadd.f32 %v4044_v11, %v12229_v26  ;;  %4340 = vadd.xlane.f32.xlu1 %v4339_v7  ;;  %v12314_v0 = vadd.f32 %v4042_v2, %v14959_v23 }
 0x679   :  { %14956 = vst [vmem:[#allocation90_spill] sm:$0xff] %v12304_v41  ;;  %v12311_v22 = vadd.f32 %v4053_v63, %v14957_v19  ;;  %v4354_v17 = vsel %vm549_vm2, %v12304_v41, 0.0  ;;  %v14977_v63 = vld [vmem:[#allocation52_spill] sm:$0xff] }
 0x67a   :  { %14960 = vst [vmem:[#allocation128_spill] sm:$0xff] %v12314_v0  ;;  %v12319_v29 = vadd.f32 %v4045_v8, %v14961_v51  ;;  %4355 = vadd.xlane.f32.xlu0 %v4354_v17  ;;  %v4348_v48 = vsel %vm549_vm2, %v12314_v0, 0.0 }
 0x67b   :  { %14958 = vst [vmem:[#allocation157_spill] sm:$0xff] %v12311_v22  ;;  %v4357_v31 = vsel %vm549_vm2, %v12311_v22, 0.0 }
 0x67c   :  { %14962 = vst [vmem:[#allocation150_spill] sm:$0xff] %v12319_v29  ;;  %4358 = vadd.xlane.f32.xlu1 %v4357_v31  ;;  %v4351_v52 = vsel %vm549_vm2, %v12319_v29, 0.0 }
 0x67d   :  { %v7487_v16 = vpop.f32.mrb[96].mxu1 }
 0x67e   :  { %v4066_v58 = vadd.f32 %v7487_v16, %v12229_v26  ;;  %v4057_v18 = vpop.f32.mrb[97].mxu1  ;;  %4349 = vadd.xlane.f32.xlu0 %v4348_v48  ;;  %v14979_v16 = vld [vmem:[#allocation53_spill] sm:$0xff] }
 0x67f   :  { %v4058_v62 = vadd.f32 %v4057_v18, %v12229_v26  ;;  %v7488_v38 = vpop.f32.mrb[98].mxu1 }
 0x680   :  { %v12328_v34 = vadd.f32 %v4066_v58, %v14963_v35  ;;  %v4069_v46 = vadd.f32 %v7488_v38, %v12229_v26  ;;  %v4060_v56 = vpop.f32.mrb[99].mxu1  ;;  %4352 = vadd.xlane.f32.xlu1 %v4351_v52  ;;  %v14981_v35 = vld [vmem:[#allocation54_spill] sm:$0xff] }
 0x681   :  { %v4061_v13 = vadd.f32 %v4060_v56, %v12229_v26  ;;  %v12338_v36 = vadd.f32 %v4058_v62, %v14967_v54  ;;  %v14983_v56 = vld [vmem:[#allocation55_spill] sm:$0xff] }
 0x682   :  { %14964 = vst [vmem:[#allocation80_spill] sm:$0xff] %v12328_v34  ;;  %v12335_v39 = vadd.f32 %v4069_v46, %v14965_v24  ;;  %v4366_v40 = vsel %vm549_vm2, %v12328_v34, 0.0  ;;  %v14985_v24 = vld [vmem:[#allocation56_spill] sm:$0xff] }
 0x683   :  { %14968 = vst [vmem:[#allocation87_spill] sm:$0xff] %v12338_v36  ;;  %v12343_v25 = vadd.f32 %v4061_v13, %v14969_v27  ;;  %4367 = vadd.xlane.f32.xlu0 %v4366_v40  ;;  %v4360_v9 = vsel %vm549_vm2, %v12338_v36, 0.0 }
 0x684   :  { %14966 = vst [vmem:[#allocation153_spill] sm:$0xff] %v12335_v39  ;;  %v4369_v30 = vsel %vm549_vm2, %v12335_v39, 0.0 }
 0x685   :  { %14970 = vst [vmem:[#allocation132_spill] sm:$0xff] %v12343_v25  ;;  %4370 = vadd.xlane.f32.xlu1 %v4369_v30  ;;  %v4363_v60 = vsel %vm549_vm2, %v12343_v25, 0.0 }
 0x687   :  { %4361 = vadd.xlane.f32.xlu0 %v4360_v9 }
 0x688   :  { %v7491_v53 = vpop.f32.mrb[100].mxu1 }
 0x689   :  { %v4082_v49 = vadd.f32 %v7491_v53, %v12229_v26  ;;  %v4073_v4 = vpop.f32.mrb[101].mxu1  ;;  %4364 = vadd.xlane.f32.xlu1 %v4363_v60 }
 0x68a   :  { %v4074_v50 = vadd.f32 %v4073_v4, %v12229_v26  ;;  %v7492_v6 = vpop.f32.mrb[102].mxu1 }
 0x68b   :  { %v12352_v47 = vadd.f32 %v4082_v49, %v14971_v59  ;;  %v4085_v44 = vadd.f32 %v7492_v6, %v12229_v26  ;;  %v4076_v43 = vpop.f32.mrb[103].mxu1  ;;  %v14987_v6 = vld [vmem:[#allocation57_spill] sm:$0xff] }
 0x68c   :  { %v4077_v15 = vadd.f32 %v4076_v43, %v12229_v26  ;;  %v12362_v12 = vadd.f32 %v4074_v50, %v14975_v14 }
 0x68d   :  { %14972 = vst [vmem:[#allocation85_spill] sm:$0xff] %v12352_v47  ;;  %v12359_v2 = vadd.f32 %v4085_v44, %v14973_v57  ;;  %v4378_v3 = vsel %vm549_vm2, %v12352_v47, 0.0 }
 0x68e   :  { %14976 = vst [vmem:[#allocation135_spill] sm:$0xff] %v12362_v12  ;;  %v12367_v11 = vadd.f32 %v4077_v15, %v14977_v63  ;;  %4379 = vadd.xlane.f32.xlu0 %v4378_v3  ;;  %v4372_v31 = vsel %vm549_vm2, %v12362_v12, 0.0  ;;  %v14989_v15 = vld [vmem:[#allocation58_spill] sm:$0xff]  ;;  %v14991_v3 = vld [vmem:[#allocation59_spill] sm:$0xff] }
 0x68f   :  { %14974 = vst [vmem:[#allocation83_spill] sm:$0xff] %v12359_v2  ;;  %v4381_v7 = vsel %vm549_vm2, %v12359_v2, 0.0 }
 0x690   :  { %14978 = vst [vmem:[#allocation97_spill] sm:$0xff] %v12367_v11  ;;  %4382 = vadd.xlane.f32.xlu1 %v4381_v7  ;;  %v4375_v38 = vsel %vm549_vm2, %v12367_v11, 0.0  ;;  %v14993_v7 = vld [vmem:[#allocation60_spill] sm:$0xff] }
 0x692   :  { %4373 = vadd.xlane.f32.xlu0 %v4372_v31 }
 0x693   :  { %v7495_v8 = vpop.f32.mrb[104].mxu1 }
 0x694   :  { %v4098_v19 = vadd.f32 %v7495_v8, %v12229_v26  ;;  %v4089_v23 = vpop.f32.mrb[105].mxu1  ;;  %4376 = vadd.xlane.f32.xlu1 %v4375_v38 }
 0x695   :  { %v4090_v17 = vadd.f32 %v4089_v23, %v12229_v26  ;;  %v7496_v51 = vpop.f32.mrb[106].mxu1 }
 0x696   :  { %v12376_v58 = vadd.f32 %v4098_v19, %v14979_v16  ;;  %v4101_v18 = vadd.f32 %v7496_v51, %v12229_v26  ;;  %v4092_v62 = vpop.f32.mrb[107].mxu1 }
 0x697   :  { %v4093_v48 = vadd.f32 %v4092_v62, %v12229_v26  ;;  %v12386_v52 = vadd.f32 %v4090_v17, %v14983_v56  ;;  %v14995_v62 = vld [vmem:[#allocation61_spill] sm:$0xff] }
 0x698   :  { %14980 = vst [vmem:[#allocation185_spill] sm:$0xff] %v12376_v58  ;;  %v12383_v46 = vadd.f32 %v4101_v18, %v14981_v35  ;;  %v4390_v13 = vsel %vm549_vm2, %v12376_v58, 0.0 }
 0x699   :  { %14984 = vst [vmem:[#allocation186_spill] sm:$0xff] %v12386_v52  ;;  %v12391_v54 = vadd.f32 %v4093_v48, %v14985_v24  ;;  %4391 = vadd.xlane.f32.xlu0 %v4390_v13  ;;  %v4384_v50 = vsel %vm549_vm2, %v12386_v52, 0.0  ;;  %v14997_v24 = vld [vmem:[#allocation62_spill] sm:$0xff] }
 0x69a   :  { %14982 = vst [vmem:[#allocation99_spill] sm:$0xff] %v12383_v46  ;;  %v4393_v40 = vsel %vm549_vm2, %v12383_v46, 0.0 }
 0x69b   :  { %14986 = vst [vmem:[#allocation147_spill] sm:$0xff] %v12391_v54  ;;  %4394 = vadd.xlane.f32.xlu1 %v4393_v40  ;;  %v4387_v59 = vsel %vm549_vm2, %v12391_v54, 0.0 }
 0x69d   :  { %v7499_v27 = vpop.f32.mrb[108].mxu1  ;;  %4385 = vadd.xlane.f32.xlu0 %v4384_v50 }
 0x69e   :  { %v4114_v30 = vadd.f32 %v7499_v27, %v12229_v26  ;;  %v4105_v53 = vpop.f32.mrb[109].mxu1 }
 0x69f   :  { %v4106_v49 = vadd.f32 %v4105_v53, %v12229_v26  ;;  %v7500_v4 = vpop.f32.mrb[110].mxu1  ;;  %4388 = vadd.xlane.f32.xlu1 %v4387_v59 }
 0x6a0   :  { %v12400_v9 = vadd.f32 %v4114_v30, %v14987_v6  ;;  %v4117_v44 = vadd.f32 %v7500_v4, %v12229_v26  ;;  %v4108_v43 = vpop.f32.mrb[111].mxu1  ;;  %v14999_v30 = vld [vmem:[#allocation63_spill] sm:$0xff] }
 0x6a1   :  { %v4109_v60 = vadd.f32 %v4108_v43, %v12229_v26  ;;  %v12412_v63 = vadd.f32 %v4106_v49, %v14991_v3  ;;  %v15001_v49 = vld [vmem:[#allocation64_spill] sm:$0xff] }
 0x6a2   :  { %14988 = vst [vmem:[#allocation187_spill] sm:$0xff] %v12400_v9  ;;  %v12407_v57 = vadd.f32 %v4117_v44, %v14989_v15  ;;  %v4402_v14 = vsel %vm549_vm2, %v12400_v9, 0.0 }
 0x6a3   :  { %14992 = vst [vmem:[#allocation169_spill] sm:$0xff] %v12412_v63  ;;  %v12415_v8 = vadd.f32 %v4109_v60, %v14993_v7  ;;  %4403 = vadd.xlane.f32.xlu0 %v4402_v14  ;;  %v4396_v18 = vsel %vm549_vm2, %v12412_v63, 0.0  ;;  %v15003_v14 = vld [vmem:[#allocation65_spill] sm:$0xff] }
 0x6a4   :  { %14990 = vst [vmem:[#allocation148_spill] sm:$0xff] %v12407_v57  ;;  %v4405_v19 = vsel %vm549_vm2, %v12407_v57, 0.0 }
 0x6a5   :  { %14994 = vst [vmem:[#allocation111_spill] sm:$0xff] %v12415_v8  ;;  %4406 = vadd.xlane.f32.xlu1 %v4405_v19  ;;  %v7503_v23 = vpop.f32.mrb[112].mxu1  ;;  %v4399_v56 = vsel %vm549_vm2, %v12415_v8, 0.0 }
 0x6a6   :  { %v4130_v17 = vadd.f32 %v7503_v23, %v12229_v26  ;;  %v4121_v51 = vpop.f32.mrb[113].mxu1 }
 0x6a7   :  { %v4122_v31 = vadd.f32 %v4121_v51, %v12229_v26  ;;  %v7504_v16 = vpop.f32.mrb[114].mxu1  ;;  %4397 = vadd.xlane.f32.xlu0 %v4396_v18  ;;  %v15005_v51 = vld [vmem:[#allocation66_spill] sm:$0xff]  ;;  %v15007_v18 = vld [vmem:[#allocation67_spill] sm:$0xff] }
 0x6a8   :  { %v12424_v38 = vadd.f32 %v4130_v17, %v14995_v62  ;;  %v4133_v48 = vadd.f32 %v7504_v16, %v12229_v26  ;;  %v4124_v35 = vpop.f32.mrb[115].mxu1 }
 0x6a9   :  { %v4125_v13 = vadd.f32 %v4124_v35, %v12229_v26  ;;  %4400 = vadd.xlane.f32.xlu1 %v4399_v56  ;;  %v12436_v53 = vadd.f32 %v4122_v31, %v14999_v30 }
 0x6aa   :  { %14996 = vst [vmem:[#allocation165_spill] sm:$0xff] %v12424_v38  ;;  %v12431_v40 = vadd.f32 %v4133_v48, %v14997_v24  ;;  %v4414_v27 = vsel %vm549_vm2, %v12424_v38, 0.0  ;;  %v15009_v48 = vld [vmem:[#allocation68_spill] sm:$0xff] }
 0x6ab   :  { %15000 = vst [vmem:[#allocation188_spill] sm:$0xff] %v12436_v53  ;;  %v12439_v4 = vadd.f32 %v4125_v13, %v15001_v49  ;;  %4415 = vadd.xlane.f32.xlu0 %v4414_v27  ;;  %v4408_v15 = vsel %vm549_vm2, %v12436_v53, 0.0 }
 0x6ac   :  { %14998 = vst [vmem:[#allocation142_spill] sm:$0xff] %v12431_v40  ;;  %v4417_v50 = vsel %vm549_vm2, %v12431_v40, 0.0 }
 0x6ad   :  { %15002 = vst [vmem:[#allocation104_spill] sm:$0xff] %v12439_v4  ;;  %v7507_v6 = vpop.f32.mrb[116].mxu1  ;;  %4418 = vadd.xlane.f32.xlu1 %v4417_v50  ;;  %v4411_v23 = vsel %vm549_vm2, %v12439_v4, 0.0 }
 0x6ae   :  { %v4146_v59 = vadd.f32 %v7507_v6, %v12229_v26  ;;  %v4137_v44 = vpop.f32.mrb[117].mxu1  ;;  %v15011_v6 = vld [vmem:[#allocation69_spill] sm:$0xff] }
 0x6af   :  { %v4138_v43 = vadd.f32 %v4137_v44, %v12229_v26  ;;  %v7508_v60 = vpop.f32.mrb[118].mxu1  ;;  %4409 = vadd.xlane.f32.xlu0 %v4408_v15 }
 0x6b0   :  { %v12448_v3 = vadd.f32 %v4146_v59, %v15003_v14  ;;  %v4149_v7 = vadd.f32 %v7508_v60, %v12229_v26  ;;  %v4140_v19 = vpop.f32.mrb[119].mxu1  ;;  %v15013_v14 = vld [vmem:[#allocation70_spill] sm:$0xff] }
 0x6b1   :  { %v4141_v17 = vadd.f32 %v4140_v19, %v12229_v26  ;;  %4412 = vadd.xlane.f32.xlu1 %v4411_v23  ;;  %v12460_v62 = vadd.f32 %v4138_v43, %v15007_v18  ;;  %v15015_v23 = vld [vmem:[#allocation71_spill] sm:$0xff] }
 0x6b2   :  { %15004 = vst [vmem:[#allocation113_spill] sm:$0xff] %v12448_v3  ;;  %v12455_v31 = vadd.f32 %v4149_v7, %v15005_v51  ;;  %v4426_v16 = vsel %vm549_vm2, %v12448_v3, 0.0  ;;  %v15017_v51 = vld [vmem:[#allocation72_spill] sm:$0xff] }
 0x6b3   :  { %15008 = vst [vmem:[#allocation190_spill] sm:$0xff] %v12460_v62  ;;  %v12463_v35 = vadd.f32 %v4141_v17, %v15009_v48  ;;  %4427 = vadd.xlane.f32.xlu0 %v4426_v16  ;;  %v4420_v50 = vsel %vm549_vm2, %v12460_v62, 0.0 }
 0x6b4   :  { %15006 = vst [vmem:[#allocation154_spill] sm:$0xff] %v12455_v31  ;;  %v4429_v56 = vsel %vm549_vm2, %v12455_v31, 0.0 }
 0x6b5   :  { %15010 = vst [vmem:[#allocation156_spill] sm:$0xff] %v12463_v35  ;;  %v7511_v13 = vpop.f32.mrb[120].mxu1  ;;  %4430 = vadd.xlane.f32.xlu1 %v4429_v56  ;;  %v4423_v60 = vsel %vm549_vm2, %v12463_v35, 0.0 }
 0x6b6   :  { %v4162_v24 = vadd.f32 %v7511_v13, %v12229_v26  ;;  %v4153_v27 = vpop.f32.mrb[121].mxu1 }
 0x6b7   :  { %v4154_v30 = vadd.f32 %v4153_v27, %v12229_v26  ;;  %v7512_v49 = vpop.f32.mrb[122].mxu1  ;;  %4421 = vadd.xlane.f32.xlu0 %v4420_v50 }
 0x6b8   :  { %v12472_v59 = vadd.f32 %v4162_v24, %v15011_v6  ;;  %v4165_v44 = vadd.f32 %v7512_v49, %v12229_v26  ;;  %v4156_v43 = vpop.f32.mrb[123].mxu1 }
 0x6b9   :  { %v4157_v15 = vadd.f32 %v4156_v43, %v12229_v26  ;;  %4424 = vadd.xlane.f32.xlu1 %v4423_v60  ;;  %v12484_v17 = vadd.f32 %v4154_v30, %v15015_v23  ;;  %v15019_v30 = vld [vmem:[#allocation73_spill] sm:$0xff]  ;;  %v15023_v23 = vld [vmem:[#allocation75_spill] sm:$0xff] }
 0x6ba   :  { %15012 = vst [vmem:[#allocation77_spill] sm:$0xff] %v12472_v59  ;;  %v12479_v7 = vadd.f32 %v4165_v44, %v15013_v14  ;;  %v4438_v19 = vsel %vm549_vm2, %v12472_v59, 0.0 }
 0x6bb   :  { %15016 = vst [vmem:[#allocation112_spill] sm:$0xff] %v12484_v17  ;;  %v12487_v16 = vadd.f32 %v4157_v15, %v15017_v51  ;;  %4439 = vadd.xlane.f32.xlu0 %v4438_v19  ;;  %v4432_v49 = vsel %vm549_vm2, %v12484_v17, 0.0  ;;  %v15021_v15 = vld [vmem:[#allocation74_spill] sm:$0xff] }
 0x6bc   :  { %15014 = vst [vmem:[#allocation78_spill] sm:$0xff] %v12479_v7  ;;  %v4441_v18 = vsel %vm549_vm2, %v12479_v7, 0.0 }
 0x6bd   :  { %15018 = vst [vmem:[#allocation137_spill] sm:$0xff] %v12487_v16  ;;  %v7515_v48 = vpop.f32.mrb[124].mxu1  ;;  %4442 = vadd.xlane.f32.xlu1 %v4441_v18  ;;  %v4435_v43 = vsel %vm549_vm2, %v12487_v16, 0.0  ;;  %v15025_v18 = vld [vmem:[#allocation76_spill] sm:$0xff] }
 0x6be   :  { %v4178_v56 = vadd.f32 %v7515_v48, %v12229_v26  ;;  %v4169_v13 = vpop.f32.mrb[125].mxu1 }
 0x6bf   :  { %v4170_v24 = vadd.f32 %v4169_v13, %v12229_v26  ;;  %v7516_v27 = vpop.f32.mrb[126].mxu1  ;;  %4433 = vadd.xlane.f32.xlu0 %v4432_v49 }
 0x6c0   :  { %v12496_v50 = vadd.f32 %v4178_v56, %v15019_v30  ;;  %v4181_v6 = vadd.f32 %v7516_v27, %v12229_v26  ;;  %v4172_v44 = vpop.f32.mrb[127].mxu1 }
 0x6c1   :  { %v4173_v60 = vadd.f32 %v4172_v44, %v12229_v26  ;;  %4436 = vadd.xlane.f32.xlu1 %v4435_v43  ;;  %v12508_v51 = vadd.f32 %v4170_v24, %v15023_v23  ;;  %v15027_v24 = vld [vmem:[#allocation17_spill] sm:$0xff] }
 0x6c2   :  { %15020 = vst [vmem:[#allocation189_spill] sm:$0xff] %v12496_v50  ;;  %v12503_v14 = vadd.f32 %v4181_v6, %v15021_v15  ;;  %v4450_v19 = vsel %vm549_vm2, %v12496_v50, 0.0 }
 0x6c3   :  { %15024 = vst [vmem:[#allocation115_spill] sm:$0xff] %v12508_v51  ;;  %v12511_v48 = vadd.f32 %v4173_v60, %v15025_v18  ;;  %4451 = vadd.xlane.f32.xlu0 %v4450_v19  ;;  %v4444_v44 = vsel %vm549_vm2, %v12508_v51, 0.0  ;;  %v15029_v18 = vld [vmem:[#allocation19_spill] sm:$0xff] }
 0x6c4   :  { %15022 = vst [vmem:[#allocation155_spill] sm:$0xff] %v12503_v14  ;;  %v4453_v56 = vsel %vm549_vm2, %v12503_v14, 0.0 }
 0x6c5   :  { %15026 = vst [vmem:[#allocation106_spill] sm:$0xff] %v12511_v48  ;;  %v7519_v13 = vpop.f32.mrb[128].mxu1  ;;  %4454 = vadd.xlane.f32.xlu1 %v4453_v56  ;;  %v4447_v19 = vsel %vm549_vm2, %v12511_v48, 0.0 }
 0x6c6   :  { %v4194_v27 = vadd.f32 %v7519_v13, %v12229_v26  ;;  %v4185_v49 = vpop.f32.mrb[129].mxu1 }
 0x6c7   :  { %v4186_v30 = vadd.f32 %v4185_v49, %v12229_v26  ;;  %v7520_v6 = vpop.f32.mrb[130].mxu1  ;;  %4445 = vadd.xlane.f32.xlu0 %v4444_v44  ;;  %v15031_v49 = vld [vmem:[#allocation18_spill] sm:$0xff] }
 0x6c8   :  { %v12520_v43 = vadd.f32 %v4194_v27, %v15027_v24  ;;  %v4197_v60 = vadd.f32 %v7520_v6, %v12229_v26  ;;  %v4188_v15 = vpop.f32.mrb[131].mxu1  ;;  %v15033_v27 = vld [vmem:[#allocation20_spill] sm:$0xff] }
 0x6c9   :  { %v4189_v23 = vadd.f32 %v4188_v15, %v12229_v26  ;;  %4448 = vadd.xlane.f32.xlu1 %v4447_v19  ;;  %v12532_v37 = vadd.f32 %v4186_v30, %v15031_v49  ;;  %v15035_v30 = vld [vmem:[#allocation25_spill] sm:$0xff] }
 0x6ca   :  { %15028 = vst [vmem:[#allocation193_spill] sm:$0xff] %v12520_v43  ;;  %v12527_v56 = vadd.f32 %v4197_v60, %v15029_v18  ;;  %v4462_v13 = vsel %vm549_vm2, %v12520_v43, 0.0 }
 0x6cb   :  { %15032 = vst [vmem:[#allocation146_spill] sm:$0xff] %v12532_v37  ;;  %v12535_v24 = vadd.f32 %v4189_v23, %v15033_v27  ;;  %4463 = vadd.xlane.f32.xlu0 %v4462_v13  ;;  %v4456_v43 = vsel %vm549_vm2, %v12532_v37, 0.0  ;;  %v15039_v37 = vld [vmem:[#allocation27_spill] sm:$0xff] }
 0x6cc   :  { %15030 = vst [vmem:[#allocation158_spill] sm:$0xff] %v12527_v56  ;;  %v4465_v6 = vsel %vm549_vm2, %v12527_v56, 0.0 }
 0x6cd   :  { %15034 = vst [vmem:[#allocation143_spill] sm:$0xff] %v12535_v24  ;;  %v7523_v44 = vpop.f32.mrb[132].mxu1  ;;  %4466 = vadd.xlane.f32.xlu1 %v4465_v6  ;;  %v4459_v27 = vsel %vm549_vm2, %v12535_v24, 0.0 }
 0x6ce   :  { %v4210_v15 = vadd.f32 %v7523_v44, %v12229_v26  ;;  %v4201_v19 = vpop.f32.mrb[133].mxu1  ;;  %v15037_v44 = vld [vmem:[#allocation26_spill] sm:$0xff] }
 0x6cf   :  { %v4202_v60 = vadd.f32 %v4201_v19, %v12229_v26  ;;  %v7524_v18 = vpop.f32.mrb[134].mxu1  ;;  %4457 = vadd.xlane.f32.xlu0 %v4456_v43 }
 0x6d0   :  { %v12544_v49 = vadd.f32 %v4210_v15, %v15035_v30  ;;  %v4213_v23 = vadd.f32 %v7524_v18, %v12229_v26  ;;  %v4204_v13 = vpop.f32.mrb[135].mxu1  ;;  %v15041_v15 = vld [vmem:[#allocation29_spill] sm:$0xff] }
 0x6d1   :  { %v4205_v6 = vadd.f32 %v4204_v13, %v12229_v26  ;;  %4460 = vadd.xlane.f32.xlu1 %v4459_v27  ;;  %v12556_v14 = vadd.f32 %v4202_v60, %v15039_v37  ;;  %v15043_v37 = vld [vmem:[#allocation33_spill] sm:$0xff] }
 0x6d2   :  { %15036 = vst [vmem:[#allocation159_spill] sm:$0xff] %v12544_v49  ;;  %v12551_v56 = vadd.f32 %v4213_v23, %v15037_v44  ;;  %v4474_v19 = vsel %vm549_vm2, %v12544_v49, 0.0 }
 0x6d3   :  { %15040 = vst [vmem:[#allocation162_spill] sm:$0xff] %v12556_v14  ;;  %v12559_v30 = vadd.f32 %v4205_v6, %v15041_v15  ;;  %4475 = vadd.xlane.f32.xlu0 %v4474_v19  ;;  %v4468_v49 = vsel %vm549_vm2, %v12556_v14, 0.0  ;;  %v15047_v14 = vld [vmem:[#allocation35_spill] sm:$0xff] }
 0x6d4   :  { %15038 = vst [vmem:[#allocation161_spill] sm:$0xff] %v12551_v56  ;;  %v4477_v43 = vsel %vm549_vm2, %v12551_v56, 0.0 }
 0x6d5   :  { %15042 = vst [vmem:[#allocation98_spill] sm:$0xff] %v12559_v30  ;;  %v7527_v18 = vpop.f32.mrb[136].mxu1  ;;  %4478 = vadd.xlane.f32.xlu1 %v4477_v43  ;;  %v4471_v15 = vsel %vm549_vm2, %v12559_v30, 0.0 }
 0x6d6   :  { %v4226_v13 = vadd.f32 %v7527_v18, %v12229_v26  ;;  %v4217_v27 = vpop.f32.mrb[137].mxu1  ;;  %v15045_v18 = vld [vmem:[#allocation34_spill] sm:$0xff] }
 0x6d7   :  { %v4218_v23 = vadd.f32 %v4217_v27, %v12229_v26  ;;  %v7528_v44 = vpop.f32.mrb[138].mxu1  ;;  %4469 = vadd.xlane.f32.xlu0 %v4468_v49 }
 0x6d8   :  { %v12568_v60 = vadd.f32 %v4226_v13, %v15043_v37  ;;  %v4229_v6 = vadd.f32 %v7528_v44, %v12229_v26  ;;  %v4220_v19 = vpop.f32.mrb[139].mxu1  ;;  %v15049_v13 = vld [vmem:[#allocation37_spill] sm:$0xff] }
 0x6d9   :  { %v4221_v43 = vadd.f32 %v4220_v19, %v12229_v26  ;;  %4472 = vadd.xlane.f32.xlu1 %v4471_v15  ;;  %v12580_v24 = vadd.f32 %v4218_v23, %v15047_v14 }
 0x6da   :  { %15044 = vst [vmem:[#allocation144_spill] sm:$0xff] %v12568_v60  ;;  %v12575_v56 = vadd.f32 %v4229_v6, %v15045_v18  ;;  %v4486_v27 = vsel %vm549_vm2, %v12568_v60, 0.0 }
 0x6db   :  { %15048 = vst [vmem:[#allocation145_spill] sm:$0xff] %v12580_v24  ;;  %v12583_v37 = vadd.f32 %v4221_v43, %v15049_v13  ;;  %4487 = vadd.xlane.f32.xlu0 %v4486_v27  ;;  %v4480_v18 = vsel %vm549_vm2, %v12580_v24, 0.0  ;;  %v15051_v43 = vld [vmem:[#allocation43_spill] sm:$0xff] }
 0x6dc   :  { %15046 = vst [vmem:[#allocation117_spill] sm:$0xff] %v12575_v56  ;;  %v4489_v49 = vsel %vm549_vm2, %v12575_v56, 0.0 }
 0x6dd   :  { %15050 = vst [vmem:[#allocation168_spill] sm:$0xff] %v12583_v37  ;;  %v12587_v44 = vpop.f32.mrb[140].mxu1  ;;  %4490 = vadd.xlane.f32.xlu1 %v4489_v49  ;;  %v4483_v23 = vsel %vm549_vm2, %v12583_v37, 0.0  ;;  %v15053_v49 = vld [vmem:[#allocation45_spill] sm:$0xff] }
 0x6de   :  { %v4233_v19 = vpop.f32.mrb[141].mxu1 }
 0x6df   :  { %v4234_v6 = vadd.f32 %v4233_v19, %v12229_v26  ;;  %v12590_v15 = vpop.f32.mrb[142].mxu1  ;;  %4481 = vadd.xlane.f32.xlu0 %v4480_v18 }
 0x6e0   :  { %v4236_v14 = vpop.f32.mrb[143].mxu1 }
 0x6e1   :  { %v12597_v27 = vadd.f32 %v4234_v6, %v15051_v43  ;;  %v4237_v13 = vadd.f32 %v4236_v14, %v12229_v26  ;;  %4484 = vadd.xlane.f32.xlu1 %v4483_v23 }
 0x6e3   :  { %15052 = vst [vmem:[#allocation127_spill] sm:$0xff] %v12597_v27  ;;  %v12601_v56 = vadd.f32 %v4237_v13, %v15053_v49  ;;  %v4492_v19 = vsel %vm549_vm2, %v12597_v27, 0.0 }
 0x6e4   :  { %4493 = vadd.xlane.f32.xlu0 %v4492_v19 }
 0x6e5   :  { %15054 = vst [vmem:[#allocation164_spill] sm:$0xff] %v12601_v56  ;;  %v4495_v24 = vsel %vm549_vm2, %v12601_v56, 0.0 }
 0x6e6   :  { %4496 = vadd.xlane.f32.xlu1 %v4495_v24  ;;  %v4320_v18 = vpop.xlane.xlu0 %4319 }
 0x6e7   :  { %v4506_v60 = vmul.f32 0.03125, %v4320_v18 }
 0x6e9   :  { %v12608_v37 = vsub.f32 %v12234_v20, %v4506_v60  ;;  %v4317_v6 = vpop.xlane.xlu1 %4316 }
 0x6ea   :  { %v4314_v43 = vpop.xlane.xlu0 %4313  ;;  %v4505_v13 = vmul.f32 0.03125, %v4317_v6 }
 0x6eb   :  { %15055 = vst [vmem:[#allocation102_spill] sm:$0xff] %v12608_v37  ;;  %v4504_v14 = vmul.f32 0.03125, %v4314_v43  ;;  %v4634_v23 = vmul.f32 %v12608_v37, %v12608_v37 }
 0x6ec   :  { %v12619_v60 = vsub.f32 %v12244_v28, %v4505_v13 }
 0x6ed   :  { %v12613_v49 = vsub.f32 %v12238_v10, %v4504_v14  ;;  %v4702_v19 = vsel %vm549_vm2, %v4634_v23, 0.0  ;;  %v7721_v10 = vld [vmem:[#allocation5] sm:$0xff]  }
 0x6ee   :  { %4703 = vadd.xlane.f32.xlu0 %v4702_v19  ;;  %v4323_v56 = vpop.xlane.xlu0 %4322  ;;  %15056 = vst [vmem:[#allocation163_spill] sm:$0xff] %v12619_v60  ;;  %v4633_v19 = vmul.f32 %v12619_v60, %v12619_v60  ;;  %7533 = vmatprep.subr.bf16.mxu1 %v7721_v10 }
 0x6ef   :  { %v4507_v24 = vmul.f32 0.03125, %v4323_v56  ;;  %v4632_v18 = vmul.f32 %v12613_v49, %v12613_v49  ;;  %7534 = vmatpush3.bf16.msra.mxu1 %v7721_v10 }
 0x6f0   :  { %v4699_v60 = vsel %vm549_vm2, %v4633_v19, 0.0 }
 0x6f1   :  { %v12622_v43 = vsub.f32 %v12249_v5, %v4507_v24  ;;  %v4696_v20 = vsel %vm549_vm2, %v4632_v18, 0.0 }
 0x6f2   :  { %4697 = vadd.xlane.f32.xlu0 %v4696_v20 }
 0x6f3   :  { %15057 = vst [vmem:[#allocation166_spill] sm:$0xff] %v12622_v43  ;;  %v4332_v14 = vpop.xlane.xlu0 %4331  ;;  %v4635_v56 = vmul.f32 %v12622_v43, %v12622_v43 }
 0x6f4   :  { %v4510_v23 = vmul.f32 0.03125, %v4332_v14 }
 0x6f5   :  { %v4335_v6 = vpop.xlane.xlu1 %4334  ;;  %v4705_v18 = vsel %vm549_vm2, %v4635_v56, 0.0 }
 0x6f6   :  { %v4511_v37 = vmul.f32 0.03125, %v4335_v6  ;;  %v12633_v24 = vsub.f32 %v12255_v21, %v4510_v23  ;;  %4706 = vadd.xlane.f32.xlu1 %v4705_v18  ;;  %v15060_v21 = vld [vmem:[#allocation42_spill] sm:$0xff] }
 0x6f7   :  { %v4326_v6 = vpop.xlane.xlu0 %4325 }
 0x6f8   :  { %v12630_v13 = vsub.f32 %v12263_v33, %v4511_v37  ;;  %v4508_v28 = vmul.f32 0.03125, %v4326_v6  ;;  %v4638_v5 = vmul.f32 %v12633_v24, %v12633_v24 }
 0x6f9   :  { %v4329_v20 = vpop.xlane.xlu1 %4328 }
 0x6fa   :  { %v4509_v14 = vmul.f32 0.03125, %v4329_v20  ;;  %v12643_v37 = vsub.f32 %v12266_v1, %v4508_v28  ;;  %v4714_v23 = vsel %vm549_vm2, %v4638_v5, 0.0  ;;  %v4639_v10 = vmul.f32 %v12630_v13, %v12630_v13  ;;  %4700 = vadd.xlane.f32.xlu1 %v4699_v60 }
 0x6fb   :  { %4715 = vadd.xlane.f32.xlu0 %v4714_v23 }
 0x6fc   :  { %v12640_v43 = vsub.f32 %v12269_v32, %v4509_v14  ;;  %v4636_v6 = vmul.f32 %v12643_v37, %v12643_v37  ;;  %v4717_v28 = vsel %vm549_vm2, %v4639_v10, 0.0 }
 0x6fe   :  { %v4708_v32 = vsel %vm549_vm2, %v4636_v6, 0.0  ;;  %v4637_v5 = vmul.f32 %v12640_v43, %v12640_v43  ;;  %4718 = vadd.xlane.f32.xlu1 %v4717_v28 }
 0x6ff   :  { %v4344_v56 = vpop.xlane.xlu0 %4343  ;;  %4709 = vadd.xlane.f32.xlu0 %v4708_v32 }
 0x700   :  { %v4514_v20 = vmul.f32 0.03125, %v4344_v56  ;;  %v4711_v10 = vsel %vm549_vm2, %v4637_v5, 0.0 }
 0x701   :  { %v4347_v18 = vpop.xlane.xlu1 %4346 }
 0x702   :  { %v4515_v19 = vmul.f32 0.03125, %v4347_v18  ;;  %v12651_v14 = vsub.f32 %v12282_v61, %v4514_v20  ;;  %4712 = vadd.xlane.f32.xlu1 %v4711_v10 }
 0x703   :  { %v4338_v23 = vpop.xlane.xlu0 %4337 }
 0x704   :  { %v12658_v60 = vsub.f32 %v12287_v42, %v4515_v19  ;;  %v4512_v1 = vmul.f32 0.03125, %v4338_v23  ;;  %v4642_v18 = vmul.f32 %v12651_v14, %v12651_v14 }
 0x705   :  { %v4341_v56 = vpop.xlane.xlu1 %4340 }
 0x706   :  { %v4513_v20 = vmul.f32 0.03125, %v4341_v56  ;;  %v12663_v61 = vsub.f32 %v12290_v45, %v4512_v1  ;;  %v4726_v6 = vsel %vm549_vm2, %v4642_v18, 0.0  ;;  %v4643_v19 = vmul.f32 %v12658_v60, %v12658_v60 }
 0x707   :  { %4727 = vadd.xlane.f32.xlu0 %v4726_v6  ;;  %v4356_v32 = vpop.xlane.xlu0 %4355 }
 0x708   :  { %v12670_v28 = vsub.f32 %v12295_v55, %v4513_v20  ;;  %v4518_v42 = vmul.f32 0.03125, %v4356_v32  ;;  %v4640_v56 = vmul.f32 %v12663_v61, %v12663_v61  ;;  %v4729_v5 = vsel %vm549_vm2, %v4643_v19, 0.0 }
 0x709   :  { %v4359_v23 = vpop.xlane.xlu1 %4358  ;;  %4730 = vadd.xlane.f32.xlu1 %v4729_v5 }
 0x70a   :  { %v4519_v1 = vmul.f32 0.03125, %v4359_v23  ;;  %v12675_v45 = vsub.f32 %v12304_v41, %v4518_v42  ;;  %v4720_v18 = vsel %vm549_vm2, %v4640_v56, 0.0  ;;  %v4641_v20 = vmul.f32 %v12670_v28, %v12670_v28 }
 0x70b   :  { %4721 = vadd.xlane.f32.xlu0 %v4720_v18  ;;  %v4350_v6 = vpop.xlane.xlu0 %4349 }
 0x70c   :  { %v12682_v10 = vsub.f32 %v12311_v22, %v4519_v1  ;;  %v4516_v55 = vmul.f32 0.03125, %v4350_v6  ;;  %v4646_v23 = vmul.f32 %v12675_v45, %v12675_v45  ;;  %v4723_v19 = vsel %vm549_vm2, %v4641_v20, 0.0 }
 0x70d   :  { %v4353_v32 = vpop.xlane.xlu1 %4352  ;;  %4724 = vadd.xlane.f32.xlu1 %v4723_v19 }
 0x70e   :  { %v4517_v42 = vmul.f32 0.03125, %v4353_v32  ;;  %v12687_v41 = vsub.f32 %v12314_v0, %v4516_v55  ;;  %v4738_v56 = vsel %vm549_vm2, %v4646_v23, 0.0  ;;  %v4647_v1 = vmul.f32 %v12682_v10, %v12682_v10 }
 0x70f   :  { %4739 = vadd.xlane.f32.xlu0 %v4738_v56 }
 0x710   :  { %v12694_v5 = vsub.f32 %v12319_v29, %v4517_v42  ;;  %v4368_v18 = vpop.xlane.xlu0 %4367  ;;  %v4644_v32 = vmul.f32 %v12687_v41, %v12687_v41  ;;  %v4741_v20 = vsel %vm549_vm2, %v4647_v1, 0.0 }
 0x711   :  { %v4522_v22 = vmul.f32 0.03125, %v4368_v18  ;;  %4742 = vadd.xlane.f32.xlu1 %v4741_v20 }
 0x712   :  { %v4371_v6 = vpop.xlane.xlu1 %4370  ;;  %v4732_v23 = vsel %vm549_vm2, %v4644_v32, 0.0  ;;  %v4645_v42 = vmul.f32 %v12694_v5, %v12694_v5 }
 0x713   :  { %v4523_v55 = vmul.f32 0.03125, %v4371_v6  ;;  %v12699_v0 = vsub.f32 %v12328_v34, %v4522_v22  ;;  %4733 = vadd.xlane.f32.xlu0 %v4732_v23 }
 0x714   :  { %v4362_v56 = vpop.xlane.xlu0 %4361  ;;  %v4735_v1 = vsel %vm549_vm2, %v4645_v42, 0.0 }
 0x715   :  { %v12706_v19 = vsub.f32 %v12335_v39, %v4523_v55  ;;  %v4520_v29 = vmul.f32 0.03125, %v4362_v56  ;;  %v4650_v6 = vmul.f32 %v12699_v0, %v12699_v0  ;;  %4736 = vadd.xlane.f32.xlu1 %v4735_v1 }
 0x716   :  { %v4365_v18 = vpop.xlane.xlu1 %4364 }
 0x717   :  { %v4521_v22 = vmul.f32 0.03125, %v4365_v18  ;;  %v12711_v34 = vsub.f32 %v12338_v36, %v4520_v29  ;;  %v4750_v32 = vsel %vm549_vm2, %v4650_v6, 0.0  ;;  %v4651_v55 = vmul.f32 %v12706_v19, %v12706_v19 }
 0x718   :  { %4751 = vadd.xlane.f32.xlu0 %v4750_v32 }
 0x719   :  { %v12718_v20 = vsub.f32 %v12343_v25, %v4521_v22  ;;  %v4648_v18 = vmul.f32 %v12711_v34, %v12711_v34  ;;  %v4753_v42 = vsel %vm549_vm2, %v4651_v55, 0.0 }
 0x71a   :  { %4754 = vadd.xlane.f32.xlu1 %v4753_v42 }
 0x71b   :  { %v4380_v23 = vpop.xlane.xlu0 %4379  ;;  %v4744_v6 = vsel %vm549_vm2, %v4648_v18, 0.0  ;;  %v4649_v22 = vmul.f32 %v12718_v20, %v12718_v20 }
 0x71c   :  { %v4526_v39 = vmul.f32 0.03125, %v4380_v23  ;;  %4745 = vadd.xlane.f32.xlu0 %v4744_v6 }
 0x71d   :  { %v4383_v56 = vpop.xlane.xlu1 %4382  ;;  %v4747_v55 = vsel %vm549_vm2, %v4649_v22, 0.0 }
 0x71e   :  { %v4527_v29 = vmul.f32 0.03125, %v4383_v56  ;;  %v12723_v36 = vsub.f32 %v12352_v47, %v4526_v39  ;;  %4748 = vadd.xlane.f32.xlu1 %v4747_v55 }
 0x71f   :  { %v4374_v32 = vpop.xlane.xlu0 %4373 }
 0x720   :  { %v12730_v1 = vsub.f32 %v12359_v2, %v4527_v29  ;;  %v4524_v25 = vmul.f32 0.03125, %v4374_v32  ;;  %v4654_v56 = vmul.f32 %v12723_v36, %v12723_v36 }
 0x721   :  { %v4377_v23 = vpop.xlane.xlu1 %4376 }
 0x722   :  { %v4525_v39 = vmul.f32 0.03125, %v4377_v23  ;;  %v12735_v47 = vsub.f32 %v12362_v12, %v4524_v25  ;;  %v4762_v18 = vsel %vm549_vm2, %v4654_v56, 0.0  ;;  %v4655_v29 = vmul.f32 %v12730_v1, %v12730_v1 }
 0x723   :  { %4763 = vadd.xlane.f32.xlu0 %v4762_v18 }
 0x724   :  { %v12742_v42 = vsub.f32 %v12367_v11, %v4525_v39  ;;  %v4652_v23 = vmul.f32 %v12735_v47, %v12735_v47  ;;  %v4765_v22 = vsel %vm549_vm2, %v4655_v29, 0.0 }
 0x725   :  { %4766 = vadd.xlane.f32.xlu1 %v4765_v22 }
 0x726   :  { %v4392_v6 = vpop.xlane.xlu0 %4391  ;;  %v4756_v56 = vsel %vm549_vm2, %v4652_v23, 0.0  ;;  %v4653_v39 = vmul.f32 %v12742_v42, %v12742_v42 }
 0x727   :  { %v4530_v2 = vmul.f32 0.03125, %v4392_v6  ;;  %4757 = vadd.xlane.f32.xlu0 %v4756_v56 }
 0x728   :  { %v4395_v32 = vpop.xlane.xlu1 %4394  ;;  %v4759_v29 = vsel %vm549_vm2, %v4653_v39, 0.0 }
 0x729   :  { %v4531_v25 = vmul.f32 0.03125, %v4395_v32  ;;  %v12747_v12 = vsub.f32 %v12376_v58, %v4530_v2  ;;  %4760 = vadd.xlane.f32.xlu1 %v4759_v29 }
 0x72a   :  { %v4386_v18 = vpop.xlane.xlu0 %4385 }
 0x72b   :  { %v12754_v55 = vsub.f32 %v12383_v46, %v4531_v25  ;;  %v4528_v11 = vmul.f32 0.03125, %v4386_v18  ;;  %v4658_v32 = vmul.f32 %v12747_v12, %v12747_v12 }
 0x72c   :  { %v4389_v6 = vpop.xlane.xlu1 %4388 }
 0x72d   :  { %v4529_v2 = vmul.f32 0.03125, %v4389_v6  ;;  %v12759_v58 = vsub.f32 %v12386_v52, %v4528_v11  ;;  %v4774_v23 = vsel %vm549_vm2, %v4658_v32, 0.0  ;;  %v4659_v25 = vmul.f32 %v12754_v55, %v12754_v55 }
 0x72e   :  { %4775 = vadd.xlane.f32.xlu0 %v4774_v23 }
 0x72f   :  { %v12766_v22 = vsub.f32 %v12391_v54, %v4529_v2  ;;  %v4656_v6 = vmul.f32 %v12759_v58, %v12759_v58  ;;  %v4777_v39 = vsel %vm549_vm2, %v4659_v25, 0.0 }
 0x730   :  { %v4404_v56 = vpop.xlane.xlu0 %4403  ;;  %4778 = vadd.xlane.f32.xlu1 %v4777_v39 }
 0x731   :  { %v4534_v18 = vmul.f32 0.03125, %v4404_v56  ;;  %v4768_v32 = vsel %vm549_vm2, %v4656_v6, 0.0  ;;  %v4657_v2 = vmul.f32 %v12766_v22, %v12766_v22 }
 0x732   :  { %v4407_v46 = vpop.xlane.xlu1 %4406  ;;  %4769 = vadd.xlane.f32.xlu0 %v4768_v32 }
 0x733   :  { %v4535_v11 = vmul.f32 0.03125, %v4407_v46  ;;  %v12771_v52 = vsub.f32 %v12400_v9, %v4534_v18  ;;  %v4771_v25 = vsel %vm549_vm2, %v4657_v2, 0.0 }
 0x734   :  { %v4398_v23 = vpop.xlane.xlu0 %4397  ;;  %4772 = vadd.xlane.f32.xlu1 %v4771_v25 }
 0x735   :  { %v12778_v29 = vsub.f32 %v12407_v57, %v4535_v11  ;;  %v4532_v56 = vmul.f32 0.03125, %v4398_v23  ;;  %v4662_v46 = vmul.f32 %v12771_v52, %v12771_v52 }
 0x736   :  { %v4401_v54 = vpop.xlane.xlu1 %4400 }
 0x737   :  { %v4533_v18 = vmul.f32 0.03125, %v4401_v54  ;;  %v12783_v9 = vsub.f32 %v12412_v63, %v4532_v56  ;;  %v4786_v6 = vsel %vm549_vm2, %v4662_v46, 0.0  ;;  %v4663_v11 = vmul.f32 %v12778_v29, %v12778_v29  ;;  %v7722_v63 = vld [vmem:[#allocation5 + $0x8] sm:$0xff]  }
 0x738   :  { %4787 = vadd.xlane.f32.xlu0 %v4786_v6  ;;  %v4416_v32 = vpop.xlane.xlu0 %4415  ;;  %7535 = vmatprep.subr.bf16.mxu1 %v7722_v63 }
 0x739   :  { %v12790_v39 = vsub.f32 %v12415_v8, %v4533_v18  ;;  %v4538_v23 = vmul.f32 0.03125, %v4416_v32  ;;  %v4660_v54 = vmul.f32 %v12783_v9, %v12783_v9  ;;  %v4789_v46 = vsel %vm549_vm2, %v4663_v11, 0.0  ;;  %7536 = vmatpush3.bf16.msra.mxu1 %v7722_v63 }
 0x73a   :  { %v4419_v57 = vpop.xlane.xlu1 %4418  ;;  %4790 = vadd.xlane.f32.xlu1 %v4789_v46  ;;  %v4242_v11 = vadd.f32 %v12587_v44, %v12229_v26 }
 0x73b   :  { %v4539_v56 = vmul.f32 0.03125, %v4419_v57  ;;  %v12795_v2 = vsub.f32 %v12424_v38, %v4538_v23  ;;  %v4780_v33 = vsel %vm549_vm2, %v4660_v54, 0.0  ;;  %v4661_v18 = vmul.f32 %v12790_v39, %v12790_v39 }
 0x73c   :  { %4781 = vadd.xlane.f32.xlu0 %v4780_v33  ;;  %v4410_v6 = vpop.xlane.xlu0 %4409 }
 0x73d   :  { %v12802_v25 = vsub.f32 %v12431_v40, %v4539_v56  ;;  %v4536_v32 = vmul.f32 0.03125, %v4410_v6  ;;  %v4666_v57 = vmul.f32 %v12795_v2, %v12795_v2  ;;  %v4783_v56 = vsel %vm549_vm2, %v4661_v18, 0.0 }
 0x73e   :  { %v4413_v8 = vpop.xlane.xlu1 %4412  ;;  %4784 = vadd.xlane.f32.xlu1 %v4783_v56  ;;  %v4245_v18 = vadd.f32 %v12590_v15, %v12229_v26 }
 0x73f   :  { %v4537_v23 = vmul.f32 0.03125, %v4413_v8  ;;  %v12809_v54 = vsub.f32 %v12436_v53, %v4536_v32  ;;  %v4798_v46 = vsel %vm549_vm2, %v4666_v57, 0.0  ;;  %v4667_v33 = vmul.f32 %v12802_v25, %v12802_v25  ;;  %v15059_v8 = vld [vmem:[#allocation41_spill] sm:$0xff] }
 0x740   :  { %4799 = vadd.xlane.f32.xlu0 %v4798_v46  ;;  %v4428_v40 = vpop.xlane.xlu0 %4427  ;;  %v12821_v44 = vadd.f32 %v4242_v11, %v15059_v8 }
 0x741   :  { %15058 = vst [vmem:[#allocation86_spill] sm:$0xff] %v12809_v54  ;;  %v12816_v6 = vsub.f32 %v12439_v4, %v4537_v23  ;;  %v4664_v63 = vmul.f32 %v12809_v54, %v12809_v54  ;;  %v4542_v32 = vmul.f32 0.03125, %v4428_v40  ;;  %v4801_v57 = vsel %vm549_vm2, %v4667_v33, 0.0 }
 0x742   :  { %v4431_v38 = vpop.xlane.xlu1 %4430  ;;  %4802 = vadd.xlane.f32.xlu1 %v4801_v57  ;;  %v12830_v54 = vadd.f32 %v4245_v18, %v15060_v21  ;;  %v4498_v33 = vsel %vm549_vm2, %v12821_v44, 0.0 }
 0x743   :  { %v4792_v53 = vsel %vm549_vm2, %v4664_v63, 0.0  ;;  %v4665_v23 = vmul.f32 %v12816_v6, %v12816_v6  ;;  %v4543_v11 = vmul.f32 0.03125, %v4431_v38  ;;  %v12833_v26 = vsub.f32 %v12448_v3, %v4542_v32 }
 0x744   :  { %4793 = vadd.xlane.f32.xlu0 %v4792_v53  ;;  %v4422_v56 = vpop.xlane.xlu0 %4421  ;;  %v4501_v18 = vsel %vm549_vm2, %v12830_v54, 0.0 }
 0x745   :  { %v4540_v46 = vmul.f32 0.03125, %v4422_v56  ;;  %v4795_v15 = vsel %vm549_vm2, %v4665_v23, 0.0  ;;  %v4670_v56 = vmul.f32 %v12833_v26, %v12833_v26 }
 0x746   :  { %v4425_v4 = vpop.xlane.xlu1 %4424  ;;  %4796 = vadd.xlane.f32.xlu1 %v4795_v15 }
 0x747   :  { %v4541_v8 = vmul.f32 0.03125, %v4425_v4  ;;  %v12836_v40 = vsub.f32 %v12460_v62, %v4540_v46  ;;  %v12847_v4 = vsub.f32 %v12455_v31, %v4543_v11  ;;  %v4810_v31 = vsel %vm549_vm2, %v4670_v56, 0.0 }
 0x748   :  { %4499 = vadd.xlane.f32.xlu0 %v4498_v33  ;;  %v4440_v21 = vpop.xlane.xlu0 %4439 }
 0x749   :  { %v12842_v53 = vsub.f32 %v12463_v35, %v4541_v8  ;;  %v4668_v38 = vmul.f32 %v12836_v40, %v12836_v40  ;;  %v4546_v32 = vmul.f32 0.03125, %v4440_v21  ;;  %v4671_v35 = vmul.f32 %v12847_v4, %v12847_v4 }
 0x74a   :  { %v4443_v63 = vpop.xlane.xlu1 %4442  ;;  %4502 = vadd.xlane.f32.xlu1 %v4501_v18 }
 0x74b   :  { %v4804_v57 = vsel %vm549_vm2, %v4668_v38, 0.0  ;;  %v4669_v23 = vmul.f32 %v12842_v53, %v12842_v53  ;;  %v4547_v33 = vmul.f32 0.03125, %v4443_v63  ;;  %v12859_v21 = vsub.f32 %v12472_v59, %v4546_v32 }
 0x74c   :  { %4805 = vadd.xlane.f32.xlu0 %v4804_v57  ;;  %v4434_v46 = vpop.xlane.xlu0 %4433 }
 0x74d   :  { %v4544_v8 = vmul.f32 0.03125, %v4434_v46  ;;  %v4807_v62 = vsel %vm549_vm2, %v4669_v23, 0.0  ;;  %v12872_v32 = vsub.f32 %v12479_v7, %v4547_v33 }
 0x74e   :  { %v4437_v15 = vpop.xlane.xlu1 %4436  ;;  %4808 = vadd.xlane.f32.xlu1 %v4807_v62  ;;  %v4674_v62 = vmul.f32 %v12859_v21, %v12859_v21 }
 0x74f   :  { %v4545_v11 = vmul.f32 0.03125, %v4437_v15  ;;  %v12862_v38 = vsub.f32 %v12484_v17, %v4544_v8  ;;  %15061 = vst [vmem:[#allocation167_spill] sm:$0xff] %v12872_v32  ;;  %v4813_v8 = vsel %vm549_vm2, %v4671_v35, 0.0  ;;  %v4675_v33 = vmul.f32 %v12872_v32, %v12872_v32 }
 0x750   :  { %4811 = vadd.xlane.f32.xlu0 %v4810_v31  ;;  %v4452_v63 = vpop.xlane.xlu0 %4451  ;;  %v4822_v7 = vsel %vm549_vm2, %v4674_v62, 0.0 }
 0x751   :  { %v12867_v18 = vsub.f32 %v12487_v16, %v4545_v11  ;;  %v4672_v46 = vmul.f32 %v12862_v38, %v12862_v38  ;;  %v4550_v15 = vmul.f32 0.03125, %v4452_v63 }
 0x752   :  { %v4455_v57 = vpop.xlane.xlu1 %4454  ;;  %4814 = vadd.xlane.f32.xlu1 %v4813_v8 }
 0x753   :  { %v4816_v23 = vsel %vm549_vm2, %v4672_v46, 0.0  ;;  %v4673_v56 = vmul.f32 %v12867_v18, %v12867_v18  ;;  %v4551_v17 = vmul.f32 0.03125, %v4455_v57  ;;  %v12883_v35 = vsub.f32 %v12496_v50, %v4550_v15 }
 0x754   :  { %4817 = vadd.xlane.f32.xlu0 %v4816_v23  ;;  %v4446_v31 = vpop.xlane.xlu0 %4445 }
 0x755   :  { %v4548_v11 = vmul.f32 0.03125, %v4446_v31  ;;  %15062 = vst [vmem:[#allocation116_spill] sm:$0xff] %v12883_v35  ;;  %v4819_v46 = vsel %vm549_vm2, %v4673_v56, 0.0  ;;  %v15065_v31 = vld [vmem:[#allocation155_spill] sm:$0xff] }
 0x756   :  { %v4449_v16 = vpop.xlane.xlu1 %4448  ;;  %4820 = vadd.xlane.f32.xlu1 %v4819_v46  ;;  %v12896_v15 = vsub.f32 %v15065_v31, %v4551_v17 }
 0x757   :  { %v4549_v59 = vmul.f32 0.03125, %v4449_v16  ;;  %v12886_v63 = vsub.f32 %v12508_v51, %v4548_v11  ;;  %v4825_v11 = vsel %vm549_vm2, %v4675_v33, 0.0  ;;  %v15067_v33 = vld [vmem:[#allocation193_spill] sm:$0xff] }
 0x758   :  { %4823 = vadd.xlane.f32.xlu0 %v4822_v7  ;;  %v4464_v57 = vpop.xlane.xlu0 %4463  ;;  %15066 = vst [vmem:[#allocation171_spill] sm:$0xff] %v12896_v15  ;;  %v4679_v17 = vmul.f32 %v12896_v15, %v12896_v15  ;;  %v15073_v15 = vld [vmem:[#allocation158_spill] sm:$0xff] }
 0x759   :  { %15063 = vst [vmem:[#allocation170_spill] sm:$0xff] %v12886_v63  ;;  %v12891_v8 = vsub.f32 %v12511_v48, %v4549_v59  ;;  %v4676_v23 = vmul.f32 %v12886_v63, %v12886_v63  ;;  %v4554_v51 = vmul.f32 0.03125, %v4464_v57  ;;  %v4678_v59 = vmul.f32 %v12883_v35, %v12883_v35 }
 0x75a   :  { %v4467_v16 = vpop.xlane.xlu1 %4466  ;;  %4826 = vadd.xlane.f32.xlu1 %v4825_v11  ;;  %v15071_v11 = vld [vmem:[#allocation143_spill] sm:$0xff] }
 0x75b   :  { %15064 = vst [vmem:[#allocation84_spill] sm:$0xff] %v12891_v8  ;;  %v4828_v56 = vsel %vm549_vm2, %v4676_v23, 0.0  ;;  %v4677_v62 = vmul.f32 %v12891_v8, %v12891_v8  ;;  %v4555_v50 = vmul.f32 0.03125, %v4467_v16  ;;  %v12907_v57 = vsub.f32 %v15067_v33, %v4554_v51  ;;  %v15069_v23 = vld [vmem:[#allocation146_spill] sm:$0xff] }
 0x75c   :  { %4829 = vadd.xlane.f32.xlu0 %v4828_v56  ;;  %v4458_v7 = vpop.xlane.xlu0 %4457  ;;  %v4834_v35 = vsel %vm549_vm2, %v4678_v59, 0.0 }
 0x75d   :  { %v4552_v46 = vmul.f32 0.03125, %v4458_v7  ;;  %15068 = vst [vmem:[#allocation105_spill] sm:$0xff] %v12907_v57  ;;  %v4831_v8 = vsel %vm549_vm2, %v4677_v62, 0.0  ;;  %v12920_v51 = vsub.f32 %v15073_v15, %v4555_v50 }
 0x75e   :  { %v4461_v48 = vpop.xlane.xlu1 %4460  ;;  %4832 = vadd.xlane.f32.xlu1 %v4831_v8 }
 0x75f   :  { %v4553_v3 = vmul.f32 0.03125, %v4461_v48  ;;  %v12910_v31 = vsub.f32 %v15069_v23, %v4552_v46  ;;  %15074 = vst [vmem:[#allocation173_spill] sm:$0xff] %v12920_v51  ;;  %v4837_v46 = vsel %vm549_vm2, %v4679_v17, 0.0  ;;  %v4683_v50 = vmul.f32 %v12920_v51, %v12920_v51  ;;  %v15075_v17 = vld [vmem:[#allocation159_spill] sm:$0xff] }
 0x760   :  { %4835 = vadd.xlane.f32.xlu0 %v4834_v35  ;;  %v4476_v16 = vpop.xlane.xlu0 %4475 }
 0x761   :  { %15070 = vst [vmem:[#allocation172_spill] sm:$0xff] %v12910_v31  ;;  %v12915_v56 = vsub.f32 %v15071_v11, %v4553_v3  ;;  %v4680_v7 = vmul.f32 %v12910_v31, %v12910_v31  ;;  %v4558_v23 = vmul.f32 0.03125, %v4476_v16  ;;  %v4682_v3 = vmul.f32 %v12907_v57, %v12907_v57 }
 0x762   :  { %v4479_v48 = vpop.xlane.xlu1 %4478  ;;  %4838 = vadd.xlane.f32.xlu1 %v4837_v46 }
 0x763   :  { %15072 = vst [vmem:[#allocation134_spill] sm:$0xff] %v12915_v56  ;;  %v4840_v62 = vsel %vm549_vm2, %v4680_v7, 0.0  ;;  %v4681_v59 = vmul.f32 %v12915_v56, %v12915_v56  ;;  %v4559_v33 = vmul.f32 0.03125, %v4479_v48  ;;  %v12931_v16 = vsub.f32 %v15075_v17, %v4558_v23  ;;  %v15077_v7 = vld [vmem:[#allocation162_spill] sm:$0xff] }
 0x764   :  { %4841 = vadd.xlane.f32.xlu0 %v4840_v62  ;;  %v4470_v35 = vpop.xlane.xlu0 %4469  ;;  %v4846_v57 = vsel %vm549_vm2, %v4682_v3, 0.0 }
 0x765   :  { %v4556_v8 = vmul.f32 0.03125, %v4470_v35  ;;  %15076 = vst [vmem:[#allocation175_spill] sm:$0xff] %v12931_v16  ;;  %v4843_v56 = vsel %vm549_vm2, %v4681_v59, 0.0  ;;  %v15080_v35 = vld [vmem:[#allocation161_spill] sm:$0xff] }
 0x766   :  { %v4473_v11 = vpop.xlane.xlu1 %4472  ;;  %4844 = vadd.xlane.f32.xlu1 %v4843_v56  ;;  %v12944_v23 = vsub.f32 %v15080_v35, %v4559_v33 }
 0x767   :  { %v4557_v31 = vmul.f32 0.03125, %v4473_v11  ;;  %v12934_v15 = vsub.f32 %v15077_v7, %v4556_v8  ;;  %v4849_v8 = vsel %vm549_vm2, %v4683_v50, 0.0  ;;  %v15082_v7 = vld [vmem:[#allocation144_spill] sm:$0xff] }
 0x768   :  { %4847 = vadd.xlane.f32.xlu0 %v4846_v57  ;;  %v4488_v48 = vpop.xlane.xlu0 %4487  ;;  %15081 = vst [vmem:[#allocation114_spill] sm:$0xff] %v12944_v23  ;;  %v4687_v50 = vmul.f32 %v12944_v23, %v12944_v23 }
 0x769   :  { %15078 = vst [vmem:[#allocation149_spill] sm:$0xff] %v12934_v15  ;;  %v12939_v46 = vsub.f32 %v12559_v30, %v4557_v31  ;;  %v4684_v62 = vmul.f32 %v12934_v15, %v12934_v15  ;;  %v4562_v17 = vmul.f32 0.03125, %v4488_v48  ;;  %v4686_v31 = vmul.f32 %v12931_v16, %v12931_v16 }
 0x76a   :  { %v4491_v11 = vpop.xlane.xlu1 %4490  ;;  %4850 = vadd.xlane.f32.xlu1 %v4849_v8  ;;  %v15086_v8 = vld [vmem:[#allocation168_spill] sm:$0xff] }
 0x76b   :  { %15079 = vst [vmem:[#allocation109_spill] sm:$0xff] %v12939_v46  ;;  %v4852_v59 = vsel %vm549_vm2, %v4684_v62, 0.0  ;;  %v4685_v3 = vmul.f32 %v12939_v46, %v12939_v46  ;;  %v12953_v15 = vsub.f32 %v15082_v7, %v4562_v17  ;;  %v4563_v33 = vmul.f32 0.03125, %v4491_v11  ;;  %v15084_v62 = vld [vmem:[#allocation145_spill] sm:$0xff] }
 0x76c   :  { %4853 = vadd.xlane.f32.xlu0 %v4852_v59  ;;  %v4482_v57 = vpop.xlane.xlu0 %4481  ;;  %v4858_v16 = vsel %vm549_vm2, %v4686_v31, 0.0  ;;  %v15088_v11 = vld [vmem:[#allocation117_spill] sm:$0xff] }
 0x76d   :  { %v4560_v56 = vmul.f32 0.03125, %v4482_v57  ;;  %15083 = vst [vmem:[#allocation118_spill] sm:$0xff] %v12953_v15  ;;  %v4855_v46 = vsel %vm549_vm2, %v4685_v3, 0.0  ;;  %v12968_v7 = vsub.f32 %v15088_v11, %v4563_v33  ;;  %v4690_v3 = vmul.f32 %v12953_v15, %v12953_v15 }
 0x76e   :  { %v4485_v30 = vpop.xlane.xlu1 %4484  ;;  %4856 = vadd.xlane.f32.xlu1 %v4855_v46 }
 0x76f   :  { %v4561_v48 = vmul.f32 0.03125, %v4485_v30  ;;  %v12958_v35 = vsub.f32 %v15084_v62, %v4560_v56  ;;  %15089 = vst [vmem:[#allocation110_spill] sm:$0xff] %v12968_v7  ;;  %v4861_v56 = vsel %vm549_vm2, %v4687_v50, 0.0  ;;  %v4691_v33 = vmul.f32 %v12968_v7, %v12968_v7 }
 0x770   :  { %4859 = vadd.xlane.f32.xlu0 %v4858_v16  ;;  %v4870_v62 = vsel %vm549_vm2, %v4690_v3, 0.0 }
 0x771   :  { %15085 = vst [vmem:[#allocation107_spill] sm:$0xff] %v12958_v35  ;;  %v12963_v59 = vsub.f32 %v15086_v8, %v4561_v48  ;;  %v4494_v57 = vpop.xlane.xlu0 %4493  ;;  %v4688_v30 = vmul.f32 %v12958_v35, %v12958_v35  ;;  %v15095_v35 = vld [vmem:[#allocation166_spill] sm:$0xff] }
 0x772   :  { %v4564_v17 = vmul.f32 0.03125, %v4494_v57  ;;  %4862 = vadd.xlane.f32.xlu1 %v4861_v56  ;;  %v15091_v57 = vld [vmem:[#allocation164_spill] sm:$0xff] }
 0x773   :  { %15087 = vst [vmem:[#allocation191_spill] sm:$0xff] %v12963_v59  ;;  %v4497_v23 = vpop.xlane.xlu1 %4496  ;;  %v4864_v16 = vsel %vm549_vm2, %v4688_v30, 0.0  ;;  %v4689_v46 = vmul.f32 %v12963_v59, %v12963_v59 }
 0x774   :  { %v12974_v31 = vsub.f32 %v12597_v27, %v4564_v17  ;;  %v4565_v48 = vmul.f32 0.03125, %v4497_v23  ;;  %4865 = vadd.xlane.f32.xlu0 %v4864_v16  ;;  %v4873_v17 = vsel %vm549_vm2, %v4691_v33, 0.0 }
 0x775   :  { %v4867_v50 = vsel %vm549_vm2, %v4689_v46, 0.0 }
 0x776   :  { %15090 = vst [vmem:[#allocation177_spill] sm:$0xff] %v12974_v31  ;;  %v12982_v8 = vsub.f32 %v15091_v57, %v4565_v48  ;;  %v4692_v23 = vmul.f32 %v12974_v31, %v12974_v31  ;;  %4868 = vadd.xlane.f32.xlu1 %v4867_v50 }
 0x778   :  { %15092 = vst [vmem:[#allocation178_spill] sm:$0xff] %v12982_v8  ;;  %4871 = vadd.xlane.f32.xlu0 %v4870_v62  ;;  %v4876_v30 = vsel %vm549_vm2, %v4692_v23, 0.0  ;;  %v4693_v56 = vmul.f32 %v12982_v8, %v12982_v8 }
 0x77a   :  { %4874 = vadd.xlane.f32.xlu1 %v4873_v17  ;;  %v4879_v48 = vsel %vm549_vm2, %v4693_v56, 0.0 }
 0x77b   :  { %v4704_v16 = vpop.xlane.xlu0 %4703 }
 0x77c   :  { %4877 = vadd.xlane.f32.xlu0 %v4876_v30  ;;  %v4890_v46 = vmul.f32 0.03125, %v4704_v16 }
 0x77e   :  { %4880 = vadd.xlane.f32.xlu1 %v4879_v48  ;;  %v4954_v27 = vadd.f32 1e-05, %v4890_v46 }
 0x77f   :  { %v4698_v3 = vpop.xlane.xlu0 %4697 }
 0x780   :  { %v4888_v57 = vmul.f32 0.03125, %v4698_v3  ;;  %7981 = vrsqrt.f32 %v4954_v27 }
 0x782   :  { %v4952_v11 = vadd.f32 1e-05, %v4888_v57 }
 0x783   :  { %v4707_v50 = vpop.xlane.xlu1 %4706 }
 0x784   :  { %v4891_v62 = vmul.f32 0.03125, %v4707_v50  ;;  %7983 = vrsqrt.f32 %v4952_v11  ;;  %v15093_v50 = vld [vmem:[#allocation12_spill] sm:$0xff] }
 0x785   :  { %v5146_v27 = vsub.s32 4, %v15093_v50 }
 0x786   :  { %v4955_v33 = vadd.f32 1e-05, %v4891_v62 }
 0x787   :  { %v4701_v23 = vpop.xlane.xlu1 %4700 }
 0x788   :  { %v4716_v31 = vpop.xlane.xlu0 %4715  ;;  %7985 = vrsqrt.f32 %v4955_v33  ;;  %v4889_v8 = vmul.f32 0.03125, %v4701_v23 }
 0x789   :  { %v4894_v17 = vmul.f32 0.03125, %v4716_v31  ;;  %v5214_v31 = vsub.s32 5, %v15093_v50 }
 0x78a   :  { %v4953_v30 = vadd.f32 1e-05, %v4889_v8  ;;  %v7982_v3 = vpop.eup %7981 }
 0x78b   :  { %v4958_v7 = vadd.f32 1e-05, %v4894_v17  ;;  %v4719_v56 = vpop.xlane.xlu1 %4718 }
 0x78c   :  { %v4710_v48 = vpop.xlane.xlu0 %4709  ;;  %7987 = vrsqrt.f32 %v4953_v30  ;;  %v4895_v16 = vmul.f32 0.03125, %v4719_v56  ;;  %v8239_v56 = vld [vmem:[#allocation2] sm:$0xff] }
 0x78d   :  { %v4892_v15 = vmul.f32 0.03125, %v4710_v48  ;;  %7989 = vrsqrt.f32 %v4958_v7  ;;  %v12995_v48 = vrot.slane %v8239_v56, %v5146_v27  ;;  %v15094_v7 = vld [vmem:[#allocation102_spill] sm:$0xff]  ;;  %v13001_v27 = vrot.slane %v8239_v56, %v5214_v31 }
 0x78e   :  { %v4959_v46 = vadd.f32 1e-05, %v4895_v16  ;;  %v7984_v59 = vpop.eup %7983 }
 0x78f   :  { %v4956_v57 = vadd.f32 1e-05, %v4892_v15  ;;  %v4713_v11 = vpop.xlane.xlu1 %4712  ;;  %v5082_v15 = vmul.f32 %v7982_v3, %v15094_v7  ;;  %v5080_v16 = vmul.f32 %v7984_v59, %v12613_v49  ;;  %v15096_v7 = vld [vmem:[#allocation163_spill] sm:$0xff] }
 0x790   :  { %7991 = vrsqrt.f32 %v4959_v46  ;;  %v4893_v33 = vmul.f32 0.03125, %v4713_v11 }
 0x791   :  { %7993 = vrsqrt.f32 %v4956_v57  ;;  %v5150_v3 = vmul.f32 %v12995_v48, %v5082_v15 }
 0x792   :  { %v7986_v8 = vpop.eup %7985  ;;  %v4957_v17 = vadd.f32 1e-05, %v4893_v33 }
 0x793   :  { %v5083_v51 = vmul.f32 %v7986_v8, %v15095_v35  ;;  %v5148_v8 = vmul.f32 %v12995_v48, %v5080_v16 }
 0x794   :  { %v4728_v62 = vpop.xlane.xlu0 %4727  ;;  %7995 = vrsqrt.f32 %v4957_v17  ;;  %v7723_v17 = vld [vmem:[#allocation7] sm:$0xff]  }
 0x795   :  { %v4898_v23 = vmul.f32 0.03125, %v4728_v62  ;;  %v5151_v57 = vmul.f32 %v12995_v48, %v5083_v51  ;;  %7601 = vmatprep.subr.bf16.mxu0 %v7723_v17 }
 0x796   :  { %v4731_v63 = vpop.xlane.xlu1 %4730  ;;  %v7988_v62 = vpop.eup %7987  ;;  %7602 = vmatpush3.bf16.msra.mxu0 %v7723_v17 }
 0x797   :  { %v4962_v30 = vadd.f32 1e-05, %v4898_v23  ;;  %v4899_v46 = vmul.f32 0.03125, %v4731_v63  ;;  %v7990_v50 = vpop.eup %7989  ;;  %v5081_v49 = vmul.f32 %v7988_v62, %v15096_v7  ;;  %v5219_v51 = vadd.f32 %v13001_v27, %v5151_v57 }
 0x798   :  { %v4722_v32 = vpop.xlane.xlu0 %4721  ;;  %v5086_v56 = vmul.f32 %v7990_v50, %v12633_v24  ;;  %v5218_v62 = vadd.f32 %v13001_v27, %v5150_v3 }
 0x799   :  { %v4896_v11 = vmul.f32 0.03125, %v4722_v32  ;;  %7997 = vrsqrt.f32 %v4962_v30  ;;  %v4963_v33 = vadd.f32 1e-05, %v4899_v46  ;;  %v5149_v30 = vmul.f32 %v12995_v48, %v5081_v49 }
 0x79a   :  { %v4725_v59 = vpop.xlane.xlu1 %4724  ;;  %v7992_v31 = vpop.eup %7991  ;;  %v5281_v50 = vpack.c.bf16 %v5219_v51, %v5218_v62  ;;  %v5154_v3 = vmul.f32 %v12995_v48, %v5086_v56 }
 0x79b   :  { %v4960_v23 = vadd.f32 1e-05, %v4896_v11  ;;  %7999 = vrsqrt.f32 %v4963_v33  ;;  %v4897_v32 = vmul.f32 0.03125, %v4725_v59  ;;  %v7994_v11 = vpop.eup %7993  ;;  %v5087_v16 = vmul.f32 %v7992_v31, %v12630_v13 }
 0x79c   :  { %v4740_v35 = vpop.xlane.xlu0 %4739  ;;  %v5216_v59 = vadd.f32 %v13001_v27, %v5148_v8  ;;  %v5217_v57 = vadd.f32 %v13001_v27, %v5149_v30 }
 0x79d   :  { %v4902_v63 = vmul.f32 0.03125, %v4740_v35  ;;  %8001 = vrsqrt.f32 %v4960_v23  ;;  %v4961_v15 = vadd.f32 1e-05, %v4897_v32  ;;  %v5084_v23 = vmul.f32 %v7994_v11, %v12643_v37 }
 0x79e   :  { %v4743_v33 = vpop.xlane.xlu1 %4742  ;;  %v5280_v24 = vpack.c.bf16 %v5217_v57, %v5216_v59  ;;  %v7996_v17 = vpop.eup %7995  ;;  %v5155_v13 = vmul.f32 %v12995_v48, %v5087_v16 }
 0x79f   :  { %v4966_v46 = vadd.f32 1e-05, %v4902_v63  ;;  %8003 = vrsqrt.f32 %v4961_v15  ;;  %v4903_v49 = vmul.f32 0.03125, %v4743_v33  ;;  %v5085_v31 = vmul.f32 %v7996_v17, %v12640_v43 }
 0x7a0   :  { %v4734_v7 = vpop.xlane.xlu0 %4733  ;;  %7537 = vmatprep.mubr.msk.bf16.mxu1 %vm549_vm2, %v5280_v24  ;;  %v5152_v37 = vmul.f32 %v12995_v48, %v5084_v23  ;;  %v5222_v43 = vadd.f32 %v13001_v27, %v5154_v3  ;;  %v5223_v33 = vadd.f32 %v13001_v27, %v5155_v13 }
 0x7a1   :  { %v4900_v35 = vmul.f32 0.03125, %v4734_v7  ;;  %8005 = vrsqrt.f32 %v4966_v46  ;;  %v4967_v32 = vadd.f32 1e-05, %v4903_v49  ;;  %7538 = vmatmul.mubr.msk.bf16.vlgmr.msra.gmra.mrb[144].mxu1 %vm549_vm2, %v5281_v50  ;;  %v5153_v51 = vmul.f32 %v12995_v48, %v5085_v31 }
 0x7a2   :  { %v4737_v8 = vpop.xlane.xlu1 %4736 }
 0x7a3   :  { %v4964_v63 = vadd.f32 1e-05, %v4900_v35  ;;  %v7998_v15 = vpop.eup %7997  ;;  %8007 = vrsqrt.f32 %v4967_v32  ;;  %v4901_v46 = vmul.f32 0.03125, %v4737_v8  ;;  %v5220_v35 = vadd.f32 %v13001_v27, %v5152_v37 }
 0x7a4   :  { %v5090_v59 = vmul.f32 %v7998_v15, %v12651_v14  ;;  %v5221_v24 = vadd.f32 %v13001_v27, %v5153_v51  ;;  %v5283_v8 = vpack.c.bf16 %v5223_v33, %v5222_v43 }
 0x7a5   :  { %v4752_v30 = vpop.xlane.xlu0 %4751  ;;  %8009 = vrsqrt.f32 %v4964_v63  ;;  %v8000_v56 = vpop.eup %7999  ;;  %v4965_v62 = vadd.f32 1e-05, %v4901_v46 }
 0x7a6   :  { %v4906_v11 = vmul.f32 0.03125, %v4752_v30  ;;  %v5091_v57 = vmul.f32 %v8000_v56, %v12658_v60  ;;  %v5282_v63 = vpack.c.bf16 %v5221_v24, %v5220_v35  ;;  %v5158_v46 = vmul.f32 %v12995_v48, %v5090_v59 }
 0x7a7   :  { %v8002_v7 = vpop.eup %8001  ;;  %v4755_v23 = vpop.xlane.xlu1 %4754  ;;  %8011 = vrsqrt.f32 %v4965_v62 }
 0x7a8   :  { %v4970_v16 = vadd.f32 1e-05, %v4906_v11  ;;  %v5088_v50 = vmul.f32 %v8002_v7, %v12663_v61  ;;  %v4907_v17 = vmul.f32 0.03125, %v4755_v23  ;;  %v5159_v3 = vmul.f32 %v12995_v48, %v5091_v57  ;;  %7541 = vmatprep.mubr.msk.bf16.mxu1 %vm549_vm2, %v5282_v63 }
 0x7a9   :  { %v4746_v49 = vpop.xlane.xlu0 %4745  ;;  %v8004_v13 = vpop.eup %8003  ;;  %7542 = vmatmul.mubr.msk.bf16.gmra.mrb[148].mxu1 %vm549_vm2, %v5283_v8  ;;  %v5226_v24 = vadd.f32 %v13001_v27, %v5158_v46 }
 0x7aa   :  { %v4904_v32 = vmul.f32 0.03125, %v4746_v49  ;;  %8013 = vrsqrt.f32 %v4970_v16  ;;  %v4971_v31 = vadd.f32 1e-05, %v4907_v17  ;;  %v5089_v30 = vmul.f32 %v8004_v13, %v12670_v28 }
 0x7ab   :  { %v8006_v60 = vpop.eup %8005  ;;  %v4749_v15 = vpop.xlane.xlu1 %4748  ;;  %v5156_v61 = vmul.f32 %v12995_v48, %v5088_v50  ;;  %v5227_v62 = vadd.f32 %v13001_v27, %v5159_v3 }
 0x7ac   :  { %v4968_v14 = vadd.f32 1e-05, %v4904_v32  ;;  %8015 = vrsqrt.f32 %v4971_v31  ;;  %v4905_v11 = vmul.f32 0.03125, %v4749_v15  ;;  %v5157_v56 = vmul.f32 %v12995_v48, %v5089_v30 }
 0x7ad   :  { %v8008_v16 = vpop.eup %8007  ;;  %v5094_v28 = vmul.f32 %v8006_v60, %v12675_v45  ;;  %v5224_v49 = vadd.f32 %v13001_v27, %v5156_v61  ;;  %v5285_v63 = vpack.c.bf16 %v5227_v62, %v5226_v24 }
 0x7ae   :  { %8017 = vrsqrt.f32 %v4968_v14  ;;  %v4969_v43 = vadd.f32 1e-05, %v4905_v11  ;;  %v5095_v57 = vmul.f32 %v8008_v16, %v12682_v10  ;;  %v5225_v35 = vadd.f32 %v13001_v27, %v5157_v56 }
 0x7af   :  { %v8010_v7 = vpop.eup %8009  ;;  %v5162_v10 = vmul.f32 %v12995_v48, %v5094_v28 }
 0x7b0   :  { %v4764_v37 = vpop.xlane.xlu0 %4763  ;;  %v5092_v50 = vmul.f32 %v8010_v7, %v12687_v41  ;;  %8019 = vrsqrt.f32 %v4969_v43  ;;  %v5284_v45 = vpack.c.bf16 %v5225_v35, %v5224_v49  ;;  %v5163_v14 = vmul.f32 %v12995_v48, %v5095_v57 }
 0x7b1   :  { %v4910_v51 = vmul.f32 0.03125, %v4764_v37  ;;  %v8012_v3 = vpop.eup %8011 }
 0x7b2   :  { %v4767_v23 = vpop.xlane.xlu1 %4766  ;;  %v5093_v8 = vmul.f32 %v8012_v3, %v12694_v5  ;;  %7545 = vmatprep.mubr.msk.bf16.mxu1 %vm549_vm2, %v5284_v45  ;;  %v5160_v41 = vmul.f32 %v12995_v48, %v5092_v50  ;;  %v5230_v5 = vadd.f32 %v13001_v27, %v5162_v10  ;;  %v5231_v62 = vadd.f32 %v13001_v27, %v5163_v14 }
 0x7b3   :  { %v4974_v33 = vadd.f32 1e-05, %v4910_v51  ;;  %v4911_v17 = vmul.f32 0.03125, %v4767_v23  ;;  %7546 = vmatmul.mubr.msk.bf16.gmra.mrb[152].mxu1 %vm549_vm2, %v5285_v63 }
 0x7b4   :  { %v4758_v59 = vpop.xlane.xlu0 %4757  ;;  %v8014_v15 = vpop.eup %8013  ;;  %v5161_v46 = vmul.f32 %v12995_v48, %v5093_v8  ;;  %v5228_v57 = vadd.f32 %v13001_v27, %v5160_v41  ;;  %v5287_v45 = vpack.c.bf16 %v5231_v62, %v5230_v5 }
 0x7b5   :  { %v4908_v32 = vmul.f32 0.03125, %v4758_v59  ;;  %8021 = vrsqrt.f32 %v4974_v33  ;;  %v4975_v13 = vadd.f32 1e-05, %v4911_v17  ;;  %v5098_v28 = vmul.f32 %v8014_v15, %v12699_v0 }
 0x7b6   :  { %v4761_v60 = vpop.xlane.xlu1 %4760  ;;  %v8016_v11 = vpop.eup %8015  ;;  %v5229_v23 = vadd.f32 %v13001_v27, %v5161_v46 }
 0x7b7   :  { %v4972_v31 = vadd.f32 1e-05, %v4908_v32  ;;  %8023 = vrsqrt.f32 %v4975_v13  ;;  %v4909_v37 = vmul.f32 0.03125, %v4761_v60  ;;  %v5099_v43 = vmul.f32 %v8016_v11, %v12706_v19 }
 0x7b8   :  { %v8018_v16 = vpop.eup %8017  ;;  %v5286_v24 = vpack.c.bf16 %v5229_v23, %v5228_v57 }
 0x7b9   :  { %8025 = vrsqrt.f32 %v4972_v31  ;;  %v4973_v51 = vadd.f32 1e-05, %v4909_v37  ;;  %v5096_v59 = vmul.f32 %v8018_v16, %v12711_v34  ;;  %v5167_v50 = vmul.f32 %v12995_v48, %v5099_v43 }
 0x7ba   :  { %v8020_v17 = vpop.eup %8019  ;;  %7549 = vmatprep.mubr.msk.bf16.mxu1 %vm549_vm2, %v5286_v24  ;;  %v5166_v31 = vmul.f32 %v12995_v48, %v5098_v28 }
 0x7bb   :  { %v4776_v30 = vpop.xlane.xlu0 %4775  ;;  %8027 = vrsqrt.f32 %v4973_v51  ;;  %v5097_v63 = vmul.f32 %v8020_v17, %v12718_v20  ;;  %v5164_v34 = vmul.f32 %v12995_v48, %v5096_v59  ;;  %7550 = vmatmul.mubr.msk.bf16.gmra.mrb[156].mxu1 %vm549_vm2, %v5287_v45  ;;  %v5235_v60 = vadd.f32 %v13001_v27, %v5167_v50 }
 0x7bc   :  { %v4914_v61 = vmul.f32 0.03125, %v4776_v30  ;;  %v5234_v5 = vadd.f32 %v13001_v27, %v5166_v31 }
 0x7bd   :  { %v4779_v33 = vpop.xlane.xlu1 %4778  ;;  %v5165_v8 = vmul.f32 %v12995_v48, %v5097_v63  ;;  %v5232_v51 = vadd.f32 %v13001_v27, %v5164_v34 }
 0x7be   :  { %v4978_v56 = vadd.f32 1e-05, %v4914_v61  ;;  %v4915_v49 = vmul.f32 0.03125, %v4779_v33  ;;  %v5289_v43 = vpack.c.bf16 %v5235_v60, %v5234_v5 }
 0x7bf   :  { %v4770_v7 = vpop.xlane.xlu0 %4769  ;;  %v8022_v19 = vpop.eup %8021 }
 0x7c0   :  { %v4912_v35 = vmul.f32 0.03125, %v4770_v7  ;;  %8029 = vrsqrt.f32 %v4978_v56  ;;  %v4979_v32 = vadd.f32 1e-05, %v4915_v49  ;;  %v5102_v20 = vmul.f32 %v8022_v19, %v12723_v36 }
 0x7c1   :  { %v4773_v3 = vpop.xlane.xlu1 %4772  ;;  %v8024_v30 = vpop.eup %8023  ;;  %v5233_v56 = vadd.f32 %v13001_v27, %v5165_v8 }
 0x7c2   :  { %v4976_v0 = vadd.f32 1e-05, %v4912_v35  ;;  %8031 = vrsqrt.f32 %v4979_v32  ;;  %v4913_v10 = vmul.f32 0.03125, %v4773_v3  ;;  %v5103_v61 = vmul.f32 %v8024_v30, %v12730_v1 }
 0x7c3   :  { %v8026_v37 = vpop.eup %8025  ;;  %v5288_v36 = vpack.c.bf16 %v5233_v56, %v5232_v51  ;;  %v5170_v1 = vmul.f32 %v12995_v48, %v5102_v20 }
 0x7c4   :  { %8033 = vrsqrt.f32 %v4976_v0  ;;  %v4977_v41 = vadd.f32 1e-05, %v4913_v10  ;;  %v5100_v62 = vmul.f32 %v8026_v37, %v12735_v47  ;;  %v5171_v23 = vmul.f32 %v12995_v48, %v5103_v61 }
 0x7c5   :  { %v4788_v13 = vpop.xlane.xlu0 %4787  ;;  %v8028_v33 = vpop.eup %8027  ;;  %7553 = vmatprep.mubr.msk.bf16.mxu1 %vm549_vm2, %v5288_v36 }
 0x7c6   :  { %v4918_v14 = vmul.f32 0.03125, %v4788_v13  ;;  %8035 = vrsqrt.f32 %v4977_v41  ;;  %v5101_v59 = vmul.f32 %v8028_v33, %v12742_v42  ;;  %v5168_v47 = vmul.f32 %v12995_v48, %v5100_v62  ;;  %7554 = vmatmul.mubr.msk.bf16.gmra.mrb[160].mxu1 %vm549_vm2, %v5289_v43 }
 0x7c7   :  { %v4791_v46 = vpop.xlane.xlu1 %4790  ;;  %v5238_v42 = vadd.f32 %v13001_v27, %v5170_v1  ;;  %v5239_v63 = vadd.f32 %v13001_v27, %v5171_v23 }
 0x7c8   :  { %v4982_v15 = vadd.f32 1e-05, %v4918_v14  ;;  %v4919_v16 = vmul.f32 0.03125, %v4791_v46  ;;  %v5169_v32 = vmul.f32 %v12995_v48, %v5101_v59  ;;  %v5236_v14 = vadd.f32 %v13001_v27, %v5168_v47 }
 0x7c9   :  { %v4782_v11 = vpop.xlane.xlu0 %4781  ;;  %v5291_v46 = vpack.c.bf16 %v5239_v63, %v5238_v42 }
 0x7ca   :  { %v4916_v28 = vmul.f32 0.03125, %v4782_v11  ;;  %8037 = vrsqrt.f32 %v4982_v15  ;;  %v4983_v7 = vadd.f32 1e-05, %v4919_v16  ;;  %v8030_v24 = vpop.eup %8029  ;;  %v5237_v8 = vadd.f32 %v13001_v27, %v5169_v32 }
 0x7cb   :  { %v4785_v49 = vpop.xlane.xlu1 %4784  ;;  %v5106_v13 = vmul.f32 %v8030_v24, %v12747_v12 }
 0x7cc   :  { %v4980_v57 = vadd.f32 1e-05, %v4916_v28  ;;  %8039 = vrsqrt.f32 %v4983_v7  ;;  %v4917_v50 = vmul.f32 0.03125, %v4785_v49  ;;  %v8032_v0 = vpop.eup %8031  ;;  %v5290_v41 = vpack.c.bf16 %v5237_v8, %v5236_v14 }
 0x7cd   :  { %v4800_v35 = vpop.xlane.xlu0 %4799  ;;  %v5107_v34 = vmul.f32 %v8032_v0, %v12754_v55  ;;  %v5174_v5 = vmul.f32 %v12995_v48, %v5106_v13 }
 0x7ce   :  { %v4922_v17 = vmul.f32 0.03125, %v4800_v35  ;;  %8041 = vrsqrt.f32 %v4980_v57  ;;  %v4981_v45 = vadd.f32 1e-05, %v4917_v50  ;;  %v8034_v3 = vpop.eup %8033  ;;  %7557 = vmatprep.mubr.msk.bf16.mxu1 %vm549_vm2, %v5290_v41 }
 0x7cf   :  { %v4803_v31 = vpop.xlane.xlu1 %4802  ;;  %v5104_v60 = vmul.f32 %v8034_v3, %v12759_v58  ;;  %v5175_v12 = vmul.f32 %v12995_v48, %v5107_v34  ;;  %7558 = vmatmul.mubr.msk.bf16.gmra.mrb[164].mxu1 %vm549_vm2, %v5291_v46 }
 0x7d0   :  { %v4986_v19 = vadd.f32 1e-05, %v4922_v17  ;;  %8043 = vrsqrt.f32 %v4981_v45  ;;  %v4923_v30 = vmul.f32 0.03125, %v4803_v31  ;;  %v8036_v15 = vpop.eup %8035 }
 0x7d1   :  { %v4794_v10 = vpop.xlane.xlu0 %4793  ;;  %v5105_v11 = vmul.f32 %v8036_v15, %v12766_v22  ;;  %v5172_v58 = vmul.f32 %v12995_v48, %v5104_v60  ;;  %v5243_v7 = vadd.f32 %v13001_v27, %v5175_v12 }
 0x7d2   :  { %v4920_v20 = vmul.f32 0.03125, %v4794_v10  ;;  %8045 = vrsqrt.f32 %v4986_v19  ;;  %v4987_v37 = vadd.f32 1e-05, %v4923_v30 }
 0x7d3   :  { %v4797_v51 = vpop.xlane.xlu1 %4796  ;;  %v5173_v36 = vmul.f32 %v12995_v48, %v5105_v11  ;;  %v5240_v49 = vadd.f32 %v13001_v27, %v5172_v58 }
 0x7d4   :  { %v4984_v61 = vadd.f32 1e-05, %v4920_v20  ;;  %v8038_v55 = vpop.eup %8037  ;;  %8047 = vrsqrt.f32 %v4987_v37  ;;  %v4921_v62 = vmul.f32 0.03125, %v4797_v51 }
 0x7d5   :  { %v4500_v56 = vpop.xlane.xlu0 %4499  ;;  %v5110_v28 = vmul.f32 %v8038_v55, %v12771_v52  ;;  %v5241_v35 = vadd.f32 %v13001_v27, %v5173_v36  ;;  %v5242_v52 = vadd.f32 %v13001_v27, %v5174_v5  ;;  %v15097_v5 = vld [vmem:[#allocation86_spill] sm:$0xff] }
 0x7d6   :  { %v4566_v16 = vmul.f32 0.03125, %v4500_v56  ;;  %8049 = vrsqrt.f32 %v4984_v61  ;;  %v8040_v43 = vpop.eup %8039  ;;  %v4985_v22 = vadd.f32 1e-05, %v4921_v62 }
 0x7d7   :  { %v5111_v1 = vmul.f32 %v8040_v43, %v12778_v29  ;;  %v4503_v23 = vpop.xlane.xlu1 %4502  ;;  %v5292_v17 = vpack.c.bf16 %v5241_v35, %v5240_v49  ;;  %v5178_v0 = vmul.f32 %v12995_v48, %v5110_v28  ;;  %v5293_v42 = vpack.c.bf16 %v5243_v7, %v5242_v52 }
 0x7d8   :  { %v13093_v33 = vsub.f32 %v12821_v44, %v4566_v16  ;;  %v8042_v57 = vpop.eup %8041  ;;  %8051 = vrsqrt.f32 %v4985_v22  ;;  %v4567_v24 = vmul.f32 0.03125, %v4503_v23 }
 0x7d9   :  { %v4806_v59 = vpop.xlane.xlu0 %4805  ;;  %v5108_v47 = vmul.f32 %v8042_v57, %v12783_v9  ;;  %v5179_v63 = vmul.f32 %v12995_v48, %v5111_v1  ;;  %7561 = vmatprep.mubr.msk.bf16.mxu1 %vm549_vm2, %v5292_v17 }
 0x7da   :  { %v4924_v50 = vmul.f32 0.03125, %v4806_v59  ;;  %v4694_v32 = vmul.f32 %v13093_v33, %v13093_v33  ;;  %v8044_v29 = vpop.eup %8043  ;;  %v13105_v45 = vsub.f32 %v12830_v54, %v4567_v24  ;;  %7562 = vmatmul.mubr.msk.bf16.gmra.mrb[168].mxu1 %vm549_vm2, %v5293_v42 }
 0x7db   :  { %v5109_v9 = vmul.f32 %v8044_v29, %v12790_v39  ;;  %v4809_v13 = vpop.xlane.xlu1 %4808  ;;  %v5176_v10 = vmul.f32 %v12995_v48, %v5108_v47  ;;  %v5246_v39 = vadd.f32 %v13001_v27, %v5178_v0  ;;  %v5247_v61 = vadd.f32 %v13001_v27, %v5179_v63 }
 0x7dc   :  { %v4988_v19 = vadd.f32 1e-05, %v4924_v50  ;;  %v8046_v3 = vpop.eup %8045  ;;  %v4882_v34 = vsel %vm549_vm2, %v4694_v32, 0.0  ;;  %v4925_v14 = vmul.f32 0.03125, %v4809_v13  ;;  %v4695_v60 = vmul.f32 %v13105_v45, %v13105_v45 }
 0x7dd   :  { %v4812_v31 = vpop.xlane.xlu0 %4811  ;;  %4883 = vadd.xlane.f32.xlu0 %v4882_v34  ;;  %v5177_v30 = vmul.f32 %v12995_v48, %v5109_v9  ;;  %v5114_v41 = vmul.f32 %v8046_v3, %v12795_v2  ;;  %v5244_v56 = vadd.f32 %v13001_v27, %v5176_v10 }
 0x7de   :  { %8053 = vrsqrt.f32 %v4988_v19  ;;  %v4926_v8 = vmul.f32 0.03125, %v4812_v31  ;;  %v8048_v20 = vpop.eup %8047  ;;  %v4989_v15 = vadd.f32 1e-05, %v4925_v14  ;;  %v4885_v55 = vsel %vm549_vm2, %v4695_v60, 0.0 }
 0x7df   :  { %v5115_v12 = vmul.f32 %v8048_v20, %v12802_v25  ;;  %v4815_v11 = vpop.xlane.xlu1 %4814  ;;  %v5245_v58 = vadd.f32 %v13001_v27, %v5177_v30  ;;  %4886 = vadd.xlane.f32.xlu1 %v4885_v55  ;;  %v5295_v25 = vpack.c.bf16 %v5247_v61, %v5246_v39  ;;  %v5182_v52 = vmul.f32 %v12995_v48, %v5114_v41 }
 0x7e0   :  { %v4990_v37 = vadd.f32 1e-05, %v4926_v8  ;;  %v8050_v46 = vpop.eup %8049  ;;  %8055 = vrsqrt.f32 %v4989_v15  ;;  %v4927_v2 = vmul.f32 0.03125, %v4815_v11 }
 0x7e1   :  { %v4818_v51 = vpop.xlane.xlu0 %4817  ;;  %v5112_v62 = vmul.f32 %v8050_v46, %v15097_v5  ;;  %v5294_v28 = vpack.c.bf16 %v5245_v58, %v5244_v56  ;;  %v5183_v7 = vmul.f32 %v12995_v48, %v5115_v12  ;;  %v5250_v9 = vadd.f32 %v13001_v27, %v5182_v52 }
 0x7e2   :  { %v4928_v16 = vmul.f32 0.03125, %v4818_v51  ;;  %8057 = vrsqrt.f32 %v4990_v37  ;;  %v8052_v36 = vpop.eup %8051  ;;  %v4991_v43 = vadd.f32 1e-05, %v4927_v2 }
 0x7e3   :  { %v5113_v57 = vmul.f32 %v8052_v36, %v12816_v6  ;;  %v4821_v1 = vpop.xlane.xlu1 %4820  ;;  %7565 = vmatprep.mubr.msk.bf16.mxu1 %vm549_vm2, %v5294_v28  ;;  %v5180_v59 = vmul.f32 %v12995_v48, %v5112_v62  ;;  %v5251_v6 = vadd.f32 %v13001_v27, %v5183_v7 }
 0x7e4   :  { %v4992_v22 = vadd.f32 1e-05, %v4928_v16  ;;  %8059 = vrsqrt.f32 %v4991_v43  ;;  %v4929_v49 = vmul.f32 0.03125, %v4821_v1  ;;  %7566 = vmatmul.mubr.msk.bf16.gmra.mrb[172].mxu1 %vm549_vm2, %v5295_v25 }
 0x7e5   :  { %v4824_v23 = vpop.xlane.xlu0 %4823  ;;  %v5181_v47 = vmul.f32 %v12995_v48, %v5113_v57  ;;  %v5248_v19 = vadd.f32 %v13001_v27, %v5180_v59  ;;  %v5297_v14 = vpack.c.bf16 %v5251_v6, %v5250_v9  ;;  %v15098_v6 = vld [vmem:[#allocation167_spill] sm:$0xff] }
 0x7e6   :  { %v4930_v35 = vmul.f32 0.03125, %v4824_v23  ;;  %8061 = vrsqrt.f32 %v4992_v22  ;;  %v4993_v50 = vadd.f32 1e-05, %v4929_v49 }
 0x7e7   :  { %v4827_v0 = vpop.xlane.xlu1 %4826  ;;  %v5249_v42 = vadd.f32 %v13001_v27, %v5181_v47 }
 0x7e8   :  { %v8054_v24 = vpop.eup %8053  ;;  %v4994_v17 = vadd.f32 1e-05, %v4930_v35  ;;  %8063 = vrsqrt.f32 %v4993_v50  ;;  %v4931_v63 = vmul.f32 0.03125, %v4827_v0 }
 0x7e9   :  { %v5116_v32 = vmul.f32 %v8054_v24, %v12836_v40  ;;  %v4830_v29 = vpop.xlane.xlu0 %4829  ;;  %v5296_v13 = vpack.c.bf16 %v5249_v42, %v5248_v19 }
 0x7ea   :  { %v4932_v3 = vmul.f32 0.03125, %v4830_v29  ;;  %8065 = vrsqrt.f32 %v4994_v17  ;;  %v8056_v34 = vpop.eup %8055  ;;  %v4995_v31 = vadd.f32 1e-05, %v4931_v63  ;;  %v15099_v63 = vld [vmem:[#allocation170_spill] sm:$0xff] }
 0x7eb   :  { %v5117_v40 = vmul.f32 %v8056_v34, %v12842_v53  ;;  %v4833_v60 = vpop.xlane.xlu1 %4832  ;;  %7569 = vmatprep.mubr.msk.bf16.mxu1 %vm549_vm2, %v5296_v13  ;;  %v5184_v39 = vmul.f32 %v12995_v48, %v5116_v32 }
 0x7ec   :  { %v4996_v10 = vadd.f32 1e-05, %v4932_v3  ;;  %v8058_v8 = vpop.eup %8057  ;;  %8067 = vrsqrt.f32 %v4995_v31  ;;  %v4933_v41 = vmul.f32 0.03125, %v4833_v60  ;;  %7570 = vmatmul.mubr.msk.bf16.gmra.mrb[176].mxu1 %vm549_vm2, %v5297_v14  ;;  %v15100_v60 = vld [vmem:[#allocation84_spill] sm:$0xff] }
 0x7ed   :  { %v4836_v30 = vpop.xlane.xlu0 %4835  ;;  %v5118_v20 = vmul.f32 %v8058_v8, %v12833_v26  ;;  %v5185_v37 = vmul.f32 %v12995_v48, %v5117_v40  ;;  %v5252_v56 = vadd.f32 %v13001_v27, %v5184_v39 }
 0x7ee   :  { %v4934_v15 = vmul.f32 0.03125, %v4836_v30  ;;  %8069 = vrsqrt.f32 %v4996_v10  ;;  %v8060_v61 = vpop.eup %8059  ;;  %v4997_v46 = vadd.f32 1e-05, %v4933_v41 }
 0x7ef   :  { %v5119_v55 = vmul.f32 %v8060_v61, %v12847_v4  ;;  %v4839_v11 = vpop.xlane.xlu1 %4838  ;;  %v5253_v26 = vadd.f32 %v13001_v27, %v5185_v37  ;;  %v5186_v58 = vmul.f32 %v12995_v48, %v5118_v20  ;;  %v15101_v61 = vld [vmem:[#allocation116_spill] sm:$0xff] }
 0x7f0   :  { %v4998_v12 = vadd.f32 1e-05, %v4934_v15  ;;  %v8062_v53 = vpop.eup %8061  ;;  %8071 = vrsqrt.f32 %v4997_v46  ;;  %v4935_v62 = vmul.f32 0.03125, %v4839_v11 }
 0x7f1   :  { %v4842_v51 = vpop.xlane.xlu0 %4841  ;;  %v5120_v5 = vmul.f32 %v8062_v53, %v12862_v38  ;;  %v5298_v16 = vpack.c.bf16 %v5253_v26, %v5252_v56  ;;  %v5187_v28 = vmul.f32 %v12995_v48, %v5119_v55  ;;  %v5254_v1 = vadd.f32 %v13001_v27, %v5186_v58 }
 0x7f2   :  { %v4936_v2 = vmul.f32 0.03125, %v4842_v51  ;;  %8073 = vrsqrt.f32 %v4998_v12  ;;  %v8064_v36 = vpop.eup %8063  ;;  %v4999_v43 = vadd.f32 1e-05, %v4935_v62 }
 0x7f3   :  { %v5121_v25 = vmul.f32 %v8064_v36, %v12867_v18  ;;  %v4845_v7 = vpop.xlane.xlu1 %4844  ;;  %7573 = vmatprep.mubr.msk.bf16.mxu1 %vm549_vm2, %v5298_v16  ;;  %v5255_v38 = vadd.f32 %v13001_v27, %v5187_v28  ;;  %v5188_v23 = vmul.f32 %v12995_v48, %v5120_v5  ;;  %v15102_v5 = vld [vmem:[#allocation171_spill] sm:$0xff] }
 0x7f4   :  { %v5000_v4 = vadd.f32 1e-05, %v4936_v2  ;;  %v8066_v22 = vpop.eup %8065  ;;  %8075 = vrsqrt.f32 %v4999_v43  ;;  %v4937_v49 = vmul.f32 0.03125, %v4845_v7 }
 0x7f5   :  { %v4848_v57 = vpop.xlane.xlu0 %4847  ;;  %v5122_v59 = vmul.f32 %v8066_v22, %v12859_v21  ;;  %v5299_v52 = vpack.c.bf16 %v5255_v38, %v5254_v1  ;;  %v5189_v47 = vmul.f32 %v12995_v48, %v5121_v25  ;;  %v5256_v19 = vadd.f32 %v13001_v27, %v5188_v23 }
 0x7f6   :  { %v4938_v35 = vmul.f32 0.03125, %v4848_v57  ;;  %8077 = vrsqrt.f32 %v5000_v4  ;;  %v8068_v18 = vpop.eup %8067  ;;  %v5001_v24 = vadd.f32 1e-05, %v4937_v49  ;;  %v15103_v4 = vld [vmem:[#allocation172_spill] sm:$0xff] }
 0x7f7   :  { %v5123_v32 = vmul.f32 %v8068_v18, %v15098_v6  ;;  %v4851_v0 = vpop.xlane.xlu1 %4850  ;;  %7574 = vmatmul.mubr.msk.bf16.gmra.mrb[180].mxu1 %vm549_vm2, %v5299_v52  ;;  %v5257_v21 = vadd.f32 %v13001_v27, %v5189_v47  ;;  %v5190_v42 = vmul.f32 %v12995_v48, %v5122_v59  ;;  %v15105_v6 = vld [vmem:[#allocation105_spill] sm:$0xff] }
 0x7f8   :  { %v5002_v50 = vadd.f32 1e-05, %v4938_v35  ;;  %v8070_v17 = vpop.eup %8069  ;;  %8079 = vrsqrt.f32 %v5001_v24  ;;  %v4939_v9 = vmul.f32 0.03125, %v4851_v0  ;;  %v15104_v35 = vld [vmem:[#allocation134_spill] sm:$0xff] }
 0x7f9   :  { %v4854_v29 = vpop.xlane.xlu0 %4853  ;;  %v5124_v3 = vmul.f32 %v8070_v17, %v15099_v63  ;;  %v5300_v34 = vpack.c.bf16 %v5257_v21, %v5256_v19  ;;  %v5191_v31 = vmul.f32 %v12995_v48, %v5123_v32  ;;  %v5258_v41 = vadd.f32 %v13001_v27, %v5190_v42 }
 0x7fa   :  { %v4940_v13 = vmul.f32 0.03125, %v4854_v29  ;;  %8081 = vrsqrt.f32 %v5002_v50  ;;  %v8072_v10 = vpop.eup %8071  ;;  %v5003_v14 = vadd.f32 1e-05, %v4939_v9 }
 0x7fb   :  { %v5125_v30 = vmul.f32 %v8072_v10, %v15100_v60  ;;  %v4857_v39 = vpop.xlane.xlu1 %4856  ;;  %7577 = vmatprep.mubr.msk.bf16.mxu1 %vm549_vm2, %v5300_v34  ;;  %v5259_v15 = vadd.f32 %v13001_v27, %v5191_v31  ;;  %v5192_v37 = vmul.f32 %v12995_v48, %v5124_v3  ;;  %v15107_v60 = vld [vmem:[#allocation149_spill] sm:$0xff] }
 0x7fc   :  { %v5004_v8 = vadd.f32 1e-05, %v4940_v13  ;;  %v8074_v40 = vpop.eup %8073  ;;  %8083 = vrsqrt.f32 %v5003_v14  ;;  %v4941_v12 = vmul.f32 0.03125, %v4857_v39  ;;  %v15106_v13 = vld [vmem:[#allocation173_spill] sm:$0xff] }
 0x7fd   :  { %v4860_v20 = vpop.xlane.xlu0 %4859  ;;  %v5126_v46 = vmul.f32 %v8074_v40, %v15101_v61  ;;  %v5301_v55 = vpack.c.bf16 %v5259_v15, %v5258_v41  ;;  %v5193_v11 = vmul.f32 %v12995_v48, %v5125_v30  ;;  %v5260_v28 = vadd.f32 %v13001_v27, %v5192_v37 }
 0x7fe   :  { %v4942_v53 = vmul.f32 0.03125, %v4860_v20  ;;  %8085 = vrsqrt.f32 %v5004_v8  ;;  %v8076_v51 = vpop.eup %8075  ;;  %v5005_v56 = vadd.f32 1e-05, %v4941_v12 }
 0x7ff   :  { %v5127_v62 = vmul.f32 %v8076_v51, %v15102_v5  ;;  %v4863_v2 = vpop.xlane.xlu1 %4862  ;;  %7578 = vmatmul.mubr.msk.bf16.gmra.mrb[184].mxu1 %vm549_vm2, %v5301_v55  ;;  %v5261_v36 = vadd.f32 %v13001_v27, %v5193_v11  ;;  %v5194_v43 = vmul.f32 %v12995_v48, %v5126_v46 }
 0x800   :  { %v5006_v26 = vadd.f32 1e-05, %v4942_v53  ;;  %v8078_v58 = vpop.eup %8077  ;;  %8087 = vrsqrt.f32 %v5005_v56  ;;  %v4943_v25 = vmul.f32 0.03125, %v4863_v2  ;;  %v15108_v53 = vld [vmem:[#allocation109_spill] sm:$0xff] }
 0x801   :  { %v4866_v16 = vpop.xlane.xlu0 %4865  ;;  %v5128_v22 = vmul.f32 %v8078_v58, %v15103_v4  ;;  %v5302_v57 = vpack.c.bf16 %v5261_v36, %v5260_v28  ;;  %v5195_v1 = vmul.f32 %v12995_v48, %v5127_v62  ;;  %v5262_v24 = vadd.f32 %v13001_v27, %v5194_v43  ;;  %v15109_v58 = vld [vmem:[#allocation175_spill] sm:$0xff]  ;;  %v15110_v4 = vld [vmem:[#allocation114_spill] sm:$0xff] }
 0x802   :  { %v4944_v7 = vmul.f32 0.03125, %v4866_v16  ;;  %8089 = vrsqrt.f32 %v5006_v26  ;;  %v8080_v38 = vpop.eup %8079  ;;  %v5007_v23 = vadd.f32 1e-05, %v4943_v25 }
 0x803   :  { %v5129_v52 = vmul.f32 %v8080_v38, %v15104_v35  ;;  %v4869_v47 = vpop.xlane.xlu1 %4868  ;;  %7581 = vmatprep.mubr.msk.bf16.mxu1 %vm549_vm2, %v5302_v57  ;;  %v5263_v50 = vadd.f32 %v13001_v27, %v5195_v1  ;;  %v5196_v17 = vmul.f32 %v12995_v48, %v5128_v22  ;;  %v15111_v1 = vld [vmem:[#allocation107_spill] sm:$0xff] }
 0x804   :  { %v5008_v59 = vadd.f32 1e-05, %v4944_v7  ;;  %v8082_v49 = vpop.eup %8081  ;;  %8091 = vrsqrt.f32 %v5007_v23  ;;  %v4945_v0 = vmul.f32 0.03125, %v4869_v47 }
 0x805   :  { %v4872_v18 = vpop.xlane.xlu0 %4871  ;;  %v5130_v32 = vmul.f32 %v8082_v49, %v15105_v6  ;;  %v5303_v19 = vpack.c.bf16 %v5263_v50, %v5262_v24  ;;  %v5197_v21 = vmul.f32 %v12995_v48, %v5129_v52  ;;  %v5264_v14 = vadd.f32 %v13001_v27, %v5196_v17  ;;  %v15112_v52 = vld [vmem:[#allocation191_spill] sm:$0xff]  ;;  %v15113_v17 = vld [vmem:[#allocation118_spill] sm:$0xff] }
 0x806   :  { %v4946_v29 = vmul.f32 0.03125, %v4872_v18  ;;  %8093 = vrsqrt.f32 %v5008_v59  ;;  %v8084_v42 = vpop.eup %8083  ;;  %v5009_v63 = vadd.f32 1e-05, %v4945_v0 }
 0x807   :  { %v5131_v34 = vmul.f32 %v8084_v42, %v15106_v13  ;;  %v4875_v31 = vpop.xlane.xlu1 %4874  ;;  %7582 = vmatmul.mubr.msk.bf16.gmra.mrb[188].mxu1 %vm549_vm2, %v5303_v19  ;;  %v5265_v8 = vadd.f32 %v13001_v27, %v5197_v21  ;;  %v5198_v40 = vmul.f32 %v12995_v48, %v5130_v32  ;;  %v15114_v21 = vld [vmem:[#allocation110_spill] sm:$0xff]  ;;  %v15115_v13 = vld [vmem:[#allocation177_spill] sm:$0xff] }
 0x808   :  { %v5010_v3 = vadd.f32 1e-05, %v4946_v29  ;;  %v8086_v9 = vpop.eup %8085  ;;  %8095 = vrsqrt.f32 %v5009_v63  ;;  %v4947_v39 = vmul.f32 0.03125, %v4875_v31 }
 0x809   :  { %v4878_v10 = vpop.xlane.xlu0 %4877  ;;  %v5132_v30 = vmul.f32 %v8086_v9, %v15107_v60  ;;  %v5304_v41 = vpack.c.bf16 %v5265_v8, %v5264_v14  ;;  %v5199_v15 = vmul.f32 %v12995_v48, %v5131_v34  ;;  %v5266_v51 = vadd.f32 %v13001_v27, %v5198_v40  ;;  %v15116_v8 = vld [vmem:[#allocation178_spill] sm:$0xff] }
 0x80a   :  { %v4948_v20 = vmul.f32 0.03125, %v4878_v10  ;;  %8097 = vrsqrt.f32 %v5010_v3  ;;  %v8088_v37 = vpop.eup %8087  ;;  %v5011_v61 = vadd.f32 1e-05, %v4947_v39 }
 0x80b   :  { %v5133_v55 = vmul.f32 %v8088_v37, %v15108_v53  ;;  %v4881_v11 = vpop.xlane.xlu1 %4880  ;;  %7585 = vmatprep.mubr.msk.bf16.mxu1 %vm549_vm2, %v5304_v41  ;;  %v5267_v56 = vadd.f32 %v13001_v27, %v5199_v15  ;;  %v5200_v26 = vmul.f32 %v12995_v48, %v5132_v30 }
 0x80c   :  { %v5012_v46 = vadd.f32 1e-05, %v4948_v20  ;;  %v8090_v12 = vpop.eup %8089  ;;  %8099 = vrsqrt.f32 %v5011_v61  ;;  %v4949_v62 = vmul.f32 0.03125, %v4881_v11 }
 0x80d   :  { %v5134_v5 = vmul.f32 %v8090_v12, %v15109_v58  ;;  %v5305_v2 = vpack.c.bf16 %v5267_v56, %v5266_v51  ;;  %v5201_v16 = vmul.f32 %v12995_v48, %v5133_v55  ;;  %v5268_v25 = vadd.f32 %v13001_v27, %v5200_v26  ;;  %v15117_v58 = vld [vmem:[#allocation12_spill] sm:$0xff] }
 0x80e   :  { %8101 = vrsqrt.f32 %v5012_v46  ;;  %v8092_v28 = vpop.eup %8091  ;;  %v5013_v36 = vadd.f32 1e-05, %v4949_v62  ;;  %v7724_v46 = vld [vmem:[#allocation7 + $0x8] sm:$0xff]  }
 0x80f   :  { %v5135_v22 = vmul.f32 %v8092_v28, %v15110_v4  ;;  %7586 = vmatmul.mubr.msk.bf16.gmra.mrb[192].mxu1 %vm549_vm2, %v5305_v2  ;;  %v5269_v7 = vadd.f32 %v13001_v27, %v5201_v16  ;;  %v5202_v57 = vmul.f32 %v12995_v48, %v5134_v5  ;;  %7603 = vmatprep.subr.bf16.mxu0 %v7724_v46  ;;  %v5318_v5 = vsub.s32 6, %v15117_v58  ;;  %v8240_v16 = vld [vmem:[#allocation2] sm:$0xff] }
 0x810   :  { %v8094_v43 = vpop.eup %8093  ;;  %8103 = vrsqrt.f32 %v5013_v36  ;;  %7604 = vmatpush3.bf16.msra.mxu0 %v7724_v46 }
 0x811   :  { %v5136_v38 = vmul.f32 %v8094_v43, %v15111_v1  ;;  %v5306_v23 = vpack.c.bf16 %v5269_v7, %v5268_v25  ;;  %v5203_v59 = vmul.f32 %v12995_v48, %v5135_v22  ;;  %v5270_v18 = vadd.f32 %v13001_v27, %v5202_v57 }
 0x812   :  { %v8096_v49 = vpop.eup %8095  ;;  %v13230_v28 = vrot.slane %v8240_v16, %v5318_v5 }
 0x813   :  { %v5137_v47 = vmul.f32 %v8096_v49, %v15112_v52  ;;  %7589 = vmatprep.mubr.msk.bf16.mxu1 %vm549_vm2, %v5306_v23  ;;  %v5271_v24 = vadd.f32 %v13001_v27, %v5203_v59  ;;  %v5204_v50 = vmul.f32 %v12995_v48, %v5136_v38 }
 0x814   :  { %v8098_v35 = vpop.eup %8097 }
 0x815   :  { %v5138_v6 = vmul.f32 %v8098_v35, %v15113_v17  ;;  %v5307_v32 = vpack.c.bf16 %v5271_v24, %v5270_v18  ;;  %v5205_v0 = vmul.f32 %v12995_v48, %v5137_v47  ;;  %v5272_v63 = vadd.f32 %v13001_v27, %v5204_v50 }
 0x816   :  { %v8100_v29 = vpop.eup %8099 }
 0x817   :  { %v5139_v42 = vmul.f32 %v8100_v29, %v15114_v21  ;;  %7590 = vmatmul.mubr.msk.bf16.gmra.mrb[196].mxu1 %vm549_vm2, %v5307_v32  ;;  %v5273_v3 = vadd.f32 %v13001_v27, %v5205_v0  ;;  %v5206_v9 = vmul.f32 %v12995_v48, %v5138_v6 }
 0x818   :  { %v8102_v19 = vpop.eup %8101 }
 0x819   :  { %v5140_v34 = vmul.f32 %v8102_v19, %v15115_v13  ;;  %v5308_v31 = vpack.c.bf16 %v5273_v3, %v5272_v63  ;;  %v5207_v10 = vmul.f32 %v12995_v48, %v5139_v42  ;;  %v5274_v60 = vadd.f32 %v13001_v27, %v5206_v9 }
 0x81a   :  { %v8104_v14 = vpop.eup %8103 }
 0x81b   :  { %v5141_v40 = vmul.f32 %v8104_v14, %v15116_v8  ;;  %7593 = vmatprep.mubr.msk.bf16.mxu1 %vm549_vm2, %v5308_v31  ;;  %v5275_v30 = vadd.f32 %v13001_v27, %v5207_v10  ;;  %v5208_v39 = vmul.f32 %v12995_v48, %v5140_v34 }
 0x81d   :  { %v5309_v20 = vpack.c.bf16 %v5275_v30, %v5274_v60  ;;  %v5209_v41 = vmul.f32 %v12995_v48, %v5141_v40  ;;  %v5276_v15 = vadd.f32 %v13001_v27, %v5208_v39 }
 0x81f   :  { %7594 = vmatmul.mubr.msk.bf16.gmra.mrb[200].mxu1 %vm549_vm2, %v5309_v20  ;;  %v5277_v37 = vadd.f32 %v13001_v27, %v5209_v41 }
 0x821   :  { %v5310_v61 = vpack.c.bf16 %v5277_v37, %v5276_v15 }
 0x823   :  { %7597 = vmatprep.mubr.msk.bf16.mxu1 %vm549_vm2, %v5310_v61 }
 0x86a   :  { %v4884_v12 = vpop.xlane.xlu0 %4883 }
 0x86b   :  { %v4950_v53 = vmul.f32 0.03125, %v4884_v12 }
 0x86c   :  { %v4887_v11 = vpop.xlane.xlu1 %4886 }
 0x86d   :  { %v5014_v55 = vadd.f32 1e-05, %v4950_v53  ;;  %v4951_v51 = vmul.f32 0.03125, %v4887_v11 }
 0x86f   :  { %8105 = vrsqrt.f32 %v5014_v55  ;;  %v5015_v56 = vadd.f32 1e-05, %v4951_v51 }
 0x871   :  { %8107 = vrsqrt.f32 %v5015_v56 }
 0x874   :  { %v7539_v4 = vpop.f32.mrb[144].mxu1 }
 0x875   :  { %v5471_v25 = vadd.f32 %v7539_v4, %v13230_v28  ;;  %v5462_v7 = vpop.f32.mrb[145].mxu1 }
 0x876   :  { %v5463_v57 = vadd.f32 %v5462_v7, %v13230_v28  ;;  %v7540_v1 = vpop.f32.mrb[146].mxu1 }
 0x877   :  { %v5783_v23 = vmul.f32 0.70710677, %v5471_v25  ;;  %v5474_v59 = vadd.f32 %v7540_v1, %v13230_v28  ;;  %v5465_v49 = vpop.f32.mrb[147].mxu1  ;;  %v5719_v40 = vmul.f32 0.5, %v5471_v25 }
 0x878   :  { %v5466_v35 = vadd.f32 %v5465_v49, %v13230_v28  ;;  %v5717_v41 = vmul.f32 0.5, %v5463_v57 }
 0x879   :  { %v8106_v26 = vpop.eup %8105  ;;  %8109 = verf.f32 %v5783_v23  ;;  %v5720_v60 = vmul.f32 0.5, %v5474_v59 }
 0x87a   :  { %v5142_v62 = vmul.f32 %v8106_v26, %v13093_v33  ;;  %v5782_v47 = vmul.f32 0.70710677, %v5466_v35  ;;  %v5718_v15 = vmul.f32 0.5, %v5466_v35 }
 0x87b   :  { %v8108_v2 = vpop.eup %8107 }
 0x87c   :  { %v5143_v36 = vmul.f32 %v8108_v2, %v13105_v45  ;;  %v5210_v43 = vmul.f32 %v12995_v48, %v5142_v62  ;;  %v5781_v45 = vmul.f32 0.70710677, %v5463_v57  ;;  %v7543_v18 = vpop.f32.mrb[148].mxu1 }
 0x87d   :  { %v5487_v24 = vadd.f32 %v7543_v18, %v13230_v28 }
 0x87e   :  { %v5211_v22 = vmul.f32 %v12995_v48, %v5143_v36  ;;  %v5278_v38 = vadd.f32 %v13001_v27, %v5210_v43  ;;  %v5784_v48 = vmul.f32 0.70710677, %v5474_v59  ;;  %8111 = verf.f32 %v5781_v45 }
 0x87f   :  { %v5787_v6 = vmul.f32 0.70710677, %v5487_v24 }
 0x880   :  { %v5279_v33 = vadd.f32 %v13001_v27, %v5211_v22  ;;  %8113 = verf.f32 %v5784_v48  ;;  %v5478_v27 = vpop.f32.mrb[149].mxu1 }
 0x881   :  { %8115 = verf.f32 %v5782_v47  ;;  %v13244_v50 = vadd.f32 %v5478_v27, %v13230_v28  ;;  %v7544_v17 = vpop.f32.mrb[150].mxu1 }
 0x882   :  { %v5311_v52 = vpack.c.bf16 %v5279_v33, %v5278_v38  ;;  %v5490_v32 = vadd.f32 %v7544_v17, %v13230_v28  ;;  %v5481_v0 = vpop.f32.mrb[151].mxu1  ;;  %8117 = verf.f32 %v5787_v6  ;;  %v5723_v33 = vmul.f32 0.5, %v5487_v24 }
 0x883   :  { %v5785_v29 = vmul.f32 0.70710677, %v13244_v50  ;;  %v5482_v19 = vadd.f32 %v5481_v0, %v13230_v28  ;;  %v8110_v63 = vpop.eup %8109  ;;  %v5721_v35 = vmul.f32 0.5, %v13244_v50 }
 0x884   :  { %7598 = vmatmul.mubr.msk.bf16.gmra.mrb[204].mxu1 %vm549_vm2, %v5311_v52  ;;  %v5788_v21 = vmul.f32 0.70710677, %v5490_v32  ;;  %v5911_v9 = vadd.f32 1.0, %v8110_v63  ;;  %v5724_v23 = vmul.f32 0.5, %v5490_v32 }
 0x885   :  { %8119 = verf.f32 %v5785_v29  ;;  %v5786_v42 = vmul.f32 0.70710677, %v5482_v19  ;;  %v5722_v52 = vmul.f32 0.5, %v5482_v19 }
 0x886   :  { %8121 = verf.f32 %v5788_v21  ;;  %v7547_v13 = vpop.f32.mrb[152].mxu1  ;;  %v5975_v12 = vmul.f32 %v5911_v9, %v5719_v40 }
 0x887   :  { %8123 = verf.f32 %v5786_v42  ;;  %v13250_v10 = vadd.f32 %v7547_v13, %v13230_v28  ;;  %v5494_v14 = vpop.f32.mrb[153].mxu1 }
 0x888   :  { %v8112_v3 = vpop.eup %8111  ;;  %v13253_v39 = vadd.f32 %v5494_v14, %v13230_v28  ;;  %v7548_v20 = vpop.f32.mrb[154].mxu1 }
 0x889   :  { %v5909_v31 = vadd.f32 1.0, %v8112_v3  ;;  %v5791_v61 = vmul.f32 0.70710677, %v13250_v10  ;;  %v5497_v46 = vpop.f32.mrb[155].mxu1  ;;  %v5506_v11 = vadd.f32 %v7548_v20, %v13230_v28 }
 0x88a   :  { %v8114_v34 = vpop.eup %8113  ;;  %v5789_v55 = vmul.f32 0.70710677, %v13253_v39  ;;  %v5498_v26 = vadd.f32 %v5497_v46, %v13230_v28 }
 0x88b   :  { %v8116_v8 = vpop.eup %8115  ;;  %v5912_v30 = vadd.f32 1.0, %v8114_v34  ;;  %v5973_v51 = vmul.f32 %v5909_v31, %v5717_v41  ;;  %8125 = verf.f32 %v5791_v61  ;;  %v5792_v62 = vmul.f32 0.70710677, %v5506_v11 }
 0x88c   :  { %v5910_v37 = vadd.f32 1.0, %v8116_v8  ;;  %8127 = verf.f32 %v5789_v55  ;;  %v8118_v2 = vpop.eup %8117  ;;  %v5790_v36 = vmul.f32 0.70710677, %v5498_v26  ;;  %v5727_v8 = vmul.f32 0.5, %v13250_v10 }
 0x88d   :  { %v5976_v53 = vmul.f32 %v5912_v30, %v5720_v60  ;;  %v5915_v4 = vadd.f32 1.0, %v8118_v2  ;;  %8129 = verf.f32 %v5792_v62  ;;  %v5725_v41 = vmul.f32 0.5, %v13253_v39 }
 0x88e   :  { %v5974_v56 = vmul.f32 %v5910_v37, %v5718_v15  ;;  %v7551_v22 = vpop.f32.mrb[156].mxu1  ;;  %8131 = verf.f32 %v5790_v36  ;;  %v5728_v15 = vmul.f32 0.5, %v5506_v11 }
 0x88f   :  { %v6038_v5 = vpack.c.bf16 %v5976_v53, %v5975_v12  ;;  %v8120_v43 = vpop.eup %8119  ;;  %v13260_v57 = vadd.f32 %v7551_v22, %v13230_v28  ;;  %v5510_v1 = vpop.f32.mrb[157].mxu1  ;;  %v5979_v27 = vmul.f32 %v5915_v4, %v5723_v33  ;;  %v5726_v12 = vmul.f32 0.5, %v5498_v26 }
 0x890   :  { %v6037_v16 = vpack.c.bf16 %v5974_v56, %v5973_v51  ;;  %v8122_v25 = vpop.eup %8121  ;;  %v5913_v7 = vadd.f32 1.0, %v8120_v43  ;;  %v13264_v49 = vadd.f32 %v5510_v1, %v13230_v28  ;;  %v7552_v45 = vpop.f32.mrb[158].mxu1 }
 0x891   :  { %v8124_v38 = vpop.eup %8123  ;;  %v5916_v59 = vadd.f32 1.0, %v8122_v25  ;;  %v5795_v47 = vmul.f32 0.70710677, %v13260_v57  ;;  %v5513_v18 = vpop.f32.mrb[159].mxu1  ;;  %v5522_v24 = vadd.f32 %v7552_v45, %v13230_v28 }
 0x892   :  { %7605 = vmatprep.mubr.msk.bf16.mxu0 %vm549_vm2, %v6037_v16  ;;  %v5914_v48 = vadd.f32 1.0, %v8124_v38  ;;  %v5793_v6 = vmul.f32 0.70710677, %v13264_v49  ;;  %v5977_v32 = vmul.f32 %v5913_v7, %v5721_v35  ;;  %v5514_v29 = vadd.f32 %v5513_v18, %v13230_v28 }
 0x893   :  { %7606 = vmatmul.mubr.msk.bf16.vlgmr.msra.gmra.mrb[144].mxu0 %vm549_vm2, %v6038_v5  ;;  %v5980_v17 = vmul.f32 %v5916_v59, %v5724_v23  ;;  %8133 = verf.f32 %v5795_v47  ;;  %v5796_v42 = vmul.f32 0.70710677, %v5522_v24  ;;  %v5731_v38 = vmul.f32 0.5, %v13260_v57 }
 0x894   :  { %v5978_v0 = vmul.f32 %v5914_v48, %v5722_v52  ;;  %8135 = verf.f32 %v5793_v6  ;;  %v5794_v63 = vmul.f32 0.70710677, %v5514_v29  ;;  %v5729_v35 = vmul.f32 0.5, %v13264_v49 }
 0x895   :  { %v6040_v21 = vpack.c.bf16 %v5980_v17, %v5979_v27  ;;  %v8126_v50 = vpop.eup %8125  ;;  %8137 = verf.f32 %v5796_v42  ;;  %v5732_v52 = vmul.f32 0.5, %v5522_v24  ;;  %v5730_v27 = vmul.f32 0.5, %v5514_v29 }
 0x896   :  { %v6039_v19 = vpack.c.bf16 %v5978_v0, %v5977_v32  ;;  %v8128_v3 = vpop.eup %8127  ;;  %v5919_v13 = vadd.f32 1.0, %v8126_v50  ;;  %8139 = verf.f32 %v5794_v63 }
 0x897   :  { %v8130_v14 = vpop.eup %8129  ;;  %v5917_v40 = vadd.f32 1.0, %v8128_v3 }
 0x898   :  { %7609 = vmatprep.mubr.msk.bf16.mxu0 %vm549_vm2, %v6039_v19  ;;  %v8132_v20 = vpop.eup %8131  ;;  %v5920_v37 = vadd.f32 1.0, %v8130_v14  ;;  %v5983_v51 = vmul.f32 %v5919_v13, %v5727_v8 }
 0x899   :  { %v7555_v9 = vpop.f32.mrb[160].mxu1  ;;  %v5918_v53 = vadd.f32 1.0, %v8132_v20  ;;  %v5981_v62 = vmul.f32 %v5917_v40, %v5725_v41 }
 0x89a   :  { %v13273_v34 = vadd.f32 %v7555_v9, %v13230_v28  ;;  %v5526_v31 = vpop.f32.mrb[161].mxu1  ;;  %v5984_v56 = vmul.f32 %v5920_v37, %v5728_v15 }
 0x89b   :  { %v13278_v60 = vadd.f32 %v5526_v31, %v13230_v28  ;;  %v7556_v30 = vpop.f32.mrb[162].mxu1  ;;  %7610 = vmatmul.mubr.msk.bf16.gmra.mrb[148].mxu0 %vm549_vm2, %v6040_v21  ;;  %v5982_v39 = vmul.f32 %v5918_v53, %v5726_v12 }
 0x89c   :  { %v5799_v61 = vmul.f32 0.70710677, %v13273_v34  ;;  %v5529_v46 = vpop.f32.mrb[163].mxu1  ;;  %v13285_v10 = vadd.f32 %v7556_v30, %v13230_v28  ;;  %v6042_v16 = vpack.c.bf16 %v5984_v56, %v5983_v51  ;;  %v5735_v40 = vmul.f32 0.5, %v13273_v34 }
 0x89d   :  { %v5797_v55 = vmul.f32 0.70710677, %v13278_v60  ;;  %v13288_v5 = vadd.f32 %v5529_v46, %v13230_v28  ;;  %v8134_v2 = vpop.eup %8133  ;;  %v6041_v43 = vpack.c.bf16 %v5982_v39, %v5981_v62  ;;  %v5733_v37 = vmul.f32 0.5, %v13278_v60 }
 0x89e   :  { %8141 = verf.f32 %v5799_v61  ;;  %v5800_v11 = vmul.f32 0.70710677, %v13285_v10  ;;  %v8136_v36 = vpop.eup %8135  ;;  %v5923_v22 = vadd.f32 1.0, %v8134_v2  ;;  %v5736_v61 = vmul.f32 0.5, %v13285_v10 }
 0x89f   :  { %8143 = verf.f32 %v5797_v55  ;;  %v5798_v26 = vmul.f32 0.70710677, %v13288_v5  ;;  %v8138_v1 = vpop.eup %8137  ;;  %v5921_v33 = vadd.f32 1.0, %v8136_v36  ;;  %7613 = vmatprep.mubr.msk.bf16.mxu0 %vm549_vm2, %v6041_v43  ;;  %v5734_v34 = vmul.f32 0.5, %v13288_v5 }
 0x8a0   :  { %8145 = verf.f32 %v5800_v11  ;;  %v8140_v45 = vpop.eup %8139  ;;  %v5924_v48 = vadd.f32 1.0, %v8138_v1  ;;  %v5987_v32 = vmul.f32 %v5923_v22, %v5731_v38 }
 0x8a1   :  { %8147 = verf.f32 %v5798_v26  ;;  %v5922_v17 = vadd.f32 1.0, %v8140_v45  ;;  %v5985_v49 = vmul.f32 %v5921_v33, %v5729_v35 }
 0x8a2   :  { %v7559_v4 = vpop.f32.mrb[164].mxu1  ;;  %v5988_v0 = vmul.f32 %v5924_v48, %v5732_v52 }
 0x8a3   :  { %v13293_v25 = vadd.f32 %v7559_v4, %v13230_v28  ;;  %v5542_v7 = vpop.f32.mrb[165].mxu1  ;;  %7614 = vmatmul.mubr.msk.bf16.gmra.mrb[152].mxu0 %vm549_vm2, %v6042_v16  ;;  %v5986_v24 = vmul.f32 %v5922_v17, %v5730_v27 }
 0x8a4   :  { %v13297_v23 = vadd.f32 %v5542_v7, %v13230_v28  ;;  %v7560_v59 = vpop.f32.mrb[166].mxu1  ;;  %v6044_v19 = vpack.c.bf16 %v5988_v0, %v5987_v32 }
 0x8a5   :  { %v5803_v47 = vmul.f32 0.70710677, %v13293_v25  ;;  %v5545_v18 = vpop.f32.mrb[167].mxu1  ;;  %v13305_v6 = vadd.f32 %v7560_v59, %v13230_v28  ;;  %v6043_v3 = vpack.c.bf16 %v5986_v24, %v5985_v49  ;;  %v5739_v33 = vmul.f32 0.5, %v13293_v25 }
 0x8a6   :  { %v5801_v57 = vmul.f32 0.70710677, %v13297_v23  ;;  %v13308_v21 = vadd.f32 %v5545_v18, %v13230_v28  ;;  %v5737_v48 = vmul.f32 0.5, %v13297_v23 }
 0x8a7   :  { %8149 = verf.f32 %v5803_v47  ;;  %v5804_v42 = vmul.f32 0.70710677, %v13305_v6  ;;  %7617 = vmatprep.mubr.msk.bf16.mxu0 %vm549_vm2, %v6043_v3  ;;  %v5740_v47 = vmul.f32 0.5, %v13305_v6 }
 0x8a8   :  { %8151 = verf.f32 %v5801_v57  ;;  %v8142_v50 = vpop.eup %8141  ;;  %v5802_v29 = vmul.f32 0.70710677, %v13308_v21  ;;  %v5738_v25 = vmul.f32 0.5, %v13308_v21 }
 0x8a9   :  { %v8144_v63 = vpop.eup %8143  ;;  %8153 = verf.f32 %v5804_v42  ;;  %v5927_v13 = vadd.f32 1.0, %v8142_v50 }
 0x8aa   :  { %8155 = verf.f32 %v5802_v29  ;;  %v8146_v8 = vpop.eup %8145  ;;  %v5925_v30 = vadd.f32 1.0, %v8144_v63 }
 0x8ab   :  { %v8148_v15 = vpop.eup %8147  ;;  %v5928_v46 = vadd.f32 1.0, %v8146_v8  ;;  %7618 = vmatmul.mubr.msk.bf16.gmra.mrb[156].mxu0 %vm549_vm2, %v6044_v19  ;;  %v5991_v62 = vmul.f32 %v5927_v13, %v5735_v40 }
 0x8ac   :  { %v5926_v55 = vadd.f32 1.0, %v8148_v15  ;;  %v5989_v10 = vmul.f32 %v5925_v30, %v5733_v37 }
 0x8ad   :  { %v7563_v9 = vpop.f32.mrb[168].mxu1  ;;  %v5992_v39 = vmul.f32 %v5928_v46, %v5736_v61 }
 0x8ae   :  { %v13313_v31 = vadd.f32 %v7563_v9, %v13230_v28  ;;  %v5558_v14 = vpop.f32.mrb[169].mxu1  ;;  %v5990_v11 = vmul.f32 %v5926_v55, %v5734_v34 }
 0x8af   :  { %v13317_v20 = vadd.f32 %v5558_v14, %v13230_v28  ;;  %v7564_v41 = vpop.f32.mrb[170].mxu1  ;;  %v6046_v26 = vpack.c.bf16 %v5992_v39, %v5991_v62 }
 0x8b0   :  { %v5807_v12 = vmul.f32 0.70710677, %v13313_v31  ;;  %v5561_v53 = vpop.f32.mrb[171].mxu1  ;;  %v13327_v56 = vadd.f32 %v7564_v41, %v13230_v28  ;;  %v6045_v43 = vpack.c.bf16 %v5990_v11, %v5989_v10  ;;  %v5743_v30 = vmul.f32 0.5, %v13313_v31 }
 0x8b1   :  { %v5805_v51 = vmul.f32 0.70710677, %v13317_v20  ;;  %v13330_v60 = vadd.f32 %v5561_v53, %v13230_v28  ;;  %v8150_v16 = vpop.eup %8149  ;;  %v5741_v46 = vmul.f32 0.5, %v13317_v20 }
 0x8b2   :  { %8157 = verf.f32 %v5807_v12  ;;  %v5808_v2 = vmul.f32 0.70710677, %v13327_v56  ;;  %v8152_v36 = vpop.eup %8151  ;;  %v5931_v22 = vadd.f32 1.0, %v8150_v16  ;;  %7621 = vmatprep.mubr.msk.bf16.mxu0 %vm549_vm2, %v6045_v43  ;;  %v5744_v12 = vmul.f32 0.5, %v13327_v56 }
 0x8b3   :  { %8159 = verf.f32 %v5805_v51  ;;  %v5806_v5 = vmul.f32 0.70710677, %v13330_v60  ;;  %v8154_v38 = vpop.eup %8153  ;;  %v5929_v59 = vadd.f32 1.0, %v8152_v36  ;;  %7622 = vmatmul.mubr.msk.bf16.gmra.mrb[160].mxu0 %vm549_vm2, %v6046_v26  ;;  %v5742_v31 = vmul.f32 0.5, %v13330_v60 }
 0x8b4   :  { %8161 = verf.f32 %v5808_v2  ;;  %v8156_v52 = vpop.eup %8155  ;;  %v5932_v18 = vadd.f32 1.0, %v8154_v38  ;;  %v5995_v49 = vmul.f32 %v5931_v22, %v5739_v33 }
 0x8b5   :  { %8163 = verf.f32 %v5806_v5  ;;  %v5930_v57 = vadd.f32 1.0, %v8156_v52  ;;  %v5993_v42 = vmul.f32 %v5929_v59, %v5737_v48 }
 0x8b6   :  { %v5996_v24 = vmul.f32 %v5932_v18, %v5740_v47 }
 0x8b7   :  { %v7567_v4 = vpop.f32.mrb[172].mxu1  ;;  %v5994_v6 = vmul.f32 %v5930_v57, %v5738_v25 }
 0x8b8   :  { %v13335_v7 = vadd.f32 %v7567_v4, %v13230_v28  ;;  %v5574_v1 = vpop.f32.mrb[173].mxu1  ;;  %v6048_v29 = vpack.c.bf16 %v5996_v24, %v5995_v49 }
 0x8b9   :  { %v13339_v45 = vadd.f32 %v5574_v1, %v13230_v28  ;;  %v7568_v35 = vpop.f32.mrb[174].mxu1  ;;  %v6047_v9 = vpack.c.bf16 %v5994_v6, %v5993_v42 }
 0x8ba   :  { %v5811_v27 = vmul.f32 0.70710677, %v13335_v7  ;;  %v5577_v17 = vpop.f32.mrb[175].mxu1  ;;  %v5586_v0 = vadd.f32 %v7568_v35, %v13230_v28  ;;  %v5747_v33 = vmul.f32 0.5, %v13335_v7 }
 0x8bb   :  { %v5809_v32 = vmul.f32 0.70710677, %v13339_v45  ;;  %v5578_v23 = vadd.f32 %v5577_v17, %v13230_v28  ;;  %7625 = vmatprep.mubr.msk.bf16.mxu0 %vm549_vm2, %v6047_v9  ;;  %v5745_v48 = vmul.f32 0.5, %v13339_v45 }
 0x8bc   :  { %8165 = verf.f32 %v5811_v27  ;;  %v5812_v50 = vmul.f32 0.70710677, %v5586_v0  ;;  %v8158_v19 = vpop.eup %8157  ;;  %7626 = vmatmul.mubr.msk.bf16.gmra.mrb[164].mxu0 %vm549_vm2, %v6048_v29  ;;  %v5748_v59 = vmul.f32 0.5, %v5586_v0 }
 0x8bd   :  { %8167 = verf.f32 %v5809_v32  ;;  %v5810_v63 = vmul.f32 0.70710677, %v5578_v23  ;;  %v8160_v3 = vpop.eup %8159  ;;  %v5935_v13 = vadd.f32 1.0, %v8158_v19  ;;  %v5746_v47 = vmul.f32 0.5, %v5578_v23 }
 0x8be   :  { %8169 = verf.f32 %v5812_v50  ;;  %v8162_v40 = vpop.eup %8161  ;;  %v5933_v41 = vadd.f32 1.0, %v8160_v3 }
 0x8bf   :  { %v7571_v21 = vpop.f32.mrb[176].mxu1  ;;  %8171 = verf.f32 %v5810_v63  ;;  %v8164_v61 = vpop.eup %8163  ;;  %v5936_v53 = vadd.f32 1.0, %v8162_v40  ;;  %v5999_v10 = vmul.f32 %v5935_v13, %v5743_v30 }
 0x8c0   :  { %v13351_v14 = vadd.f32 %v7571_v21, %v13230_v28  ;;  %v5590_v8 = vpop.f32.mrb[177].mxu1  ;;  %v5934_v51 = vadd.f32 1.0, %v8164_v61  ;;  %v5997_v2 = vmul.f32 %v5933_v41, %v5741_v46 }
 0x8c1   :  { %v13355_v15 = vadd.f32 %v5590_v8, %v13230_v28  ;;  %v7572_v37 = vpop.f32.mrb[178].mxu1  ;;  %v6000_v11 = vmul.f32 %v5936_v53, %v5744_v12 }
 0x8c2   :  { %v5815_v34 = vmul.f32 0.70710677, %v13351_v14  ;;  %v5593_v55 = vpop.f32.mrb[179].mxu1  ;;  %v5602_v39 = vadd.f32 %v7572_v37, %v13230_v28  ;;  %v5998_v56 = vmul.f32 %v5934_v51, %v5742_v31  ;;  %v5751_v13 = vmul.f32 0.5, %v13351_v14 }
 0x8c3   :  { %v5813_v62 = vmul.f32 0.70710677, %v13355_v15  ;;  %v5594_v20 = vadd.f32 %v5593_v55, %v13230_v28  ;;  %v6050_v5 = vpack.c.bf16 %v6000_v11, %v5999_v10  ;;  %v5749_v41 = vmul.f32 0.5, %v13355_v15 }
 0x8c4   :  { %8173 = verf.f32 %v5815_v34  ;;  %v5816_v16 = vmul.f32 0.70710677, %v5602_v39  ;;  %v6049_v4 = vpack.c.bf16 %v5998_v56, %v5997_v2  ;;  %v5752_v37 = vmul.f32 0.5, %v5602_v39 }
 0x8c5   :  { %8175 = verf.f32 %v5813_v62  ;;  %v5814_v36 = vmul.f32 0.70710677, %v5594_v20  ;;  %v5750_v12 = vmul.f32 0.5, %v5594_v20 }
 0x8c6   :  { %v8166_v26 = vpop.eup %8165  ;;  %8177 = verf.f32 %v5816_v16  ;;  %7629 = vmatprep.mubr.msk.bf16.mxu0 %vm549_vm2, %v6049_v4 }
 0x8c7   :  { %v8168_v43 = vpop.eup %8167  ;;  %v5939_v60 = vadd.f32 1.0, %v8166_v26  ;;  %8179 = verf.f32 %v5814_v36  ;;  %7630 = vmatmul.mubr.msk.bf16.gmra.mrb[168].mxu0 %vm549_vm2, %v6050_v5 }
 0x8c8   :  { %v8170_v22 = vpop.eup %8169  ;;  %v5937_v1 = vadd.f32 1.0, %v8168_v43 }
 0x8c9   :  { %v8172_v38 = vpop.eup %8171  ;;  %v5940_v35 = vadd.f32 1.0, %v8170_v22  ;;  %v6003_v25 = vmul.f32 %v5939_v60, %v5747_v33 }
 0x8ca   :  { %v7575_v52 = vpop.f32.mrb[180].mxu1  ;;  %v5938_v18 = vadd.f32 1.0, %v8172_v38  ;;  %v6001_v7 = vmul.f32 %v5937_v1, %v5745_v48 }
 0x8cb   :  { %v13371_v27 = vadd.f32 %v7575_v52, %v13230_v28  ;;  %v5606_v17 = vpop.f32.mrb[181].mxu1  ;;  %v6004_v57 = vmul.f32 %v5940_v35, %v5748_v59 }
 0x8cc   :  { %v13374_v32 = vadd.f32 %v5606_v17, %v13230_v28  ;;  %v7576_v49 = vpop.f32.mrb[182].mxu1  ;;  %v6002_v0 = vmul.f32 %v5938_v18, %v5746_v47 }
 0x8cd   :  { %v5819_v24 = vmul.f32 0.70710677, %v13371_v27  ;;  %v5618_v42 = vadd.f32 %v7576_v49, %v13230_v28  ;;  %v5609_v6 = vpop.f32.mrb[183].mxu1  ;;  %v6052_v23 = vpack.c.bf16 %v6004_v57, %v6003_v25  ;;  %v5755_v59 = vmul.f32 0.5, %v13371_v27 }
 0x8ce   :  { %v8174_v45 = vpop.eup %8173  ;;  %v5817_v50 = vmul.f32 0.70710677, %v13374_v32  ;;  %v5610_v19 = vadd.f32 %v5609_v6, %v13230_v28  ;;  %v6051_v63 = vpack.c.bf16 %v6002_v0, %v6001_v7  ;;  %v5753_v18 = vmul.f32 0.5, %v13374_v32 }
 0x8cf   :  { %v8176_v29 = vpop.eup %8175  ;;  %8181 = verf.f32 %v5819_v24  ;;  %v5943_v3 = vadd.f32 1.0, %v8174_v45  ;;  %v5820_v9 = vmul.f32 0.70710677, %v5618_v42  ;;  %v5756_v17 = vmul.f32 0.5, %v5618_v42 }
 0x8d0   :  { %8183 = verf.f32 %v5817_v50  ;;  %v8178_v21 = vpop.eup %8177  ;;  %v5941_v8 = vadd.f32 1.0, %v8176_v29  ;;  %v5818_v40 = vmul.f32 0.70710677, %v5610_v19  ;;  %7633 = vmatprep.mubr.msk.bf16.mxu0 %vm549_vm2, %v6051_v63  ;;  %v5754_v7 = vmul.f32 0.5, %v5610_v19 }
 0x8d1   :  { %v8180_v30 = vpop.eup %8179  ;;  %v5944_v61 = vadd.f32 1.0, %v8178_v21  ;;  %8185 = verf.f32 %v5820_v9  ;;  %7634 = vmatmul.mubr.msk.bf16.gmra.mrb[172].mxu0 %vm549_vm2, %v6052_v23  ;;  %v6007_v55 = vmul.f32 %v5943_v3, %v5751_v13 }
 0x8d2   :  { %v7579_v46 = vpop.f32.mrb[184].mxu1  ;;  %v5942_v53 = vadd.f32 1.0, %v8180_v30  ;;  %8187 = verf.f32 %v5818_v40  ;;  %v6005_v15 = vmul.f32 %v5941_v8, %v5749_v41 }
 0x8d3   :  { %v13385_v34 = vadd.f32 %v7579_v46, %v13230_v28  ;;  %v5622_v14 = vpop.f32.mrb[185].mxu1  ;;  %v6008_v31 = vmul.f32 %v5944_v61, %v5752_v37 }
 0x8d4   :  { %v13388_v51 = vadd.f32 %v5622_v14, %v13230_v28  ;;  %v7580_v62 = vpop.f32.mrb[186].mxu1  ;;  %v6006_v39 = vmul.f32 %v5942_v53, %v5750_v12 }
 0x8d5   :  { %v5823_v10 = vmul.f32 0.70710677, %v13385_v34  ;;  %v5634_v11 = vadd.f32 %v7580_v62, %v13230_v28  ;;  %v5625_v2 = vpop.f32.mrb[187].mxu1  ;;  %v6054_v20 = vpack.c.bf16 %v6008_v31, %v6007_v55  ;;  %v5759_v61 = vmul.f32 0.5, %v13385_v34 }
 0x8d6   :  { %v5821_v56 = vmul.f32 0.70710677, %v13388_v51  ;;  %v5626_v16 = vadd.f32 %v5625_v2, %v13230_v28  ;;  %v6053_v26 = vpack.c.bf16 %v6006_v39, %v6005_v15  ;;  %v5757_v55 = vmul.f32 0.5, %v13388_v51 }
 0x8d7   :  { %8189 = verf.f32 %v5823_v10  ;;  %v5824_v5 = vmul.f32 0.70710677, %v5634_v11  ;;  %v5760_v46 = vmul.f32 0.5, %v5634_v11 }
 0x8d8   :  { %8191 = verf.f32 %v5821_v56  ;;  %v5822_v36 = vmul.f32 0.70710677, %v5626_v16  ;;  %7637 = vmatprep.mubr.msk.bf16.mxu0 %vm549_vm2, %v6053_v26  ;;  %v5758_v31 = vmul.f32 0.5, %v5626_v16 }
 0x8d9   :  { %v8182_v43 = vpop.eup %8181  ;;  %8193 = verf.f32 %v5824_v5  ;;  %7638 = vmatmul.mubr.msk.bf16.gmra.mrb[176].mxu0 %vm549_vm2, %v6054_v20 }
 0x8da   :  { %v8184_v4 = vpop.eup %8183  ;;  %8195 = verf.f32 %v5822_v36  ;;  %v7583_v60 = vpop.f32.mrb[188].mxu1  ;;  %v5947_v22 = vadd.f32 1.0, %v8182_v43 }
 0x8db   :  { %v13397_v1 = vadd.f32 %v7583_v60, %v13230_v28  ;;  %v5638_v38 = vpop.f32.mrb[189].mxu1  ;;  %v8186_v33 = vpop.eup %8185  ;;  %v5945_v35 = vadd.f32 1.0, %v8184_v4 }
 0x8dc   :  { %v13401_v52 = vadd.f32 %v5638_v38, %v13230_v28  ;;  %v7584_v48 = vpop.f32.mrb[190].mxu1  ;;  %v8188_v47 = vpop.eup %8187  ;;  %v5948_v25 = vadd.f32 1.0, %v8186_v33  ;;  %v6011_v27 = vmul.f32 %v5947_v22, %v5755_v59 }
 0x8dd   :  { %v5827_v57 = vmul.f32 0.70710677, %v13397_v1  ;;  %v5641_v49 = vpop.f32.mrb[191].mxu1  ;;  %v5946_v0 = vadd.f32 1.0, %v8188_v47  ;;  %v13407_v6 = vadd.f32 %v7584_v48, %v13230_v28  ;;  %v6009_v50 = vmul.f32 %v5945_v35, %v5753_v18 }
 0x8de   :  { %v5825_v24 = vmul.f32 0.70710677, %v13401_v52  ;;  %v6012_v45 = vmul.f32 %v5948_v25, %v5756_v17  ;;  %v13410_v23 = vadd.f32 %v5641_v49, %v13230_v28  ;;  %v5763_v35 = vmul.f32 0.5, %v13397_v1 }
 0x8df   :  { %8197 = verf.f32 %v5827_v57  ;;  %v6010_v32 = vmul.f32 %v5946_v0, %v5754_v7  ;;  %v5828_v42 = vmul.f32 0.70710677, %v13407_v6  ;;  %v5761_v25 = vmul.f32 0.5, %v13401_v52 }
 0x8e0   :  { %8199 = verf.f32 %v5825_v24  ;;  %v6056_v63 = vpack.c.bf16 %v6012_v45, %v6011_v27  ;;  %v5826_v19 = vmul.f32 0.70710677, %v13410_v23  ;;  %v5764_v57 = vmul.f32 0.5, %v13407_v6 }
 0x8e1   :  { %v8190_v29 = vpop.eup %8189  ;;  %v6055_v9 = vpack.c.bf16 %v6010_v32, %v6009_v50  ;;  %8201 = verf.f32 %v5828_v42  ;;  %v5762_v24 = vmul.f32 0.5, %v13410_v23 }
 0x8e2   :  { %v8192_v3 = vpop.eup %8191  ;;  %v5951_v21 = vadd.f32 1.0, %v8190_v29  ;;  %v7587_v13 = vpop.f32.mrb[192].mxu1  ;;  %8203 = verf.f32 %v5826_v19 }
 0x8e3   :  { %v8194_v8 = vpop.eup %8193  ;;  %v5949_v40 = vadd.f32 1.0, %v8192_v3  ;;  %v13415_v30 = vadd.f32 %v7587_v13, %v13230_v28  ;;  %v5654_v41 = vpop.f32.mrb[193].mxu1  ;;  %7641 = vmatprep.mubr.msk.bf16.mxu0 %vm549_vm2, %v6055_v9 }
 0x8e4   :  { %v8196_v37 = vpop.eup %8195  ;;  %v5952_v12 = vadd.f32 1.0, %v8194_v8  ;;  %v13419_v53 = vadd.f32 %v5654_v41, %v13230_v28  ;;  %v7588_v14 = vpop.f32.mrb[194].mxu1  ;;  %7642 = vmatmul.mubr.msk.bf16.gmra.mrb[180].mxu0 %vm549_vm2, %v6056_v63  ;;  %v6015_v10 = vmul.f32 %v5951_v21, %v5759_v61 }
 0x8e5   :  { %v5950_v62 = vadd.f32 1.0, %v8196_v37  ;;  %v5831_v15 = vmul.f32 0.70710677, %v13415_v30  ;;  %v5657_v39 = vpop.f32.mrb[195].mxu1  ;;  %v5666_v11 = vadd.f32 %v7588_v14, %v13230_v28  ;;  %v6013_v20 = vmul.f32 %v5949_v40, %v5757_v55 }
 0x8e6   :  { %v6016_v2 = vmul.f32 %v5952_v12, %v5760_v46  ;;  %v5829_v34 = vmul.f32 0.70710677, %v13419_v53  ;;  %v5658_v26 = vadd.f32 %v5657_v39, %v13230_v28  ;;  %v5767_v37 = vmul.f32 0.5, %v13415_v30 }
 0x8e7   :  { %v6014_v56 = vmul.f32 %v5950_v62, %v5758_v31  ;;  %8205 = verf.f32 %v5831_v15  ;;  %v5832_v51 = vmul.f32 0.70710677, %v5666_v11  ;;  %v5765_v55 = vmul.f32 0.5, %v13419_v53 }
 0x8e8   :  { %v6058_v5 = vpack.c.bf16 %v6016_v2, %v6015_v10  ;;  %8207 = verf.f32 %v5829_v34  ;;  %v5830_v43 = vmul.f32 0.70710677, %v5658_v26  ;;  %v5768_v31 = vmul.f32 0.5, %v5666_v11 }
 0x8e9   :  { %v8198_v16 = vpop.eup %8197  ;;  %v6057_v36 = vpack.c.bf16 %v6014_v56, %v6013_v20  ;;  %8209 = verf.f32 %v5832_v51  ;;  %v5766_v10 = vmul.f32 0.5, %v5658_v26 }
 0x8ea   :  { %v8200_v4 = vpop.eup %8199  ;;  %v7591_v60 = vpop.f32.mrb[196].mxu1  ;;  %v5955_v22 = vadd.f32 1.0, %v8198_v16  ;;  %8211 = verf.f32 %v5830_v43 }
 0x8eb   :  { %v13429_v38 = vadd.f32 %v7591_v60, %v13230_v28  ;;  %v5670_v33 = vpop.f32.mrb[197].mxu1  ;;  %7645 = vmatprep.mubr.msk.bf16.mxu0 %vm549_vm2, %v6057_v36  ;;  %v8202_v59 = vpop.eup %8201  ;;  %v5953_v48 = vadd.f32 1.0, %v8200_v4 }
 0x8ec   :  { %v13434_v47 = vadd.f32 %v5670_v33, %v13230_v28  ;;  %v7592_v18 = vpop.f32.mrb[198].mxu1  ;;  %v8204_v17 = vpop.eup %8203  ;;  %v5956_v49 = vadd.f32 1.0, %v8202_v59  ;;  %7646 = vmatmul.mubr.msk.bf16.gmra.mrb[184].mxu0 %vm549_vm2, %v6058_v5  ;;  %v6019_v50 = vmul.f32 %v5955_v22, %v5763_v35 }
 0x8ed   :  { %v5835_v7 = vmul.f32 0.70710677, %v13429_v38  ;;  %v5673_v0 = vpop.f32.mrb[199].mxu1  ;;  %v5954_v27 = vadd.f32 1.0, %v8204_v17  ;;  %v5682_v45 = vadd.f32 %v7592_v18, %v13230_v28  ;;  %v6017_v42 = vmul.f32 %v5953_v48, %v5761_v25 }
 0x8ee   :  { %v5833_v1 = vmul.f32 0.70710677, %v13434_v47  ;;  %v6020_v32 = vmul.f32 %v5956_v49, %v5764_v57  ;;  %v5674_v52 = vadd.f32 %v5673_v0, %v13230_v28  ;;  %v5771_v35 = vmul.f32 0.5, %v13429_v38 }
 0x8ef   :  { %8213 = verf.f32 %v5835_v7  ;;  %v6018_v6 = vmul.f32 %v5954_v27, %v5762_v24  ;;  %v5836_v29 = vmul.f32 0.70710677, %v5682_v45  ;;  %v5772_v48 = vmul.f32 0.5, %v5682_v45 }
 0x8f0   :  { %8215 = verf.f32 %v5833_v1  ;;  %v6060_v19 = vpack.c.bf16 %v6020_v32, %v6019_v50  ;;  %v5834_v3 = vmul.f32 0.70710677, %v5674_v52  ;;  %v5769_v17 = vmul.f32 0.5, %v13434_v47 }
 0x8f1   :  { %v8206_v63 = vpop.eup %8205  ;;  %v6059_v21 = vpack.c.bf16 %v6018_v6, %v6017_v42  ;;  %8217 = verf.f32 %v5836_v29  ;;  %v5770_v25 = vmul.f32 0.5, %v5674_v52 }
 0x8f2   :  { %v8208_v9 = vpop.eup %8207  ;;  %v7595_v23 = vpop.f32.mrb[200].mxu1  ;;  %v5959_v13 = vadd.f32 1.0, %v8206_v63  ;;  %8219 = verf.f32 %v5834_v3 }
 0x8f3   :  { %v5695_v8 = vadd.f32 %v7595_v23, %v13230_v28  ;;  %v5686_v40 = vpop.f32.mrb[201].mxu1  ;;  %v8210_v41 = vpop.eup %8209  ;;  %v5957_v61 = vadd.f32 1.0, %v8208_v9  ;;  %7649 = vmatprep.mubr.msk.bf16.mxu0 %vm549_vm2, %v6059_v21 }
 0x8f4   :  { %v5687_v46 = vadd.f32 %v5686_v40, %v13230_v28  ;;  %v7596_v12 = vpop.f32.mrb[202].mxu1  ;;  %v8212_v14 = vpop.eup %8211  ;;  %v5960_v62 = vadd.f32 1.0, %v8210_v41  ;;  %7650 = vmatmul.mubr.msk.bf16.gmra.mrb[188].mxu0 %vm549_vm2, %v6060_v19  ;;  %v6023_v20 = vmul.f32 %v5959_v13, %v5767_v37 }
 0x8f5   :  { %v5839_v15 = vmul.f32 0.70710677, %v5695_v8  ;;  %v5689_v39 = vpop.f32.mrb[203].mxu1  ;;  %v5958_v2 = vadd.f32 1.0, %v8212_v14  ;;  %v5698_v30 = vadd.f32 %v7596_v12, %v13230_v28  ;;  %v6021_v51 = vmul.f32 %v5957_v61, %v5765_v55 }
 0x8f6   :  { %v5837_v34 = vmul.f32 0.70710677, %v5687_v46  ;;  %v6024_v56 = vmul.f32 %v5960_v62, %v5768_v31  ;;  %v5690_v5 = vadd.f32 %v5689_v39, %v13230_v28  ;;  %v5775_v45 = vmul.f32 0.5, %v5695_v8 }
 0x8f7   :  { %8221 = verf.f32 %v5839_v15  ;;  %v6022_v16 = vmul.f32 %v5958_v2, %v5766_v10  ;;  %v5840_v53 = vmul.f32 0.70710677, %v5698_v30  ;;  %v5776_v63 = vmul.f32 0.5, %v5698_v30 }
 0x8f8   :  { %8223 = verf.f32 %v5837_v34  ;;  %v6062_v36 = vpack.c.bf16 %v6024_v56, %v6023_v20  ;;  %v5838_v43 = vmul.f32 0.70710677, %v5690_v5  ;;  %v5773_v47 = vmul.f32 0.5, %v5687_v46 }
 0x8f9   :  { %v8214_v11 = vpop.eup %8213  ;;  %v6061_v60 = vpack.c.bf16 %v6022_v16, %v6021_v51  ;;  %8225 = verf.f32 %v5840_v53  ;;  %v5774_v52 = vmul.f32 0.5, %v5690_v5  ;;  %v6075_v2 = vsub.s32 7, %v15117_v58  ;;  %v8241_v51 = vld [vmem:[#allocation2] sm:$0xff] }
 0x8fa   :  { %v8216_v4 = vpop.eup %8215  ;;  %v5963_v26 = vadd.f32 1.0, %v8214_v11  ;;  %8227 = verf.f32 %v5838_v43 }
 0x8fb   :  { %v8218_v22 = vpop.eup %8217  ;;  %v5961_v33 = vadd.f32 1.0, %v8216_v4  ;;  %7653 = vmatprep.mubr.msk.bf16.mxu0 %vm549_vm2, %v6061_v60  ;;  %v13465_v16 = vrot.slane %v8241_v51, %v6075_v2 }
 0x8fc   :  { %v8220_v59 = vpop.eup %8219  ;;  %v5964_v18 = vadd.f32 1.0, %v8218_v22  ;;  %7654 = vmatmul.mubr.msk.bf16.gmra.mrb[192].mxu0 %vm549_vm2, %v6062_v36  ;;  %v6027_v49 = vmul.f32 %v5963_v26, %v5771_v35 }
 0x8fd   :  { %v5962_v57 = vadd.f32 1.0, %v8220_v59  ;;  %v6025_v0 = vmul.f32 %v5961_v33, %v5769_v17 }
 0x8fe   :  { %v6028_v7 = vmul.f32 %v5964_v18, %v5772_v48 }
 0x8ff   :  { %v6026_v24 = vmul.f32 %v5962_v57, %v5770_v25 }
 0x900   :  { %v6064_v1 = vpack.c.bf16 %v6028_v7, %v6027_v49 }
 0x901   :  { %v8222_v27 = vpop.eup %8221  ;;  %v6063_v32 = vpack.c.bf16 %v6026_v24, %v6025_v0  ;;  %v15118_v24 = vld [vmem:[#allocation94_spill] sm:$0xff] }
 0x902   :  { %v8224_v50 = vpop.eup %8223  ;;  %v5967_v42 = vadd.f32 1.0, %v8222_v27 }
 0x903   :  { %v8226_v6 = vpop.eup %8225  ;;  %v5965_v29 = vadd.f32 1.0, %v8224_v50  ;;  %7657 = vmatprep.mubr.msk.bf16.mxu0 %vm549_vm2, %v6063_v32  ;;  %v15120_v32 = vld [vmem:[#allocation91_spill] sm:$0xff] }
 0x904   :  { %v8228_v38 = vpop.eup %8227  ;;  %v5968_v19 = vadd.f32 1.0, %v8226_v6  ;;  %7658 = vmatmul.mubr.msk.bf16.gmra.mrb[196].mxu0 %vm549_vm2, %v6064_v1  ;;  %v6031_v9 = vmul.f32 %v5967_v42, %v5775_v45  ;;  %v15119_v1 = vld [vmem:[#allocation124_spill] sm:$0xff] }
 0x905   :  { %v5966_v3 = vadd.f32 1.0, %v8228_v38  ;;  %v6029_v23 = vmul.f32 %v5965_v29, %v5773_v47  ;;  %v15121_v6 = vld [vmem:[#allocation92_spill] sm:$0xff] }
 0x906   :  { %v6032_v21 = vmul.f32 %v5968_v19, %v5776_v63 }
 0x907   :  { %v6030_v13 = vmul.f32 %v5966_v3, %v5774_v52 }
 0x908   :  { %v6066_v40 = vpack.c.bf16 %v6032_v21, %v6031_v9 }
 0x909   :  { %v6065_v41 = vpack.c.bf16 %v6030_v13, %v6029_v23  ;;  %v15122_v13 = vld [vmem:[#allocation125_spill] sm:$0xff] }
 0x90b   :  { %7661 = vmatprep.mubr.msk.bf16.mxu0 %vm549_vm2, %v6065_v41  ;;  %v15123_v41 = vld [vmem:[#allocation93_spill] sm:$0xff] }
 0x90c   :  { %7662 = vmatmul.mubr.msk.bf16.gmra.mrb[200].mxu0 %vm549_vm2, %v6066_v40 }
 0x957   :  { %v7599_v37 = vpop.f32.mrb[204].mxu1 }
 0x958   :  { %v5711_v8 = vadd.f32 %v7599_v37, %v13230_v28  ;;  %v5702_v61 = vpop.f32.mrb[205].mxu1 }
 0x959   :  { %v5703_v12 = vadd.f32 %v5702_v61, %v13230_v28  ;;  %v7600_v14 = vpop.f32.mrb[206].mxu1 }
 0x95a   :  { %v5843_v46 = vmul.f32 0.70710677, %v5711_v8  ;;  %v5714_v55 = vadd.f32 %v7600_v14, %v13230_v28  ;;  %v5705_v31 = vpop.f32.mrb[207].mxu1  ;;  %v5779_v11 = vmul.f32 0.5, %v5711_v8  ;;  %v15124_v8 = vld [vmem:[#allocation95_spill] sm:$0xff] }
 0x95b   :  { %v5841_v62 = vmul.f32 0.70710677, %v5703_v12  ;;  %v5706_v15 = vadd.f32 %v5705_v31, %v13230_v28  ;;  %v5777_v43 = vmul.f32 0.5, %v5703_v12  ;;  %v15125_v12 = vld [vmem:[#allocation96_spill] sm:$0xff] }
 0x95c   :  { %8229 = verf.f32 %v5843_v46  ;;  %v5844_v39 = vmul.f32 0.70710677, %v5714_v55  ;;  %v5780_v36 = vmul.f32 0.5, %v5714_v55 }
 0x95d   :  { %8231 = verf.f32 %v5841_v62  ;;  %v5842_v10 = vmul.f32 0.70710677, %v5706_v15  ;;  %v5778_v4 = vmul.f32 0.5, %v5706_v15 }
 0x95e   :  { %8233 = verf.f32 %v5844_v39 }
 0x95f   :  { %8235 = verf.f32 %v5842_v10 }
 0x966   :  { %v8230_v34 = vpop.eup %8229  ;;  %v7607_v33 = vpop.f32.mrb[144].mxu0 }
 0x967   :  { %v8232_v30 = vpop.eup %8231  ;;  %v5971_v20 = vadd.f32 1.0, %v8230_v34  ;;  %v6228_v35 = vadd.f32 %v7607_v33, %v13465_v16  ;;  %v6219_v48 = vpop.f32.mrb[145].mxu0 }
 0x968   :  { %v8234_v56 = vpop.eup %8233  ;;  %v5969_v5 = vadd.f32 1.0, %v8232_v30  ;;  %v6220_v17 = vadd.f32 %v6219_v48, %v13465_v16  ;;  %v7608_v25 = vpop.f32.mrb[146].mxu0 }
 0x969   :  { %v8236_v53 = vpop.eup %8235  ;;  %v5972_v28 = vadd.f32 1.0, %v8234_v56  ;;  %v6035_v26 = vmul.f32 %v5971_v20, %v5779_v11  ;;  %v6231_v49 = vadd.f32 %v7608_v25, %v13465_v16  ;;  %v6222_v7 = vpop.f32.mrb[147].mxu0  ;;  %v13472_v27 = vadd.f32 %v6228_v35, %v15118_v24  ;;  %v15126_v20 = vld [vmem:[#allocation151_spill] sm:$0xff]  ;;  %v15131_v25 = vld [vmem:[#allocation157_spill] sm:$0xff] }
 0x96a   :  { %v5970_v60 = vadd.f32 1.0, %v8236_v53  ;;  %v6033_v59 = vmul.f32 %v5969_v5, %v5777_v43  ;;  %v6223_v0 = vadd.f32 %v6222_v7, %v13465_v16  ;;  %v13479_v42 = vadd.f32 %v6220_v17, %v15120_v32  ;;  %v15127_v5 = vld [vmem:[#allocation88_spill] sm:$0xff] }
 0x96b   :  { %v6036_v22 = vmul.f32 %v5972_v28, %v5780_v36  ;;  %v13475_v50 = vadd.f32 %v6231_v49, %v15119_v1  ;;  %v15128_v53 = vld [vmem:[#allocation152_spill] sm:$0xff]  ;;  %v15129_v36 = vld [vmem:[#allocation103_spill] sm:$0xff] }
 0x96c   :  { %v6034_v58 = vmul.f32 %v5970_v60, %v5778_v4  ;;  %v13482_v29 = vadd.f32 %v6223_v0, %v15121_v6  ;;  %v15132_v49 = vld [vmem:[#allocation128_spill] sm:$0xff]  ;;  %v15133_v0 = vld [vmem:[#allocation150_spill] sm:$0xff] }
 0x96d   :  { %v6068_v18 = vpack.c.bf16 %v6036_v22, %v6035_v26  ;;  %v6540_v38 = vpack.c.bf16 %v13475_v50, %v13472_v27 }
 0x96e   :  { %v6067_v57 = vpack.c.bf16 %v6034_v58, %v6033_v59  ;;  %v6539_v45 = vpack.c.bf16 %v13482_v29, %v13479_v42  ;;  %v7611_v63 = vpop.f32.mrb[148].mxu0 }
 0x96f   :  { %v6244_v19 = vadd.f32 %v7611_v63, %v13465_v16  ;;  %v6235_v47 = vpop.f32.mrb[149].mxu0 }
 0x970   :  { %7665 = vmatprep.mubr.msk.bf16.mxu0 %vm549_vm2, %v6067_v57  ;;  %v6236_v52 = vadd.f32 %v6235_v47, %v13465_v16  ;;  %v7612_v3 = vpop.f32.mrb[150].mxu0 }
 0x971   :  { %7666 = vmatmul.mubr.msk.bf16.gmra.mrb[204].mxu0 %vm549_vm2, %v6068_v18  ;;  %v6247_v9 = vadd.f32 %v7612_v3, %v13465_v16  ;;  %v6238_v21 = vpop.f32.mrb[151].mxu0  ;;  %v13494_v40 = vadd.f32 %v6244_v19, %v15122_v13  ;;  %v15130_v18 = vld [vmem:[#allocation90_spill] sm:$0xff] }
 0x972   :  { %v6239_v23 = vadd.f32 %v6238_v21, %v13465_v16  ;;  %v13500_v61 = vadd.f32 %v6236_v52, %v15124_v8 }
 0x973   :  { %v13497_v37 = vadd.f32 %v6247_v9, %v15123_v41  ;;  %v15135_v41 = vld [vmem:[#allocation153_spill] sm:$0xff] }
 0x974   :  { %v13503_v14 = vadd.f32 %v6239_v23, %v15125_v12  ;;  %v15134_v23 = vld [vmem:[#allocation80_spill] sm:$0xff]  ;;  %v15136_v12 = vld [vmem:[#allocation87_spill] sm:$0xff] }
 0x975   :  { %v6542_v46 = vpack.c.bf16 %v13497_v37, %v13494_v40  ;;  %v15153_v40 = vld [vmem:[#allocation104_spill] sm:$0xff] }
 0x976   :  { %v6541_v55 = vpack.c.bf16 %v13503_v14, %v13500_v61  ;;  %v7615_v31 = vpop.f32.mrb[152].mxu0 }
 0x977   :  { %v6260_v62 = vadd.f32 %v7615_v31, %v13465_v16  ;;  %v6251_v15 = vpop.f32.mrb[153].mxu0 }
 0x978   :  { %v6252_v39 = vadd.f32 %v6251_v15, %v13465_v16  ;;  %v7616_v10 = vpop.f32.mrb[154].mxu0 }
 0x979   :  { %v6263_v2 = vadd.f32 %v7616_v10, %v13465_v16  ;;  %v6254_v34 = vpop.f32.mrb[155].mxu0  ;;  %v13514_v56 = vadd.f32 %v6260_v62, %v15126_v20  ;;  %v15137_v62 = vld [vmem:[#allocation132_spill] sm:$0xff] }
 0x97a   :  { %v6255_v30 = vadd.f32 %v6254_v34, %v13465_v16  ;;  %v13520_v11 = vadd.f32 %v6252_v39, %v15128_v53  ;;  %v6581_v53 = vsel %vm549_vm2, %v6539_v45, 0 }
 0x97b   :  { %v13517_v51 = vadd.f32 %v6263_v2, %v15127_v5 }
 0x97c   :  { %v13523_v28 = vadd.f32 %v6255_v30, %v15129_v36 }
 0x97d   :  { %v6544_v43 = vpack.c.bf16 %v13517_v51, %v13514_v56  ;;  %v15158_v51 = vld [vmem:[#allocation77_spill] sm:$0xff] }
 0x97e   :  { %v6543_v4 = vpack.c.bf16 %v13523_v28, %v13520_v11  ;;  %v7619_v60 = vpop.f32.mrb[156].mxu0  ;;  %v15155_v11 = vld [vmem:[#allocation154_spill] sm:$0xff] }
 0x97f   :  { %v6276_v26 = vadd.f32 %v7619_v60, %v13465_v16  ;;  %v6267_v22 = vpop.f32.mrb[157].mxu0 }
 0x980   :  { %v6268_v33 = vadd.f32 %v6267_v22, %v13465_v16  ;;  %v7620_v59 = vpop.f32.mrb[158].mxu0  ;;  %v15138_v22 = vld [vmem:[#allocation85_spill] sm:$0xff] }
 0x981   :  { %v6279_v58 = vadd.f32 %v7620_v59, %v13465_v16  ;;  %v6270_v35 = vpop.f32.mrb[159].mxu0  ;;  %v13534_v17 = vadd.f32 %v6276_v26, %v15130_v18  ;;  %v15139_v59 = vld [vmem:[#allocation83_spill] sm:$0xff]  ;;  %v15141_v18 = vld [vmem:[#allocation97_spill] sm:$0xff] }
 0x982   :  { %v6271_v48 = vadd.f32 %v6270_v35, %v13465_v16  ;;  %v13540_v7 = vadd.f32 %v6268_v33, %v15132_v49  ;;  %v15140_v35 = vld [vmem:[#allocation135_spill] sm:$0xff] }
 0x983   :  { %v13537_v57 = vadd.f32 %v6279_v58, %v15131_v25 }
 0x984   :  { %v13543_v24 = vadd.f32 %v6271_v48, %v15133_v0 }
 0x985   :  { %v6546_v1 = vpack.c.bf16 %v13537_v57, %v13534_v17  ;;  %v15167_v57 = vld [vmem:[#allocation158_spill] sm:$0xff] }
 0x986   :  { %v6545_v32 = vpack.c.bf16 %v13543_v24, %v13540_v7  ;;  %v7623_v6 = vpop.f32.mrb[160].mxu0  ;;  %v15162_v24 = vld [vmem:[#allocation189_spill] sm:$0xff] }
 0x987   :  { %v6292_v63 = vadd.f32 %v7623_v6, %v13465_v16  ;;  %v6283_v19 = vpop.f32.mrb[161].mxu0 }
 0x988   :  { %v6284_v47 = vadd.f32 %v6283_v19, %v13465_v16  ;;  %v7624_v52 = vpop.f32.mrb[162].mxu0  ;;  %v6584_v19 = vsel %vm549_vm2, %v6540_v38, 0 }
 0x989   :  { %v6295_v3 = vadd.f32 %v7624_v52, %v13465_v16  ;;  %v6286_v9 = vpop.f32.mrb[163].mxu0  ;;  %v6492_v13 = vadd.f32 %v6292_v63, %v15134_v23  ;;  %v15143_v23 = vld [vmem:[#allocation99_spill] sm:$0xff] }
 0x98a   :  { %v6287_v21 = vadd.f32 %v6286_v9, %v13465_v16  ;;  %v6490_v31 = vadd.f32 %v6284_v47, %v15136_v12  ;;  %v15142_v9 = vld [vmem:[#allocation185_spill] sm:$0xff]  ;;  %v15145_v12 = vld [vmem:[#allocation147_spill] sm:$0xff] }
 0x98b   :  { %v6493_v8 = vadd.f32 %v6295_v3, %v15135_v41  ;;  %v15144_v41 = vld [vmem:[#allocation186_spill] sm:$0xff] }
 0x98c   :  { %v6491_v15 = vadd.f32 %v6287_v21, %v15137_v62 }
 0x98d   :  { %v6548_v39 = vpack.c.bf16 %v6493_v8, %v6492_v13 }
 0x98e   :  { %v6547_v10 = vpack.c.bf16 %v6491_v15, %v6490_v31 }
 0x98f   :  { %v7627_v2 = vpop.f32.mrb[164].mxu0 }
 0x990   :  { %v6308_v34 = vadd.f32 %v7627_v2, %v13465_v16  ;;  %v6299_v30 = vpop.f32.mrb[165].mxu0  ;;  %7673 = vmatprep.subr.msk.bf16.mxu1 %vm549_vm2, %v6547_v10  ;;  %v6587_v2 = vsel %vm549_vm2, %v6541_v55, 0 }
 0x991   :  { %v6300_v20 = vadd.f32 %v6299_v30, %v13465_v16  ;;  %v7628_v5 = vpop.f32.mrb[166].mxu0  ;;  %7172 = vmatpush3.bf16.xpose.msra.mxu1 %v6581_v53 }
 0x992   :  { %v6311_v36 = vadd.f32 %v7628_v5, %v13465_v16  ;;  %v6302_v60 = vpop.f32.mrb[167].mxu0  ;;  %7674 = vmatprep.subr.msk.bf16.mxu1 %vm549_vm2, %v6548_v39  ;;  %v6496_v33 = vadd.f32 %v6308_v34, %v15138_v22  ;;  %v15146_v5 = vld [vmem:[#allocation187_spill] sm:$0xff] }
 0x993   :  { %v6303_v26 = vadd.f32 %v6302_v60, %v13465_v16  ;;  %v6494_v48 = vadd.f32 %v6300_v20, %v15140_v35 }
 0x994   :  { %v6497_v58 = vadd.f32 %v6311_v36, %v15139_v59  ;;  %v15147_v36 = vld [vmem:[#allocation148_spill] sm:$0xff] }
 0x995   :  { %v6495_v25 = vadd.f32 %v6303_v26, %v15141_v18  ;;  %v15148_v26 = vld [vmem:[#allocation169_spill] sm:$0xff] }
 0x996   :  { %v6550_v49 = vpack.c.bf16 %v6497_v58, %v6496_v33  ;;  %v15149_v33 = vld [vmem:[#allocation111_spill] sm:$0xff] }
 0x997   :  { %v6549_v42 = vpack.c.bf16 %v6495_v25, %v6494_v48  ;;  %v6590_v25 = vsel %vm549_vm2, %v6542_v46, 0 }
 0x999   :  { %7174 = vmatpush3.bf16.xpose.msra.mxu1 %v6584_v19  ;;  %v15152_v19 = vld [vmem:[#allocation188_spill] sm:$0xff] }
 0x99a   :  { %v7631_v29 = vpop.f32.mrb[168].mxu0  ;;  %7675 = vmatprep.subr.msk.bf16.mxu1 %vm549_vm2, %v6549_v42 }
 0x99b   :  { %v6324_v45 = vadd.f32 %v7631_v29, %v13465_v16  ;;  %v6315_v0 = vpop.f32.mrb[169].mxu0 }
 0x99c   :  { %v6316_v6 = vadd.f32 %v6315_v0, %v13465_v16  ;;  %v7632_v63 = vpop.f32.mrb[170].mxu0 }
 0x99d   :  { %v6327_v47 = vadd.f32 %v7632_v63, %v13465_v16  ;;  %v6318_v52 = vpop.f32.mrb[171].mxu0  ;;  %v6500_v21 = vadd.f32 %v6324_v45, %v15142_v9  ;;  %v15150_v45 = vld [vmem:[#allocation165_spill] sm:$0xff] }
 0x99e   :  { %v6319_v3 = vadd.f32 %v6318_v52, %v13465_v16  ;;  %v6498_v8 = vadd.f32 %v6316_v6, %v15144_v41  ;;  %v15151_v6 = vld [vmem:[#allocation142_spill] sm:$0xff] }
 0x99f   :  { %v6501_v13 = vadd.f32 %v6327_v47, %v15143_v23 }
 0x9a0   :  { %v6499_v31 = vadd.f32 %v6319_v3, %v15145_v12  ;;  %v6593_v3 = vsel %vm549_vm2, %v6543_v4, 0  ;;  %v15156_v4 = vld [vmem:[#allocation190_spill] sm:$0xff] }
 0x9a1   :  { %v6552_v62 = vpack.c.bf16 %v6501_v13, %v6500_v21  ;;  %7176 = vmatpush3.bf16.xpose.msra.mxu1 %v6587_v2 }
 0x9a2   :  { %v6551_v27 = vpack.c.bf16 %v6499_v31, %v6498_v8  ;;  %7676 = vmatprep.subr.msk.bf16.mxu1 %vm549_vm2, %v6550_v49 }
 0x9a4   :  { %v7635_v50 = vpop.f32.mrb[172].mxu0 }
 0x9a5   :  { %v6340_v38 = vadd.f32 %v7635_v50, %v13465_v16  ;;  %v6331_v15 = vpop.f32.mrb[173].mxu0 }
 0x9a6   :  { %v6332_v39 = vadd.f32 %v6331_v15, %v13465_v16  ;;  %v7636_v10 = vpop.f32.mrb[174].mxu0  ;;  %v15157_v15 = vld [vmem:[#allocation156_spill] sm:$0xff] }
 0x9a7   :  { %v6343_v34 = vadd.f32 %v7636_v10, %v13465_v16  ;;  %v6334_v30 = vpop.f32.mrb[175].mxu0  ;;  %v13594_v53 = vadd.f32 %v6340_v38, %v15146_v5  ;;  %v6596_v10 = vsel %vm549_vm2, %v6544_v43, 0 }
 0x9a8   :  { %v6335_v20 = vadd.f32 %v6334_v30, %v13465_v16  ;;  %v6502_v22 = vadd.f32 %v6332_v39, %v15148_v26  ;;  %v15159_v26 = vld [vmem:[#allocation78_spill] sm:$0xff] }
 0x9a9   :  { %v6505_v60 = vadd.f32 %v6343_v34, %v15147_v36  ;;  %7178 = vmatpush3.bf16.xpose.msra.mxu1 %v6590_v25 }
 0x9aa   :  { %v6503_v59 = vadd.f32 %v6335_v20, %v15149_v33  ;;  %7677 = vmatprep.subr.msk.bf16.mxu1 %vm549_vm2, %v6551_v27  ;;  %v15154_v27 = vld [vmem:[#allocation113_spill] sm:$0xff]  ;;  %v15160_v33 = vld [vmem:[#allocation112_spill] sm:$0xff] }
 0x9ab   :  { %v6554_v61 = vpack.c.bf16 %v6505_v60, %v13594_v53 }
 0x9ac   :  { %v6553_v14 = vpack.c.bf16 %v6503_v59, %v6502_v22  ;;  %v7639_v55 = vpop.f32.mrb[176].mxu0 }
 0x9ad   :  { %v6356_v58 = vadd.f32 %v7639_v55, %v13465_v16  ;;  %v6347_v35 = vpop.f32.mrb[177].mxu0  ;;  %v15161_v55 = vld [vmem:[#allocation137_spill] sm:$0xff] }
 0x9ae   :  { %v6348_v48 = vadd.f32 %v6347_v35, %v13465_v16  ;;  %v7640_v18 = vpop.f32.mrb[178].mxu0  ;;  %v6599_v35 = vsel %vm549_vm2, %v6545_v32, 0 }
 0x9af   :  { %v6359_v49 = vadd.f32 %v7640_v18, %v13465_v16  ;;  %v6350_v42 = vpop.f32.mrb[179].mxu0  ;;  %v13610_v0 = vadd.f32 %v6356_v58, %v15150_v45 }
 0x9b0   :  { %v6351_v29 = vadd.f32 %v6350_v42, %v13465_v16  ;;  %v13616_v47 = vadd.f32 %v6348_v48, %v15152_v19  ;;  %v15163_v19 = vld [vmem:[#allocation155_spill] sm:$0xff] }
 0x9b1   :  { %v13613_v63 = vadd.f32 %v6359_v49, %v15151_v6  ;;  %7180 = vmatpush3.bf16.xpose.msra.mxu1 %v6593_v3  ;;  %v15164_v3 = vld [vmem:[#allocation115_spill] sm:$0xff] }
 0x9b2   :  { %v13619_v37 = vadd.f32 %v6351_v29, %v15153_v40  ;;  %7678 = vmatprep.subr.msk.bf16.mxu1 %vm549_vm2, %v6552_v62 }
 0x9b3   :  { %v6556_v46 = vpack.c.bf16 %v13613_v63, %v13610_v0 }
 0x9b4   :  { %v6555_v52 = vpack.c.bf16 %v13619_v37, %v13616_v47  ;;  %v15173_v47 = vld [vmem:[#allocation98_spill] sm:$0xff] }
 0x9b7   :  { %v7643_v9 = vpop.f32.mrb[180].mxu0 }
 0x9b8   :  { %v6372_v21 = vadd.f32 %v7643_v9, %v13465_v16  ;;  %v6363_v23 = vpop.f32.mrb[181].mxu0 }
 0x9b9   :  { %v6364_v13 = vadd.f32 %v6363_v23, %v13465_v16  ;;  %v7644_v41 = vpop.f32.mrb[182].mxu0  ;;  %7182 = vmatpush3.bf16.xpose.msra.mxu1 %v6596_v10 }
 0x9ba   :  { %v6375_v8 = vadd.f32 %v7644_v41, %v13465_v16  ;;  %v6366_v12 = vpop.f32.mrb[183].mxu0  ;;  %v13635_v50 = vadd.f32 %v6372_v21, %v15154_v27  ;;  %7679 = vmatprep.subr.msk.bf16.mxu1 %vm549_vm2, %v6553_v14  ;;  %v15165_v21 = vld [vmem:[#allocation106_spill] sm:$0xff] }
 0x9bb   :  { %v6367_v31 = vadd.f32 %v6366_v12, %v13465_v16  ;;  %v13641_v38 = vadd.f32 %v6364_v13, %v15156_v4  ;;  %v6602_v13 = vsel %vm549_vm2, %v6546_v1, 0 }
 0x9bc   :  { %v13638_v28 = vadd.f32 %v6375_v8, %v15155_v11 }
 0x9bd   :  { %v13644_v39 = vadd.f32 %v6367_v31, %v15157_v15 }
 0x9be   :  { %v6558_v62 = vpack.c.bf16 %v13638_v28, %v13635_v50 }
 0x9bf   :  { %v6557_v2 = vpack.c.bf16 %v13644_v39, %v13641_v38  ;;  %v7647_v34 = vpop.f32.mrb[184].mxu0 }
 0x9c0   :  { %v6388_v30 = vadd.f32 %v7647_v34, %v13465_v16  ;;  %v6379_v20 = vpop.f32.mrb[185].mxu0  ;;  %v15166_v34 = vld [vmem:[#allocation193_spill] sm:$0xff] }
 0x9c1   :  { %v6380_v5 = vadd.f32 %v6379_v20, %v13465_v16  ;;  %v7648_v53 = vpop.f32.mrb[186].mxu0  ;;  %7184 = vmatpush3.bf16.xpose.msra.mxu1 %v6599_v35  ;;  %v6635_v63 = vsel %vm549_vm2, %v6557_v2, 0 }
 0x9c2   :  { %v6391_v36 = vadd.f32 %v7648_v53, %v13465_v16  ;;  %v6382_v60 = vpop.f32.mrb[187].mxu0  ;;  %v13660_v43 = vadd.f32 %v6388_v30, %v15158_v51  ;;  %7680 = vmatprep.subr.msk.bf16.mxu1 %vm549_vm2, %v6554_v61  ;;  %v15168_v30 = vld [vmem:[#allocation146_spill] sm:$0xff]  ;;  %v13715_v51 = vld [vmem:[%s13812_s8] sm:$0x3] }
 0x9c3   :  { %v6383_v56 = vadd.f32 %v6382_v60, %v13465_v16  ;;  %v13666_v59 = vadd.f32 %v6380_v5, %v15160_v33  ;;  %v15169_v5 = vld [vmem:[#allocation143_spill] sm:$0xff]  ;;  %7187 = vmatprep.mubr.msk.bf16.mxu1 %vm549_vm2, %v13715_v51  ;;  %7205 = vmatprep.mubr.msk.bf16.mxu0 %vm549_vm2, %v13715_v51 }
 0x9c4   :  { %v13663_v22 = vadd.f32 %v6391_v36, %v15159_v26 }
 0x9c5   :  { %v13669_v58 = vadd.f32 %v6383_v56, %v15161_v55 }
 0x9c6   :  { %v6560_v14 = vpack.c.bf16 %v13663_v22, %v13660_v43  ;;  %v15178_v43 = vld [vmem:[#allocation127_spill] sm:$0xff] }
 0x9c7   :  { %v6559_v48 = vpack.c.bf16 %v13669_v58, %v13666_v59  ;;  %v7651_v18 = vpop.f32.mrb[188].mxu0 }
 0x9c8   :  { %v6404_v25 = vadd.f32 %v7651_v18, %v13465_v16  ;;  %v6395_v49 = vpop.f32.mrb[189].mxu0  ;;  %v6629_v18 = vsel %vm549_vm2, %v6555_v52, 0  ;;  %v6644_v38 = vsel %vm549_vm2, %v6560_v14, 0  ;;  %v15179_v14 = vld [vmem:[#allocation164_spill] sm:$0xff] }
 0x9c9   :  { %v6396_v42 = vadd.f32 %v6395_v49, %v13465_v16  ;;  %v7652_v29 = vpop.f32.mrb[190].mxu0  ;;  %7186 = vmatpush3.bf16.xpose.msra.mxu1 %v6602_v13 }
 0x9ca   :  { %v6407_v45 = vadd.f32 %v7652_v29, %v13465_v16  ;;  %v6398_v6 = vpop.f32.mrb[191].mxu0  ;;  %v13685_v32 = vadd.f32 %v6404_v25, %v15162_v24  ;;  %v15170_v29 = vld [vmem:[#allocation159_spill] sm:$0xff]  ;;  %v15172_v24 = vld [vmem:[#allocation162_spill] sm:$0xff] }
 0x9cb   :  { %v6399_v7 = vadd.f32 %v6398_v6, %v13465_v16  ;;  %v13691_v9 = vadd.f32 %v6396_v42, %v15164_v3  ;;  %v15171_v6 = vld [vmem:[#allocation161_spill] sm:$0xff] }
 0x9cc   :  { %v13688_v40 = vadd.f32 %v6407_v45, %v15163_v19  ;;  %v6571_v3 = vld [vmem:[%s13813_s9] sm:$0xf]  ;;  %s8344_s9 = smov [#allocation8]  }
 0x9cd   :  { %v13694_v23 = vadd.f32 %v6399_v7, %v15165_v21  ;;  %s6774_s26 = sshll.u32 %s8344_s9, 4  ;;  %s6775_s26 = int_to_ptr.vmem [resolvable:$true] %s6774_s26 }
 0x9ce   :  { %v6562_v61 = vpack.c.bf16 %v13688_v40, %v13685_v32  ;;  %s8308_s27 = scalar_lea.vmem %s6775_s26, 256  ;;  %p8313_p11 = scmp.lt.s32.totalorder %s6775_s26, %s6775_s26 }
 0x9cf   :  { %v6561_v41 = vpack.c.bf16 %v13694_v23, %v13691_v9  ;;  %v7655_v8 = vpop.f32.mrb[192].mxu0  ;;  %p8309_p10 = scmp.ne.s32.totalorder %s6775_s26, %s8308_s27  ;;  %p8314_p12 = scmp.lt.s32.totalorder %s8308_s27, %s8308_s27 }
 0x9d0   :  { %v6420_v12 = vadd.f32 %v7655_v8, %v13465_v16  ;;  %v6411_v31 = vpop.f32.mrb[193].mxu0  ;;  %7188 = vmatmul.mubr.msk.bf16.vlgmr.msra.gmra.mrb[208].mxu1 %vm549_vm2, %v13715_v51  ;;  %v8343_v8 = vmov 0  }
 0x9d1   :  { %v6412_v27 = vadd.f32 %v6411_v31, %v13465_v16  ;;  %v7656_v11 = vpop.f32.mrb[194].mxu0  ;;  %7700 = vset.pattern.permute.xlu0 %v8343_v8  ;;  %p8315_p13 = por %p8314_p12, %p8313_p11 }
 0x9d2   :  { %v6423_v4 = vadd.f32 %v7656_v11, %v13465_v16  ;;  %v6414_v15 = vpop.f32.mrb[195].mxu0  ;;  %v6524_v17 = vadd.f32 %v6420_v12, %v15166_v34  ;;  %6574 = vperm.xlu0 %7700, %v6571_v3  }
 0x9d3   :  { %v6415_v10 = vadd.f32 %v6414_v15, %v13465_v16  ;;  %v6522_v20 = vadd.f32 %v6412_v27, %v15168_v30  ;;  %p8316_p0 = pnand %p8315_p13, %p8309_p10 }
 0x9d4   :  { %v6525_v1 = vadd.f32 %v6423_v4, %v15167_v57  ;;  %v6632_v4 = vsel %vm549_vm2, %v6556_v46, 0  ;;  %v6638_v46 = vsel %vm549_vm2, %v6558_v62, 0 }
 0x9d5   :  { %v6523_v53 = vadd.f32 %v6415_v10, %v15169_v5 }
 0x9d6   :  { %v6564_v36 = vpack.c.bf16 %v6525_v1, %v6524_v17  ;;  %v15174_v17 = vld [vmem:[#allocation144_spill] sm:$0xff]  ;;  %v15175_v1 = vld [vmem:[#allocation117_spill] sm:$0xff] }
 0x9d7   :  { %v6563_v60 = vpack.c.bf16 %v6523_v53, %v6522_v20  ;;  %v7659_v56 = vpop.f32.mrb[196].mxu0  ;;  %v15176_v20 = vld [vmem:[#allocation145_spill] sm:$0xff]  ;;  %v15177_v53 = vld [vmem:[#allocation168_spill] sm:$0xff] }
 0x9d8   :  { %v6436_v26 = vadd.f32 %v7659_v56, %v13465_v16  ;;  %v6427_v33 = vpop.f32.mrb[197].mxu0  ;;  %v6641_v56 = vsel %vm549_vm2, %v6559_v48, 0 }
 0x9d9   :  { %v6428_v55 = vadd.f32 %v6427_v33, %v13465_v16  ;;  %v7660_v35 = vpop.f32.mrb[198].mxu0  ;;  %7681 = vmatprep.subr.msk.bf16.mxu0 %vm549_vm2, %v6563_v60 }
 0x9da   :  { %v6439_v25 = vadd.f32 %v7660_v35, %v13465_v16  ;;  %v6430_v49 = vpop.f32.mrb[199].mxu0  ;;  %7190 = vmatpush3.bf16.xpose.msra.mxu0 %v6629_v18  ;;  %v6528_v45 = vadd.f32 %v6436_v26, %v15170_v29 }
 0x9db   :  { %v6431_v42 = vadd.f32 %v6430_v49, %v13465_v16  ;;  %7682 = vmatprep.subr.msk.bf16.mxu0 %vm549_vm2, %v6564_v36  ;;  %v6526_v19 = vadd.f32 %v6428_v55, %v15172_v24 }
 0x9dc   :  { %v6529_v7 = vadd.f32 %v6439_v25, %v15171_v6  ;;  %v6647_v25 = vsel %vm549_vm2, %v6561_v41, 0 }
 0x9dd   :  { %v6527_v37 = vadd.f32 %v6431_v42, %v15173_v47 }
 0x9de   :  { %v6566_v52 = vpack.c.bf16 %v6529_v7, %v6528_v45 }
 0x9df   :  { %v6565_v21 = vpack.c.bf16 %v6527_v37, %v6526_v19  ;;  %v7663_v13 = vpop.f32.mrb[200].mxu0 }
 0x9e0   :  { %v6452_v12 = vadd.f32 %v7663_v13, %v13465_v16  ;;  %v6443_v31 = vpop.f32.mrb[201].mxu0 }
 0x9e1   :  { %v6444_v27 = vadd.f32 %v6443_v31, %v13465_v16  ;;  %v7664_v11 = vpop.f32.mrb[202].mxu0 }
 0x9e2   :  { %v6455_v15 = vadd.f32 %v7664_v11, %v13465_v16  ;;  %v6446_v10 = vpop.f32.mrb[203].mxu0  ;;  %7192 = vmatpush3.bf16.xpose.msra.mxu0 %v6632_v4  ;;  %v6532_v57 = vadd.f32 %v6452_v12, %v15174_v17 }
 0x9e3   :  { %v6447_v34 = vadd.f32 %v6446_v10, %v13465_v16  ;;  %7683 = vmatprep.subr.msk.bf16.mxu0 %vm549_vm2, %v6565_v21  ;;  %v6530_v5 = vadd.f32 %v6444_v27, %v15176_v20 }
 0x9e4   :  { %v6533_v30 = vadd.f32 %v6455_v15, %v15175_v1 }
 0x9e5   :  { %v6531_v36 = vadd.f32 %v6447_v34, %v15177_v53 }
 0x9e6   :  { %v6568_v60 = vpack.c.bf16 %v6533_v30, %v6532_v57 }
 0x9e7   :  { %v6567_v0 = vpack.c.bf16 %v6531_v36, %v6530_v5 }
 0x9ea   :  { %7194 = vmatpush3.bf16.xpose.msra.mxu0 %v6635_v63 }
 0x9eb   :  { %7684 = vmatprep.subr.msk.bf16.mxu0 %vm549_vm2, %v6566_v52 }
 0x9f2   :  { %7196 = vmatpush3.bf16.xpose.msra.mxu0 %v6638_v46 }
 0x9f3   :  { %7685 = vmatprep.subr.msk.bf16.mxu0 %vm549_vm2, %v6567_v0 }
 0x9fa   :  { %7198 = vmatpush3.bf16.xpose.msra.mxu0 %v6641_v56 }
 0x9fb   :  { %7686 = vmatprep.subr.msk.bf16.mxu0 %vm549_vm2, %v6568_v60 }
 0xa02   :  { %7200 = vmatpush3.bf16.xpose.msra.mxu0 %v6644_v38 }
 0xa44   :  { %v7667_v50 = vpop.f32.mrb[204].mxu0 }
 0xa45   :  { %v6468_v28 = vadd.f32 %v7667_v50, %v13465_v16  ;;  %v6459_v39 = vpop.f32.mrb[205].mxu0 }
 0xa46   :  { %v6460_v62 = vadd.f32 %v6459_v39, %v13465_v16  ;;  %v7668_v2 = vpop.f32.mrb[206].mxu0 }
 0xa47   :  { %v6471_v59 = vadd.f32 %v7668_v2, %v13465_v16  ;;  %v6462_v58 = vpop.f32.mrb[207].mxu0  ;;  %v6536_v26 = vadd.f32 %v6468_v28, %v12821_v44 }
 0xa48   :  { %v6463_v48 = vadd.f32 %v6462_v58, %v13465_v16  ;;  %v6534_v22 = vadd.f32 %v6460_v62, %v15178_v43 }
 0xa49   :  { %v6537_v33 = vadd.f32 %v6471_v59, %v12830_v54  ;;  %v6650_v54 = vsel %vm549_vm2, %v6562_v61, 0 }
 0xa4a   :  { %v6535_v55 = vadd.f32 %v6463_v48, %v15179_v14 }
 0xa4b   :  { %v6570_v35 = vpack.c.bf16 %v6537_v33, %v6536_v26 }
 0xa4c   :  { %v6569_v18 = vpack.c.bf16 %v6535_v55, %v6534_v22 }
 0xa4e   :  { %7687 = vmatprep.subr.msk.bf16.mxu0 %vm549_vm2, %v6569_v18 }
 0xa4f   :  { %7202 = vmatpush3.bf16.xpose.msra.mxu0 %v6647_v25 }
 0xa50   :  { %7688 = vmatprep.subr.msk.bf16.mxu0 %vm549_vm2, %v6570_v35 }
 0xa51   :  { %v6575_v29 = vpop.permute.xlu0 %6574 }
 0xa57   :  { %7204 = vmatpush3.bf16.xpose.msra.mxu0 %v6650_v54 }
 0xa5e   :  { %7206 = vmatmul.mubr.msk.bf16.vlgmr.msra.gmra.mrb[208].mxu0 %vm549_vm2, %v13715_v51 }
 0xaa3   :  { %v6710_v44 = vpop.f32.mrb[208].mxu1 }
 0xaa4   :  { %v6712_v16 = vpop.f32.mrb[209].mxu1  ;;  %v6711_v9 = vadd.f32 %v6710_v44, %v6575_v29 }
 0xaa5   :  { %v6714_v49 = vpop.f32.mrb[210].mxu1  ;;  %v6713_v23 = vadd.f32 %v6712_v16, %v6575_v29 }
 0xaa6   :  { %v6715_v42 = vpop.f32.mrb[211].mxu1 }
 0xaa7   :  { %v6760_v41 = vcombine.low %v6711_v9, %v6713_v23 }
 0xaa9   :  { %6762 = vst [vmem:[#allocation8] sm:$0xff] %v6760_v41 }
 0xb31   :  { %v6751_v45 = vpop.f32.mrb[208].mxu0 }
 0xb32   :  { %v6753_v6 = vpop.f32.mrb[209].mxu0  ;;  %v6752_v7 = vadd.f32 %v6751_v45, %v6575_v29 }
 0xb33   :  { %v6755_v32 = vpop.f32.mrb[210].mxu0  ;;  %v6754_v40 = vadd.f32 %v6753_v6, %v6575_v29 }
 0xb34   :  { %v6756_v61 = vpop.f32.mrb[211].mxu0 }
 0xb35   :  { %v6765_v24 = vcombine.low %v6752_v7, %v6754_v40 }
 0xb37   :  { %6768 = vst [vmem:[#allocation8 + $0x8] sm:$0xff] %v6765_v24 }
 0xb38   :  { %8319 = shalt.err (!%p8316_p0)
}
 0xb39   :  { %s8320_s2 = scalar_lea.hbm %s13814_s10, 256 }
 0xb3a   :  { %p8321_p1 = scmp.ne.s32.totalorder %s13814_s10, %s8320_s2  ;;  %p8324_p2 = scmp.lt.u32.totalorder %s8320_s2, %s13814_s10 }
 0xb3c   :  { %p8326_p3 = pnand %p8324_p2, %p8321_p1 }
 0xb3e   :  { %8329 = shalt.err (!%p8326_p3)
}
 0xb3f   :  { %s8345_s5 = smov 128   ;;  %s8346_s23 = smov 8  }
 0xb40   :  { %6780 = dma.vmem_to_hbm [thread:$0]  %s6775_s26, 256, %s13814_s10, [#allocation4], %s8345_s5, %s8345_s5, %s8346_s23  }
 0xb41   :  { %8334 = dma.done.wait [#allocation4], 256  }
 0xb42   :  { %8335 = vsyncadd [#allocation4], 4294967040 }
 0xb43   :  { %6784 = vsyncpa [#allocation3], 1 }
 0xb44   :  { %6785 = vsyncpa [#allocation6], 1 }
 0xb45   :  { %6786 = vsyncpa [#allocation4], 1 }

</bundles_post_ra>
